<compile_context>
chip_gen: v6e
topology: v6e:2x2x1
jax: 0.10.0
libtpu: 0.0.40
codegen_flags: <defaults>
</compile_context>

<pallas_src>
import functools

import jax
import jax.numpy as jnp
from jax.experimental import pallas as pl
from jax.experimental.pallas import tpu as pltpu


POOL_K = 5      # avg_pool2d kernel size
POOL_S = 3      # avg_pool2d stride
C_MID = 128     # conv0 output channels
C_OUT = 768     # conv1 output channels
N_PAD = 128     # lane-dense padding of the final FC output


# ------------------------------- Pallas kernels ------------------------------


def branch_kernel(p_ref, w0_ref, b0_ref, w1_ref, b1_ref, o_ref):
    """Fused (avgpool+conv0+BN+ReLU) + (conv1 5x5 + BN + ReLU) for one branch.

    p_ref:  (1, P, N, K0)        f32 im2col patches (K0 = 5*5*Cin, pool folded in)
    w0_ref: (1, K0, C_MID)       bf16 folded pool+conv0 weight (BN scale folded)
    b0_ref: (1, 1, C_MID)        f32 BN0 shift
    w1_ref: (1, P, C_MID, C_OUT) bf16 conv1 weight per hidden position (BN scale folded)
    b1_ref: (1, 1, C_OUT)        f32 BN1 shift
    o_ref:  (1, N, C_OUT)        f32 branch features
    """
    n_pos = p_ref.shape[1]
    n_imgs = o_ref.shape[1]
    c_out = o_ref.shape[2]

    w0 = w0_ref[0]                                     # (K0, C_MID) bf16
    b0 = b0_ref[0]                                     # (1, C_MID)  f32
    b1 = b1_ref[0]                                     # (1, C_OUT)  f32

    acc = jnp.zeros((n_imgs, c_out), jnp.float32)
    for pos in range(n_pos):                           # P = 25, fully unrolled
        patch = p_ref[0, pos].astype(jnp.bfloat16)     # (N, K0)
        h = jnp.dot(patch, w0, preferred_element_type=jnp.float32)
        h = jnp.maximum(h + b0, 0.0).astype(jnp.bfloat16)          # (N, C_MID)
        acc = acc + jnp.dot(h, w1_ref[0, pos],
                            preferred_element_type=jnp.float32)    # (N, C_OUT)
    o_ref[0] = jnp.maximum(acc + b1, 0.0)


def fc_kernel(f_ref, w_ref, b_ref, o_ref):
    """Two-view Linear: out = f1 @ W1 + f2 @ W2 + b (concat folded into the sum).

    f_ref: (2, N, C_OUT) f32   w_ref: (2, C_OUT, N_PAD) f32
    b_ref: (1, N_PAD) f32      o_ref: (N, N_PAD) f32
    """
    acc = jnp.dot(f_ref[0], w_ref[0], preferred_element_type=jnp.float32)
    acc = acc + jnp.dot(f_ref[1], w_ref[1], preferred_element_type=jnp.float32)
    o_ref[...] = acc + b_ref[...]


# ------------------------------ kernel wrappers -----------------------------


def run_branches(patches, w0, b0, w1, b1):
    # patches: (2, P, N, K0); weights stacked with a leading branch axis.
    nb, n_pos, n, k0 = patches.shape
    c_mid = w0.shape[-1]
    c_out = w1.shape[-1]
    flops = 2 * nb * n_pos * n * (k0 * c_mid + c_mid * c_out)
    bytes_accessed = (patches.size * patches.dtype.itemsize
                      + w0.size * w0.dtype.itemsize
                      + b0.size * b0.dtype.itemsize
                      + w1.size * w1.dtype.itemsize
                      + b1.size * b1.dtype.itemsize
                      + nb * n * c_out * 4)
    return pl.pallas_call(
        branch_kernel,
        out_shape=jax.ShapeDtypeStruct((nb, n, c_out), jnp.float32),
        grid=(nb,),
        in_specs=[
            pl.BlockSpec((1, n_pos, n, k0), lambda b: (b, 0, 0, 0)),
            pl.BlockSpec((1, k0, c_mid), lambda b: (b, 0, 0)),
            pl.BlockSpec((1, 1, c_mid), lambda b: (b, 0, 0)),
            pl.BlockSpec((1, n_pos, c_mid, c_out), lambda b: (b, 0, 0, 0)),
            pl.BlockSpec((1, 1, c_out), lambda b: (b, 0, 0)),
        ],
        out_specs=pl.BlockSpec((1, n, c_out), lambda b: (b, 0, 0)),
        compiler_params=pltpu.CompilerParams(
            dimension_semantics=("parallel",),
            vmem_limit_bytes=24 * 1024 * 1024),
        cost_estimate=pl.CostEstimate(
            flops=flops, transcendentals=0, bytes_accessed=bytes_accessed),
    )(patches, w0, b0, w1, b1)


def run_fc(feats, fc_w, fc_b):
    # feats: (2, N, C_OUT); fc_w: (2, C_OUT, N_PAD); fc_b: (1, N_PAD)
    nb, n, c_feat = feats.shape
    n_pad = fc_w.shape[-1]
    return pl.pallas_call(
        fc_kernel,
        out_shape=jax.ShapeDtypeStruct((n, n_pad), jnp.float32),
        grid=(1,),
        in_specs=[
            pl.BlockSpec((nb, n, c_feat), lambda i: (0, 0, 0)),
            pl.BlockSpec((nb, c_feat, n_pad), lambda i: (0, 0, 0)),
            pl.BlockSpec((1, n_pad), lambda i: (0, 0)),
        ],
        out_specs=pl.BlockSpec((n, n_pad), lambda i: (0, 0)),
        compiler_params=pltpu.CompilerParams(
            dimension_semantics=("arbitrary",)),
    )(feats, fc_w, fc_b)


# ------------------------------ layout plumbing ------------------------------


def extract_patches(x_nchw):
    """NCHW input -> (P, N, 5*5*Cin) im2col patches at the pooled positions."""
    x = jnp.transpose(x_nchw, (0, 2, 3, 1)).astype(jnp.float32)   # NHWC
    n, h, w, c = x.shape
    ho = (h - POOL_K) // POOL_S + 1
    wo = (w - POOL_K) // POOL_S + 1
    assert ho == POOL_K and wo == POOL_K, (
        "conv1 (5x5, valid) expects a 5x5 pooled map, got %dx%d" % (ho, wo))
    rows = []
    for i in range(ho):
        for j in range(wo):
            win = x[:, POOL_S * i:POOL_S * i + POOL_K,
                    POOL_S * j:POOL_S * j + POOL_K, :]            # (N, 5, 5, C)
            rows.append(win.reshape(n, POOL_K * POOL_K * c))      # (kh, kw, c) order
    return jnp.stack(rows, axis=0)                                # (P, N, 5*5*C)


# ------------------------------ parameter setup -----------------------------


def fold_bn(gamma, beta, mean, var, eps=1e-3):
    scale = gamma / jnp.sqrt(var + eps)
    shift = beta - mean * scale
    return scale, shift


def make_bn_params(key, c):
    k1, k2, k3, k4 = jax.random.split(key, 4)
    gamma = 1.0 + 0.1 * jax.random.normal(k1, (c,), jnp.float32)
    beta = 0.1 * jax.random.normal(k2, (c,), jnp.float32)
    mean = 0.05 * jax.random.normal(k3, (c,), jnp.float32)
    var = 1.0 + 0.1 * jnp.abs(jax.random.normal(k4, (c,), jnp.float32))
    return fold_bn(gamma, beta, mean, var)


def make_branch_params(key, in_channels):
    k0, k0b, k1, k1b = jax.random.split(key, 4)
    taps = POOL_K * POOL_K                                        # 25 pool taps
    # conv0: Conv2d(Cin, 128, 1, bias=False) -> torch weight (128, Cin, 1, 1)
    w0_torch = 0.1 * jax.random.normal(k0, (C_MID, in_channels, 1, 1), jnp.float32)
    w0 = jnp.transpose(w0_torch.reshape(C_MID, in_channels), (1, 0))  # (Cin, 128)
    s0, b0 = make_bn_params(k0b, C_MID)
    # Fold avgpool into K: tile the 1x1 weight over the 25 window taps / 25, and
    # fold the BN scale into the weight (offline; weights are constants).
    w0_eff = (jnp.tile(w0, (taps, 1)) / float(taps)) * s0[None, :]    # (200, 128)
    # conv1: Conv2d(128, 768, 5, bias=False), stddev=0.01 -> (768, 128, 5, 5)
    w1_torch = 0.01 * jax.random.normal(k1, (C_OUT, C_MID, POOL_K, POOL_K),
                                        jnp.float32)
    s1, b1 = make_bn_params(k1b, C_OUT)
    # Per hidden position (kh, kw): a (128, 768) slice, BN scale folded.
    w1_eff = jnp.transpose(w1_torch, (2, 3, 1, 0)).reshape(taps, C_MID, C_OUT)
    w1_eff = w1_eff * s1[None, None, :]
    return dict(w0=w0_eff.astype(jnp.bfloat16), b0=b0.reshape(1, C_MID),
                w1=w1_eff.astype(jnp.bfloat16), b1=b1.reshape(1, C_OUT))


def make_params(key, in_channels, num_classes):
    kb1, kb2, kw, kb = jax.random.split(key, 4)
    br1 = make_branch_params(kb1, in_channels)
    br2 = make_branch_params(kb2, in_channels)
    # fc_twoview: Linear(1536, num_classes), stddev=0.001
    fc_w_torch = 0.001 * jax.random.normal(kw, (num_classes, 2 * C_OUT), jnp.float32)
    fc_b = 0.001 * jax.random.normal(kb, (num_classes,), jnp.float32)
    fc_w_t = jnp.transpose(fc_w_torch, (1, 0))                    # (1536, num_classes)
    fc_w_pad = jnp.zeros((2 * C_OUT, N_PAD), jnp.float32).at[:, :num_classes].set(fc_w_t)
    fc_b_pad = jnp.zeros((1, N_PAD), jnp.float32).at[0, :num_classes].set(fc_b)
    return dict(
        w0=jnp.stack([br1["w0"], br2["w0"]], axis=0),             # (2, 200, 128) bf16
        b0=jnp.stack([br1["b0"], br2["b0"]], axis=0),             # (2, 1, 128)   f32
        w1=jnp.stack([br1["w1"], br2["w1"]], axis=0),             # (2, 25, 128, 768) bf16
        b1=jnp.stack([br1["b1"], br2["b1"]], axis=0),             # (2, 1, 768)   f32
        fc_w=fc_w_pad.reshape(2, C_OUT, N_PAD),                   # (2, 768, 128)
        fc_b=fc_b_pad,                                            # (1, 128)
    )


# -------------------------------- forward pass -------------------------------


@functools.partial(jax.jit, static_argnames=("num_classes",))
def inception_aux_twoview(x1, x2, params, *, num_classes):
    patches = jnp.stack([extract_patches(x1), extract_patches(x2)], axis=0)
    feats = run_branches(patches, params["w0"], params["b0"],
                         params["w1"], params["b1"])              # (2, N, 768)
    logits_pad = run_fc(feats, params["fc_w"], params["fc_b"])    # (N, 128)
    return logits_pad[:, :num_classes]


# ------------------------------------ main -----------------------------------

if __name__ == "__main__":
    key = jax.random.PRNGKey(0)
    kx1, kx2, kp = jax.random.split(key, 3)

    batch, in_channels, spatial, num_classes = 2, 8, 17, 10
    # avg_pool2d(k=5, s=3): 17 -> 5 ; conv1 5x5 valid: 5 -> 1 (Inception-v3 aux geometry).
    x1 = jax.random.normal(kx1, (batch, in_channels, spatial, spatial), jnp.float32)
    x2 = jax.random.normal(kx2, (batch, in_channels, spatial, spatial), jnp.float32)

    params = make_params(kp, in_channels, num_classes)

    out = inception_aux_twoview(x1, x2, params, num_classes=num_classes)
    out = jax.block_until_ready(out)
    assert out.shape == (batch, num_classes)
    assert bool(jnp.all(jnp.isfinite(out)))
    print("KERNEL_OK")
</pallas_src>

<mosaic_0001>
module attributes {stable_mosaic.version = 11 : i64} {
  func.func @fc_kernel(%arg0: i32, %arg1: memref<2x2x768xf32, #tpu.memory_space<vmem>>, %arg2: memref<2x768x128xf32, #tpu.memory_space<vmem>>, %arg3: memref<1x128xf32, #tpu.memory_space<vmem>>, %arg4: memref<2x128xf32, #tpu.memory_space<vmem>>) attributes {dimension_semantics = [#tpu.dimension_semantics<arbitrary>], iteration_bounds = array<i64: 1>, scalar_prefetch = 0 : i64, scratch_operands = 0 : i64, tpu.core_type = #tpu.core_type<tc>, window_params = [{pipeline_mode = #tpu.pipeline_mode<synchronous>, transform_indices = @transform_0, window_bounds = array<i64: 2, 2, 768>}, {pipeline_mode = #tpu.pipeline_mode<synchronous>, transform_indices = @transform_1, window_bounds = array<i64: 2, 768, 128>}, {pipeline_mode = #tpu.pipeline_mode<synchronous>, transform_indices = @transform_2, window_bounds = array<i64: 1, 128>}, {pipeline_mode = #tpu.pipeline_mode<synchronous>, transform_indices = @transform_3, window_bounds = array<i64: 2, 128>}]} {
    %c0 = arith.constant 0 : index
    %c0_0 = arith.constant 0 : index
    %c0_1 = arith.constant 0 : index
    %0 = vector.load %arg1[%c0, %c0_0, %c0_1] : memref<2x2x768xf32, #tpu.memory_space<vmem>>, vector<1x2x768xf32>
    %1 = vector.shape_cast %0 : vector<1x2x768xf32> to vector<2x768xf32>
    %c0_2 = arith.constant 0 : index
    %c0_3 = arith.constant 0 : index
    %c0_4 = arith.constant 0 : index
    %2 = vector.load %arg2[%c0_2, %c0_3, %c0_4] : memref<2x768x128xf32, #tpu.memory_space<vmem>>, vector<1x768x128xf32>
    %3 = vector.shape_cast %2 : vector<1x768x128xf32> to vector<768x128xf32>
    %cst = arith.constant dense<0.000000e+00> : vector<2x128xf32>
    %4 = tpu.matmul %1, %3, %cst {dimension_numbers = #tpu.dot_dimension_numbers<[1], [0], [0], [1], [0, 0, 1, 1], [], []>} : vector<2x768xf32>, vector<768x128xf32>, vector<2x128xf32> -> vector<2x128xf32>
    %c1 = arith.constant 1 : index
    %c0_5 = arith.constant 0 : index
    %c0_6 = arith.constant 0 : index
    %5 = vector.load %arg1[%c1, %c0_5, %c0_6] : memref<2x2x768xf32, #tpu.memory_space<vmem>>, vector<1x2x768xf32>
    %6 = vector.shape_cast %5 : vector<1x2x768xf32> to vector<2x768xf32>
    %c1_7 = arith.constant 1 : index
    %c0_8 = arith.constant 0 : index
    %c0_9 = arith.constant 0 : index
    %7 = vector.load %arg2[%c1_7, %c0_8, %c0_9] : memref<2x768x128xf32, #tpu.memory_space<vmem>>, vector<1x768x128xf32>
    %8 = vector.shape_cast %7 : vector<1x768x128xf32> to vector<768x128xf32>
    %cst_10 = arith.constant dense<0.000000e+00> : vector<2x128xf32>
    %9 = tpu.matmul %6, %8, %cst_10 {dimension_numbers = #tpu.dot_dimension_numbers<[1], [0], [0], [1], [0, 0, 1, 1], [], []>} : vector<2x768xf32>, vector<768x128xf32>, vector<2x128xf32> -> vector<2x128xf32>
    %10 = arith.addf %4, %9 : vector<2x128xf32>
    %c0_11 = arith.constant 0 : index
    %c0_12 = arith.constant 0 : index
    %11 = vector.load %arg3[%c0_11, %c0_12] : memref<1x128xf32, #tpu.memory_space<vmem>>, vector<1x128xf32>
    %12 = vector.broadcast %11 : vector<1x128xf32> to vector<2x128xf32>
    %13 = arith.addf %10, %12 : vector<2x128xf32>
    %c0_13 = arith.constant 0 : index
    %c0_14 = arith.constant 0 : index
    %14 = vector.load %arg4[%c0_13, %c0_14] : memref<2x128xf32, #tpu.memory_space<vmem>>, vector<2x128xf32>
    tpu.vector_store %arg4[%c0_13, %c0_14], %13 {strides = array<i32>} : memref<2x128xf32, #tpu.memory_space<vmem>>, vector<2x128xf32>,
    return
  }
  func.func @transform_0(%arg0: i32) -> (i32, i32, i32) {
    %c0_i32 = arith.constant 0 : i32
    %c0_i32_0 = arith.constant 0 : i32
    %c0_i32_1 = arith.constant 0 : i32
    %c0_i32_2 = arith.constant 0 : i32
    return %c0_i32, %c0_i32_0, %c0_i32_1 : i32, i32, i32
  }
  func.func @transform_1(%arg0: i32) -> (i32, i32, i32) {
    %c0_i32 = arith.constant 0 : i32
    %c0_i32_0 = arith.constant 0 : i32
    %c0_i32_1 = arith.constant 0 : i32
    %c0_i32_2 = arith.constant 0 : i32
    return %c0_i32, %c0_i32_0, %c0_i32_1 : i32, i32, i32
  }
  func.func @transform_2(%arg0: i32) -> (i32, i32) {
    %c0_i32 = arith.constant 0 : i32
    %c0_i32_0 = arith.constant 0 : i32
    %c0_i32_1 = arith.constant 0 : i32
    return %c0_i32, %c0_i32_0 : i32, i32
  }
  func.func @transform_3(%arg0: i32) -> (i32, i32) {
    %c0_i32 = arith.constant 0 : i32
    %c0_i32_0 = arith.constant 0 : i32
    %c0_i32_1 = arith.constant 0 : i32
    return %c0_i32, %c0_i32_0 : i32, i32
  }
}

module attributes {stable_mosaic.version = 11 : i64} {
  func.func @branch_kernel(%arg0: i32, %arg1: memref<1x25x2x200xf32, #tpu.memory_space<vmem>>, %arg2: memref<1x200x128xbf16, #tpu.memory_space<vmem>>, %arg3: memref<1x1x128xf32, #tpu.memory_space<vmem>>, %arg4: memref<1x25x128x768xbf16, #tpu.memory_space<vmem>>, %arg5: memref<1x1x768xf32, #tpu.memory_space<vmem>>, %arg6: memref<1x2x768xf32, #tpu.memory_space<vmem>>) attributes {dimension_semantics = [#tpu.dimension_semantics<parallel>], iteration_bounds = array<i64: 2>, scalar_prefetch = 0 : i64, scratch_operands = 0 : i64, tpu.core_type = #tpu.core_type<tc>, window_params = [{transform_indices = @transform_0, window_bounds = array<i64: 1, 25, 2, 200>}, {transform_indices = @transform_1, window_bounds = array<i64: 1, 200, 128>}, {transform_indices = @transform_2, window_bounds = array<i64: 1, 1, 128>}, {transform_indices = @transform_3, window_bounds = array<i64: 1, 25, 128, 768>}, {transform_indices = @transform_4, window_bounds = array<i64: 1, 1, 768>}, {transform_indices = @transform_5, window_bounds = array<i64: 1, 2, 768>}]} {
    %c0 = arith.constant 0 : index
    %c0_0 = arith.constant 0 : index
    %c0_1 = arith.constant 0 : index
    %0 = vector.load %arg2[%c0, %c0_0, %c0_1] : memref<1x200x128xbf16, #tpu.memory_space<vmem>>, vector<1x200x128xbf16>
    %1 = vector.shape_cast %0 : vector<1x200x128xbf16> to vector<200x128xbf16>
    %c0_2 = arith.constant 0 : index
    %c0_3 = arith.constant 0 : index
    %c0_4 = arith.constant 0 : index
    %2 = vector.load %arg3[%c0_2, %c0_3, %c0_4] : memref<1x1x128xf32, #tpu.memory_space<vmem>>, vector<1x1x128xf32>
    %3 = vector.shape_cast %2 : vector<1x1x128xf32> to vector<1x128xf32>
    %c0_5 = arith.constant 0 : index
    %c0_6 = arith.constant 0 : index
    %c0_7 = arith.constant 0 : index
    %4 = vector.load %arg5[%c0_5, %c0_6, %c0_7] : memref<1x1x768xf32, #tpu.memory_space<vmem>>, vector<1x1x768xf32>
    %5 = vector.shape_cast %4 : vector<1x1x768xf32> to vector<1x768xf32>
    %cst = arith.constant 0.000000e+00 : f32
    %6 = vector.broadcast %cst : f32 to vector<2x768xf32>
    %c0_8 = arith.constant 0 : index
    %c0_9 = arith.constant 0 : index
    %c0_10 = arith.constant 0 : index
    %c0_11 = arith.constant 0 : index
    %7 = vector.load %arg1[%c0_8, %c0_9, %c0_10, %c0_11] : memref<1x25x2x200xf32, #tpu.memory_space<vmem>>, vector<1x1x2x200xf32>
    %8 = vector.shape_cast %7 : vector<1x1x2x200xf32> to vector<2x200xf32>
    %9 = arith.truncf %8 : vector<2x200xf32> to vector<2x200xbf16>
    %cst_12 = arith.constant dense<0.000000e+00> : vector<2x128xf32>
    %10 = tpu.matmul %9, %1, %cst_12 {dimension_numbers = #tpu.dot_dimension_numbers<[1], [0], [0], [1], [0, 0, 1, 1], [], []>} : vector<2x200xbf16>, vector<200x128xbf16>, vector<2x128xf32> -> vector<2x128xf32>
    %11 = vector.broadcast %3 : vector<1x128xf32> to vector<2x128xf32>
    %12 = arith.addf %10, %11 : vector<2x128xf32>
    %cst_13 = arith.constant 0.000000e+00 : f32
    %13 = vector.broadcast %cst_13 : f32 to vector<2x128xf32>
    %14 = arith.maximumf %12, %13 : vector<2x128xf32>
    %15 = arith.truncf %14 : vector<2x128xf32> to vector<2x128xbf16>
    %c0_14 = arith.constant 0 : index
    %c0_15 = arith.constant 0 : index
    %c0_16 = arith.constant 0 : index
    %c0_17 = arith.constant 0 : index
    %16 = vector.load %arg4[%c0_14, %c0_15, %c0_16, %c0_17] : memref<1x25x128x768xbf16, #tpu.memory_space<vmem>>, vector<1x1x128x768xbf16>
    %17 = vector.shape_cast %16 : vector<1x1x128x768xbf16> to vector<128x768xbf16>
    %cst_18 = arith.constant dense<0.000000e+00> : vector<2x768xf32>
    %18 = tpu.matmul %15, %17, %cst_18 {dimension_numbers = #tpu.dot_dimension_numbers<[1], [0], [0], [1], [0, 0, 1, 1], [], []>} : vector<2x128xbf16>, vector<128x768xbf16>, vector<2x768xf32> -> vector<2x768xf32>
    %19 = arith.addf %6, %18 : vector<2x768xf32>
    %c0_19 = arith.constant 0 : index
    %c1 = arith.constant 1 : index
    %c0_20 = arith.constant 0 : index
    %c0_21 = arith.constant 0 : index
    %20 = vector.load %arg1[%c0_19, %c1, %c0_20, %c0_21] : memref<1x25x2x200xf32, #tpu.memory_space<vmem>>, vector<1x1x2x200xf32>
    %21 = vector.shape_cast %20 : vector<1x1x2x200xf32> to vector<2x200xf32>
    %22 = arith.truncf %21 : vector<2x200xf32> to vector<2x200xbf16>
    %cst_22 = arith.constant dense<0.000000e+00> : vector<2x128xf32>
    %23 = tpu.matmul %22, %1, %cst_22 {dimension_numbers = #tpu.dot_dimension_numbers<[1], [0], [0], [1], [0, 0, 1, 1], [], []>} : vector<2x200xbf16>, vector<200x128xbf16>, vector<2x128xf32> -> vector<2x128xf32>
    %24 = vector.broadcast %3 : vector<1x128xf32> to vector<2x128xf32>
    %25 = arith.addf %23, %24 : vector<2x128xf32>
    %cst_23 = arith.constant 0.000000e+00 : f32
    %26 = vector.broadcast %cst_23 : f32 to vector<2x128xf32>
    %27 = arith.maximumf %25, %26 : vector<2x128xf32>
    %28 = arith.truncf %27 : vector<2x128xf32> to vector<2x128xbf16>
    %c0_24 = arith.constant 0 : index
    %c1_25 = arith.constant 1 : index
    %c0_26 = arith.constant 0 : index
    %c0_27 = arith.constant 0 : index
    %29 = vector.load %arg4[%c0_24, %c1_25, %c0_26, %c0_27] : memref<1x25x128x768xbf16, #tpu.memory_space<vmem>>, vector<1x1x128x768xbf16>
    %30 = vector.shape_cast %29 : vector<1x1x128x768xbf16> to vector<128x768xbf16>
    %cst_28 = arith.constant dense<0.000000e+00> : vector<2x768xf32>
    %31 = tpu.matmul %28, %30, %cst_28 {dimension_numbers = #tpu.dot_dimension_numbers<[1], [0], [0], [1], [0, 0, 1, 1], [], []>} : vector<2x128xbf16>, vector<128x768xbf16>, vector<2x768xf32> -> vector<2x768xf32>
    %32 = arith.addf %19, %31 : vector<2x768xf32>
    %c0_29 = arith.constant 0 : index
    %c2 = arith.constant 2 : index
    %c0_30 = arith.constant 0 : index
    %c0_31 = arith.constant 0 : index
    %33 = vector.load %arg1[%c0_29, %c2, %c0_30, %c0_31] : memref<1x25x2x200xf32, #tpu.memory_space<vmem>>, vector<1x1x2x200xf32>
    %34 = vector.shape_cast %33 : vector<1x1x2x200xf32> to vector<2x200xf32>
    %35 = arith.truncf %34 : vector<2x200xf32> to vector<2x200xbf16>
    %cst_32 = arith.constant dense<0.000000e+00> : vector<2x128xf32>
    %36 = tpu.matmul %35, %1, %cst_32 {dimension_numbers = #tpu.dot_dimension_numbers<[1], [0], [0], [1], [0, 0, 1, 1], [], []>} : vector<2x200xbf16>, vector<200x128xbf16>, vector<2x128xf32> -> vector<2x128xf32>
    %37 = vector.broadcast %3 : vector<1x128xf32> to vector<2x128xf32>
    %38 = arith.addf %36, %37 : vector<2x128xf32>
    %cst_33 = arith.constant 0.000000e+00 : f32
    %39 = vector.broadcast %cst_33 : f32 to vector<2x128xf32>
    %40 = arith.maximumf %38, %39 : vector<2x128xf32>
    %41 = arith.truncf %40 : vector<2x128xf32> to vector<2x128xbf16>
    %c0_34 = arith.constant 0 : index
    %c2_35 = arith.constant 2 : index
    %c0_36 = arith.constant 0 : index
    %c0_37 = arith.constant 0 : index
    %42 = vector.load %arg4[%c0_34, %c2_35, %c0_36, %c0_37] : memref<1x25x128x768xbf16, #tpu.memory_space<vmem>>, vector<1x1x128x768xbf16>
    %43 = vector.shape_cast %42 : vector<1x1x128x768xbf16> to vector<128x768xbf16>
    %cst_38 = arith.constant dense<0.000000e+00> : vector<2x768xf32>
    %44 = tpu.matmul %41, %43, %cst_38 {dimension_numbers = #tpu.dot_dimension_numbers<[1], [0], [0], [1], [0, 0, 1, 1], [], []>} : vector<2x128xbf16>, vector<128x768xbf16>, vector<2x768xf32> -> vector<2x768xf32>
    %45 = arith.addf %32, %44 : vector<2x768xf32>
    %c0_39 = arith.constant 0 : index
    %c3 = arith.constant 3 : index
    %c0_40 = arith.constant 0 : index
    %c0_41 = arith.constant 0 : index
    %46 = vector.load %arg1[%c0_39, %c3, %c0_40, %c0_41] : memref<1x25x2x200xf32, #tpu.memory_space<vmem>>, vector<1x1x2x200xf32>
    %47 = vector.shape_cast %46 : vector<1x1x2x200xf32> to vector<2x200xf32>
    %48 = arith.truncf %47 : vector<2x200xf32> to vector<2x200xbf16>
    %cst_42 = arith.constant dense<0.000000e+00> : vector<2x128xf32>
    %49 = tpu.matmul %48, %1, %cst_42 {dimension_numbers = #tpu.dot_dimension_numbers<[1], [0], [0], [1], [0, 0, 1, 1], [], []>} : vector<2x200xbf16>, vector<200x128xbf16>, vector<2x128xf32> -> vector<2x128xf32>
    %50 = vector.broadcast %3 : vector<1x128xf32> to vector<2x128xf32>
    %51 = arith.addf %49, %50 : vector<2x128xf32>
    %cst_43 = arith.constant 0.000000e+00 : f32
    %52 = vector.broadcast %cst_43 : f32 to vector<2x128xf32>
    %53 = arith.maximumf %51, %52 : vector<2x128xf32>
    %54 = arith.truncf %53 : vector<2x128xf32> to vector<2x128xbf16>
    %c0_44 = arith.constant 0 : index
    %c3_45 = arith.constant 3 : index
    %c0_46 = arith.constant 0 : index
    %c0_47 = arith.constant 0 : index
    %55 = vector.load %arg4[%c0_44, %c3_45, %c0_46, %c0_47] : memref<1x25x128x768xbf16, #tpu.memory_space<vmem>>, vector<1x1x128x768xbf16>
    %56 = vector.shape_cast %55 : vector<1x1x128x768xbf16> to vector<128x768xbf16>
    %cst_48 = arith.constant dense<0.000000e+00> : vector<2x768xf32>
    %57 = tpu.matmul %54, %56, %cst_48 {dimension_numbers = #tpu.dot_dimension_numbers<[1], [0], [0], [1], [0, 0, 1, 1], [], []>} : vector<2x128xbf16>, vector<128x768xbf16>, vector<2x768xf32> -> vector<2x768xf32>
    %58 = arith.addf %45, %57 : vector<2x768xf32>
    %c0_49 = arith.constant 0 : index
    %c4 = arith.constant 4 : index
    %c0_50 = arith.constant 0 : index
    %c0_51 = arith.constant 0 : index
    %59 = vector.load %arg1[%c0_49, %c4, %c0_50, %c0_51] : memref<1x25x2x200xf32, #tpu.memory_space<vmem>>, vector<1x1x2x200xf32>
    %60 = vector.shape_cast %59 : vector<1x1x2x200xf32> to vector<2x200xf32>
    %61 = arith.truncf %60 : vector<2x200xf32> to vector<2x200xbf16>
    %cst_52 = arith.constant dense<0.000000e+00> : vector<2x128xf32>
    %62 = tpu.matmul %61, %1, %cst_52 {dimension_numbers = #tpu.dot_dimension_numbers<[1], [0], [0], [1], [0, 0, 1, 1], [], []>} : vector<2x200xbf16>, vector<200x128xbf16>, vector<2x128xf32> -> vector<2x128xf32>
    %63 = vector.broadcast %3 : vector<1x128xf32> to vector<2x128xf32>
    %64 = arith.addf %62, %63 : vector<2x128xf32>
    %cst_53 = arith.constant 0.000000e+00 : f32
    %65 = vector.broadcast %cst_53 : f32 to vector<2x128xf32>
    %66 = arith.maximumf %64, %65 : vector<2x128xf32>
    %67 = arith.truncf %66 : vector<2x128xf32> to vector<2x128xbf16>
    %c0_54 = arith.constant 0 : index
    %c4_55 = arith.constant 4 : index
    %c0_56 = arith.constant 0 : index
    %c0_57 = arith.constant 0 : index
    %68 = vector.load %arg4[%c0_54, %c4_55, %c0_56, %c0_57] : memref<1x25x128x768xbf16, #tpu.memory_space<vmem>>, vector<1x1x128x768xbf16>
    %69 = vector.shape_cast %68 : vector<1x1x128x768xbf16> to vector<128x768xbf16>
    %cst_58 = arith.constant dense<0.000000e+00> : vector<2x768xf32>
    %70 = tpu.matmul %67, %69, %cst_58 {dimension_numbers = #tpu.dot_dimension_numbers<[1], [0], [0], [1], [0, 0, 1, 1], [], []>} : vector<2x128xbf16>, vector<128x768xbf16>, vector<2x768xf32> -> vector<2x768xf32>
    %71 = arith.addf %58, %70 : vector<2x768xf32>
    %c0_59 = arith.constant 0 : index
    %c5 = arith.constant 5 : index
    %c0_60 = arith.constant 0 : index
    %c0_61 = arith.constant 0 : index
    %72 = vector.load %arg1[%c0_59, %c5, %c0_60, %c0_61] : memref<1x25x2x200xf32, #tpu.memory_space<vmem>>, vector<1x1x2x200xf32>
    %73 = vector.shape_cast %72 : vector<1x1x2x200xf32> to vector<2x200xf32>
    %74 = arith.truncf %73 : vector<2x200xf32> to vector<2x200xbf16>
    %cst_62 = arith.constant dense<0.000000e+00> : vector<2x128xf32>
    %75 = tpu.matmul %74, %1, %cst_62 {dimension_numbers = #tpu.dot_dimension_numbers<[1], [0], [0], [1], [0, 0, 1, 1], [], []>} : vector<2x200xbf16>, vector<200x128xbf16>, vector<2x128xf32> -> vector<2x128xf32>
    %76 = vector.broadcast %3 : vector<1x128xf32> to vector<2x128xf32>
    %77 = arith.addf %75, %76 : vector<2x128xf32>
    %cst_63 = arith.constant 0.000000e+00 : f32
    %78 = vector.broadcast %cst_63 : f32 to vector<2x128xf32>
    %79 = arith.maximumf %77, %78 : vector<2x128xf32>
    %80 = arith.truncf %79 : vector<2x128xf32> to vector<2x128xbf16>
    %c0_64 = arith.constant 0 : index
    %c5_65 = arith.constant 5 : index
    %c0_66 = arith.constant 0 : index
    %c0_67 = arith.constant 0 : index
    %81 = vector.load %arg4[%c0_64, %c5_65, %c0_66, %c0_67] : memref<1x25x128x768xbf16, #tpu.memory_space<vmem>>, vector<1x1x128x768xbf16>
    %82 = vector.shape_cast %81 : vector<1x1x128x768xbf16> to vector<128x768xbf16>
    %cst_68 = arith.constant dense<0.000000e+00> : vector<2x768xf32>
    %83 = tpu.matmul %80, %82, %cst_68 {dimension_numbers = #tpu.dot_dimension_numbers<[1], [0], [0], [1], [0, 0, 1, 1], [], []>} : vector<2x128xbf16>, vector<128x768xbf16>, vector<2x768xf32> -> vector<2x768xf32>
    %84 = arith.addf %71, %83 : vector<2x768xf32>
    %c0_69 = arith.constant 0 : index
    %c6 = arith.constant 6 : index
    %c0_70 = arith.constant 0 : index
    %c0_71 = arith.constant 0 : index
    %85 = vector.load %arg1[%c0_69, %c6, %c0_70, %c0_71] : memref<1x25x2x200xf32, #tpu.memory_space<vmem>>, vector<1x1x2x200xf32>
    %86 = vector.shape_cast %85 : vector<1x1x2x200xf32> to vector<2x200xf32>
    %87 = arith.truncf %86 : vector<2x200xf32> to vector<2x200xbf16>
    %cst_72 = arith.constant dense<0.000000e+00> : vector<2x128xf32>
    %88 = tpu.matmul %87, %1, %cst_72 {dimension_numbers = #tpu.dot_dimension_numbers<[1], [0], [0], [1], [0, 0, 1, 1], [], []>} : vector<2x200xbf16>, vector<200x128xbf16>, vector<2x128xf32> -> vector<2x128xf32>
    %89 = vector.broadcast %3 : vector<1x128xf32> to vector<2x128xf32>
    %90 = arith.addf %88, %89 : vector<2x128xf32>
    %cst_73 = arith.constant 0.000000e+00 : f32
    %91 = vector.broadcast %cst_73 : f32 to vector<2x128xf32>
    %92 = arith.maximumf %90, %91 : vector<2x128xf32>
    %93 = arith.truncf %92 : vector<2x128xf32> to vector<2x128xbf16>
    %c0_74 = arith.constant 0 : index
    %c6_75 = arith.constant 6 : index
    %c0_76 = arith.constant 0 : index
    %c0_77 = arith.constant 0 : index
    %94 = vector.load %arg4[%c0_74, %c6_75, %c0_76, %c0_77] : memref<1x25x128x768xbf16, #tpu.memory_space<vmem>>, vector<1x1x128x768xbf16>
    %95 = vector.shape_cast %94 : vector<1x1x128x768xbf16> to vector<128x768xbf16>
    %cst_78 = arith.constant dense<0.000000e+00> : vector<2x768xf32>
    %96 = tpu.matmul %93, %95, %cst_78 {dimension_numbers = #tpu.dot_dimension_numbers<[1], [0], [0], [1], [0, 0, 1, 1], [], []>} : vector<2x128xbf16>, vector<128x768xbf16>, vector<2x768xf32> -> vector<2x768xf32>
    %97 = arith.addf %84, %96 : vector<2x768xf32>
    %c0_79 = arith.constant 0 : index
    %c7 = arith.constant 7 : index
    %c0_80 = arith.constant 0 : index
    %c0_81 = arith.constant 0 : index
    %98 = vector.load %arg1[%c0_79, %c7, %c0_80, %c0_81] : memref<1x25x2x200xf32, #tpu.memory_space<vmem>>, vector<1x1x2x200xf32>
    %99 = vector.shape_cast %98 : vector<1x1x2x200xf32> to vector<2x200xf32>
    %100 = arith.truncf %99 : vector<2x200xf32> to vector<2x200xbf16>
    %cst_82 = arith.constant dense<0.000000e+00> : vector<2x128xf32>
    %101 = tpu.matmul %100, %1, %cst_82 {dimension_numbers = #tpu.dot_dimension_numbers<[1], [0], [0], [1], [0, 0, 1, 1], [], []>} : vector<2x200xbf16>, vector<200x128xbf16>, vector<2x128xf32> -> vector<2x128xf32>
    %102 = vector.broadcast %3 : vector<1x128xf32> to vector<2x128xf32>
    %103 = arith.addf %101, %102 : vector<2x128xf32>
    %cst_83 = arith.constant 0.000000e+00 : f32
    %104 = vector.broadcast %cst_83 : f32 to vector<2x128xf32>
    %105 = arith.maximumf %103, %104 : vector<2x128xf32>
    %106 = arith.truncf %105 : vector<2x128xf32> to vector<2x128xbf16>
    %c0_84 = arith.constant 0 : index
    %c7_85 = arith.constant 7 : index
    %c0_86 = arith.constant 0 : index
    %c0_87 = arith.constant 0 : index
    %107 = vector.load %arg4[%c0_84, %c7_85, %c0_86, %c0_87] : memref<1x25x128x768xbf16, #tpu.memory_space<vmem>>, vector<1x1x128x768xbf16>
    %108 = vector.shape_cast %107 : vector<1x1x128x768xbf16> to vector<128x768xbf16>
    %cst_88 = arith.constant dense<0.000000e+00> : vector<2x768xf32>
    %109 = tpu.matmul %106, %108, %cst_88 {dimension_numbers = #tpu.dot_dimension_numbers<[1], [0], [0], [1], [0, 0, 1, 1], [], []>} : vector<2x128xbf16>, vector<128x768xbf16>, vector<2x768xf32> -> vector<2x768xf32>
    %110 = arith.addf %97, %109 : vector<2x768xf32>
    %c0_89 = arith.constant 0 : index
    %c8 = arith.constant 8 : index
    %c0_90 = arith.constant 0 : index
    %c0_91 = arith.constant 0 : index
    %111 = vector.load %arg1[%c0_89, %c8, %c0_90, %c0_91] : memref<1x25x2x200xf32, #tpu.memory_space<vmem>>, vector<1x1x2x200xf32>
    %112 = vector.shape_cast %111 : vector<1x1x2x200xf32> to vector<2x200xf32>
    %113 = arith.truncf %112 : vector<2x200xf32> to vector<2x200xbf16>
    %cst_92 = arith.constant dense<0.000000e+00> : vector<2x128xf32>
    %114 = tpu.matmul %113, %1, %cst_92 {dimension_numbers = #tpu.dot_dimension_numbers<[1], [0], [0], [1], [0, 0, 1, 1], [], []>} : vector<2x200xbf16>, vector<200x128xbf16>, vector<2x128xf32> -> vector<2x128xf32>
    %115 = vector.broadcast %3 : vector<1x128xf32> to vector<2x128xf32>
    %116 = arith.addf %114, %115 : vector<2x128xf32>
    %cst_93 = arith.constant 0.000000e+00 : f32
    %117 = vector.broadcast %cst_93 : f32 to vector<2x128xf32>
    %118 = arith.maximumf %116, %117 : vector<2x128xf32>
    %119 = arith.truncf %118 : vector<2x128xf32> to vector<2x128xbf16>
    %c0_94 = arith.constant 0 : index
    %c8_95 = arith.constant 8 : index
    %c0_96 = arith.constant 0 : index
    %c0_97 = arith.constant 0 : index
    %120 = vector.load %arg4[%c0_94, %c8_95, %c0_96, %c0_97] : memref<1x25x128x768xbf16, #tpu.memory_space<vmem>>, vector<1x1x128x768xbf16>
    %121 = vector.shape_cast %120 : vector<1x1x128x768xbf16> to vector<128x768xbf16>
    %cst_98 = arith.constant dense<0.000000e+00> : vector<2x768xf32>
    %122 = tpu.matmul %119, %121, %cst_98 {dimension_numbers = #tpu.dot_dimension_numbers<[1], [0], [0], [1], [0, 0, 1, 1], [], []>} : vector<2x128xbf16>, vector<128x768xbf16>, vector<2x768xf32> -> vector<2x768xf32>
    %123 = arith.addf %110, %122 : vector<2x768xf32>
    %c0_99 = arith.constant 0 : index
    %c9 = arith.constant 9 : index
    %c0_100 = arith.constant 0 : index
    %c0_101 = arith.constant 0 : index
    %124 = vector.load %arg1[%c0_99, %c9, %c0_100, %c0_101] : memref<1x25x2x200xf32, #tpu.memory_space<vmem>>, vector<1x1x2x200xf32>
    %125 = vector.shape_cast %124 : vector<1x1x2x200xf32> to vector<2x200xf32>
    %126 = arith.truncf %125 : vector<2x200xf32> to vector<2x200xbf16>
    %cst_102 = arith.constant dense<0.000000e+00> : vector<2x128xf32>
    %127 = tpu.matmul %126, %1, %cst_102 {dimension_numbers = #tpu.dot_dimension_numbers<[1], [0], [0], [1], [0, 0, 1, 1], [], []>} : vector<2x200xbf16>, vector<200x128xbf16>, vector<2x128xf32> -> vector<2x128xf32>
    %128 = vector.broadcast %3 : vector<1x128xf32> to vector<2x128xf32>
    %129 = arith.addf %127, %128 : vector<2x128xf32>
    %cst_103 = arith.constant 0.000000e+00 : f32
    %130 = vector.broadcast %cst_103 : f32 to vector<2x128xf32>
    %131 = arith.maximumf %129, %130 : vector<2x128xf32>
    %132 = arith.truncf %131 : vector<2x128xf32> to vector<2x128xbf16>
    %c0_104 = arith.constant 0 : index
    %c9_105 = arith.constant 9 : index
    %c0_106 = arith.constant 0 : index
    %c0_107 = arith.constant 0 : index
    %133 = vector.load %arg4[%c0_104, %c9_105, %c0_106, %c0_107] : memref<1x25x128x768xbf16, #tpu.memory_space<vmem>>, vector<1x1x128x768xbf16>
    %134 = vector.shape_cast %133 : vector<1x1x128x768xbf16> to vector<128x768xbf16>
    %cst_108 = arith.constant dense<0.000000e+00> : vector<2x768xf32>
    %135 = tpu.matmul %132, %134, %cst_108 {dimension_numbers = #tpu.dot_dimension_numbers<[1], [0], [0], [1], [0, 0, 1, 1], [], []>} : vector<2x128xbf16>, vector<128x768xbf16>, vector<2x768xf32> -> vector<2x768xf32>
    %136 = arith.addf %123, %135 : vector<2x768xf32>
    %c0_109 = arith.constant 0 : index
    %c10 = arith.constant 10 : index
    %c0_110 = arith.constant 0 : index
    %c0_111 = arith.constant 0 : index
    %137 = vector.load %arg1[%c0_109, %c10, %c0_110, %c0_111] : memref<1x25x2x200xf32, #tpu.memory_space<vmem>>, vector<1x1x2x200xf32>
    %138 = vector.shape_cast %137 : vector<1x1x2x200xf32> to vector<2x200xf32>
    %139 = arith.truncf %138 : vector<2x200xf32> to vector<2x200xbf16>
    %cst_112 = arith.constant dense<0.000000e+00> : vector<2x128xf32>
    %140 = tpu.matmul %139, %1, %cst_112 {dimension_numbers = #tpu.dot_dimension_numbers<[1], [0], [0], [1], [0, 0, 1, 1], [], []>} : vector<2x200xbf16>, vector<200x128xbf16>, vector<2x128xf32> -> vector<2x128xf32>
    %141 = vector.broadcast %3 : vector<1x128xf32> to vector<2x128xf32>
    %142 = arith.addf %140, %141 : vector<2x128xf32>
    %cst_113 = arith.constant 0.000000e+00 : f32
    %143 = vector.broadcast %cst_113 : f32 to vector<2x128xf32>
    %144 = arith.maximumf %142, %143 : vector<2x128xf32>
    %145 = arith.truncf %144 : vector<2x128xf32> to vector<2x128xbf16>
    %c0_114 = arith.constant 0 : index
    %c10_115 = arith.constant 10 : index
    %c0_116 = arith.constant 0 : index
    %c0_117 = arith.constant 0 : index
    %146 = vector.load %arg4[%c0_114, %c10_115, %c0_116, %c0_117] : memref<1x25x128x768xbf16, #tpu.memory_space<vmem>>, vector<1x1x128x768xbf16>
    %147 = vector.shape_cast %146 : vector<1x1x128x768xbf16> to vector<128x768xbf16>
    %cst_118 = arith.constant dense<0.000000e+00> : vector<2x768xf32>
    %148 = tpu.matmul %145, %147, %cst_118 {dimension_numbers = #tpu.dot_dimension_numbers<[1], [0], [0], [1], [0, 0, 1, 1], [], []>} : vector<2x128xbf16>, vector<128x768xbf16>, vector<2x768xf32> -> vector<2x768xf32>
    %149 = arith.addf %136, %148 : vector<2x768xf32>
    %c0_119 = arith.constant 0 : index
    %c11 = arith.constant 11 : index
    %c0_120 = arith.constant 0 : index
    %c0_121 = arith.constant 0 : index
    %150 = vector.load %arg1[%c0_119, %c11, %c0_120, %c0_121] : memref<1x25x2x200xf32, #tpu.memory_space<vmem>>, vector<1x1x2x200xf32>
    %151 = vector.shape_cast %150 : vector<1x1x2x200xf32> to vector<2x200xf32>
    %152 = arith.truncf %151 : vector<2x200xf32> to vector<2x200xbf16>
    %cst_122 = arith.constant dense<0.000000e+00> : vector<2x128xf32>
    %153 = tpu.matmul %152, %1, %cst_122 {dimension_numbers = #tpu.dot_dimension_numbers<[1], [0], [0], [1], [0, 0, 1, 1], [], []>} : vector<2x200xbf16>, vector<200x128xbf16>, vector<2x128xf32> -> vector<2x128xf32>
    %154 = vector.broadcast %3 : vector<1x128xf32> to vector<2x128xf32>
    %155 = arith.addf %153, %154 : vector<2x128xf32>
    %cst_123 = arith.constant 0.000000e+00 : f32
    %156 = vector.broadcast %cst_123 : f32 to vector<2x128xf32>
    %157 = arith.maximumf %155, %156 : vector<2x128xf32>
    %158 = arith.truncf %157 : vector<2x128xf32> to vector<2x128xbf16>
    %c0_124 = arith.constant 0 : index
    %c11_125 = arith.constant 11 : index
    %c0_126 = arith.constant 0 : index
    %c0_127 = arith.constant 0 : index
    %159 = vector.load %arg4[%c0_124, %c11_125, %c0_126, %c0_127] : memref<1x25x128x768xbf16, #tpu.memory_space<vmem>>, vector<1x1x128x768xbf16>
    %160 = vector.shape_cast %159 : vector<1x1x128x768xbf16> to vector<128x768xbf16>
    %cst_128 = arith.constant dense<0.000000e+00> : vector<2x768xf32>
    %161 = tpu.matmul %158, %160, %cst_128 {dimension_numbers = #tpu.dot_dimension_numbers<[1], [0], [0], [1], [0, 0, 1, 1], [], []>} : vector<2x128xbf16>, vector<128x768xbf16>, vector<2x768xf32> -> vector<2x768xf32>
    %162 = arith.addf %149, %161 : vector<2x768xf32>
    %c0_129 = arith.constant 0 : index
    %c12 = arith.constant 12 : index
    %c0_130 = arith.constant 0 : index
    %c0_131 = arith.constant 0 : index
    %163 = vector.load %arg1[%c0_129, %c12, %c0_130, %c0_131] : memref<1x25x2x200xf32, #tpu.memory_space<vmem>>, vector<1x1x2x200xf32>
    %164 = vector.shape_cast %163 : vector<1x1x2x200xf32> to vector<2x200xf32>
    %165 = arith.truncf %164 : vector<2x200xf32> to vector<2x200xbf16>
    %cst_132 = arith.constant dense<0.000000e+00> : vector<2x128xf32>
    %166 = tpu.matmul %165, %1, %cst_132 {dimension_numbers = #tpu.dot_dimension_numbers<[1], [0], [0], [1], [0, 0, 1, 1], [], []>} : vector<2x200xbf16>, vector<200x128xbf16>, vector<2x128xf32> -> vector<2x128xf32>
    %167 = vector.broadcast %3 : vector<1x128xf32> to vector<2x128xf32>
    %168 = arith.addf %166, %167 : vector<2x128xf32>
    %cst_133 = arith.constant 0.000000e+00 : f32
    %169 = vector.broadcast %cst_133 : f32 to vector<2x128xf32>
    %170 = arith.maximumf %168, %169 : vector<2x128xf32>
    %171 = arith.truncf %170 : vector<2x128xf32> to vector<2x128xbf16>
    %c0_134 = arith.constant 0 : index
    %c12_135 = arith.constant 12 : index
    %c0_136 = arith.constant 0 : index
    %c0_137 = arith.constant 0 : index
    %172 = vector.load %arg4[%c0_134, %c12_135, %c0_136, %c0_137] : memref<1x25x128x768xbf16, #tpu.memory_space<vmem>>, vector<1x1x128x768xbf16>
    %173 = vector.shape_cast %172 : vector<1x1x128x768xbf16> to vector<128x768xbf16>
    %cst_138 = arith.constant dense<0.000000e+00> : vector<2x768xf32>
    %174 = tpu.matmul %171, %173, %cst_138 {dimension_numbers = #tpu.dot_dimension_numbers<[1], [0], [0], [1], [0, 0, 1, 1], [], []>} : vector<2x128xbf16>, vector<128x768xbf16>, vector<2x768xf32> -> vector<2x768xf32>
    %175 = arith.addf %162, %174 : vector<2x768xf32>
    %c0_139 = arith.constant 0 : index
    %c13 = arith.constant 13 : index
    %c0_140 = arith.constant 0 : index
    %c0_141 = arith.constant 0 : index
    %176 = vector.load %arg1[%c0_139, %c13, %c0_140, %c0_141] : memref<1x25x2x200xf32, #tpu.memory_space<vmem>>, vector<1x1x2x200xf32>
    %177 = vector.shape_cast %176 : vector<1x1x2x200xf32> to vector<2x200xf32>
    %178 = arith.truncf %177 : vector<2x200xf32> to vector<2x200xbf16>
    %cst_142 = arith.constant dense<0.000000e+00> : vector<2x128xf32>
    %179 = tpu.matmul %178, %1, %cst_142 {dimension_numbers = #tpu.dot_dimension_numbers<[1], [0], [0], [1], [0, 0, 1, 1], [], []>} : vector<2x200xbf16>, vector<200x128xbf16>, vector<2x128xf32> -> vector<2x128xf32>
    %180 = vector.broadcast %3 : vector<1x128xf32> to vector<2x128xf32>
    %181 = arith.addf %179, %180 : vector<2x128xf32>
    %cst_143 = arith.constant 0.000000e+00 : f32
    %182 = vector.broadcast %cst_143 : f32 to vector<2x128xf32>
    %183 = arith.maximumf %181, %182 : vector<2x128xf32>
    %184 = arith.truncf %183 : vector<2x128xf32> to vector<2x128xbf16>
    %c0_144 = arith.constant 0 : index
    %c13_145 = arith.constant 13 : index
    %c0_146 = arith.constant 0 : index
    %c0_147 = arith.constant 0 : index
    %185 = vector.load %arg4[%c0_144, %c13_145, %c0_146, %c0_147] : memref<1x25x128x768xbf16, #tpu.memory_space<vmem>>, vector<1x1x128x768xbf16>
    %186 = vector.shape_cast %185 : vector<1x1x128x768xbf16> to vector<128x768xbf16>
    %cst_148 = arith.constant dense<0.000000e+00> : vector<2x768xf32>
    %187 = tpu.matmul %184, %186, %cst_148 {dimension_numbers = #tpu.dot_dimension_numbers<[1], [0], [0], [1], [0, 0, 1, 1], [], []>} : vector<2x128xbf16>, vector<128x768xbf16>, vector<2x768xf32> -> vector<2x768xf32>
    %188 = arith.addf %175, %187 : vector<2x768xf32>
    %c0_149 = arith.constant 0 : index
    %c14 = arith.constant 14 : index
    %c0_150 = arith.constant 0 : index
    %c0_151 = arith.constant 0 : index
    %189 = vector.load %arg1[%c0_149, %c14, %c0_150, %c0_151] : memref<1x25x2x200xf32, #tpu.memory_space<vmem>>, vector<1x1x2x200xf32>
    %190 = vector.shape_cast %189 : vector<1x1x2x200xf32> to vector<2x200xf32>
    %191 = arith.truncf %190 : vector<2x200xf32> to vector<2x200xbf16>
    %cst_152 = arith.constant dense<0.000000e+00> : vector<2x128xf32>
    %192 = tpu.matmul %191, %1, %cst_152 {dimension_numbers = #tpu.dot_dimension_numbers<[1], [0], [0], [1], [0, 0, 1, 1], [], []>} : vector<2x200xbf16>, vector<200x128xbf16>, vector<2x128xf32> -> vector<2x128xf32>
    %193 = vector.broadcast %3 : vector<1x128xf32> to vector<2x128xf32>
    %194 = arith.addf %192, %193 : vector<2x128xf32>
    %cst_153 = arith.constant 0.000000e+00 : f32
    %195 = vector.broadcast %cst_153 : f32 to vector<2x128xf32>
    %196 = arith.maximumf %194, %195 : vector<2x128xf32>
    %197 = arith.truncf %196 : vector<2x128xf32> to vector<2x128xbf16>
    %c0_154 = arith.constant 0 : index
    %c14_155 = arith.constant 14 : index
    %c0_156 = arith.constant 0 : index
    %c0_157 = arith.constant 0 : index
    %198 = vector.load %arg4[%c0_154, %c14_155, %c0_156, %c0_157] : memref<1x25x128x768xbf16, #tpu.memory_space<vmem>>, vector<1x1x128x768xbf16>
    %199 = vector.shape_cast %198 : vector<1x1x128x768xbf16> to vector<128x768xbf16>
    %cst_158 = arith.constant dense<0.000000e+00> : vector<2x768xf32>
    %200 = tpu.matmul %197, %199, %cst_158 {dimension_numbers = #tpu.dot_dimension_numbers<[1], [0], [0], [1], [0, 0, 1, 1], [], []>} : vector<2x128xbf16>, vector<128x768xbf16>, vector<2x768xf32> -> vector<2x768xf32>
    %201 = arith.addf %188, %200 : vector<2x768xf32>
    %c0_159 = arith.constant 0 : index
    %c15 = arith.constant 15 : index
    %c0_160 = arith.constant 0 : index
    %c0_161 = arith.constant 0 : index
    %202 = vector.load %arg1[%c0_159, %c15, %c0_160, %c0_161] : memref<1x25x2x200xf32, #tpu.memory_space<vmem>>, vector<1x1x2x200xf32>
    %203 = vector.shape_cast %202 : vector<1x1x2x200xf32> to vector<2x200xf32>
    %204 = arith.truncf %203 : vector<2x200xf32> to vector<2x200xbf16>
    %cst_162 = arith.constant dense<0.000000e+00> : vector<2x128xf32>
    %205 = tpu.matmul %204, %1, %cst_162 {dimension_numbers = #tpu.dot_dimension_numbers<[1], [0], [0], [1], [0, 0, 1, 1], [], []>} : vector<2x200xbf16>, vector<200x128xbf16>, vector<2x128xf32> -> vector<2x128xf32>
    %206 = vector.broadcast %3 : vector<1x128xf32> to vector<2x128xf32>
    %207 = arith.addf %205, %206 : vector<2x128xf32>
    %cst_163 = arith.constant 0.000000e+00 : f32
    %208 = vector.broadcast %cst_163 : f32 to vector<2x128xf32>
    %209 = arith.maximumf %207, %208 : vector<2x128xf32>
    %210 = arith.truncf %209 : vector<2x128xf32> to vector<2x128xbf16>
    %c0_164 = arith.constant 0 : index
    %c15_165 = arith.constant 15 : index
    %c0_166 = arith.constant 0 : index
    %c0_167 = arith.constant 0 : index
    %211 = vector.load %arg4[%c0_164, %c15_165, %c0_166, %c0_167] : memref<1x25x128x768xbf16, #tpu.memory_space<vmem>>, vector<1x1x128x768xbf16>
    %212 = vector.shape_cast %211 : vector<1x1x128x768xbf16> to vector<128x768xbf16>
    %cst_168 = arith.constant dense<0.000000e+00> : vector<2x768xf32>
    %213 = tpu.matmul %210, %212, %cst_168 {dimension_numbers = #tpu.dot_dimension_numbers<[1], [0], [0], [1], [0, 0, 1, 1], [], []>} : vector<2x128xbf16>, vector<128x768xbf16>, vector<2x768xf32> -> vector<2x768xf32>
    %214 = arith.addf %201, %213 : vector<2x768xf32>
    %c0_169 = arith.constant 0 : index
    %c16 = arith.constant 16 : index
    %c0_170 = arith.constant 0 : index
    %c0_171 = arith.constant 0 : index
    %215 = vector.load %arg1[%c0_169, %c16, %c0_170, %c0_171] : memref<1x25x2x200xf32, #tpu.memory_space<vmem>>, vector<1x1x2x200xf32>
    %216 = vector.shape_cast %215 : vector<1x1x2x200xf32> to vector<2x200xf32>
    %217 = arith.truncf %216 : vector<2x200xf32> to vector<2x200xbf16>
    %cst_172 = arith.constant dense<0.000000e+00> : vector<2x128xf32>
    %218 = tpu.matmul %217, %1, %cst_172 {dimension_numbers = #tpu.dot_dimension_numbers<[1], [0], [0], [1], [0, 0, 1, 1], [], []>} : vector<2x200xbf16>, vector<200x128xbf16>, vector<2x128xf32> -> vector<2x128xf32>
    %219 = vector.broadcast %3 : vector<1x128xf32> to vector<2x128xf32>
    %220 = arith.addf %218, %219 : vector<2x128xf32>
    %cst_173 = arith.constant 0.000000e+00 : f32
    %221 = vector.broadcast %cst_173 : f32 to vector<2x128xf32>
    %222 = arith.maximumf %220, %221 : vector<2x128xf32>
    %223 = arith.truncf %222 : vector<2x128xf32> to vector<2x128xbf16>
    %c0_174 = arith.constant 0 : index
    %c16_175 = arith.constant 16 : index
    %c0_176 = arith.constant 0 : index
    %c0_177 = arith.constant 0 : index
    %224 = vector.load %arg4[%c0_174, %c16_175, %c0_176, %c0_177] : memref<1x25x128x768xbf16, #tpu.memory_space<vmem>>, vector<1x1x128x768xbf16>
    %225 = vector.shape_cast %224 : vector<1x1x128x768xbf16> to vector<128x768xbf16>
    %cst_178 = arith.constant dense<0.000000e+00> : vector<2x768xf32>
    %226 = tpu.matmul %223, %225, %cst_178 {dimension_numbers = #tpu.dot_dimension_numbers<[1], [0], [0], [1], [0, 0, 1, 1], [], []>} : vector<2x128xbf16>, vector<128x768xbf16>, vector<2x768xf32> -> vector<2x768xf32>
    %227 = arith.addf %214, %226 : vector<2x768xf32>
    %c0_179 = arith.constant 0 : index
    %c17 = arith.constant 17 : index
    %c0_180 = arith.constant 0 : index
    %c0_181 = arith.constant 0 : index
    %228 = vector.load %arg1[%c0_179, %c17, %c0_180, %c0_181] : memref<1x25x2x200xf32, #tpu.memory_space<vmem>>, vector<1x1x2x200xf32>
    %229 = vector.shape_cast %228 : vector<1x1x2x200xf32> to vector<2x200xf32>
    %230 = arith.truncf %229 : vector<2x200xf32> to vector<2x200xbf16>
    %cst_182 = arith.constant dense<0.000000e+00> : vector<2x128xf32>
    %231 = tpu.matmul %230, %1, %cst_182 {dimension_numbers = #tpu.dot_dimension_numbers<[1], [0], [0], [1], [0, 0, 1, 1], [], []>} : vector<2x200xbf16>, vector<200x128xbf16>, vector<2x128xf32> -> vector<2x128xf32>
    %232 = vector.broadcast %3 : vector<1x128xf32> to vector<2x128xf32>
    %233 = arith.addf %231, %232 : vector<2x128xf32>
    %cst_183 = arith.constant 0.000000e+00 : f32
    %234 = vector.broadcast %cst_183 : f32 to vector<2x128xf32>
    %235 = arith.maximumf %233, %234 : vector<2x128xf32>
    %236 = arith.truncf %235 : vector<2x128xf32> to vector<2x128xbf16>
    %c0_184 = arith.constant 0 : index
    %c17_185 = arith.constant 17 : index
    %c0_186 = arith.constant 0 : index
    %c0_187 = arith.constant 0 : index
    %237 = vector.load %arg4[%c0_184, %c17_185, %c0_186, %c0_187] : memref<1x25x128x768xbf16, #tpu.memory_space<vmem>>, vector<1x1x128x768xbf16>
    %238 = vector.shape_cast %237 : vector<1x1x128x768xbf16> to vector<128x768xbf16>
    %cst_188 = arith.constant dense<0.000000e+00> : vector<2x768xf32>
    %239 = tpu.matmul %236, %238, %cst_188 {dimension_numbers = #tpu.dot_dimension_numbers<[1], [0], [0], [1], [0, 0, 1, 1], [], []>} : vector<2x128xbf16>, vector<128x768xbf16>, vector<2x768xf32> -> vector<2x768xf32>
    %240 = arith.addf %227, %239 : vector<2x768xf32>
    %c0_189 = arith.constant 0 : index
    %c18 = arith.constant 18 : index
    %c0_190 = arith.constant 0 : index
    %c0_191 = arith.constant 0 : index
    %241 = vector.load %arg1[%c0_189, %c18, %c0_190, %c0_191] : memref<1x25x2x200xf32, #tpu.memory_space<vmem>>, vector<1x1x2x200xf32>
    %242 = vector.shape_cast %241 : vector<1x1x2x200xf32> to vector<2x200xf32>
    %243 = arith.truncf %242 : vector<2x200xf32> to vector<2x200xbf16>
    %cst_192 = arith.constant dense<0.000000e+00> : vector<2x128xf32>
    %244 = tpu.matmul %243, %1, %cst_192 {dimension_numbers = #tpu.dot_dimension_numbers<[1], [0], [0], [1], [0, 0, 1, 1], [], []>} : vector<2x200xbf16>, vector<200x128xbf16>, vector<2x128xf32> -> vector<2x128xf32>
    %245 = vector.broadcast %3 : vector<1x128xf32> to vector<2x128xf32>
    %246 = arith.addf %244, %245 : vector<2x128xf32>
    %cst_193 = arith.constant 0.000000e+00 : f32
    %247 = vector.broadcast %cst_193 : f32 to vector<2x128xf32>
    %248 = arith.maximumf %246, %247 : vector<2x128xf32>
    %249 = arith.truncf %248 : vector<2x128xf32> to vector<2x128xbf16>
    %c0_194 = arith.constant 0 : index
    %c18_195 = arith.constant 18 : index
    %c0_196 = arith.constant 0 : index
    %c0_197 = arith.constant 0 : index
    %250 = vector.load %arg4[%c0_194, %c18_195, %c0_196, %c0_197] : memref<1x25x128x768xbf16, #tpu.memory_space<vmem>>, vector<1x1x128x768xbf16>
    %251 = vector.shape_cast %250 : vector<1x1x128x768xbf16> to vector<128x768xbf16>
    %cst_198 = arith.constant dense<0.000000e+00> : vector<2x768xf32>
    %252 = tpu.matmul %249, %251, %cst_198 {dimension_numbers = #tpu.dot_dimension_numbers<[1], [0], [0], [1], [0, 0, 1, 1], [], []>} : vector<2x128xbf16>, vector<128x768xbf16>, vector<2x768xf32> -> vector<2x768xf32>
    %253 = arith.addf %240, %252 : vector<2x768xf32>
    %c0_199 = arith.constant 0 : index
    %c19 = arith.constant 19 : index
    %c0_200 = arith.constant 0 : index
    %c0_201 = arith.constant 0 : index
    %254 = vector.load %arg1[%c0_199, %c19, %c0_200, %c0_201] : memref<1x25x2x200xf32, #tpu.memory_space<vmem>>, vector<1x1x2x200xf32>
    %255 = vector.shape_cast %254 : vector<1x1x2x200xf32> to vector<2x200xf32>
    %256 = arith.truncf %255 : vector<2x200xf32> to vector<2x200xbf16>
    %cst_202 = arith.constant dense<0.000000e+00> : vector<2x128xf32>
    %257 = tpu.matmul %256, %1, %cst_202 {dimension_numbers = #tpu.dot_dimension_numbers<[1], [0], [0], [1], [0, 0, 1, 1], [], []>} : vector<2x200xbf16>, vector<200x128xbf16>, vector<2x128xf32> -> vector<2x128xf32>
    %258 = vector.broadcast %3 : vector<1x128xf32> to vector<2x128xf32>
    %259 = arith.addf %257, %258 : vector<2x128xf32>
    %cst_203 = arith.constant 0.000000e+00 : f32
    %260 = vector.broadcast %cst_203 : f32 to vector<2x128xf32>
    %261 = arith.maximumf %259, %260 : vector<2x128xf32>
    %262 = arith.truncf %261 : vector<2x128xf32> to vector<2x128xbf16>
    %c0_204 = arith.constant 0 : index
    %c19_205 = arith.constant 19 : index
    %c0_206 = arith.constant 0 : index
    %c0_207 = arith.constant 0 : index
    %263 = vector.load %arg4[%c0_204, %c19_205, %c0_206, %c0_207] : memref<1x25x128x768xbf16, #tpu.memory_space<vmem>>, vector<1x1x128x768xbf16>
    %264 = vector.shape_cast %263 : vector<1x1x128x768xbf16> to vector<128x768xbf16>
    %cst_208 = arith.constant dense<0.000000e+00> : vector<2x768xf32>
    %265 = tpu.matmul %262, %264, %cst_208 {dimension_numbers = #tpu.dot_dimension_numbers<[1], [0], [0], [1], [0, 0, 1, 1], [], []>} : vector<2x128xbf16>, vector<128x768xbf16>, vector<2x768xf32> -> vector<2x768xf32>
    %266 = arith.addf %253, %265 : vector<2x768xf32>
    %c0_209 = arith.constant 0 : index
    %c20 = arith.constant 20 : index
    %c0_210 = arith.constant 0 : index
    %c0_211 = arith.constant 0 : index
    %267 = vector.load %arg1[%c0_209, %c20, %c0_210, %c0_211] : memref<1x25x2x200xf32, #tpu.memory_space<vmem>>, vector<1x1x2x200xf32>
    %268 = vector.shape_cast %267 : vector<1x1x2x200xf32> to vector<2x200xf32>
    %269 = arith.truncf %268 : vector<2x200xf32> to vector<2x200xbf16>
    %cst_212 = arith.constant dense<0.000000e+00> : vector<2x128xf32>
    %270 = tpu.matmul %269, %1, %cst_212 {dimension_numbers = #tpu.dot_dimension_numbers<[1], [0], [0], [1], [0, 0, 1, 1], [], []>} : vector<2x200xbf16>, vector<200x128xbf16>, vector<2x128xf32> -> vector<2x128xf32>
    %271 = vector.broadcast %3 : vector<1x128xf32> to vector<2x128xf32>
    %272 = arith.addf %270, %271 : vector<2x128xf32>
    %cst_213 = arith.constant 0.000000e+00 : f32
    %273 = vector.broadcast %cst_213 : f32 to vector<2x128xf32>
    %274 = arith.maximumf %272, %273 : vector<2x128xf32>
    %275 = arith.truncf %274 : vector<2x128xf32> to vector<2x128xbf16>
    %c0_214 = arith.constant 0 : index
    %c20_215 = arith.constant 20 : index
    %c0_216 = arith.constant 0 : index
    %c0_217 = arith.constant 0 : index
    %276 = vector.load %arg4[%c0_214, %c20_215, %c0_216, %c0_217] : memref<1x25x128x768xbf16, #tpu.memory_space<vmem>>, vector<1x1x128x768xbf16>
    %277 = vector.shape_cast %276 : vector<1x1x128x768xbf16> to vector<128x768xbf16>
    %cst_218 = arith.constant dense<0.000000e+00> : vector<2x768xf32>
    %278 = tpu.matmul %275, %277, %cst_218 {dimension_numbers = #tpu.dot_dimension_numbers<[1], [0], [0], [1], [0, 0, 1, 1], [], []>} : vector<2x128xbf16>, vector<128x768xbf16>, vector<2x768xf32> -> vector<2x768xf32>
    %279 = arith.addf %266, %278 : vector<2x768xf32>
    %c0_219 = arith.constant 0 : index
    %c21 = arith.constant 21 : index
    %c0_220 = arith.constant 0 : index
    %c0_221 = arith.constant 0 : index
    %280 = vector.load %arg1[%c0_219, %c21, %c0_220, %c0_221] : memref<1x25x2x200xf32, #tpu.memory_space<vmem>>, vector<1x1x2x200xf32>
    %281 = vector.shape_cast %280 : vector<1x1x2x200xf32> to vector<2x200xf32>
    %282 = arith.truncf %281 : vector<2x200xf32> to vector<2x200xbf16>
    %cst_222 = arith.constant dense<0.000000e+00> : vector<2x128xf32>
    %283 = tpu.matmul %282, %1, %cst_222 {dimension_numbers = #tpu.dot_dimension_numbers<[1], [0], [0], [1], [0, 0, 1, 1], [], []>} : vector<2x200xbf16>, vector<200x128xbf16>, vector<2x128xf32> -> vector<2x128xf32>
    %284 = vector.broadcast %3 : vector<1x128xf32> to vector<2x128xf32>
    %285 = arith.addf %283, %284 : vector<2x128xf32>
    %cst_223 = arith.constant 0.000000e+00 : f32
    %286 = vector.broadcast %cst_223 : f32 to vector<2x128xf32>
    %287 = arith.maximumf %285, %286 : vector<2x128xf32>
    %288 = arith.truncf %287 : vector<2x128xf32> to vector<2x128xbf16>
    %c0_224 = arith.constant 0 : index
    %c21_225 = arith.constant 21 : index
    %c0_226 = arith.constant 0 : index
    %c0_227 = arith.constant 0 : index
    %289 = vector.load %arg4[%c0_224, %c21_225, %c0_226, %c0_227] : memref<1x25x128x768xbf16, #tpu.memory_space<vmem>>, vector<1x1x128x768xbf16>
    %290 = vector.shape_cast %289 : vector<1x1x128x768xbf16> to vector<128x768xbf16>
    %cst_228 = arith.constant dense<0.000000e+00> : vector<2x768xf32>
    %291 = tpu.matmul %288, %290, %cst_228 {dimension_numbers = #tpu.dot_dimension_numbers<[1], [0], [0], [1], [0, 0, 1, 1], [], []>} : vector<2x128xbf16>, vector<128x768xbf16>, vector<2x768xf32> -> vector<2x768xf32>
    %292 = arith.addf %279, %291 : vector<2x768xf32>
    %c0_229 = arith.constant 0 : index
    %c22 = arith.constant 22 : index
    %c0_230 = arith.constant 0 : index
    %c0_231 = arith.constant 0 : index
    %293 = vector.load %arg1[%c0_229, %c22, %c0_230, %c0_231] : memref<1x25x2x200xf32, #tpu.memory_space<vmem>>, vector<1x1x2x200xf32>
    %294 = vector.shape_cast %293 : vector<1x1x2x200xf32> to vector<2x200xf32>
    %295 = arith.truncf %294 : vector<2x200xf32> to vector<2x200xbf16>
    %cst_232 = arith.constant dense<0.000000e+00> : vector<2x128xf32>
    %296 = tpu.matmul %295, %1, %cst_232 {dimension_numbers = #tpu.dot_dimension_numbers<[1], [0], [0], [1], [0, 0, 1, 1], [], []>} : vector<2x200xbf16>, vector<200x128xbf16>, vector<2x128xf32> -> vector<2x128xf32>
    %297 = vector.broadcast %3 : vector<1x128xf32> to vector<2x128xf32>
    %298 = arith.addf %296, %297 : vector<2x128xf32>
    %cst_233 = arith.constant 0.000000e+00 : f32
    %299 = vector.broadcast %cst_233 : f32 to vector<2x128xf32>
    %300 = arith.maximumf %298, %299 : vector<2x128xf32>
    %301 = arith.truncf %300 : vector<2x128xf32> to vector<2x128xbf16>
    %c0_234 = arith.constant 0 : index
    %c22_235 = arith.constant 22 : index
    %c0_236 = arith.constant 0 : index
    %c0_237 = arith.constant 0 : index
    %302 = vector.load %arg4[%c0_234, %c22_235, %c0_236, %c0_237] : memref<1x25x128x768xbf16, #tpu.memory_space<vmem>>, vector<1x1x128x768xbf16>
    %303 = vector.shape_cast %302 : vector<1x1x128x768xbf16> to vector<128x768xbf16>
    %cst_238 = arith.constant dense<0.000000e+00> : vector<2x768xf32>
    %304 = tpu.matmul %301, %303, %cst_238 {dimension_numbers = #tpu.dot_dimension_numbers<[1], [0], [0], [1], [0, 0, 1, 1], [], []>} : vector<2x128xbf16>, vector<128x768xbf16>, vector<2x768xf32> -> vector<2x768xf32>
    %305 = arith.addf %292, %304 : vector<2x768xf32>
    %c0_239 = arith.constant 0 : index
    %c23 = arith.constant 23 : index
    %c0_240 = arith.constant 0 : index
    %c0_241 = arith.constant 0 : index
    %306 = vector.load %arg1[%c0_239, %c23, %c0_240, %c0_241] : memref<1x25x2x200xf32, #tpu.memory_space<vmem>>, vector<1x1x2x200xf32>
    %307 = vector.shape_cast %306 : vector<1x1x2x200xf32> to vector<2x200xf32>
    %308 = arith.truncf %307 : vector<2x200xf32> to vector<2x200xbf16>
    %cst_242 = arith.constant dense<0.000000e+00> : vector<2x128xf32>
    %309 = tpu.matmul %308, %1, %cst_242 {dimension_numbers = #tpu.dot_dimension_numbers<[1], [0], [0], [1], [0, 0, 1, 1], [], []>} : vector<2x200xbf16>, vector<200x128xbf16>, vector<2x128xf32> -> vector<2x128xf32>
    %310 = vector.broadcast %3 : vector<1x128xf32> to vector<2x128xf32>
    %311 = arith.addf %309, %310 : vector<2x128xf32>
    %cst_243 = arith.constant 0.000000e+00 : f32
    %312 = vector.broadcast %cst_243 : f32 to vector<2x128xf32>
    %313 = arith.maximumf %311, %312 : vector<2x128xf32>
    %314 = arith.truncf %313 : vector<2x128xf32> to vector<2x128xbf16>
    %c0_244 = arith.constant 0 : index
    %c23_245 = arith.constant 23 : index
    %c0_246 = arith.constant 0 : index
    %c0_247 = arith.constant 0 : index
    %315 = vector.load %arg4[%c0_244, %c23_245, %c0_246, %c0_247] : memref<1x25x128x768xbf16, #tpu.memory_space<vmem>>, vector<1x1x128x768xbf16>
    %316 = vector.shape_cast %315 : vector<1x1x128x768xbf16> to vector<128x768xbf16>
    %cst_248 = arith.constant dense<0.000000e+00> : vector<2x768xf32>
    %317 = tpu.matmul %314, %316, %cst_248 {dimension_numbers = #tpu.dot_dimension_numbers<[1], [0], [0], [1], [0, 0, 1, 1], [], []>} : vector<2x128xbf16>, vector<128x768xbf16>, vector<2x768xf32> -> vector<2x768xf32>
    %318 = arith.addf %305, %317 : vector<2x768xf32>
    %c0_249 = arith.constant 0 : index
    %c24 = arith.constant 24 : index
    %c0_250 = arith.constant 0 : index
    %c0_251 = arith.constant 0 : index
    %319 = vector.load %arg1[%c0_249, %c24, %c0_250, %c0_251] : memref<1x25x2x200xf32, #tpu.memory_space<vmem>>, vector<1x1x2x200xf32>
    %320 = vector.shape_cast %319 : vector<1x1x2x200xf32> to vector<2x200xf32>
    %321 = arith.truncf %320 : vector<2x200xf32> to vector<2x200xbf16>
    %cst_252 = arith.constant dense<0.000000e+00> : vector<2x128xf32>
    %322 = tpu.matmul %321, %1, %cst_252 {dimension_numbers = #tpu.dot_dimension_numbers<[1], [0], [0], [1], [0, 0, 1, 1], [], []>} : vector<2x200xbf16>, vector<200x128xbf16>, vector<2x128xf32> -> vector<2x128xf32>
    %323 = vector.broadcast %3 : vector<1x128xf32> to vector<2x128xf32>
    %324 = arith.addf %322, %323 : vector<2x128xf32>
    %cst_253 = arith.constant 0.000000e+00 : f32
    %325 = vector.broadcast %cst_253 : f32 to vector<2x128xf32>
    %326 = arith.maximumf %324, %325 : vector<2x128xf32>
    %327 = arith.truncf %326 : vector<2x128xf32> to vector<2x128xbf16>
    %c0_254 = arith.constant 0 : index
    %c24_255 = arith.constant 24 : index
    %c0_256 = arith.constant 0 : index
    %c0_257 = arith.constant 0 : index
    %328 = vector.load %arg4[%c0_254, %c24_255, %c0_256, %c0_257] : memref<1x25x128x768xbf16, #tpu.memory_space<vmem>>, vector<1x1x128x768xbf16>
    %329 = vector.shape_cast %328 : vector<1x1x128x768xbf16> to vector<128x768xbf16>
    %cst_258 = arith.constant dense<0.000000e+00> : vector<2x768xf32>
    %330 = tpu.matmul %327, %329, %cst_258 {dimension_numbers = #tpu.dot_dimension_numbers<[1], [0], [0], [1], [0, 0, 1, 1], [], []>} : vector<2x128xbf16>, vector<128x768xbf16>, vector<2x768xf32> -> vector<2x768xf32>
    %331 = arith.addf %318, %330 : vector<2x768xf32>
    %332 = vector.broadcast %5 : vector<1x768xf32> to vector<2x768xf32>
    %333 = arith.addf %331, %332 : vector<2x768xf32>
    %cst_259 = arith.constant 0.000000e+00 : f32
    %334 = vector.broadcast %cst_259 : f32 to vector<2x768xf32>
    %335 = arith.maximumf %333, %334 : vector<2x768xf32>
    %c0_260 = arith.constant 0 : index
    %c0_261 = arith.constant 0 : index
    %c0_262 = arith.constant 0 : index
    %336 = vector.load %arg6[%c0_260, %c0_261, %c0_262] : memref<1x2x768xf32, #tpu.memory_space<vmem>>, vector<1x2x768xf32>
    %337 = vector.shape_cast %336 : vector<1x2x768xf32> to vector<2x768xf32>
    %338 = vector.shape_cast %335 : vector<2x768xf32> to vector<1x2x768xf32>
    tpu.vector_store %arg6[%c0_260, %c0_261, %c0_262], %338 {strides = array<i32>} : memref<1x2x768xf32, #tpu.memory_space<vmem>>, vector<1x2x768xf32>,
    return
  }
  func.func @transform_0(%arg0: i32) -> (i32, i32, i32, i32) {
    %c0_i32 = arith.constant 0 : i32
    %c0_i32_0 = arith.constant 0 : i32
    %c0_i32_1 = arith.constant 0 : i32
    %c0_i32_2 = arith.constant 0 : i32
    return %arg0, %c0_i32, %c0_i32_0, %c0_i32_1 : i32, i32, i32, i32
  }
  func.func @transform_1(%arg0: i32) -> (i32, i32, i32) {
    %c0_i32 = arith.constant 0 : i32
    %c0_i32_0 = arith.constant 0 : i32
    %c0_i32_1 = arith.constant 0 : i32
    return %arg0, %c0_i32, %c0_i32_0 : i32, i32, i32
  }
  func.func @transform_2(%arg0: i32) -> (i32, i32, i32) {
    %c0_i32 = arith.constant 0 : i32
    %c0_i32_0 = arith.constant 0 : i32
    %c0_i32_1 = arith.constant 0 : i32
    return %arg0, %c0_i32, %c0_i32_0 : i32, i32, i32
  }
  func.func @transform_3(%arg0: i32) -> (i32, i32, i32, i32) {
    %c0_i32 = arith.constant 0 : i32
    %c0_i32_0 = arith.constant 0 : i32
    %c0_i32_1 = arith.constant 0 : i32
    %c0_i32_2 = arith.constant 0 : i32
    return %arg0, %c0_i32, %c0_i32_0, %c0_i32_1 : i32, i32, i32, i32
  }
  func.func @transform_4(%arg0: i32) -> (i32, i32, i32) {
    %c0_i32 = arith.constant 0 : i32
    %c0_i32_0 = arith.constant 0 : i32
    %c0_i32_1 = arith.constant 0 : i32
    return %arg0, %c0_i32, %c0_i32_0 : i32, i32, i32
  }
  func.func @transform_5(%arg0: i32) -> (i32, i32, i32) {
    %c0_i32 = arith.constant 0 : i32
    %c0_i32_0 = arith.constant 0 : i32
    %c0_i32_1 = arith.constant 0 : i32
    return %arg0, %c0_i32, %c0_i32_0 : i32, i32, i32
  }
}

</mosaic_0001>

<bundles_post_ra>
// kernel: inception_aux_twoview.3
= control target key start
LH: loop header
LB: loop body
LE: loop exit
PB: predicated region body
PF: predicated region fallthrough
CT: control target
= control target key end

     0   :  { %v1059_v30 = vmov 1983009808   ;;  %v219_v32 = vlaneseq  ;;  %s1686_s0 = inlined_call_operand.vmem [shape: f32[2,2,768], index: 0, kind: input, shape index: {}]   ;;  %s1687_s1 = inlined_call_operand.vmem [shape: f32[2,768,128], index: 1, kind: input, shape index: {}]   ;;  %s1688_s2 = inlined_call_operand.vmem [shape: f32[1,128], index: 2, kind: input, shape index: {}]   ;;  %s1689_s3 = inlined_call_operand.hbm [shape: f32[2,128], index: 3, kind: output, shape index: {}]  }
   0x1   :  { %v755_v0 = vld [vmem:[%s1687_s1 + $0x3f8] sm:$0xff]  ;;  %v754_v4 = vld [vmem:[%s1687_s1 + $0x3f0] sm:$0xff]  ;;  %v753_v8 = vld [vmem:[%s1687_s1 + $0x3e8] sm:$0xff]  ;;  %v217_v31 = vunpack.c.l.s4 %v1059_v30 }
   0x2   :  { %v787_v1 = vld [vmem:[%s1687_s1 + $0x4f8] sm:$0xff]  ;;  %823 = vmatprep.subr.mxu0 %v755_v0  ;;  %v786_v5 = vld [vmem:[%s1687_s1 + $0x4f0] sm:$0xff]  ;;  %v785_v9 = vld [vmem:[%s1687_s1 + $0x4e8] sm:$0xff]  ;;  %v220_v42 = vshrl.u32 %v219_v32, 7 }
   0x3   :  { %v739_v2 = vld [vmem:[%s1687_s1 + $0x378] sm:$0xff]  ;;  %858 = vmatprep.subr.mxu1 %v787_v1  ;;  %v738_v6 = vld [vmem:[%s1687_s1 + $0x370] sm:$0xff]  ;;  %v737_v10 = vld [vmem:[%s1687_s1 + $0x368] sm:$0xff]  ;;  %v218_v41 = vunpack.c.0.s8 %v217_v31 }
   0x4   :  { %v771_v3 = vld [vmem:[%s1687_s1 + $0x478] sm:$0xff]  ;;  %824 = vmatpush3.msra.mxu0 %v739_v2  ;;  %v770_v7 = vld [vmem:[%s1687_s1 + $0x470] sm:$0xff]  ;;  %v769_v11 = vld [vmem:[%s1687_s1 + $0x468] sm:$0xff] }
   0x5   :  { %859 = vmatpush3.msra.mxu1 %v771_v3  ;;  %825 = vmatprep.subr.mxu0 %v754_v4  ;;  %v752_v12 = vld [vmem:[%s1687_s1 + $0x3e0] sm:$0xff]  ;;  %v751_v16 = vld [vmem:[%s1687_s1 + $0x3d8] sm:$0xff]  ;;  %v750_v20 = vld [vmem:[%s1687_s1 + $0x3d0] sm:$0xff]  ;;  %v1219_v51 = vsub.s32 %v218_v41, %v220_v42 }
   0x6   :  { %860 = vmatprep.subr.mxu1 %v786_v5  ;;  %826 = vmatpush3.msra.mxu0 %v738_v6  ;;  %v784_v13 = vld [vmem:[%s1687_s1 + $0x4e0] sm:$0xff]  ;;  %v783_v17 = vld [vmem:[%s1687_s1 + $0x4d8] sm:$0xff]  ;;  %v782_v21 = vld [vmem:[%s1687_s1 + $0x4d0] sm:$0xff] }
   0x7   :  { %861 = vmatpush3.msra.mxu1 %v770_v7  ;;  %827 = vmatprep.subr.mxu0 %v753_v8  ;;  %v736_v14 = vld [vmem:[%s1687_s1 + $0x360] sm:$0xff]  ;;  %v735_v18 = vld [vmem:[%s1687_s1 + $0x358] sm:$0xff]  ;;  %v734_v22 = vld [vmem:[%s1687_s1 + $0x350] sm:$0xff] }
   0x8   :  { %862 = vmatprep.subr.mxu1 %v785_v9  ;;  %v768_v15 = vld [vmem:[%s1687_s1 + $0x460] sm:$0xff]  ;;  %828 = vmatpush3.msra.mxu0 %v737_v10  ;;  %v767_v19 = vld [vmem:[%s1687_s1 + $0x458] sm:$0xff]  ;;  %v766_v23 = vld [vmem:[%s1687_s1 + $0x450] sm:$0xff] }
   0x9   :  { %863 = vmatpush3.msra.mxu1 %v769_v11  ;;  %829 = vmatprep.subr.mxu0 %v752_v12  ;;  %v749_v24 = vld [vmem:[%s1687_s1 + $0x3c8] sm:$0xff]  ;;  %v748_v28 = vld [vmem:[%s1687_s1 + $0x3c0] sm:$0xff]  ;;  %v747_v35 = vld [vmem:[%s1687_s1 + $0x3b8] sm:$0xff] }
   0xa   :  { %864 = vmatprep.subr.mxu1 %v784_v13  ;;  %830 = vmatpush3.msra.mxu0 %v736_v14  ;;  %v781_v25 = vld [vmem:[%s1687_s1 + $0x4c8] sm:$0xff]  ;;  %v780_v29 = vld [vmem:[%s1687_s1 + $0x4c0] sm:$0xff]  ;;  %v779_v36 = vld [vmem:[%s1687_s1 + $0x4b8] sm:$0xff] }
   0xb   :  { %865 = vmatpush3.msra.mxu1 %v768_v15  ;;  %831 = vmatprep.subr.mxu0 %v751_v16  ;;  %v733_v26 = vld [vmem:[%s1687_s1 + $0x348] sm:$0xff]  ;;  %v732_v33 = vld [vmem:[%s1687_s1 + $0x340] sm:$0xff]  ;;  %v731_v37 = vld [vmem:[%s1687_s1 + $0x338] sm:$0xff] }
   0xc   :  { %866 = vmatprep.subr.mxu1 %v783_v17  ;;  %832 = vmatpush3.msra.mxu0 %v735_v18  ;;  %v765_v27 = vld [vmem:[%s1687_s1 + $0x448] sm:$0xff]  ;;  %v764_v34 = vld [vmem:[%s1687_s1 + $0x440] sm:$0xff]  ;;  %v763_v38 = vld [vmem:[%s1687_s1 + $0x438] sm:$0xff] }
   0xd   :  { %867 = vmatpush3.msra.mxu1 %v767_v19  ;;  %833 = vmatprep.subr.mxu0 %v750_v20  ;;  %v746_v39 = vld [vmem:[%s1687_s1 + $0x3b0] sm:$0xff]  ;;  %v745_v45 = vld [vmem:[%s1687_s1 + $0x3a8] sm:$0xff]  ;;  %v744_v49 = vld [vmem:[%s1687_s1 + $0x3a0] sm:$0xff] }
   0xe   :  { %868 = vmatprep.subr.mxu1 %v782_v21  ;;  %834 = vmatpush3.msra.mxu0 %v734_v22  ;;  %v778_v40 = vld [vmem:[%s1687_s1 + $0x4b0] sm:$0xff]  ;;  %v777_v46 = vld [vmem:[%s1687_s1 + $0x4a8] sm:$0xff]  ;;  %v776_v50 = vld [vmem:[%s1687_s1 + $0x4a0] sm:$0xff] }
   0xf   :  { %869 = vmatpush3.msra.mxu1 %v766_v23  ;;  %835 = vmatprep.subr.mxu0 %v749_v24  ;;  %v730_v43 = vld [vmem:[%s1687_s1 + $0x330] sm:$0xff]  ;;  %v729_v47 = vld [vmem:[%s1687_s1 + $0x328] sm:$0xff]  ;;  %v728_v52 = vld [vmem:[%s1687_s1 + $0x320] sm:$0xff] }
  0x10   :  { %870 = vmatprep.subr.mxu1 %v781_v25  ;;  %836 = vmatpush3.msra.mxu0 %v733_v26  ;;  %v762_v44 = vld [vmem:[%s1687_s1 + $0x430] sm:$0xff]  ;;  %v761_v48 = vld [vmem:[%s1687_s1 + $0x428] sm:$0xff]  ;;  %v760_v53 = vld [vmem:[%s1687_s1 + $0x420] sm:$0xff] }
  0x11   :  { %871 = vmatpush3.msra.mxu1 %v765_v27  ;;  %837 = vmatprep.subr.mxu0 %v748_v28  ;;  %v722_v54 = vld [vmem:[%s1686_s0 + $0xc] sm:$0xff]  ;;  %v743_v55 = vld [vmem:[%s1687_s1 + $0x398] sm:$0xff]  ;;  %v740_v6 = vld [vmem:[%s1687_s1 + $0x380] sm:$0xff] }
  0x12   :  { %872 = vmatprep.subr.mxu1 %v780_v29  ;;  %838 = vmatpush3.msra.mxu0 %v732_v33  ;;  %v775_v56 = vld [vmem:[%s1687_s1 + $0x498] sm:$0xff]  ;;  %v215_v57 = vcombine.high %v722_v54, %v722_v54  ;;  %v742_v60 = vld [vmem:[%s1687_s1 + $0x390] sm:$0xff]  ;;  %v222_v62 = vrot.slane %v722_v54, %v1219_v51  ;;  %v741_v2 = vld [vmem:[%s1687_s1 + $0x388] sm:$0xff] }
  0x13   :  { %873 = vmatpush3.msra.mxu1 %v764_v34  ;;  %839 = vmatprep.subr.mxu0 %v747_v35  ;;  %v727_v58 = vld [vmem:[%s1687_s1 + $0x318] sm:$0xff]  ;;  %v774_v61 = vld [vmem:[%s1687_s1 + $0x490] sm:$0xff]  ;;  %v773_v3 = vld [vmem:[%s1687_s1 + $0x488] sm:$0xff] }
  0x14   :  { %874 = vmatprep.subr.mxu1 %v779_v36  ;;  %840 = vmatpush3.msra.mxu0 %v731_v37  ;;  %v759_v59 = vld [vmem:[%s1687_s1 + $0x418] sm:$0xff]  ;;  %v726_v63 = vld [vmem:[%s1687_s1 + $0x310] sm:$0xff]  ;;  %v229_v1 = vrot.slane %v215_v57, %v1219_v51  ;;  %v725_v4 = vld [vmem:[%s1687_s1 + $0x308] sm:$0xff]  ;;  %v230_v8 = vcombine.high %v222_v62, %v222_v62 }
  0x15   :  { %875 = vmatpush3.msra.mxu1 %v763_v38  ;;  %841 = vmatprep.subr.mxu0 %v746_v39  ;;  %v758_v0 = vld [vmem:[%s1687_s1 + $0x410] sm:$0xff]  ;;  %v757_v5 = vld [vmem:[%s1687_s1 + $0x408] sm:$0xff]  ;;  %v772_v7 = vld [vmem:[%s1687_s1 + $0x480] sm:$0xff] }
  0x16   :  { %876 = vmatprep.subr.mxu1 %v778_v40  ;;  %842 = vmatpush3.msra.mxu0 %v730_v43  ;;  %v724_v9 = vld [vmem:[%s1687_s1 + $0x300] sm:$0xff]  ;;  %v231_v10 = vcombine.high %v229_v1, %v229_v1  ;;  %v819_v12 = vld [vmem:[%s1687_s1 + $0x5f8] sm:$0xff]  ;;  %v818_v16 = vld [vmem:[%s1687_s1 + $0x5f0] sm:$0xff] }
  0x17   :  { %877 = vmatpush3.msra.mxu1 %v762_v44  ;;  %843 = vmatprep.subr.mxu0 %v745_v45  ;;  %v756_v11 = vld [vmem:[%s1687_s1 + $0x400] sm:$0xff]  ;;  %v48_v13 = vld [vmem:[%s1687_s1 + $0xf8] sm:$0xff]  ;;  %v47_v17 = vld [vmem:[%s1687_s1 + $0xf0] sm:$0xff] }
  0x18   :  { %878 = vmatprep.subr.mxu1 %v777_v46  ;;  %844 = vmatpush3.msra.mxu0 %v729_v47  ;;  %v803_v14 = vld [vmem:[%s1687_s1 + $0x578] sm:$0xff]  ;;  %v802_v18 = vld [vmem:[%s1687_s1 + $0x570] sm:$0xff]  ;;  %v817_v20 = vld [vmem:[%s1687_s1 + $0x5e8] sm:$0xff] }
  0x19   :  { %879 = vmatpush3.msra.mxu1 %v761_v48  ;;  %845 = vmatprep.subr.mxu0 %v744_v49  ;;  %v32_v15 = vld [vmem:[%s1687_s1 + $0x78] sm:$0xff]  ;;  %v31_v19 = vld [vmem:[%s1687_s1 + $0x70] sm:$0xff]  ;;  %v46_v21 = vld [vmem:[%s1687_s1 + $0xe8] sm:$0xff] }
  0x1a   :  { %880 = vmatprep.subr.mxu1 %v776_v50  ;;  %846 = vmatpush3.msra.mxu0 %v728_v52  ;;  %v801_v22 = vld [vmem:[%s1687_s1 + $0x568] sm:$0xff]  ;;  %v816_v24 = vld [vmem:[%s1687_s1 + $0x5e0] sm:$0xff]  ;;  %v815_v28 = vld [vmem:[%s1687_s1 + $0x5d8] sm:$0xff] }
  0x1b   :  { %881 = vmatpush3.msra.mxu1 %v760_v53  ;;  %847 = vmatprep.subr.mxu0 %v743_v55  ;;  %v30_v23 = vld [vmem:[%s1687_s1 + $0x68] sm:$0xff]  ;;  %v45_v25 = vld [vmem:[%s1687_s1 + $0xe0] sm:$0xff]  ;;  %v44_v29 = vld [vmem:[%s1687_s1 + $0xd8] sm:$0xff] }
  0x1c   :  { %882 = vmatprep.subr.mxu1 %v775_v56  ;;  %848 = vmatpush3.msra.mxu0 %v727_v58  ;;  %v800_v26 = vld [vmem:[%s1687_s1 + $0x560] sm:$0xff]  ;;  %v799_v30 = vld [vmem:[%s1687_s1 + $0x558] sm:$0xff]  ;;  %v814_v32 = vld [vmem:[%s1687_s1 + $0x5d0] sm:$0xff] }
  0x1d   :  { %883 = vmatpush3.msra.mxu1 %v759_v59  ;;  %849 = vmatprep.subr.mxu0 %v742_v60  ;;  %v29_v27 = vld [vmem:[%s1687_s1 + $0x60] sm:$0xff]  ;;  %v28_v31 = vld [vmem:[%s1687_s1 + $0x58] sm:$0xff]  ;;  %v43_v33 = vld [vmem:[%s1687_s1 + $0xd0] sm:$0xff] }
  0x1e   :  { %884 = vmatprep.subr.mxu1 %v774_v61  ;;  %850 = vmatpush3.msra.mxu0 %v726_v63  ;;  %v798_v34 = vld [vmem:[%s1687_s1 + $0x550] sm:$0xff]  ;;  %v813_v36 = vld [vmem:[%s1687_s1 + $0x5c8] sm:$0xff]  ;;  %v812_v40 = vld [vmem:[%s1687_s1 + $0x5c0] sm:$0xff] }
  0x1f   :  { %885 = vmatpush3.msra.mxu1 %v758_v0  ;;  %851 = vmatprep.subr.mxu0 %v741_v2  ;;  %v27_v35 = vld [vmem:[%s1687_s1 + $0x50] sm:$0xff]  ;;  %v42_v37 = vld [vmem:[%s1687_s1 + $0xc8] sm:$0xff]  ;;  %v41_v41 = vld [vmem:[%s1687_s1 + $0xc0] sm:$0xff] }
  0x20   :  { %886 = vmatprep.subr.mxu1 %v773_v3  ;;  %852 = vmatpush3.msra.mxu0 %v725_v4  ;;  %v797_v38 = vld [vmem:[%s1687_s1 + $0x548] sm:$0xff]  ;;  %v796_v42 = vld [vmem:[%s1687_s1 + $0x540] sm:$0xff]  ;;  %v811_v44 = vld [vmem:[%s1687_s1 + $0x5b8] sm:$0xff] }
  0x21   :  { %887 = vmatpush3.msra.mxu1 %v757_v5  ;;  %853 = vmatprep.subr.mxu0 %v740_v6  ;;  %v26_v39 = vld [vmem:[%s1687_s1 + $0x48] sm:$0xff]  ;;  %v25_v43 = vld [vmem:[%s1687_s1 + $0x40] sm:$0xff]  ;;  %v40_v45 = vld [vmem:[%s1687_s1 + $0xb8] sm:$0xff] }
  0x22   :  { %888 = vmatprep.subr.mxu1 %v772_v7  ;;  %854 = vmatpush3.msra.mxu0 %v724_v9  ;;  %v795_v46 = vld [vmem:[%s1687_s1 + $0x538] sm:$0xff]  ;;  %v810_v48 = vld [vmem:[%s1687_s1 + $0x5b0] sm:$0xff]  ;;  %v809_v53 = vld [vmem:[%s1687_s1 + $0x5a8] sm:$0xff] }
  0x23   :  { %310 = vmatprep.mubr.f32.mxu0 %v230_v8  ;;  %889 = vmatpush3.msra.mxu1 %v756_v11  ;;  %v24_v47 = vld [vmem:[%s1687_s1 + $0x38] sm:$0xff]  ;;  %v39_v49 = vld [vmem:[%s1687_s1 + $0xb0] sm:$0xff]  ;;  %v38_v54 = vld [vmem:[%s1687_s1 + $0xa8] sm:$0xff] }
  0x24   :  { %380 = vmatprep.mubr.f32.mxu1 %v231_v10  ;;  %311 = vmatmul.mubr.f32.vlgmr.msra.gmra.mxu0 %v222_v62  ;;  %v794_v50 = vld [vmem:[%s1687_s1 + $0x530] sm:$0xff]  ;;  %v793_v55 = vld [vmem:[%s1687_s1 + $0x528] sm:$0xff]  ;;  %v808_v57 = vld [vmem:[%s1687_s1 + $0x5a0] sm:$0xff] }
  0x25   :  { %381 = vmatmul.mubr.f32.vlgmr.msra.gmra.mxu1 %v229_v1  ;;  %893 = vmatprep.subr.mxu0 %v819_v12  ;;  %v23_v52 = vld [vmem:[%s1687_s1 + $0x30] sm:$0xff]  ;;  %v22_v56 = vld [vmem:[%s1687_s1 + $0x28] sm:$0xff]  ;;  %v37_v58 = vld [vmem:[%s1687_s1 + $0xa0] sm:$0xff] }
  0x26   :  { %928 = vmatprep.subr.mxu1 %v48_v13  ;;  %894 = vmatpush3.msra.mxu0 %v803_v14  ;;  %v792_v59 = vld [vmem:[%s1687_s1 + $0x520] sm:$0xff]  ;;  %v807_v61 = vld [vmem:[%s1687_s1 + $0x598] sm:$0xff]  ;;  %v806_v2 = vld [vmem:[%s1687_s1 + $0x590] sm:$0xff] }
  0x27   :  { %929 = vmatpush3.msra.mxu1 %v32_v15  ;;  %895 = vmatprep.subr.mxu0 %v818_v16  ;;  %v21_v60 = vld [vmem:[%s1687_s1 + $0x20] sm:$0xff]  ;;  %v36_v62 = vld [vmem:[%s1687_s1 + $0x98] sm:$0xff]  ;;  %v35_v3 = vld [vmem:[%s1687_s1 + $0x90] sm:$0xff] }
  0x28   :  { %930 = vmatprep.subr.mxu1 %v47_v17  ;;  %896 = vmatpush3.msra.mxu0 %v802_v18  ;;  %v791_v63 = vld [vmem:[%s1687_s1 + $0x518] sm:$0xff]  ;;  %v1439_v1 = vld [vmem:[%s1686_s0] sm:$0xff]  ;;  %v790_v4 = vld [vmem:[%s1687_s1 + $0x510] sm:$0xff] }
  0x29   :  { %931 = vmatpush3.msra.mxu1 %v31_v19  ;;  %897 = vmatprep.subr.mxu0 %v817_v20  ;;  %v20_v0 = vld [vmem:[%s1687_s1 + $0x18] sm:$0xff]  ;;  %v19_v5 = vld [vmem:[%s1687_s1 + $0x10] sm:$0xff]  ;;  %v805_v7 = vld [vmem:[%s1687_s1 + $0x588] sm:$0xff]  ;;  %v465_v9 = vrot.slane %v1439_v1, %v1219_v51 }
  0x2a   :  { %932 = vmatprep.subr.mxu1 %v46_v21  ;;  %898 = vmatpush3.msra.mxu0 %v801_v22  ;;  %v820_v6 = vld.sshfl [vmem:[%s1686_s0 + $0x14] sm:$0x33 pattern:$0x76325410]  ;;  %v34_v8 = vld [vmem:[%s1687_s1 + $0x88] sm:$0xff]  ;;  %v804_v12 = vld [vmem:[%s1687_s1 + $0x580] sm:$0xff] }
  0x2b   :  { %933 = vmatpush3.msra.mxu1 %v30_v23  ;;  %899 = vmatprep.subr.mxu0 %v816_v24  ;;  %v789_v10 = vld [vmem:[%s1687_s1 + $0x508] sm:$0xff]  ;;  %v33_v13 = vld [vmem:[%s1687_s1 + $0x80] sm:$0xff]  ;;  %v239_v14 = vcombine.high %v820_v6, %v820_v6  ;;  %v473_v17 = vcombine.high %v465_v9, %v465_v9  ;;  %v80_v18 = vld [vmem:[%s1687_s1 + $0x1f8] sm:$0xff] }
  0x2c   :  { %934 = vmatprep.subr.mxu1 %v45_v25  ;;  %900 = vmatpush3.msra.mxu0 %v800_v26  ;;  %v18_v11 = vld [vmem:[%s1687_s1 + $0x8] sm:$0xff]  ;;  %v788_v15 = vld [vmem:[%s1687_s1 + $0x500] sm:$0xff] }
  0x2d   :  { %935 = vmatpush3.msra.mxu1 %v29_v27  ;;  %901 = vmatprep.subr.mxu0 %v815_v28  ;;  %v17_v16 = vld [vmem:[%s1687_s1] sm:$0xff] }
  0x2e   :  { %936 = vmatprep.subr.mxu1 %v44_v29  ;;  %902 = vmatpush3.msra.mxu0 %v799_v30 }
  0x2f   :  { %937 = vmatpush3.msra.mxu1 %v28_v31  ;;  %903 = vmatprep.subr.mxu0 %v814_v32 }
  0x30   :  { %938 = vmatprep.subr.mxu1 %v43_v33  ;;  %904 = vmatpush3.msra.mxu0 %v798_v34 }
  0x31   :  { %939 = vmatpush3.msra.mxu1 %v27_v35  ;;  %905 = vmatprep.subr.mxu0 %v813_v36 }
  0x32   :  { %940 = vmatprep.subr.mxu1 %v42_v37  ;;  %906 = vmatpush3.msra.mxu0 %v797_v38 }
  0x33   :  { %941 = vmatpush3.msra.mxu1 %v26_v39  ;;  %907 = vmatprep.subr.mxu0 %v812_v40 }
  0x34   :  { %942 = vmatprep.subr.mxu1 %v41_v41  ;;  %908 = vmatpush3.msra.mxu0 %v796_v42 }
  0x35   :  { %943 = vmatpush3.msra.mxu1 %v25_v43  ;;  %909 = vmatprep.subr.mxu0 %v811_v44 }
  0x36   :  { %944 = vmatprep.subr.mxu1 %v40_v45  ;;  %910 = vmatpush3.msra.mxu0 %v795_v46 }
  0x37   :  { %945 = vmatpush3.msra.mxu1 %v24_v47  ;;  %911 = vmatprep.subr.mxu0 %v810_v48 }
  0x38   :  { %946 = vmatprep.subr.mxu1 %v39_v49  ;;  %912 = vmatpush3.msra.mxu0 %v794_v50 }
  0x39   :  { %947 = vmatpush3.msra.mxu1 %v23_v52  ;;  %913 = vmatprep.subr.mxu0 %v809_v53 }
  0x3a   :  { %948 = vmatprep.subr.mxu1 %v38_v54  ;;  %914 = vmatpush3.msra.mxu0 %v793_v55 }
  0x3b   :  { %949 = vmatpush3.msra.mxu1 %v22_v56  ;;  %915 = vmatprep.subr.mxu0 %v808_v57 }
  0x3c   :  { %950 = vmatprep.subr.mxu1 %v37_v58  ;;  %916 = vmatpush3.msra.mxu0 %v792_v59 }
  0x3d   :  { %951 = vmatpush3.msra.mxu1 %v21_v60  ;;  %917 = vmatprep.subr.mxu0 %v807_v61 }
  0x3e   :  { %952 = vmatprep.subr.mxu1 %v36_v62  ;;  %918 = vmatpush3.msra.mxu0 %v791_v63 }
  0x3f   :  { %953 = vmatpush3.msra.mxu1 %v20_v0  ;;  %919 = vmatprep.subr.mxu0 %v806_v2 }
  0x40   :  { %954 = vmatprep.subr.mxu1 %v35_v3  ;;  %920 = vmatpush3.msra.mxu0 %v790_v4 }
  0x41   :  { %955 = vmatpush3.msra.mxu1 %v19_v5  ;;  %921 = vmatprep.subr.mxu0 %v805_v7 }
  0x42   :  { %956 = vmatprep.subr.mxu1 %v34_v8  ;;  %922 = vmatpush3.msra.mxu0 %v789_v10 }
  0x43   :  { %957 = vmatpush3.msra.mxu1 %v18_v11  ;;  %923 = vmatprep.subr.mxu0 %v804_v12 }
  0x44   :  { %958 = vmatprep.subr.mxu1 %v33_v13 }
  0x45   :  { %8 = vsyncpa [#allocation3], 0  ;;  %924 = vmatpush3.msra.mxu0 %v788_v15  ;;  %450 = vmatprep.mubr.f32.mxu0 %v239_v14  ;;  %v112_v19 = vld [vmem:[%s1687_s1 + $0x2f8] sm:$0xff]  ;;  %v79_v22 = vld [vmem:[%s1687_s1 + $0x1f0] sm:$0xff]  ;;  %v458_v2 = vcombine.high %v1439_v1, %v1439_v1  ;;  %s1060_s26 = smov [#allocation2]  }
  0x46   :  { %959 = vmatpush3.msra.mxu1 %v17_v16  ;;  %451 = vmatmul.mubr.f32.vlgmr.msra.gmra.mxu0 %v820_v6  ;;  %v64_v20 = vld [vmem:[%s1687_s1 + $0x178] sm:$0xff]  ;;  %v111_v23 = vld [vmem:[%s1687_s1 + $0x2f0] sm:$0xff]  ;;  %v78_v26 = vld [vmem:[%s1687_s1 + $0x1e8] sm:$0xff]  ;;  %s714_s27 = sshll.u32 %s1060_s26, 4  ;;  %s715_s27 = int_to_ptr.vmem [resolvable:$true] %s714_s27 }
  0x47   :  { %v96_v21 = vld [vmem:[%s1687_s1 + $0x278] sm:$0xff]  ;;  %553 = vmatprep.mubr.f32.mxu1 %v473_v17  ;;  %963 = vmatprep.subr.mxu0 %v80_v18  ;;  %v63_v24 = vld [vmem:[%s1687_s1 + $0x170] sm:$0xff]  ;;  %v110_v27 = vld [vmem:[%s1687_s1 + $0x2e8] sm:$0xff]  ;;  %v472_v10 = vrot.slane %v458_v2, %v1219_v51  ;;  %s1037_s28 = scalar_lea.vmem %s715_s27, 32  ;;  %p1042_p1 = scmp.lt.s32.totalorder %s715_s27, %s715_s27 }
  0x48   :  { %998 = vmatprep.subr.mxu1 %v112_v19  ;;  %554 = vmatmul.mubr.f32.vlgmr.msra.gmra.mxu1 %v465_v9  ;;  %v95_v25 = vld [vmem:[%s1687_s1 + $0x270] sm:$0xff]  ;;  %v62_v28 = vld [vmem:[%s1687_s1 + $0x168] sm:$0xff]  ;;  %v77_v30 = vld [vmem:[%s1687_s1 + $0x1e0] sm:$0xff]  ;;  %p1038_p0 = scmp.ne.s32.totalorder %s715_s27, %s1037_s28  ;;  %p1043_p2 = scmp.lt.s32.totalorder %s1037_s28, %s1037_s28 }
  0x49   :  { %964 = vmatpush3.msra.mxu0 %v64_v20  ;;  %999 = vmatpush3.msra.mxu1 %v96_v21  ;;  %v94_v29 = vld [vmem:[%s1687_s1 + $0x268] sm:$0xff]  ;;  %v109_v31 = vld [vmem:[%s1687_s1 + $0x2e0] sm:$0xff]  ;;  %v76_v34 = vld [vmem:[%s1687_s1 + $0x1d8] sm:$0xff]  ;;  %v474_v19 = vcombine.high %v472_v10, %v472_v10 }
  0x4a   :  { %965 = vmatprep.subr.mxu0 %v79_v22  ;;  %1000 = vmatprep.subr.mxu1 %v111_v23  ;;  %v61_v32 = vld [vmem:[%s1687_s1 + $0x160] sm:$0xff]  ;;  %v108_v35 = vld [vmem:[%s1687_s1 + $0x2d8] sm:$0xff]  ;;  %v75_v38 = vld [vmem:[%s1687_s1 + $0x1d0] sm:$0xff]  ;;  %p1044_p3 = por %p1043_p2, %p1042_p1 }
  0x4b   :  { %966 = vmatpush3.msra.mxu0 %v63_v24  ;;  %1001 = vmatpush3.msra.mxu1 %v95_v25  ;;  %v93_v33 = vld [vmem:[%s1687_s1 + $0x260] sm:$0xff]  ;;  %v60_v36 = vld [vmem:[%s1687_s1 + $0x158] sm:$0xff]  ;;  %v107_v39 = vld [vmem:[%s1687_s1 + $0x2d0] sm:$0xff] }
  0x4c   :  { %967 = vmatprep.subr.mxu0 %v78_v26  ;;  %1002 = vmatprep.subr.mxu1 %v110_v27  ;;  %v92_v37 = vld [vmem:[%s1687_s1 + $0x258] sm:$0xff]  ;;  %v59_v40 = vld [vmem:[%s1687_s1 + $0x150] sm:$0xff]  ;;  %v74_v42 = vld [vmem:[%s1687_s1 + $0x1c8] sm:$0xff]  ;;  %p1045_p4 = pnand %p1044_p3, %p1038_p0 }
  0x4d   :  { %968 = vmatpush3.msra.mxu0 %v62_v28  ;;  %1003 = vmatpush3.msra.mxu1 %v94_v29  ;;  %v91_v41 = vld [vmem:[%s1687_s1 + $0x250] sm:$0xff]  ;;  %v106_v43 = vld [vmem:[%s1687_s1 + $0x2c8] sm:$0xff]  ;;  %v73_v46 = vld [vmem:[%s1687_s1 + $0x1c0] sm:$0xff] }
  0x4e   :  { %969 = vmatprep.subr.mxu0 %v77_v30  ;;  %1004 = vmatprep.subr.mxu1 %v109_v31  ;;  %v58_v44 = vld [vmem:[%s1687_s1 + $0x148] sm:$0xff]  ;;  %v105_v47 = vld [vmem:[%s1687_s1 + $0x2c0] sm:$0xff]  ;;  %v72_v50 = vld [vmem:[%s1687_s1 + $0x1b8] sm:$0xff] }
  0x4f   :  { %970 = vmatpush3.msra.mxu0 %v61_v32  ;;  %1005 = vmatpush3.msra.mxu1 %v93_v33  ;;  %v90_v45 = vld [vmem:[%s1687_s1 + $0x248] sm:$0xff]  ;;  %v57_v48 = vld [vmem:[%s1687_s1 + $0x140] sm:$0xff]  ;;  %v104_v52 = vld [vmem:[%s1687_s1 + $0x2b8] sm:$0xff] }
  0x50   :  { %971 = vmatprep.subr.mxu0 %v76_v34  ;;  %1006 = vmatprep.subr.mxu1 %v108_v35  ;;  %v89_v49 = vld [vmem:[%s1687_s1 + $0x240] sm:$0xff]  ;;  %v56_v53 = vld [vmem:[%s1687_s1 + $0x138] sm:$0xff]  ;;  %v71_v55 = vld [vmem:[%s1687_s1 + $0x1b0] sm:$0xff] }
  0x51   :  { %972 = vmatpush3.msra.mxu0 %v60_v36  ;;  %1007 = vmatpush3.msra.mxu1 %v92_v37  ;;  %v88_v54 = vld [vmem:[%s1687_s1 + $0x238] sm:$0xff]  ;;  %v103_v56 = vld [vmem:[%s1687_s1 + $0x2b0] sm:$0xff]  ;;  %v70_v59 = vld [vmem:[%s1687_s1 + $0x1a8] sm:$0xff] }
  0x52   :  { %973 = vmatprep.subr.mxu0 %v75_v38  ;;  %1008 = vmatprep.subr.mxu1 %v107_v39  ;;  %v55_v57 = vld [vmem:[%s1687_s1 + $0x130] sm:$0xff]  ;;  %v102_v60 = vld [vmem:[%s1687_s1 + $0x2a8] sm:$0xff]  ;;  %v69_v63 = vld [vmem:[%s1687_s1 + $0x1a0] sm:$0xff] }
  0x53   :  { %974 = vmatpush3.msra.mxu0 %v59_v40  ;;  %1009 = vmatpush3.msra.mxu1 %v91_v41  ;;  %v87_v58 = vld [vmem:[%s1687_s1 + $0x230] sm:$0xff]  ;;  %v54_v61 = vld [vmem:[%s1687_s1 + $0x128] sm:$0xff]  ;;  %v101_v0 = vld [vmem:[%s1687_s1 + $0x2a0] sm:$0xff] }
  0x54   :  { %975 = vmatprep.subr.mxu0 %v74_v42  ;;  %1010 = vmatprep.subr.mxu1 %v106_v43  ;;  %v86_v62 = vld [vmem:[%s1687_s1 + $0x228] sm:$0xff]  ;;  %v53_v3 = vld [vmem:[%s1687_s1 + $0x120] sm:$0xff]  ;;  %v68_v5 = vld [vmem:[%s1687_s1 + $0x198] sm:$0xff] }
  0x55   :  { %976 = vmatpush3.msra.mxu0 %v58_v44  ;;  %1011 = vmatpush3.msra.mxu1 %v90_v45  ;;  %v85_v4 = vld [vmem:[%s1687_s1 + $0x220] sm:$0xff]  ;;  %v100_v1 = vld [vmem:[%s1687_s1 + $0x298] sm:$0xff]  ;;  %v67_v8 = vld [vmem:[%s1687_s1 + $0x190] sm:$0xff] }
  0x56   :  { %977 = vmatprep.subr.mxu0 %v73_v46  ;;  %1012 = vmatprep.subr.mxu1 %v105_v47  ;;  %v52_v6 = vld [vmem:[%s1687_s1 + $0x118] sm:$0xff]  ;;  %v99_v9 = vld [vmem:[%s1687_s1 + $0x290] sm:$0xff]  ;;  %v66_v13 = vld [vmem:[%s1687_s1 + $0x188] sm:$0xff] }
  0x57   :  { %978 = vmatpush3.msra.mxu0 %v57_v48  ;;  %1013 = vmatpush3.msra.mxu1 %v89_v49  ;;  %v84_v7 = vld [vmem:[%s1687_s1 + $0x218] sm:$0xff]  ;;  %v51_v11 = vld [vmem:[%s1687_s1 + $0x110] sm:$0xff]  ;;  %v98_v51 = vld [vmem:[%s1687_s1 + $0x288] sm:$0xff] }
  0x58   :  { %979 = vmatprep.subr.mxu0 %v72_v50  ;;  %1014 = vmatprep.subr.mxu1 %v104_v52  ;;  %v83_v12 = vld [vmem:[%s1687_s1 + $0x210] sm:$0xff]  ;;  %v821_v14 = vld.sshfl [vmem:[%s1686_s0 + $0x8] sm:$0x33 pattern:$0x76325410]  ;;  %v65_v17 = vld [vmem:[%s1687_s1 + $0x180] sm:$0xff] }
  0x59   :  { %980 = vmatpush3.msra.mxu0 %v56_v53  ;;  %1015 = vmatpush3.msra.mxu1 %v88_v54  ;;  %v50_v15 = vld [vmem:[%s1687_s1 + $0x108] sm:$0xff]  ;;  %v97_v18 = vld [vmem:[%s1687_s1 + $0x280] sm:$0xff]  ;;  %v482_v21 = vcombine.high %v821_v14, %v821_v14 }
  0x5a   :  { %981 = vmatprep.subr.mxu0 %v71_v55  ;;  %1016 = vmatprep.subr.mxu1 %v103_v56  ;;  %v82_v16 = vld [vmem:[%s1687_s1 + $0x208] sm:$0xff]  ;;  %v49_v20 = vld [vmem:[%s1687_s1 + $0x100] sm:$0xff] }
  0x5b   :  { %982 = vmatpush3.msra.mxu0 %v55_v57  ;;  %1017 = vmatpush3.msra.mxu1 %v87_v58  ;;  %v81_v22 = vld [vmem:[%s1687_s1 + $0x200] sm:$0xff] }
  0x5c   :  { %983 = vmatprep.subr.mxu0 %v70_v59  ;;  %1018 = vmatprep.subr.mxu1 %v102_v60  ;;  %v822_v45 = vld [vmem:[%s1688_s2] ss:$0 sm:$0xff] }
  0x5d   :  { %984 = vmatpush3.msra.mxu0 %v54_v61  ;;  %1019 = vmatpush3.msra.mxu1 %v86_v62 }
  0x5e   :  { %985 = vmatprep.subr.mxu0 %v69_v63  ;;  %1020 = vmatprep.subr.mxu1 %v101_v0 }
  0x5f   :  { %986 = vmatpush3.msra.mxu0 %v53_v3  ;;  %1021 = vmatpush3.msra.mxu1 %v85_v4 }
  0x60   :  { %987 = vmatprep.subr.mxu0 %v68_v5  ;;  %1022 = vmatprep.subr.mxu1 %v100_v1 }
  0x61   :  { %988 = vmatpush3.msra.mxu0 %v52_v6  ;;  %1023 = vmatpush3.msra.mxu1 %v84_v7 }
  0x62   :  { %989 = vmatprep.subr.mxu0 %v67_v8  ;;  %1024 = vmatprep.subr.mxu1 %v99_v9 }
  0x63   :  { %990 = vmatpush3.msra.mxu0 %v51_v11  ;;  %1025 = vmatpush3.msra.mxu1 %v83_v12 }
  0x64   :  { %991 = vmatprep.subr.mxu0 %v66_v13  ;;  %1026 = vmatprep.subr.mxu1 %v98_v51 }
  0x65   :  { %992 = vmatpush3.msra.mxu0 %v50_v15  ;;  %1027 = vmatpush3.msra.mxu1 %v82_v16 }
  0x66   :  { %993 = vmatprep.subr.mxu0 %v65_v17  ;;  %1028 = vmatprep.subr.mxu1 %v97_v18 }
  0x67   :  { %994 = vmatpush3.msra.mxu0 %v49_v20  ;;  %623 = vmatprep.mubr.f32.mxu0 %v474_v19 }
  0x68   :  { %1029 = vmatpush3.msra.mxu1 %v81_v22  ;;  %693 = vmatprep.mubr.f32.mxu1 %v482_v21 }
  0x69   :  { %624 = vmatmul.mubr.f32.vlgmr.msra.gmra.mxu0 %v472_v10  ;;  %694 = vmatmul.mubr.f32.vlgmr.msra.gmra.mxu1 %v821_v14 }
  0xe4   :  { %v855_v23 = vpop.f32.mrf.mxu0 }
  0xe5   :  { %v890_v24 = vpop.f32.mrf.mxu1 }
  0xe6   :  { %v856_v25 = vpop.f32.mrf.mxu0 }
  0xe7   :  { %v891_v27 = vpop.f32.mrf.mxu1  ;;  %v857_v30 = vadd.f32 %v856_v25, %v855_v23 }
  0xe8   :  { %v892_v31 = vadd.f32 %v891_v27, %v890_v24 }
  0xea   :  { %v383_v34 = vadd.f32 %v892_v31, %v857_v30 }
 0x106   :  { %v925_v26 = vpop.f32.mrf.mxu0 }
 0x108   :  { %v960_v28 = vpop.f32.mrf.mxu1  ;;  %v926_v29 = vpop.f32.mrf.mxu0 }
 0x109   :  { %v927_v32 = vadd.f32 %v926_v29, %v925_v26 }
 0x10a   :  { %v961_v33 = vpop.f32.mrf.mxu1 }
 0x10b   :  { %v453_v35 = vadd.f32 %v927_v32, %v383_v34  ;;  %v962_v36 = vadd.f32 %v961_v33, %v960_v28 }
 0x10d   :  { %v556_v41 = vadd.f32 %v962_v36, %v453_v35 }
 0x129   :  { %v995_v37 = vpop.f32.mrf.mxu0  ;;  %v1030_v38 = vpop.f32.mrf.mxu1 }
 0x12b   :  { %v996_v39 = vpop.f32.mrf.mxu0  ;;  %v1031_v40 = vpop.f32.mrf.mxu1 }
 0x12c   :  { %v997_v42 = vadd.f32 %v996_v39, %v995_v37  ;;  %v1032_v44 = vadd.f32 %v1031_v40, %v1030_v38 }
 0x12e   :  { %v626_v43 = vadd.f32 %v997_v42, %v556_v41 }
 0x130   :  { %v696_v46 = vadd.f32 %v1032_v44, %v626_v43 }
 0x132   :  { %v706_v47 = vadd.f32 %v822_v45, %v696_v46 }
 0x134   :  { %707 = vst [vmem:[#allocation2] sm:$0x3] %v706_v47 }
 0x135   :  { %1048 = shalt.err (!%p1045_p4)
}
 0x136   :  { %717 = dma.vmem_to_hbm [thread:$0]  %s715_s27, 32, %s1689_s3, [#allocation3]  }
 0x137   :  { %1057 = dma.done.wait [#allocation3], 32  }
 0x138   :  { %1058 = vsyncadd [#allocation3], 4294967264 }
 0x139   :  { %721 = vsyncpa [#allocation3], 1 }

// kernel: inception_aux_twoview.2
= control target key start
LH: loop header
LB: loop body
LE: loop exit
PB: predicated region body
PF: predicated region fallthrough
CT: control target
= control target key end

     0   :  { %s16933_s18 = smov 0   ;;  %s19637_s0 = inlined_call_operand.vmem [shape: f32[2,25,2,200], index: 0, kind: input, shape index: {}]   ;;  %s19638_s1 = inlined_call_operand.vmem [shape: bf16[2,200,128], index: 1, kind: input, shape index: {}]   ;;  %s19639_s2 = inlined_call_operand.vmem [shape: f32[2,1,128], index: 2, kind: input, shape index: {}]   ;;  %s19640_s3 = inlined_call_operand.vmem [shape: bf16[2,25,128,768], index: 3, kind: input, shape index: {}]   ;;  %s19641_s4 = inlined_call_operand.vmem [shape: f32[2,1,768], index: 4, kind: input, shape index: {}]   ;;  %s19642_s5 = inlined_call_operand.vmem [shape: f32[2,2,768], index: 5, kind: output, shape index: {}]  }
   0x1 LB: > { %s12524_s19 = sadd.s32 4294967295, %s16899_s18   ;;  %p12528_p0 = scmp.ge.s32.totalorder %s16899_s18, 1  ;;  %s16899_s18 = sphi %s16933_s18, %s15_s18  }
   0x2   : > { %p224_p1 = scmp.lt.s32.totalorder %s16899_s18, 3 }
   0x4   : > { %p225_p2 = pnand %p12528_p0, %p224_p1 }
   0x5   : > { %p269_p3 = scmp.lt.s32.totalorder (!%p225_p2), %s12524_s19, 1 }
   0x6   : > { %228 = sbr.rel (%p225_p2) target bundleno = 7047 (0x1b87), region = 40 }
   0xb   : > { %v16901_v0 = vmov 0   ;;  %s19644_s19 = smov (!%p269_p3, %s12524_s19), 1  ;;  %vm419_vm0 = vcmask 588800   ;;  %vm423_vm1 = vcmask 1043456  }
   0xc   : > { %535 = vmatprep.subr.bf16.mxu1 %v16901_v0  ;;  %427 = vmatprep.subr.bf16.mxu0 %v16901_v0  ;;  %s14976_s20 = smul.u32 100, %s19644_s19  ;;  %s17059_s8 = scalar_lea.vmem %s19639_s2, %s19644_s19 }
   0xd   : > { %s14977_s24 = smul.u32 9600, %s19644_s19  ;;  %v12534_v57 = vld [vmem:[%s17059_s8] ss:$0 sm:$0xff] }
   0xe   : > { %s16949_s23 = scalar_lea.vmem %s19638_s1, %s14976_s20  ;;  %s16963_s27 = scalar_lea.vmem %s19637_s0, %s14976_s20 }
   0xf   : > { %v14990_v1 = vld [vmem:[%s16949_s23 + $0x38] sm:$0xff]   ;;  %v14991_v2 = vld [vmem:[%s16949_s23 + $0x30] sm:$0xff]   ;;  %v14992_v3 = vld [vmem:[%s16949_s23 + $0x28] sm:$0xff]   ;;  %s16968_s30 = scalar_lea.vmem %s19640_s3, %s14977_s24  ;;  %s14978_s9 = smul.u32 6, %s19644_s19 }
  0x10   : > { %536 = vmatpush1.bf16.msra.mxu1 %v14990_v1  ;;  %428 = vmatpush1.bf16.msra.mxu0 %v14990_v1  ;;  %v14993_v4 = vld [vmem:[%s16949_s23 + $0x20] sm:$0xff]   ;;  %v14994_v6 = vld [vmem:[%s16949_s23 + $0x18] sm:$0xff]   ;;  %v14995_v12 = vld [vmem:[%s16949_s23 + $0x10] sm:$0xff]   ;;  %s14979_s13 = smul.u32 12, %s19644_s19 }
  0x11   : > { %537 = vmatprep.subr.bf16.mxu1 %v16901_v0  ;;  %429 = vmatprep.subr.bf16.mxu0 %v16901_v0  ;;  %v16973_v5 = vld.sshfl [vmem:[%s16963_s27 + $0x4] sm:$0x33 pattern:$0x76325410]  ;;  %v14996_v13 = vld [vmem:[%s16949_s23 + $0x8] sm:$0xff]   ;;  %v14999_v17 = vld [vmem:[%s16949_s23 + $0x58] sm:$0xff]   ;;  %s290_s12 = scalar_lea.vmem %s19641_s4, %s14978_s9 }
  0x12   : > { %v527_v7 = vcombine.high %v16973_v5, %v16973_v5  ;;  %v16979_v8 = vld.sshfl [vmem:[%s16963_s27] sm:$0x33 pattern:$0x76325410]  ;;  %v15000_v18 = vld [vmem:[%s16949_s23 + $0x50] sm:$0xff]   ;;  %v15001_v19 = vld [vmem:[%s16949_s23 + $0x48] sm:$0xff]   ;;  %v530_v25 = vpack.c.bf16 %v16973_v5, %v16973_v5  ;;  %s295_s16 = scalar_lea.vmem %s19642_s5, %s14979_s13 }
  0x13   : > { %v333_v9 = vcombine.high %v16979_v8, %v16979_v8  ;;  %v14997_v14 = vld [vmem:[%s16949_s23] sm:$0xff]   ;;  %v15005_v21 = vld [vmem:[%s16968_s30 + $0x2d4] ss:$24 sps:$4 sm:$0xff]   ;;  %v15003_v23 = vld [vmem:[%s16968_s30 + $0x2d0] ss:$24 sps:$4 sm:$0xff]   ;;  %v336_v26 = vpack.c.bf16 %v16979_v8, %v16979_v8 }
  0x14   : > { %538 = vmatpush1.bf16.msra.mxu1 %v14991_v2  ;;  %430 = vmatpush1.bf16.msra.mxu0 %v14991_v2  ;;  %v531_v10 = vpack.c.bf16 %v527_v7, %v527_v7  ;;  %v14998_v15 = vld [vmem:[%s16949_s23 + $0x60] ss:$0 sps:$4 sm:$0xff]   ;;  %v15008_v22 = vld [vmem:[%s16968_s30 + $0x2dc] ss:$24 sps:$4 sm:$0xff]   ;;  %v15006_v24 = vld [vmem:[%s16968_s30 + $0x2d8] ss:$24 sps:$4 sm:$0xff]  }
  0x15   : > { %539 = vmatprep.subr.bf16.mxu1 %v16901_v0  ;;  %431 = vmatprep.subr.bf16.mxu0 %v16901_v0  ;;  %v337_v11 = vpack.c.bf16 %v333_v9, %v333_v9  ;;  %v16998_v16 = vsel %vm423_vm1, %v14998_v15, 0  ;;  %v15002_v20 = vld [vmem:[%s16949_s23 + $0x40] sm:$0xff]   ;;  %v15017_v31 = vld [vmem:[%s16968_s30 + $0x274] ss:$24 sps:$4 sm:$0xff]   ;;  %v15015_v33 = vld [vmem:[%s16968_s30 + $0x270] ss:$24 sps:$4 sm:$0xff]  }
  0x16   : > { %12551 = vmatprep.mubr.msk.bf16.mxu1 %vm419_vm0, %v531_v10  ;;  %v15011_v27 = vld [vmem:[%s16968_s30 + $0x2a4] ss:$24 sps:$4 sm:$0xff]   ;;  %v15009_v29 = vld [vmem:[%s16968_s30 + $0x2a0] ss:$24 sps:$4 sm:$0xff]   ;;  %v15029_v39 = vld [vmem:[%s16968_s30 + $0x214] ss:$24 sps:$4 sm:$0xff]  }
  0x17   : > { %12548 = vmatprep.mubr.msk.bf16.mxu0 %vm419_vm0, %v337_v11  ;;  %v15014_v28 = vld [vmem:[%s16968_s30 + $0x2ac] ss:$24 sps:$4 sm:$0xff]   ;;  %v15012_v30 = vld [vmem:[%s16968_s30 + $0x2a8] ss:$24 sps:$4 sm:$0xff]   ;;  %v15020_v32 = vld [vmem:[%s16968_s30 + $0x27c] ss:$24 sps:$4 sm:$0xff]  }
  0x18   : > { %540 = vmatpush1.bf16.msra.mxu1 %v14992_v3  ;;  %432 = vmatpush1.bf16.msra.mxu0 %v14992_v3  ;;  %v15018_v34 = vld [vmem:[%s16968_s30 + $0x278] ss:$24 sps:$4 sm:$0xff]   ;;  %v15023_v35 = vld [vmem:[%s16968_s30 + $0x244] ss:$24 sps:$4 sm:$0xff]   ;;  %v15024_v38 = vld [vmem:[%s16968_s30 + $0x248] ss:$24 sps:$4 sm:$0xff]  }
  0x19   : > { %541 = vmatprep.subr.bf16.mxu1 %v16901_v0  ;;  %433 = vmatprep.subr.bf16.mxu0 %v16901_v0  ;;  %v15026_v36 = vld [vmem:[%s16968_s30 + $0x24c] ss:$24 sps:$4 sm:$0xff]   ;;  %v15021_v37 = vld [vmem:[%s16968_s30 + $0x240] ss:$24 sps:$4 sm:$0xff]   ;;  %v15032_v40 = vld [vmem:[%s16968_s30 + $0x21c] ss:$24 sps:$4 sm:$0xff]  }
  0x1a   : > { %v15027_v41 = vld [vmem:[%s16968_s30 + $0x210] ss:$24 sps:$4 sm:$0xff]   ;;  %v15035_v43 = vld [vmem:[%s16968_s30 + $0x1e4] ss:$24 sps:$4 sm:$0xff]   ;;  %v15033_v45 = vld [vmem:[%s16968_s30 + $0x1e0] ss:$24 sps:$4 sm:$0xff]  }
  0x1b   : > { %v15030_v42 = vld [vmem:[%s16968_s30 + $0x218] ss:$24 sps:$4 sm:$0xff]   ;;  %v15038_v44 = vld [vmem:[%s16968_s30 + $0x1ec] ss:$24 sps:$4 sm:$0xff]   ;;  %v15036_v46 = vld [vmem:[%s16968_s30 + $0x1e8] ss:$24 sps:$4 sm:$0xff]  }
  0x1c   : > { %542 = vmatpush1.bf16.msra.mxu1 %v14993_v4  ;;  %434 = vmatpush1.bf16.msra.mxu0 %v14993_v4  ;;  %v15041_v47 = vld [vmem:[%s16968_s30 + $0x1b4] ss:$24 sps:$4 sm:$0xff]   ;;  %v15039_v49 = vld [vmem:[%s16968_s30 + $0x1b0] ss:$24 sps:$4 sm:$0xff]   ;;  %v15047_v51 = vld [vmem:[%s16968_s30 + $0x184] ss:$24 sps:$4 sm:$0xff]  }
  0x1d   : > { %543 = vmatprep.subr.bf16.mxu1 %v16901_v0  ;;  %435 = vmatprep.subr.bf16.mxu0 %v16901_v0  ;;  %v15044_v48 = vld [vmem:[%s16968_s30 + $0x1bc] ss:$24 sps:$4 sm:$0xff]   ;;  %v15042_v50 = vld [vmem:[%s16968_s30 + $0x1b8] ss:$24 sps:$4 sm:$0xff]   ;;  %v15050_v52 = vld [vmem:[%s16968_s30 + $0x18c] ss:$24 sps:$4 sm:$0xff]  }
  0x1e   : > { %v15045_v53 = vld [vmem:[%s16968_s30 + $0x180] ss:$24 sps:$4 sm:$0xff]   ;;  %v15053_v55 = vld [vmem:[%s16968_s30 + $0x2e4] ss:$24 sps:$4 sm:$0xff]   ;;  %v15056_v56 = vld [vmem:[%s16968_s30 + $0x154] ss:$24 sps:$4 sm:$0xff]  }
  0x1f   : > { %v15048_v54 = vld [vmem:[%s16968_s30 + $0x188] ss:$24 sps:$4 sm:$0xff]   ;;  %v15059_v3 = vld [vmem:[%s16968_s30 + $0x2b4] ss:$24 sps:$4 sm:$0xff]   ;;  %v15062_v4 = vld [vmem:[%s16968_s30 + $0x124] ss:$24 sps:$4 sm:$0xff]  }
  0x20   : > { %544 = vmatpush1.bf16.msra.mxu1 %v14994_v6  ;;  %436 = vmatpush1.bf16.msra.mxu0 %v14994_v6  ;;  %v15051_v62 = vld [vmem:[%s16968_s30 + $0x2e0] ss:$24 sps:$4 sm:$0xff]   ;;  %v15054_v63 = vld [vmem:[%s16968_s30 + $0x150] ss:$24 sps:$4 sm:$0xff]  }
  0x21   : > { %545 = vmatprep.subr.bf16.mxu1 %v16901_v0  ;;  %437 = vmatprep.subr.bf16.mxu0 %v16901_v0  ;;  %v15057_v9 = vld [vmem:[%s16968_s30 + $0x2b0] ss:$24 sps:$4 sm:$0xff]   ;;  %v15060_v10 = vld [vmem:[%s16968_s30 + $0x120] ss:$24 sps:$4 sm:$0xff]  }
  0x22   : > { %v15066_v15 = vld [vmem:[%s16968_s30 + $0xf0] ss:$24 sps:$4 sm:$0xff]  }
  0x24   : > { %546 = vmatpush1.bf16.msra.mxu1 %v14995_v12  ;;  %438 = vmatpush1.bf16.msra.mxu0 %v14995_v12  ;;  %v15065_v12 = vld [vmem:[%s16968_s30 + $0x284] ss:$24 sps:$4 sm:$0xff]  }
  0x25   : > { %547 = vmatprep.subr.bf16.mxu1 %v16901_v0  ;;  %439 = vmatprep.subr.bf16.mxu0 %v16901_v0 }
  0x28   : > { %548 = vmatpush1.bf16.msra.mxu1 %v14996_v13  ;;  %440 = vmatpush1.bf16.msra.mxu0 %v14996_v13  ;;  %v15068_v13 = vld [vmem:[%s16968_s30 + $0xf4] ss:$24 sps:$4 sm:$0xff]  }
  0x29   : > { %549 = vmatprep.subr.bf16.mxu1 %v16901_v0  ;;  %441 = vmatprep.subr.bf16.mxu0 %v16901_v0 }
  0x2c   : > { %550 = vmatpush1.bf16.msra.mxu1 %v14997_v14  ;;  %442 = vmatpush1.bf16.msra.mxu0 %v14997_v14  ;;  %v15063_v14 = vld [vmem:[%s16968_s30 + $0x280] ss:$24 sps:$4 sm:$0xff]  }
  0x2d   : > { %557 = vmatprep.subr.bf16.mxu1 %v16901_v0  ;;  %449 = vmatprep.subr.bf16.mxu0 %v16901_v0 }
  0x30   : > { %558 = vmatpush2.bf16.msra.mxu1 %v16998_v16  ;;  %450 = vmatpush2.bf16.msra.mxu0 %v16998_v16 }
  0x31   : > { %559 = vmatprep.subr.bf16.mxu1 %v16901_v0  ;;  %451 = vmatprep.subr.bf16.mxu0 %v16901_v0 }
  0x34   : > { %560 = vmatpush2.bf16.msra.mxu1 %v14999_v17  ;;  %452 = vmatpush2.bf16.msra.mxu0 %v14999_v17  ;;  %v15071_v17 = vld [vmem:[%s16968_s30 + $0x254] ss:$24 sps:$4 sm:$0xff]  }
  0x35   : > { %561 = vmatprep.subr.bf16.mxu1 %v16901_v0  ;;  %453 = vmatprep.subr.bf16.mxu0 %v16901_v0 }
  0x38   : > { %562 = vmatpush2.bf16.msra.mxu1 %v15000_v18  ;;  %454 = vmatpush2.bf16.msra.mxu0 %v15000_v18  ;;  %v15074_v18 = vld [vmem:[%s16968_s30 + $0xc4] ss:$24 sps:$4 sm:$0xff]  }
  0x39   : > { %563 = vmatprep.subr.bf16.mxu1 %v16901_v0  ;;  %455 = vmatprep.subr.bf16.mxu0 %v16901_v0 }
  0x3c   : > { %564 = vmatpush2.bf16.msra.mxu1 %v15001_v19  ;;  %456 = vmatpush2.bf16.msra.mxu0 %v15001_v19  ;;  %v15069_v19 = vld [vmem:[%s16968_s30 + $0x250] ss:$24 sps:$4 sm:$0xff]  }
  0x3d   : > { %565 = vmatprep.subr.bf16.mxu1 %v16901_v0  ;;  %457 = vmatprep.subr.bf16.mxu0 %v16901_v0 }
  0x40   : > { %566 = vmatpush2.bf16.msra.mxu1 %v15002_v20  ;;  %458 = vmatpush2.bf16.msra.mxu0 %v15002_v20  ;;  %v15072_v20 = vld [vmem:[%s16968_s30 + $0xc0] ss:$24 sps:$4 sm:$0xff]  }
  0x41   : > { %866 = vmatprep.subr.bf16.mxu0 %v15005_v21  ;;  %907 = vmatprep.subr.bf16.mxu1 %v15008_v22  ;;  %v15077_v21 = vld [vmem:[%s16968_s30 + $0x224] ss:$24 sps:$4 sm:$0xff]   ;;  %v15080_v22 = vld [vmem:[%s16968_s30 + $0x94] ss:$24 sps:$4 sm:$0xff]  }
  0x43   : > { %568 = vmatmul.mubr.bf16.vlgmr.msra.gmra.mxu1 %v530_v25  ;;  %460 = vmatmul.mubr.bf16.vlgmr.msra.gmra.mxu0 %v336_v26  ;;  %v15083_v25 = vld [vmem:[%s16968_s30 + $0x1f4] ss:$24 sps:$4 sm:$0xff]   ;;  %v15086_v26 = vld [vmem:[%s16968_s30 + $0x64] ss:$24 sps:$4 sm:$0xff]  }
  0x44   : > { %867 = vmatpush1.bf16.msra.mxu0 %v15003_v23  ;;  %908 = vmatpush1.bf16.msra.mxu1 %v15006_v24  ;;  %v15075_v23 = vld [vmem:[%s16968_s30 + $0x220] ss:$24 sps:$4 sm:$0xff]   ;;  %v15078_v24 = vld [vmem:[%s16968_s30 + $0x90] ss:$24 sps:$4 sm:$0xff]  }
  0x45   : > { %868 = vmatprep.subr.bf16.mxu0 %v15011_v27  ;;  %909 = vmatprep.subr.bf16.mxu1 %v15014_v28  ;;  %v15081_v27 = vld [vmem:[%s16968_s30 + $0x1f0] ss:$24 sps:$4 sm:$0xff]   ;;  %v15084_v28 = vld [vmem:[%s16968_s30 + $0x60] ss:$24 sps:$4 sm:$0xff]  }
  0x46   : > { %898 = vmatprep.mubr.bf16.mxu0 %v16901_v0  ;;  %939 = vmatprep.mubr.bf16.mxu1 %v16901_v0 }
  0x48   : > { %869 = vmatpush1.bf16.msra.mxu0 %v15009_v29  ;;  %910 = vmatpush1.bf16.msra.mxu1 %v15012_v30  ;;  %v15089_v29 = vld [vmem:[%s16968_s30 + $0x1c4] ss:$24 sps:$4 sm:$0xff]   ;;  %v15092_v30 = vld [vmem:[%s16968_s30 + $0x34] ss:$24 sps:$4 sm:$0xff]  }
  0x49   : > { %870 = vmatprep.subr.bf16.mxu0 %v15017_v31  ;;  %911 = vmatprep.subr.bf16.mxu1 %v15020_v32  ;;  %v15087_v31 = vld [vmem:[%s16968_s30 + $0x1c0] ss:$24 sps:$4 sm:$0xff]   ;;  %v15090_v32 = vld [vmem:[%s16968_s30 + $0x30] ss:$24 sps:$4 sm:$0xff]  }
  0x4c   : > { %871 = vmatpush1.bf16.msra.mxu0 %v15015_v33  ;;  %912 = vmatpush1.bf16.msra.mxu1 %v15018_v34  ;;  %v15095_v34 = vld [vmem:[%s16968_s30 + $0x194] ss:$24 sps:$4 sm:$0xff]  }
  0x4d   : > { %872 = vmatprep.subr.bf16.mxu0 %v15023_v35  ;;  %913 = vmatprep.subr.bf16.mxu1 %v15026_v36  ;;  %v15098_v35 = vld [vmem:[%s16968_s30 + $0x4] ss:$24 sps:$4 sm:$0xff]   ;;  %v15093_v36 = vld [vmem:[%s16968_s30 + $0x190] ss:$24 sps:$4 sm:$0xff]  }
  0x50   : > { %873 = vmatpush1.bf16.msra.mxu0 %v15021_v37  ;;  %914 = vmatpush1.bf16.msra.mxu1 %v15024_v38  ;;  %v15096_v37 = vld [vmem:[%s16968_s30] ss:$24 sps:$4 sm:$0xff]  }
  0x51   : > { %874 = vmatprep.subr.bf16.mxu0 %v15029_v39  ;;  %915 = vmatprep.subr.bf16.mxu1 %v15032_v40  ;;  %v15101_v39 = vld [vmem:[%s16968_s30 + $0x15c] ss:$24 sps:$4 sm:$0xff]  }
  0x52   : > { %v15104_v40 = vld [vmem:[%s16968_s30 + $0x164] ss:$24 sps:$4 sm:$0xff]  }
  0x54   : > { %875 = vmatpush1.bf16.msra.mxu0 %v15027_v41  ;;  %916 = vmatpush1.bf16.msra.mxu1 %v15030_v42  ;;  %v15099_v41 = vld [vmem:[%s16968_s30 + $0x158] ss:$24 sps:$4 sm:$0xff]  }
  0x55   : > { %876 = vmatprep.subr.bf16.mxu0 %v15035_v43  ;;  %917 = vmatprep.subr.bf16.mxu1 %v15038_v44  ;;  %v15102_v42 = vld [vmem:[%s16968_s30 + $0x160] ss:$24 sps:$4 sm:$0xff]   ;;  %v15107_v44 = vld [vmem:[%s16968_s30 + $0x12c] ss:$24 sps:$4 sm:$0xff]  }
  0x58   : > { %877 = vmatpush1.bf16.msra.mxu0 %v15033_v45  ;;  %918 = vmatpush1.bf16.msra.mxu1 %v15036_v46  ;;  %v15110_v45 = vld [vmem:[%s16968_s30 + $0x134] ss:$24 sps:$4 sm:$0xff]   ;;  %v15105_v46 = vld [vmem:[%s16968_s30 + $0x128] ss:$24 sps:$4 sm:$0xff]  }
  0x59   : > { %878 = vmatprep.subr.bf16.mxu0 %v15041_v47  ;;  %919 = vmatprep.subr.bf16.mxu1 %v15044_v48  ;;  %v15108_v47 = vld [vmem:[%s16968_s30 + $0x130] ss:$24 sps:$4 sm:$0xff]   ;;  %v15113_v48 = vld [vmem:[%s16968_s30 + $0xfc] ss:$24 sps:$4 sm:$0xff]  }
  0x5c   : > { %879 = vmatpush1.bf16.msra.mxu0 %v15039_v49  ;;  %920 = vmatpush1.bf16.msra.mxu1 %v15042_v50  ;;  %v15116_v49 = vld [vmem:[%s16968_s30 + $0x104] ss:$24 sps:$4 sm:$0xff]   ;;  %v15111_v50 = vld [vmem:[%s16968_s30 + $0xf8] ss:$24 sps:$4 sm:$0xff]  }
  0x5d   : > { %880 = vmatprep.subr.bf16.mxu0 %v15047_v51  ;;  %921 = vmatprep.subr.bf16.mxu1 %v15050_v52  ;;  %v15114_v51 = vld [vmem:[%s16968_s30 + $0x100] ss:$24 sps:$4 sm:$0xff]   ;;  %v15119_v52 = vld [vmem:[%s16968_s30 + $0xcc] ss:$24 sps:$4 sm:$0xff]  }
  0x60   : > { %881 = vmatpush1.bf16.msra.mxu0 %v15045_v53  ;;  %922 = vmatpush1.bf16.msra.mxu1 %v15048_v54  ;;  %v15122_v53 = vld [vmem:[%s16968_s30 + $0xd4] ss:$24 sps:$4 sm:$0xff]   ;;  %v15117_v54 = vld [vmem:[%s16968_s30 + $0xc8] ss:$24 sps:$4 sm:$0xff]  }
  0x61   : > { %948 = vmatprep.subr.bf16.mxu0 %v15053_v55  ;;  %1229 = vmatprep.subr.bf16.mxu1 %v15056_v56  ;;  %v15120_v55 = vld [vmem:[%s16968_s30 + $0xd0] ss:$24 sps:$4 sm:$0xff]   ;;  %v15125_v56 = vld [vmem:[%s16968_s30 + $0x9c] ss:$24 sps:$4 sm:$0xff]  }
 0x103   : > { %v569_v58 = vpop.f32.mrf.mxu1  ;;  %v461_v59 = vpop.f32.mrf.mxu0 }
 0x104   : > { %v570_v60 = vadd.f32 %v12534_v57, %v569_v58  ;;  %v462_v33 = vadd.f32 %v12534_v57, %v461_v59  ;;  %v15128_v57 = vld [vmem:[%s16968_s30 + $0xa4] ss:$24 sps:$4 sm:$0xff]   ;;  %v15123_v58 = vld [vmem:[%s16968_s30 + $0x98] ss:$24 sps:$4 sm:$0xff]  }
 0x105   : > { %v571_v61 = vpop.f32.mrf.mxu1  ;;  %v463_v1 = vpop.f32.mrf.mxu0  ;;  %v15126_v59 = vld [vmem:[%s16968_s30 + $0xa0] ss:$24 sps:$4 sm:$0xff]  }
 0x106   : > { %v575_v2 = vmax.f32 %v570_v60, 0.0  ;;  %v467_v38 = vmax.f32 %v462_v33, 0.0  ;;  %v15131_v60 = vld [vmem:[%s16968_s30 + $0x6c] ss:$24 sps:$4 sm:$0xff]   ;;  %v15137_v1 = vld [vmem:[%s16968_s30 + $0x3c] ss:$24 sps:$4 sm:$0xff]  }
 0x107   : > { %v572_v5 = vpop.f32.mrf.mxu1  ;;  %v464_v6 = vpop.f32.mrf.mxu0  ;;  %v15134_v61 = vld [vmem:[%s16968_s30 + $0x74] ss:$24 sps:$4 sm:$0xff]   ;;  %v15156_v33 = vld [vmem:[%s16968_s30 + $0x430] ss:$24 sps:$4 sm:$0xff]  }
 0x108   : > { %v17066_v7 = vpack.c.bf16 %v575_v2, %v575_v2  ;;  %v17102_v43 = vpack.c.bf16 %v467_v38, %v467_v38  ;;  %v15140_v2 = vld [vmem:[%s16968_s30 + $0x44] ss:$24 sps:$4 sm:$0xff]   ;;  %v15146_v6 = vld [vmem:[%s16968_s30 + $0x14] ss:$24 sps:$4 sm:$0xff]  }
 0x109   : > { %v573_v8 = vpop.f32.mrf.mxu1  ;;  %v465_v11 = vpop.f32.mrf.mxu0  ;;  %v15143_v5 = vld [vmem:[%s16968_s30 + $0xc] ss:$24 sps:$4 sm:$0xff]  }
 0x10a   : > { %899 = vmatmul.mubr.bf16.vlgmr.msra.gmra.mxu0 %v17066_v7  ;;  %940 = vmatmul.mubr.bf16.vlgmr.msra.gmra.mxu1 %v17066_v7  ;;  %v15141_v8 = vld [vmem:[%s16968_s30 + $0x8] ss:$24 sps:$4 sm:$0xff]   ;;  %v15167_v38 = vld [vmem:[%s16968_s30 + $0x3c4] ss:$24 sps:$4 sm:$0xff]  }
 0x10b   : > { %949 = vmatpush1.bf16.msra.mxu0 %v15051_v62  ;;  %1230 = vmatpush1.bf16.msra.mxu1 %v15054_v63  ;;  %v15129_v62 = vld [vmem:[%s16968_s30 + $0x68] ss:$24 sps:$4 sm:$0xff]  }
 0x10c   : > { %950 = vmatprep.subr.bf16.mxu0 %v15059_v3  ;;  %1231 = vmatprep.subr.bf16.mxu1 %v15062_v4  ;;  %v15132_v63 = vld [vmem:[%s16968_s30 + $0x70] ss:$24 sps:$4 sm:$0xff]   ;;  %v15138_v4 = vld [vmem:[%s16968_s30 + $0x40] ss:$24 sps:$4 sm:$0xff]  }
 0x10d   : > { %980 = vmatprep.mubr.bf16.mxu0 %v16901_v0  ;;  %1261 = vmatprep.mubr.bf16.mxu1 %v16901_v0  ;;  %v15135_v3 = vld [vmem:[%s16968_s30 + $0x38] ss:$24 sps:$4 sm:$0xff]  }
 0x10f   : > { %951 = vmatpush1.bf16.msra.mxu0 %v15057_v9  ;;  %1232 = vmatpush1.bf16.msra.mxu1 %v15060_v10  ;;  %v15144_v9 = vld [vmem:[%s16968_s30 + $0x10] ss:$24 sps:$4 sm:$0xff]  }
 0x110   : > { %952 = vmatprep.subr.bf16.mxu0 %v15065_v12  ;;  %1233 = vmatprep.subr.bf16.mxu1 %v15068_v13  ;;  %v16803_v12 = vld [vmem:[%s16949_s23 + $0x38] sm:$0xff]   ;;  %v16804_v13 = vld [vmem:[%s16949_s23 + $0x30] sm:$0xff]  }
 0x113   : > { %953 = vmatpush1.bf16.msra.mxu0 %v15063_v14  ;;  %1234 = vmatpush1.bf16.msra.mxu1 %v15066_v15  ;;  %v16805_v14 = vld [vmem:[%s16949_s23 + $0x28] sm:$0xff]   ;;  %v16806_v15 = vld [vmem:[%s16949_s23 + $0x20] sm:$0xff]  }
 0x114   : > { %954 = vmatprep.subr.bf16.mxu0 %v15071_v17  ;;  %1235 = vmatprep.subr.bf16.mxu1 %v15074_v18  ;;  %v17151_v17 = vld [vmem:[%s16949_s23 + $0x18] sm:$0xff]   ;;  %v17156_v18 = vld [vmem:[%s16949_s23 + $0x10] sm:$0xff]  }
 0x117   : > { %955 = vmatpush1.bf16.msra.mxu0 %v15069_v19  ;;  %1236 = vmatpush1.bf16.msra.mxu1 %v15072_v20  ;;  %v17161_v19 = vld [vmem:[%s16949_s23 + $0x8] sm:$0xff]   ;;  %v17166_v20 = vld [vmem:[%s16949_s23] sm:$0xff]  }
 0x118   : > { %956 = vmatprep.subr.bf16.mxu0 %v15077_v21  ;;  %1237 = vmatprep.subr.bf16.mxu1 %v15080_v22  ;;  %v17173_v21 = vld [vmem:[%s16949_s23 + $0x58] sm:$0xff]   ;;  %v17178_v22 = vld [vmem:[%s16949_s23 + $0x50] sm:$0xff]  }
 0x11b   : > { %957 = vmatpush1.bf16.msra.mxu0 %v15075_v23  ;;  %1238 = vmatpush1.bf16.msra.mxu1 %v15078_v24  ;;  %v17183_v23 = vld [vmem:[%s16949_s23 + $0x48] sm:$0xff]  }
 0x11c   : > { %958 = vmatprep.subr.bf16.mxu0 %v15083_v25  ;;  %1239 = vmatprep.subr.bf16.mxu1 %v15086_v26  ;;  %v17188_v25 = vld [vmem:[%s16949_s23 + $0x40] sm:$0xff]   ;;  %v15147_v26 = vld [vmem:[%s16968_s30 + $0x450] ss:$24 sps:$4 sm:$0xff]  }
 0x11f   : > { %959 = vmatpush1.bf16.msra.mxu0 %v15081_v27  ;;  %1240 = vmatpush1.bf16.msra.mxu1 %v15084_v28  ;;  %v15149_v27 = vld [vmem:[%s16968_s30 + $0x454] ss:$24 sps:$4 sm:$0xff]   ;;  %v15150_v28 = vld [vmem:[%s16968_s30 + $0x460] ss:$24 sps:$4 sm:$0xff]  }
 0x120   : > { %960 = vmatprep.subr.bf16.mxu0 %v15089_v29  ;;  %1241 = vmatprep.subr.bf16.mxu1 %v15092_v30  ;;  %v15152_v29 = vld [vmem:[%s16968_s30 + $0x464] ss:$24 sps:$4 sm:$0xff]  }
 0x121   : > { %v15155_v30 = vld [vmem:[%s16968_s30 + $0x424] ss:$24 sps:$4 sm:$0xff]  }
 0x123   : > { %961 = vmatpush1.bf16.msra.mxu0 %v15087_v31  ;;  %1242 = vmatpush1.bf16.msra.mxu1 %v15090_v32  ;;  %v15158_v31 = vld [vmem:[%s16968_s30 + $0x434] ss:$24 sps:$4 sm:$0xff]   ;;  %v15153_v32 = vld [vmem:[%s16968_s30 + $0x420] ss:$24 sps:$4 sm:$0xff]  }
 0x124   : > { %962 = vmatprep.subr.bf16.mxu0 %v15095_v34  ;;  %1243 = vmatprep.subr.bf16.mxu1 %v15098_v35  ;;  %v15161_v34 = vld [vmem:[%s16968_s30 + $0x3f4] ss:$24 sps:$4 sm:$0xff]   ;;  %v15164_v35 = vld [vmem:[%s16968_s30 + $0x404] ss:$24 sps:$4 sm:$0xff]  }
 0x127   : > { %963 = vmatpush1.bf16.msra.mxu0 %v15093_v36  ;;  %1244 = vmatpush1.bf16.msra.mxu1 %v15096_v37  ;;  %v15159_v36 = vld [vmem:[%s16968_s30 + $0x3f0] ss:$24 sps:$4 sm:$0xff]   ;;  %v15162_v37 = vld [vmem:[%s16968_s30 + $0x400] ss:$24 sps:$4 sm:$0xff]  }
 0x128   : > { %1270 = vmatprep.subr.bf16.mxu0 %v15101_v39  ;;  %1311 = vmatprep.subr.bf16.mxu1 %v15104_v40  ;;  %v15165_v39 = vld [vmem:[%s16968_s30 + $0x3c0] ss:$24 sps:$4 sm:$0xff]   ;;  %v15170_v40 = vld [vmem:[%s16968_s30 + $0x3d4] ss:$24 sps:$4 sm:$0xff]  }
 0x12a   : > { %981 = vmatmul.mubr.bf16.vlgmr.msra.gmra.mxu0 %v17066_v7  ;;  %1262 = vmatmul.mubr.bf16.vlgmr.msra.gmra.mxu1 %v17102_v43  ;;  %v12697_v7 = vld.sshfl [vmem:[%s16963_s27 + $0x8] sm:$0x33 pattern:$0x76325410] }
 0x12b   : > { %1271 = vmatpush1.bf16.msra.mxu0 %v15099_v41  ;;  %1312 = vmatpush1.bf16.msra.mxu1 %v15102_v42  ;;  %v1362_v10 = vcombine.high %v12697_v7, %v12697_v7  ;;  %v1365_v24 = vpack.c.bf16 %v12697_v7, %v12697_v7  ;;  %v15168_v41 = vld [vmem:[%s16968_s30 + $0x3d0] ss:$24 sps:$4 sm:$0xff]   ;;  %v15173_v42 = vld [vmem:[%s16968_s30 + $0x394] ss:$24 sps:$4 sm:$0xff]  }
 0x12c   : > { %1272 = vmatprep.subr.bf16.mxu0 %v15107_v44  ;;  %1313 = vmatprep.subr.bf16.mxu1 %v15110_v45  ;;  %v15171_v44 = vld [vmem:[%s16968_s30 + $0x390] ss:$24 sps:$4 sm:$0xff]   ;;  %v15174_v45 = vld [vmem:[%s16968_s30 + $0x3a0] ss:$24 sps:$4 sm:$0xff]  }
 0x12d   : > { %1302 = vmatprep.mubr.bf16.mxu0 %v16901_v0  ;;  %1343 = vmatprep.mubr.bf16.mxu1 %v16901_v0  ;;  %v1366_v11 = vpack.c.bf16 %v1362_v10, %v1362_v10 }
 0x12f   : > { %1273 = vmatpush1.bf16.msra.mxu0 %v15105_v46  ;;  %1314 = vmatpush1.bf16.msra.mxu1 %v15108_v47  ;;  %v15179_v46 = vld [vmem:[%s16968_s30 + $0x364] ss:$24 sps:$4 sm:$0xff]   ;;  %v15182_v47 = vld [vmem:[%s16968_s30 + $0x374] ss:$24 sps:$4 sm:$0xff]  }
 0x130   : > { %1274 = vmatprep.subr.bf16.mxu0 %v15113_v48  ;;  %1315 = vmatprep.subr.bf16.mxu1 %v15116_v49  ;;  %v15177_v48 = vld [vmem:[%s16968_s30 + $0x360] ss:$24 sps:$4 sm:$0xff]   ;;  %v15180_v49 = vld [vmem:[%s16968_s30 + $0x370] ss:$24 sps:$4 sm:$0xff]  }
 0x133   : > { %1275 = vmatpush1.bf16.msra.mxu0 %v15111_v50  ;;  %1316 = vmatpush1.bf16.msra.mxu1 %v15114_v51  ;;  %v15185_v50 = vld [vmem:[%s16968_s30 + $0x334] ss:$24 sps:$4 sm:$0xff]   ;;  %v15188_v51 = vld [vmem:[%s16968_s30 + $0x344] ss:$24 sps:$4 sm:$0xff]  }
 0x134   : > { %1276 = vmatprep.subr.bf16.mxu0 %v15119_v52  ;;  %1317 = vmatprep.subr.bf16.mxu1 %v15122_v53  ;;  %v15183_v52 = vld [vmem:[%s16968_s30 + $0x330] ss:$24 sps:$4 sm:$0xff]   ;;  %v15186_v53 = vld [vmem:[%s16968_s30 + $0x340] ss:$24 sps:$4 sm:$0xff]  }
 0x137   : > { %1277 = vmatpush1.bf16.msra.mxu0 %v15117_v54  ;;  %1318 = vmatpush1.bf16.msra.mxu1 %v15120_v55  ;;  %v15191_v54 = vld [vmem:[%s16968_s30 + $0x304] ss:$24 sps:$4 sm:$0xff]   ;;  %v15189_v55 = vld [vmem:[%s16968_s30 + $0x300] ss:$24 sps:$4 sm:$0xff]  }
 0x138   : > { %1278 = vmatprep.subr.bf16.mxu0 %v15125_v56  ;;  %1319 = vmatprep.subr.bf16.mxu1 %v15128_v57  ;;  %v15194_v56 = vld [vmem:[%s16968_s30 + $0x314] ss:$24 sps:$4 sm:$0xff]   ;;  %v15192_v57 = vld [vmem:[%s16968_s30 + $0x310] ss:$24 sps:$4 sm:$0xff]  }
 0x13b   : > { %1279 = vmatpush1.bf16.msra.mxu0 %v15123_v58  ;;  %1320 = vmatpush1.bf16.msra.mxu1 %v15126_v59  ;;  %v15197_v58 = vld [vmem:[%s16968_s30 + $0x45c] ss:$24 sps:$4 sm:$0xff]  }
 0x13c   : > { %1280 = vmatprep.subr.bf16.mxu0 %v15131_v60  ;;  %1321 = vmatprep.subr.bf16.mxu1 %v15134_v61 }
 0x13f   : > { %1281 = vmatpush1.bf16.msra.mxu0 %v15129_v62  ;;  %1322 = vmatpush1.bf16.msra.mxu1 %v15132_v63 }
 0x140   : > { %1282 = vmatprep.subr.bf16.mxu0 %v15137_v1  ;;  %1323 = vmatprep.subr.bf16.mxu1 %v15140_v2 }
 0x143   : > { %1283 = vmatpush1.bf16.msra.mxu0 %v15135_v3  ;;  %1324 = vmatpush1.bf16.msra.mxu1 %v15138_v4 }
 0x144   : > { %1284 = vmatprep.subr.bf16.mxu0 %v15143_v5  ;;  %1325 = vmatprep.subr.bf16.mxu1 %v15146_v6 }
 0x147   : > { %1285 = vmatpush1.bf16.msra.mxu0 %v15141_v8  ;;  %1326 = vmatpush1.bf16.msra.mxu1 %v15144_v9 }
 0x148   : > { %1370 = vmatprep.subr.bf16.mxu0 %v16901_v0  ;;  %1701 = vmatprep.subr.bf16.mxu1 %v15149_v27 }
 0x14a   : > { %1303 = vmatmul.mubr.bf16.vlgmr.msra.gmra.mxu0 %v17102_v43  ;;  %1344 = vmatmul.mubr.bf16.vlgmr.msra.gmra.mxu1 %v17102_v43  ;;  %v15176_v43 = vld [vmem:[%s16968_s30 + $0x3a4] ss:$24 sps:$4 sm:$0xff]  }
 0x14b   : > { %1371 = vmatpush1.bf16.msra.mxu0 %v16803_v12  ;;  %12698 = vmatprep.mubr.msk.bf16.mxu0 %vm419_vm0, %v1366_v11 }
 0x14c   : > { %1372 = vmatprep.subr.bf16.mxu0 %v16901_v0  ;;  %1733 = vmatprep.mubr.bf16.mxu1 %v16901_v0 }
 0x14d   : > { %1702 = vmatpush1.bf16.msra.mxu1 %v15147_v26 }
 0x14e   : > { %1703 = vmatprep.subr.bf16.mxu1 %v15155_v30 }
 0x14f   : > { %1373 = vmatpush1.bf16.msra.mxu0 %v16804_v13 }
 0x150   : > { %1374 = vmatprep.subr.bf16.mxu0 %v16901_v0 }
 0x151   : > { %1704 = vmatpush1.bf16.msra.mxu1 %v15153_v32 }
 0x152   : > { %1705 = vmatprep.subr.bf16.mxu1 %v15161_v34 }
 0x153   : > { %1375 = vmatpush1.bf16.msra.mxu0 %v16805_v14 }
 0x154   : > { %1376 = vmatprep.subr.bf16.mxu0 %v16901_v0 }
 0x155   : > { %1706 = vmatpush1.bf16.msra.mxu1 %v15159_v36  ;;  %v17238_v36 = vld [vmem:[%s17059_s8] ss:$0 sm:$0xff] }
 0x156   : > { %1707 = vmatprep.subr.bf16.mxu1 %v15167_v38 }
 0x157   : > { %1377 = vmatpush1.bf16.msra.mxu0 %v16806_v15 }
 0x158   : > { %1378 = vmatprep.subr.bf16.mxu0 %v16901_v0 }
 0x159   : > { %1708 = vmatpush1.bf16.msra.mxu1 %v15165_v39 }
 0x15a   : > { %1709 = vmatprep.subr.bf16.mxu1 %v15173_v42 }
 0x15b   : > { %1379 = vmatpush1.bf16.msra.mxu0 %v17151_v17 }
 0x15c   : > { %1380 = vmatprep.subr.bf16.mxu0 %v16901_v0 }
 0x15d   : > { %1710 = vmatpush1.bf16.msra.mxu1 %v15171_v44 }
 0x15e   : > { %1711 = vmatprep.subr.bf16.mxu1 %v15179_v46  ;;  %v15203_v46 = vld [vmem:[%s16968_s30 + $0x3fc] ss:$24 sps:$4 sm:$0xff]  }
 0x15f   : > { %1381 = vmatpush1.bf16.msra.mxu0 %v17156_v18 }
 0x160   : > { %1382 = vmatprep.subr.bf16.mxu0 %v16901_v0 }
 0x161   : > { %1712 = vmatpush1.bf16.msra.mxu1 %v15177_v48  ;;  %v15206_v48 = vld [vmem:[%s16968_s30 + $0x3cc] ss:$24 sps:$4 sm:$0xff]  }
 0x162   : > { %1713 = vmatprep.subr.bf16.mxu1 %v15185_v50  ;;  %v15209_v50 = vld [vmem:[%s16968_s30 + $0x39c] ss:$24 sps:$4 sm:$0xff]  }
 0x163   : > { %1383 = vmatpush1.bf16.msra.mxu0 %v17161_v19 }
 0x164   : > { %1384 = vmatprep.subr.bf16.mxu0 %v16901_v0 }
 0x165   : > { %1714 = vmatpush1.bf16.msra.mxu1 %v15183_v52  ;;  %v15212_v52 = vld [vmem:[%s16968_s30 + $0x36c] ss:$24 sps:$4 sm:$0xff]  }
 0x166   : > { %1715 = vmatprep.subr.bf16.mxu1 %v15191_v54  ;;  %v15215_v54 = vld [vmem:[%s16968_s30 + $0x33c] ss:$24 sps:$4 sm:$0xff]  }
 0x167   : > { %1385 = vmatpush1.bf16.msra.mxu0 %v17166_v20 }
 0x168   : > { %1392 = vmatprep.subr.bf16.mxu0 %v16901_v0 }
 0x169   : > { %1716 = vmatpush1.bf16.msra.mxu1 %v15189_v55  ;;  %v15213_v55 = vld [vmem:[%s16968_s30 + $0x338] ss:$24 sps:$4 sm:$0xff]  }
 0x16a   : > { %1742 = vmatprep.subr.bf16.mxu1 %v15197_v58  ;;  %v15216_v58 = vld [vmem:[%s16968_s30 + $0x308] ss:$24 sps:$4 sm:$0xff]  }
 0x16b   : > { %1393 = vmatpush2.bf16.msra.mxu0 %v16998_v16 }
 0x16c   : > { %1394 = vmatprep.subr.bf16.mxu0 %v16901_v0 }
 0x16f   : > { %1395 = vmatpush2.bf16.msra.mxu0 %v17173_v21 }
 0x170   : > { %1396 = vmatprep.subr.bf16.mxu0 %v16901_v0 }
 0x173   : > { %1397 = vmatpush2.bf16.msra.mxu0 %v17178_v22 }
 0x174   : > { %1398 = vmatprep.subr.bf16.mxu0 %v16901_v0 }
 0x177   : > { %1399 = vmatpush2.bf16.msra.mxu0 %v17183_v23 }
 0x178   : > { %1400 = vmatprep.subr.bf16.mxu0 %v16901_v0 }
 0x17b   : > { %1401 = vmatpush2.bf16.msra.mxu0 %v17188_v25 }
 0x17c   : > { %1783 = vmatprep.subr.bf16.mxu0 %v15152_v29 }
 0x17e   : > { %1403 = vmatmul.mubr.bf16.vlgmr.msra.gmra.mxu0 %v1365_v24 }
 0x17f   : > { %1815 = vmatprep.mubr.bf16.mxu0 %v16901_v0  ;;  %1784 = vmatpush1.bf16.msra.mxu0 %v15150_v28 }
 0x180   : > { %1785 = vmatprep.subr.bf16.mxu0 %v15158_v31 }
 0x183   : > { %1786 = vmatpush1.bf16.msra.mxu0 %v15156_v33 }
 0x184   : > { %1787 = vmatprep.subr.bf16.mxu0 %v15164_v35 }
 0x187   : > { %1788 = vmatpush1.bf16.msra.mxu0 %v15162_v37 }
 0x188   : > { %1789 = vmatprep.subr.bf16.mxu0 %v15170_v40 }
 0x18b   : > { %1790 = vmatpush1.bf16.msra.mxu0 %v15168_v41  ;;  %v15195_v41 = vld [vmem:[%s16968_s30 + $0x458] ss:$24 sps:$4 sm:$0xff]  }
 0x18c   : > { %1791 = vmatprep.subr.bf16.mxu0 %v15176_v43  ;;  %v15200_v43 = vld [vmem:[%s16968_s30 + $0x42c] ss:$24 sps:$4 sm:$0xff]  }
 0x18f   : > { %1792 = vmatpush1.bf16.msra.mxu0 %v15174_v45  ;;  %v15198_v45 = vld [vmem:[%s16968_s30 + $0x428] ss:$24 sps:$4 sm:$0xff]  }
 0x190   : > { %1793 = vmatprep.subr.bf16.mxu0 %v15182_v47  ;;  %v15201_v47 = vld [vmem:[%s16968_s30 + $0x3f8] ss:$24 sps:$4 sm:$0xff]  }
 0x193   : > { %1794 = vmatpush1.bf16.msra.mxu0 %v15180_v49  ;;  %v15204_v49 = vld [vmem:[%s16968_s30 + $0x3c8] ss:$24 sps:$4 sm:$0xff]  }
 0x194   : > { %1795 = vmatprep.subr.bf16.mxu0 %v15188_v51  ;;  %v15207_v51 = vld [vmem:[%s16968_s30 + $0x398] ss:$24 sps:$4 sm:$0xff]  }
 0x197   : > { %1796 = vmatpush1.bf16.msra.mxu0 %v15186_v53  ;;  %v15210_v53 = vld [vmem:[%s16968_s30 + $0x368] ss:$24 sps:$4 sm:$0xff]  }
 0x198   : > { %1797 = vmatprep.subr.bf16.mxu0 %v15194_v56  ;;  %v15218_v56 = vld [vmem:[%s16968_s30 + $0x30c] ss:$24 sps:$4 sm:$0xff]  }
 0x19b   : > { %1798 = vmatpush1.bf16.msra.mxu0 %v15192_v57  ;;  %v12796_v57 = vld.sshfl [vmem:[%s16963_s27 + $0xc] sm:$0x33 pattern:$0x76325410] }
 0x1ca   : > { %v900_v59 = vpop.f32.mrf.mxu0  ;;  %v941_v60 = vpop.f32.mrf.mxu1 }
 0x1cc   : > { %v902_v61 = vpop.f32.mrf.mxu0  ;;  %v943_v62 = vpop.f32.mrf.mxu1 }
 0x1ce   : > { %v904_v63 = vpop.f32.mrf.mxu0  ;;  %v945_v1 = vpop.f32.mrf.mxu1 }
 0x1cf   : > { %v17272_v63 = vld [vmem:[%s16949_s23 + $0x28] sm:$0xff]   ;;  %v17277_v1 = vld [vmem:[%s16949_s23 + $0x20] sm:$0xff]  }
 0x1d0   : > { %v905_v2 = vpop.f32.mrf.mxu0  ;;  %v946_v3 = vpop.f32.mrf.mxu1 }
 0x1d1   : > { %v15225_v2 = vld [vmem:[%s16968_s30 + $0x5a0] ss:$24 sps:$4 sm:$0xff]   ;;  %v15233_v3 = vld [vmem:[%s16968_s30 + $0x574] ss:$24 sps:$4 sm:$0xff]  }
 0x1ea   : > { %v982_v4 = vpop.f32.mrf.mxu0  ;;  %v1263_v5 = vpop.f32.mrf.mxu1 }
 0x1eb   : > { %v17225_v6 = vadd.f32 %v1263_v5, %v900_v59  ;;  %v1840_v59 = vcombine.high %v12796_v57, %v12796_v57  ;;  %v15231_v5 = vld [vmem:[%s16968_s30 + $0x570] ss:$24 sps:$4 sm:$0xff]  }
 0x1ec   : > { %v984_v7 = vpop.f32.mrf.mxu0  ;;  %v1265_v8 = vpop.f32.mrf.mxu1 }
 0x1ed   : > { %v17227_v9 = vadd.f32 %v1265_v8, %v902_v61  ;;  %v17261_v61 = vld [vmem:[%s16949_s23 + $0x38] sm:$0xff]  }
 0x1ee   : > { %v986_v10 = vpop.f32.mrf.mxu0  ;;  %v1267_v11 = vpop.f32.mrf.mxu1  ;;  %v15239_v8 = vld [vmem:[%s16968_s30 + $0x544] ss:$24 sps:$4 sm:$0xff]  }
 0x1ef   : > { %v15242_v10 = vld [vmem:[%s16968_s30 + $0x554] ss:$24 sps:$4 sm:$0xff]   ;;  %v15237_v11 = vld [vmem:[%s16968_s30 + $0x540] ss:$24 sps:$4 sm:$0xff]  }
 0x1f0   : > { %v987_v12 = vpop.f32.mrf.mxu0  ;;  %v1268_v13 = vpop.f32.mrf.mxu1 }
 0x1f1   : > { %v15240_v12 = vld [vmem:[%s16968_s30 + $0x550] ss:$24 sps:$4 sm:$0xff]   ;;  %v15245_v13 = vld [vmem:[%s16968_s30 + $0x514] ss:$24 sps:$4 sm:$0xff]  }
 0x20a   : > { %v1304_v14 = vpop.f32.mrf.mxu0  ;;  %v1345_v15 = vpop.f32.mrf.mxu1 }
 0x20b   : > { %v17229_v24 = vadd.f32 %v1304_v14, %v941_v60  ;;  %v17231_v26 = vadd.f32 %v1345_v15, %v982_v4  ;;  %v1844_v60 = vpack.c.bf16 %v1840_v59, %v1840_v59  ;;  %v15236_v4 = vld [vmem:[%s16968_s30 + $0x584] ss:$24 sps:$4 sm:$0xff]   ;;  %v15243_v15 = vld [vmem:[%s16968_s30 + $0x510] ss:$24 sps:$4 sm:$0xff]  }
 0x20c   : > { %v1306_v27 = vpop.f32.mrf.mxu0  ;;  %v1347_v28 = vpop.f32.mrf.mxu1  ;;  %v15248_v14 = vld [vmem:[%s16968_s30 + $0x524] ss:$24 sps:$4 sm:$0xff]  }
 0x20d   : > { %v17233_v29 = vadd.f32 %v1306_v27, %v943_v62  ;;  %v17235_v30 = vadd.f32 %v1347_v28, %v984_v7  ;;  %v17267_v62 = vld [vmem:[%s16949_s23 + $0x30] sm:$0xff]   ;;  %v15234_v7 = vld [vmem:[%s16968_s30 + $0x580] ss:$24 sps:$4 sm:$0xff]   ;;  %v15251_v28 = vld [vmem:[%s16968_s30 + $0x4e4] ss:$24 sps:$4 sm:$0xff]  }
 0x20e   : > { %v1308_v31 = vpop.f32.mrf.mxu0  ;;  %v1349_v32 = vpop.f32.mrf.mxu1  ;;  %v15246_v27 = vld [vmem:[%s16968_s30 + $0x520] ss:$24 sps:$4 sm:$0xff]  }
 0x20f   : > { %v15254_v31 = vld [vmem:[%s16968_s30 + $0x4f4] ss:$24 sps:$4 sm:$0xff]   ;;  %v15249_v32 = vld [vmem:[%s16968_s30 + $0x4e0] ss:$24 sps:$4 sm:$0xff]  }
 0x210   : > { %v1309_v33 = vpop.f32.mrf.mxu0  ;;  %v1350_v34 = vpop.f32.mrf.mxu1 }
 0x211   : > { %v15252_v33 = vld [vmem:[%s16968_s30 + $0x4f0] ss:$24 sps:$4 sm:$0xff]   ;;  %v15257_v34 = vld [vmem:[%s16968_s30 + $0x4b4] ss:$24 sps:$4 sm:$0xff]  }
 0x23e   : > { %v1404_v35 = vpop.f32.mrf.mxu0 }
 0x23f   : > { %v1405_v37 = vadd.f32 %v17238_v36, %v1404_v35  ;;  %v15260_v35 = vld [vmem:[%s16968_s30 + $0x4c4] ss:$24 sps:$4 sm:$0xff]  }
 0x240   : > { %v1406_v38 = vpop.f32.mrf.mxu0 }
 0x241   : > { %v1410_v39 = vmax.f32 %v1405_v37, 0.0  ;;  %v15255_v37 = vld [vmem:[%s16968_s30 + $0x4b0] ss:$24 sps:$4 sm:$0xff]   ;;  %v15258_v38 = vld [vmem:[%s16968_s30 + $0x4c0] ss:$24 sps:$4 sm:$0xff]  }
 0x242   : > { %v1407_v40 = vpop.f32.mrf.mxu0 }
 0x243   : > { %v1411_v42 = vpack.c.bf16 %v1410_v39, %v1410_v39  ;;  %v15263_v39 = vld [vmem:[%s16968_s30 + $0x484] ss:$24 sps:$4 sm:$0xff]   ;;  %v15261_v40 = vld [vmem:[%s16968_s30 + $0x480] ss:$24 sps:$4 sm:$0xff]  }
 0x244   : > { %v1408_v44 = vpop.f32.mrf.mxu0 }
 0x245   : > { %1734 = vmatmul.mubr.bf16.vlgmr.msra.gmra.mxu1 %v1411_v42  ;;  %1816 = vmatmul.mubr.bf16.vlgmr.msra.gmra.mxu0 %v1411_v42 }
 0x246   : > { %1743 = vmatpush1.bf16.msra.mxu1 %v15195_v41  ;;  %1774 = vmatprep.mubr.bf16.mxu1 %v16901_v0  ;;  %v15266_v41 = vld [vmem:[%s16968_s30 + $0x494] ss:$24 sps:$4 sm:$0xff]  }
 0x247   : > { %1744 = vmatprep.subr.bf16.mxu1 %v15200_v43  ;;  %2211 = vmatprep.mubr.bf16.mxu0 %v16901_v0  ;;  %v15269_v43 = vld [vmem:[%s16968_s30 + $0x5dc] ss:$24 sps:$4 sm:$0xff]  }
 0x24a   : > { %1745 = vmatpush1.bf16.msra.mxu1 %v15198_v45 }
 0x24b   : > { %1746 = vmatprep.subr.bf16.mxu1 %v15203_v46 }
 0x24e   : > { %1747 = vmatpush1.bf16.msra.mxu1 %v15201_v47 }
 0x24f   : > { %1748 = vmatprep.subr.bf16.mxu1 %v15206_v48 }
 0x252   : > { %1749 = vmatpush1.bf16.msra.mxu1 %v15204_v49 }
 0x253   : > { %1750 = vmatprep.subr.bf16.mxu1 %v15209_v50 }
 0x256   : > { %1751 = vmatpush1.bf16.msra.mxu1 %v15207_v51 }
 0x257   : > { %1752 = vmatprep.subr.bf16.mxu1 %v15212_v52 }
 0x25a   : > { %1753 = vmatpush1.bf16.msra.mxu1 %v15210_v53 }
 0x25b   : > { %1754 = vmatprep.subr.bf16.mxu1 %v15215_v54 }
 0x25e   : > { %1755 = vmatpush1.bf16.msra.mxu1 %v15213_v55 }
 0x25f   : > { %1756 = vmatprep.subr.bf16.mxu1 %v15218_v56 }
 0x262   : > { %1757 = vmatpush1.bf16.msra.mxu1 %v15216_v58 }
 0x263   : > { %1848 = vmatprep.subr.bf16.mxu1 %v16901_v0 }
 0x265   : > { %1775 = vmatmul.mubr.bf16.vlgmr.msra.gmra.mxu1 %v1411_v42  ;;  %v15264_v42 = vld [vmem:[%s16968_s30 + $0x490] ss:$24 sps:$4 sm:$0xff]  }
 0x266   : > { %1849 = vmatpush1.bf16.msra.mxu1 %v17261_v61  ;;  %12797 = vmatprep.mubr.msk.bf16.mxu1 %vm419_vm0, %v1844_v60 }
 0x267   : > { %1850 = vmatprep.subr.bf16.mxu1 %v16901_v0 }
 0x26a   : > { %1851 = vmatpush1.bf16.msra.mxu1 %v17267_v62 }
 0x26b   : > { %1852 = vmatprep.subr.bf16.mxu1 %v16901_v0 }
 0x26e   : > { %1853 = vmatpush1.bf16.msra.mxu1 %v17272_v63 }
 0x26f   : > { %1854 = vmatprep.subr.bf16.mxu1 %v16901_v0 }
 0x272   : > { %1855 = vmatpush1.bf16.msra.mxu1 %v17277_v1 }
 0x273   : > { %1856 = vmatprep.subr.bf16.mxu1 %v16901_v0 }
 0x276   : > { %1857 = vmatpush1.bf16.msra.mxu1 %v17151_v17  ;;  %v1843_v17 = vpack.c.bf16 %v12796_v57, %v12796_v57 }
 0x277   : > { %1858 = vmatprep.subr.bf16.mxu1 %v16901_v0 }
 0x27a   : > { %1859 = vmatpush1.bf16.msra.mxu1 %v17156_v18  ;;  %v15219_v18 = vld [vmem:[%s16968_s30 + $0x5d0] ss:$24 sps:$4 sm:$0xff]  }
 0x27b   : > { %1860 = vmatprep.subr.bf16.mxu1 %v16901_v0 }
 0x27e   : > { %1861 = vmatpush1.bf16.msra.mxu1 %v17161_v19  ;;  %v15221_v19 = vld [vmem:[%s16968_s30 + $0x5d4] ss:$24 sps:$4 sm:$0xff]  }
 0x27f   : > { %1862 = vmatprep.subr.bf16.mxu1 %v16901_v0  ;;  %2179 = vmatprep.subr.bf16.mxu0 %v15221_v19  ;;  %v15267_v19 = vld [vmem:[%s16968_s30 + $0x5d8] ss:$24 sps:$4 sm:$0xff]  }
 0x280   : > { %2180 = vmatpush1.bf16.msra.mxu0 %v15219_v18 }
 0x282   : > { %1863 = vmatpush1.bf16.msra.mxu1 %v17166_v20  ;;  %v15222_v20 = vld [vmem:[%s16968_s30 + $0x5e0] ss:$24 sps:$4 sm:$0xff]  }
 0x283   : > { %1870 = vmatprep.subr.bf16.mxu1 %v16901_v0 }
 0x286   : > { %1871 = vmatpush2.bf16.msra.mxu1 %v16998_v16 }
 0x287   : > { %1872 = vmatprep.subr.bf16.mxu1 %v16901_v0 }
 0x28a   : > { %1873 = vmatpush2.bf16.msra.mxu1 %v17173_v21  ;;  %v15224_v21 = vld [vmem:[%s16968_s30 + $0x5e4] ss:$24 sps:$4 sm:$0xff]  }
 0x28b   : > { %1874 = vmatprep.subr.bf16.mxu1 %v16901_v0 }
 0x28e   : > { %1875 = vmatpush2.bf16.msra.mxu1 %v17178_v22  ;;  %v15227_v22 = vld [vmem:[%s16968_s30 + $0x5a4] ss:$24 sps:$4 sm:$0xff]  }
 0x28f   : > { %1876 = vmatprep.subr.bf16.mxu1 %v16901_v0  ;;  %2181 = vmatprep.subr.bf16.mxu0 %v15227_v22  ;;  %v15275_v22 = vld [vmem:[%s16968_s30 + $0x57c] ss:$24 sps:$4 sm:$0xff]  }
 0x290   : > { %2182 = vmatpush1.bf16.msra.mxu0 %v15225_v2  ;;  %v15278_v2 = vld [vmem:[%s16968_s30 + $0x54c] ss:$24 sps:$4 sm:$0xff]  }
 0x291   : > { %2183 = vmatprep.subr.bf16.mxu0 %v15233_v3  ;;  %v15281_v3 = vld [vmem:[%s16968_s30 + $0x51c] ss:$24 sps:$4 sm:$0xff]  }
 0x292   : > { %1877 = vmatpush2.bf16.msra.mxu1 %v17183_v23  ;;  %v15230_v23 = vld [vmem:[%s16968_s30 + $0x5b4] ss:$24 sps:$4 sm:$0xff]  }
 0x293   : > { %1878 = vmatprep.subr.bf16.mxu1 %v16901_v0 }
 0x294   : > { %2184 = vmatpush1.bf16.msra.mxu0 %v15231_v5  ;;  %v15284_v5 = vld [vmem:[%s16968_s30 + $0x4ec] ss:$24 sps:$4 sm:$0xff]  }
 0x295   : > { %2185 = vmatprep.subr.bf16.mxu0 %v15239_v8  ;;  %v15287_v8 = vld [vmem:[%s16968_s30 + $0x4bc] ss:$24 sps:$4 sm:$0xff]  }
 0x296   : > { %1879 = vmatpush2.bf16.msra.mxu1 %v17188_v25  ;;  %v15228_v25 = vld [vmem:[%s16968_s30 + $0x5b0] ss:$24 sps:$4 sm:$0xff]  }
 0x297   : > { %2261 = vmatprep.subr.bf16.mxu1 %v15224_v21 }
 0x298   : > { %2186 = vmatpush1.bf16.msra.mxu0 %v15237_v11  ;;  %v15290_v11 = vld [vmem:[%s16968_s30 + $0x48c] ss:$24 sps:$4 sm:$0xff]  }
 0x299   : > { %1881 = vmatmul.mubr.bf16.vlgmr.msra.gmra.mxu1 %v1843_v17  ;;  %2187 = vmatprep.subr.bf16.mxu0 %v15245_v13  ;;  %v15288_v13 = vld [vmem:[%s16968_s30 + $0x488] ss:$24 sps:$4 sm:$0xff]  }
 0x29a   : > { %2293 = vmatprep.mubr.bf16.mxu1 %v16901_v0  ;;  %2262 = vmatpush1.bf16.msra.mxu1 %v15222_v20 }
 0x29b   : > { %2263 = vmatprep.subr.bf16.mxu1 %v15230_v23  ;;  %v15273_v23 = vld [vmem:[%s16968_s30 + $0x578] ss:$24 sps:$4 sm:$0xff]  }
 0x29c   : > { %2188 = vmatpush1.bf16.msra.mxu0 %v15243_v15 }
 0x29d   : > { %2189 = vmatprep.subr.bf16.mxu0 %v15251_v28  ;;  %v17385_v28 = vld [vmem:[%s16949_s23 + $0x10] sm:$0xff]  }
 0x29e   : > { %2264 = vmatpush1.bf16.msra.mxu1 %v15228_v25  ;;  %v15276_v25 = vld [vmem:[%s16968_s30 + $0x548] ss:$24 sps:$4 sm:$0xff]  }
 0x29f   : > { %2265 = vmatprep.subr.bf16.mxu1 %v15236_v4  ;;  %v15279_v4 = vld [vmem:[%s16968_s30 + $0x518] ss:$24 sps:$4 sm:$0xff]  }
 0x2a0   : > { %2190 = vmatpush1.bf16.msra.mxu0 %v15249_v32  ;;  %v17395_v32 = vld [vmem:[%s16949_s23] sm:$0xff]  }
 0x2a1   : > { %2191 = vmatprep.subr.bf16.mxu0 %v15257_v34  ;;  %v17407_v34 = vld [vmem:[%s16949_s23 + $0x50] sm:$0xff]  }
 0x2a2   : > { %2266 = vmatpush1.bf16.msra.mxu1 %v15234_v7  ;;  %v15282_v7 = vld [vmem:[%s16968_s30 + $0x4e8] ss:$24 sps:$4 sm:$0xff]  }
 0x2a3   : > { %2267 = vmatprep.subr.bf16.mxu1 %v15242_v10  ;;  %v15285_v10 = vld [vmem:[%s16968_s30 + $0x4b8] ss:$24 sps:$4 sm:$0xff]  }
 0x2a4   : > { %2192 = vmatpush1.bf16.msra.mxu0 %v15255_v37 }
 0x2a5   : > { %2193 = vmatprep.subr.bf16.mxu0 %v15263_v39  ;;  %v15291_v39 = vld [vmem:[%s16968_s30 + $0x750] ss:$24 sps:$4 sm:$0xff]  }
 0x2a6   : > { %2268 = vmatpush1.bf16.msra.mxu1 %v15240_v12  ;;  %v12895_v12 = vld.sshfl [vmem:[%s16963_s27 + $0x10] sm:$0x33 pattern:$0x76325410] }
 0x2a7   : > { %2269 = vmatprep.subr.bf16.mxu1 %v15248_v14  ;;  %v2318_v14 = vcombine.high %v12895_v12, %v12895_v12  ;;  %v2321_v37 = vpack.c.bf16 %v12895_v12, %v12895_v12 }
 0x2a8   : > { %2194 = vmatpush1.bf16.msra.mxu0 %v15261_v40  ;;  %v15293_v40 = vld [vmem:[%s16968_s30 + $0x754] ss:$24 sps:$4 sm:$0xff]  }
 0x2a9   : > { %2220 = vmatprep.subr.bf16.mxu0 %v15269_v43  ;;  %v2322_v15 = vpack.c.bf16 %v2318_v14, %v2318_v14  ;;  %v15299_v43 = vld [vmem:[%s16968_s30 + $0x724] ss:$24 sps:$4 sm:$0xff]  }
 0x2aa   : > { %2270 = vmatpush1.bf16.msra.mxu1 %v15246_v27  ;;  %v17380_v27 = vld [vmem:[%s16949_s23 + $0x18] sm:$0xff]  }
 0x2ab   : > { %2271 = vmatprep.subr.bf16.mxu1 %v15254_v31  ;;  %v17390_v31 = vld [vmem:[%s16949_s23 + $0x8] sm:$0xff]  }
 0x2ae   : > { %2272 = vmatpush1.bf16.msra.mxu1 %v15252_v33  ;;  %v17402_v33 = vld [vmem:[%s16949_s23 + $0x58] sm:$0xff]  }
 0x2af   : > { %2273 = vmatprep.subr.bf16.mxu1 %v15260_v35  ;;  %v17412_v35 = vld [vmem:[%s16949_s23 + $0x48] sm:$0xff]  }
 0x2b2   : > { %2274 = vmatpush1.bf16.msra.mxu1 %v15258_v38  ;;  %v17417_v38 = vld [vmem:[%s16949_s23 + $0x40] sm:$0xff]  }
 0x2b3   : > { %2275 = vmatprep.subr.bf16.mxu1 %v15266_v41  ;;  %v15294_v41 = vld [vmem:[%s16968_s30 + $0x760] ss:$24 sps:$4 sm:$0xff]  }
 0x2b6   : > { %2276 = vmatpush1.bf16.msra.mxu1 %v15264_v42  ;;  %v15296_v42 = vld [vmem:[%s16968_s30 + $0x764] ss:$24 sps:$4 sm:$0xff]  }
 0x2b7   : > { %2657 = vmatprep.subr.bf16.mxu1 %v15293_v40 }
 0x305   : > { %v1735_v44 = vpop.f32.mrf.mxu1  ;;  %v1817_v45 = vpop.f32.mrf.mxu0 }
 0x306   : > { %v17333_v46 = vadd.f32 %v1735_v44, %v17225_v6  ;;  %v17336_v47 = vadd.f32 %v1817_v45, %v17231_v26  ;;  %v15302_v44 = vld [vmem:[%s16968_s30 + $0x734] ss:$24 sps:$4 sm:$0xff]   ;;  %v15297_v45 = vld [vmem:[%s16968_s30 + $0x720] ss:$24 sps:$4 sm:$0xff]  }
 0x307   : > { %v1737_v48 = vpop.f32.mrf.mxu1  ;;  %v1819_v49 = vpop.f32.mrf.mxu0 }
 0x308   : > { %v17339_v50 = vadd.f32 %v1737_v48, %v17227_v9  ;;  %v17342_v51 = vadd.f32 %v1819_v49, %v17235_v30  ;;  %v15300_v48 = vld [vmem:[%s16968_s30 + $0x730] ss:$24 sps:$4 sm:$0xff]   ;;  %v15305_v49 = vld [vmem:[%s16968_s30 + $0x6f4] ss:$24 sps:$4 sm:$0xff]  }
 0x309   : > { %v1739_v52 = vpop.f32.mrf.mxu1  ;;  %v1821_v53 = vpop.f32.mrf.mxu0 }
 0x30a   : > { %v15308_v52 = vld [vmem:[%s16968_s30 + $0x704] ss:$24 sps:$4 sm:$0xff]   ;;  %v15303_v53 = vld [vmem:[%s16968_s30 + $0x6f0] ss:$24 sps:$4 sm:$0xff]  }
 0x30b   : > { %v1740_v54 = vpop.f32.mrf.mxu1  ;;  %v1822_v55 = vpop.f32.mrf.mxu0 }
 0x30c   : > { %v15306_v54 = vld [vmem:[%s16968_s30 + $0x700] ss:$24 sps:$4 sm:$0xff]   ;;  %v15311_v55 = vld [vmem:[%s16968_s30 + $0x6c4] ss:$24 sps:$4 sm:$0xff]  }
 0x325   : > { %v1776_v56 = vpop.f32.mrf.mxu1 }
 0x326   : > { %v17345_v6 = vadd.f32 %v1776_v56, %v17229_v24  ;;  %v15272_v24 = vld [vmem:[%s16968_s30 + $0x5ac] ss:$24 sps:$4 sm:$0xff]  }
 0x327   : > { %v1778_v26 = vpop.f32.mrf.mxu1  ;;  %v15314_v56 = vld [vmem:[%s16968_s30 + $0x6d4] ss:$24 sps:$4 sm:$0xff]  }
 0x328   : > { %v17348_v57 = vadd.f32 %v1778_v26, %v17233_v29  ;;  %v15270_v29 = vld [vmem:[%s16968_s30 + $0x5a8] ss:$24 sps:$4 sm:$0xff]  }
 0x329   : > { %v1780_v9 = vpop.f32.mrf.mxu1  ;;  %v15309_v26 = vld [vmem:[%s16968_s30 + $0x6c0] ss:$24 sps:$4 sm:$0xff]  }
 0x32a   : > { %v15312_v9 = vld [vmem:[%s16968_s30 + $0x6d0] ss:$24 sps:$4 sm:$0xff]  }
 0x32b   : > { %v1781_v58 = vpop.f32.mrf.mxu1 }
 0x32c   : > { %v15317_v58 = vld [vmem:[%s16968_s30 + $0x694] ss:$24 sps:$4 sm:$0xff]  }
 0x359   : > { %v1882_v30 = vpop.f32.mrf.mxu1 }
 0x35a   : > { %v1883_v59 = vadd.f32 %v17238_v36, %v1882_v30  ;;  %v15320_v30 = vld [vmem:[%s16968_s30 + $0x6a4] ss:$24 sps:$4 sm:$0xff]  }
 0x35b   : > { %v1884_v60 = vpop.f32.mrf.mxu1 }
 0x35c   : > { %v1888_v17 = vmax.f32 %v1883_v59, 0.0  ;;  %v15315_v59 = vld [vmem:[%s16968_s30 + $0x690] ss:$24 sps:$4 sm:$0xff]   ;;  %v15318_v60 = vld [vmem:[%s16968_s30 + $0x6a0] ss:$24 sps:$4 sm:$0xff]  }
 0x35d   : > { %v1885_v18 = vpop.f32.mrf.mxu1 }
 0x35e   : > { %v1889_v20 = vpack.c.bf16 %v1888_v17, %v1888_v17  ;;  %v15323_v17 = vld [vmem:[%s16968_s30 + $0x664] ss:$24 sps:$4 sm:$0xff]   ;;  %v15326_v18 = vld [vmem:[%s16968_s30 + $0x674] ss:$24 sps:$4 sm:$0xff]  }
 0x35f   : > { %v1886_v21 = vpop.f32.mrf.mxu1 }
 0x360   : > { %2212 = vmatmul.mubr.bf16.vlgmr.msra.gmra.mxu0 %v1889_v20  ;;  %2294 = vmatmul.mubr.bf16.vlgmr.msra.gmra.mxu1 %v1889_v20  ;;  %v15332_v21 = vld [vmem:[%s16968_s30 + $0x644] ss:$24 sps:$4 sm:$0xff]  }
 0x361   : > { %2221 = vmatpush1.bf16.msra.mxu0 %v15267_v19  ;;  %2252 = vmatprep.mubr.bf16.mxu0 %v16901_v0  ;;  %v15321_v19 = vld [vmem:[%s16968_s30 + $0x660] ss:$24 sps:$4 sm:$0xff]  }
 0x362   : > { %2222 = vmatprep.subr.bf16.mxu0 %v15272_v24  ;;  %2689 = vmatprep.mubr.bf16.mxu1 %v16901_v0  ;;  %v15329_v24 = vld [vmem:[%s16968_s30 + $0x634] ss:$24 sps:$4 sm:$0xff]  }
 0x363   : > { %2658 = vmatpush1.bf16.msra.mxu1 %v15291_v39 }
 0x364   : > { %2659 = vmatprep.subr.bf16.mxu1 %v15299_v43 }
 0x365   : > { %2223 = vmatpush1.bf16.msra.mxu0 %v15270_v29  ;;  %v15327_v29 = vld [vmem:[%s16968_s30 + $0x630] ss:$24 sps:$4 sm:$0xff]  }
 0x366   : > { %2224 = vmatprep.subr.bf16.mxu0 %v15275_v22  ;;  %v15330_v22 = vld [vmem:[%s16968_s30 + $0x640] ss:$24 sps:$4 sm:$0xff]  }
 0x367   : > { %2660 = vmatpush1.bf16.msra.mxu1 %v15297_v45 }
 0x368   : > { %2661 = vmatprep.subr.bf16.mxu1 %v15305_v49 }
 0x369   : > { %2225 = vmatpush1.bf16.msra.mxu0 %v15273_v23  ;;  %v15335_v23 = vld [vmem:[%s16968_s30 + $0x604] ss:$24 sps:$4 sm:$0xff]  }
 0x36a   : > { %2226 = vmatprep.subr.bf16.mxu0 %v15278_v2  ;;  %v15333_v2 = vld [vmem:[%s16968_s30 + $0x600] ss:$24 sps:$4 sm:$0xff]  }
 0x36b   : > { %2662 = vmatpush1.bf16.msra.mxu1 %v15303_v53 }
 0x36c   : > { %2663 = vmatprep.subr.bf16.mxu1 %v15311_v55  ;;  %v15347_v55 = vld [vmem:[%s16968_s30 + $0x6fc] ss:$24 sps:$4 sm:$0xff]  }
 0x36d   : > { %2227 = vmatpush1.bf16.msra.mxu0 %v15276_v25  ;;  %v15338_v25 = vld [vmem:[%s16968_s30 + $0x614] ss:$24 sps:$4 sm:$0xff]  }
 0x36e   : > { %2228 = vmatprep.subr.bf16.mxu0 %v15281_v3  ;;  %v15336_v3 = vld [vmem:[%s16968_s30 + $0x610] ss:$24 sps:$4 sm:$0xff]  }
 0x36f   : > { %2664 = vmatpush1.bf16.msra.mxu1 %v15309_v26  ;;  %v15350_v26 = vld [vmem:[%s16968_s30 + $0x6cc] ss:$24 sps:$4 sm:$0xff]  }
 0x370   : > { %2665 = vmatprep.subr.bf16.mxu1 %v15317_v58  ;;  %v15353_v58 = vld [vmem:[%s16968_s30 + $0x69c] ss:$24 sps:$4 sm:$0xff]  }
 0x371   : > { %2229 = vmatpush1.bf16.msra.mxu0 %v15279_v4  ;;  %v15341_v4 = vld [vmem:[%s16968_s30 + $0x75c] ss:$24 sps:$4 sm:$0xff]  }
 0x372   : > { %2230 = vmatprep.subr.bf16.mxu0 %v15284_v5 }
 0x373   : > { %2666 = vmatpush1.bf16.msra.mxu1 %v15315_v59  ;;  %v15356_v59 = vld [vmem:[%s16968_s30 + $0x66c] ss:$24 sps:$4 sm:$0xff]  }
 0x374   : > { %2667 = vmatprep.subr.bf16.mxu1 %v15323_v17  ;;  %v15359_v17 = vld [vmem:[%s16968_s30 + $0x63c] ss:$24 sps:$4 sm:$0xff]  }
 0x375   : > { %2231 = vmatpush1.bf16.msra.mxu0 %v15282_v7 }
 0x376   : > { %2232 = vmatprep.subr.bf16.mxu0 %v15287_v8 }
 0x377   : > { %2668 = vmatpush1.bf16.msra.mxu1 %v15321_v19  ;;  %v15362_v19 = vld [vmem:[%s16968_s30 + $0x60c] ss:$24 sps:$4 sm:$0xff]  }
 0x378   : > { %2669 = vmatprep.subr.bf16.mxu1 %v15329_v24  ;;  %v15360_v24 = vld [vmem:[%s16968_s30 + $0x608] ss:$24 sps:$4 sm:$0xff]  }
 0x379   : > { %2233 = vmatpush1.bf16.msra.mxu0 %v15285_v10 }
 0x37a   : > { %2234 = vmatprep.subr.bf16.mxu0 %v15290_v11 }
 0x37b   : > { %2670 = vmatpush1.bf16.msra.mxu1 %v15327_v29 }
 0x37c   : > { %2671 = vmatprep.subr.bf16.mxu1 %v15335_v23  ;;  %v15363_v23 = vld [vmem:[%s16968_s30 + $0x8d0] ss:$24 sps:$4 sm:$0xff]  }
 0x37d   : > { %2235 = vmatpush1.bf16.msra.mxu0 %v15288_v13 }
 0x37e   : > { %2326 = vmatprep.subr.bf16.mxu0 %v16901_v0 }
 0x37f   : > { %2672 = vmatpush1.bf16.msra.mxu1 %v15333_v2  ;;  %v15365_v2 = vld [vmem:[%s16968_s30 + $0x8d4] ss:$24 sps:$4 sm:$0xff]  }
 0x380   : > { %2253 = vmatmul.mubr.bf16.vlgmr.msra.gmra.mxu0 %v1889_v20  ;;  %v15324_v20 = vld [vmem:[%s16968_s30 + $0x670] ss:$24 sps:$4 sm:$0xff]   ;;  %2698 = vmatprep.subr.bf16.mxu1 %v15341_v4  ;;  %v15371_v4 = vld [vmem:[%s16968_s30 + $0x8a4] ss:$24 sps:$4 sm:$0xff]  }
 0x381   : > { %2327 = vmatpush1.bf16.msra.mxu0 %v17261_v61  ;;  %12896 = vmatprep.mubr.msk.bf16.mxu0 %vm419_vm0, %v2322_v15 }
 0x382   : > { %2328 = vmatprep.subr.bf16.mxu0 %v16901_v0 }
 0x385   : > { %2329 = vmatpush1.bf16.msra.mxu0 %v17267_v62 }
 0x386   : > { %2330 = vmatprep.subr.bf16.mxu0 %v16901_v0 }
 0x389   : > { %2331 = vmatpush1.bf16.msra.mxu0 %v17272_v63 }
 0x38a   : > { %2332 = vmatprep.subr.bf16.mxu0 %v16901_v0 }
 0x38d   : > { %2333 = vmatpush1.bf16.msra.mxu0 %v17277_v1 }
 0x38e   : > { %2334 = vmatprep.subr.bf16.mxu0 %v16901_v0 }
 0x391   : > { %2335 = vmatpush1.bf16.msra.mxu0 %v17380_v27 }
 0x392   : > { %2336 = vmatprep.subr.bf16.mxu0 %v16901_v0 }
 0x395   : > { %2337 = vmatpush1.bf16.msra.mxu0 %v17385_v28 }
 0x396   : > { %2338 = vmatprep.subr.bf16.mxu0 %v16901_v0 }
 0x399   : > { %2339 = vmatpush1.bf16.msra.mxu0 %v17390_v31 }
 0x39a   : > { %2340 = vmatprep.subr.bf16.mxu0 %v16901_v0 }
 0x39d   : > { %2341 = vmatpush1.bf16.msra.mxu0 %v17395_v32 }
 0x39e   : > { %2348 = vmatprep.subr.bf16.mxu0 %v16901_v0 }
 0x3a1   : > { %2349 = vmatpush2.bf16.msra.mxu0 %v16998_v16 }
 0x3a2   : > { %2350 = vmatprep.subr.bf16.mxu0 %v16901_v0 }
 0x3a5   : > { %2351 = vmatpush2.bf16.msra.mxu0 %v17402_v33 }
 0x3a6   : > { %2352 = vmatprep.subr.bf16.mxu0 %v16901_v0 }
 0x3a9   : > { %2353 = vmatpush2.bf16.msra.mxu0 %v17407_v34 }
 0x3aa   : > { %2354 = vmatprep.subr.bf16.mxu0 %v16901_v0 }
 0x3ad   : > { %2355 = vmatpush2.bf16.msra.mxu0 %v17412_v35 }
 0x3ae   : > { %2356 = vmatprep.subr.bf16.mxu0 %v16901_v0 }
 0x3b1   : > { %2357 = vmatpush2.bf16.msra.mxu0 %v17417_v38 }
 0x3b2   : > { %2739 = vmatprep.subr.bf16.mxu0 %v15296_v42 }
 0x3b4   : > { %2359 = vmatmul.mubr.bf16.vlgmr.msra.gmra.mxu0 %v2321_v37 }
 0x3b5   : > { %2771 = vmatprep.mubr.bf16.mxu0 %v16901_v0  ;;  %2740 = vmatpush1.bf16.msra.mxu0 %v15294_v41 }
 0x3b6   : > { %2741 = vmatprep.subr.bf16.mxu0 %v15302_v44 }
 0x3b9   : > { %2742 = vmatpush1.bf16.msra.mxu0 %v15300_v48 }
 0x3ba   : > { %2743 = vmatprep.subr.bf16.mxu0 %v15308_v52  ;;  %v15339_v52 = vld [vmem:[%s16968_s30 + $0x758] ss:$24 sps:$4 sm:$0xff]  }
 0x3bd   : > { %2744 = vmatpush1.bf16.msra.mxu0 %v15306_v54 }
 0x3be   : > { %2745 = vmatprep.subr.bf16.mxu0 %v15314_v56  ;;  %v15345_v56 = vld [vmem:[%s16968_s30 + $0x6f8] ss:$24 sps:$4 sm:$0xff]  }
 0x3c1   : > { %2746 = vmatpush1.bf16.msra.mxu0 %v15312_v9  ;;  %v15348_v9 = vld [vmem:[%s16968_s30 + $0x6c8] ss:$24 sps:$4 sm:$0xff]  }
 0x3c2   : > { %2747 = vmatprep.subr.bf16.mxu0 %v15320_v30  ;;  %v15351_v30 = vld [vmem:[%s16968_s30 + $0x698] ss:$24 sps:$4 sm:$0xff]  }
 0x3c5   : > { %2748 = vmatpush1.bf16.msra.mxu0 %v15318_v60  ;;  %v15354_v60 = vld [vmem:[%s16968_s30 + $0x668] ss:$24 sps:$4 sm:$0xff]  }
 0x3c6   : > { %2749 = vmatprep.subr.bf16.mxu0 %v15326_v18  ;;  %v15357_v18 = vld [vmem:[%s16968_s30 + $0x638] ss:$24 sps:$4 sm:$0xff]  }
 0x3c9   : > { %2750 = vmatpush1.bf16.msra.mxu0 %v15324_v20  ;;  %v12994_v20 = vld.sshfl [vmem:[%s16963_s27 + $0x14] sm:$0x33 pattern:$0x76325410] }
 0x3ca   : > { %2751 = vmatprep.subr.bf16.mxu0 %v15332_v21  ;;  %v2796_v21 = vcombine.high %v12994_v20, %v12994_v20 }
 0x3cc   : > { %v2800_v29 = vpack.c.bf16 %v2796_v21, %v2796_v21 }
 0x3cd   : > { %2752 = vmatpush1.bf16.msra.mxu0 %v15330_v22  ;;  %v2799_v22 = vpack.c.bf16 %v12994_v20, %v12994_v20 }
 0x3ce   : > { %2753 = vmatprep.subr.bf16.mxu0 %v15338_v25  ;;  %v15366_v25 = vld [vmem:[%s16968_s30 + $0x8e0] ss:$24 sps:$4 sm:$0xff]  }
 0x3d1   : > { %2754 = vmatpush1.bf16.msra.mxu0 %v15336_v3  ;;  %v15368_v3 = vld [vmem:[%s16968_s30 + $0x8e4] ss:$24 sps:$4 sm:$0xff]  }
 0x3d2   : > { %3135 = vmatprep.subr.bf16.mxu0 %v15365_v2 }
 0x420   : > { %v2213_v5 = vpop.f32.mrf.mxu0  ;;  %v2295_v7 = vpop.f32.mrf.mxu1 }
 0x421   : > { %v17455_v8 = vadd.f32 %v2213_v5, %v17333_v46  ;;  %v17458_v10 = vadd.f32 %v2295_v7, %v17336_v47  ;;  %v15374_v5 = vld [vmem:[%s16968_s30 + $0x8b4] ss:$24 sps:$4 sm:$0xff]   ;;  %v15369_v7 = vld [vmem:[%s16968_s30 + $0x8a0] ss:$24 sps:$4 sm:$0xff]  }
 0x422   : > { %v2215_v11 = vpop.f32.mrf.mxu0  ;;  %v2297_v12 = vpop.f32.mrf.mxu1 }
 0x423   : > { %v17461_v13 = vadd.f32 %v2215_v11, %v17339_v50  ;;  %v17464_v14 = vadd.f32 %v2297_v12, %v17342_v51  ;;  %v15372_v11 = vld [vmem:[%s16968_s30 + $0x8b0] ss:$24 sps:$4 sm:$0xff]   ;;  %v15377_v12 = vld [vmem:[%s16968_s30 + $0x874] ss:$24 sps:$4 sm:$0xff]  }
 0x424   : > { %v2217_v15 = vpop.f32.mrf.mxu0  ;;  %v2299_v37 = vpop.f32.mrf.mxu1 }
 0x425   : > { %v15380_v15 = vld [vmem:[%s16968_s30 + $0x884] ss:$24 sps:$4 sm:$0xff]   ;;  %v15375_v37 = vld [vmem:[%s16968_s30 + $0x870] ss:$24 sps:$4 sm:$0xff]  }
 0x426   : > { %v2218_v39 = vpop.f32.mrf.mxu0  ;;  %v2300_v40 = vpop.f32.mrf.mxu1 }
 0x427   : > { %v15378_v39 = vld [vmem:[%s16968_s30 + $0x880] ss:$24 sps:$4 sm:$0xff]   ;;  %v15383_v40 = vld [vmem:[%s16968_s30 + $0x844] ss:$24 sps:$4 sm:$0xff]  }
 0x440   : > { %v2254_v41 = vpop.f32.mrf.mxu0 }
 0x441   : > { %v17467_v46 = vadd.f32 %v2254_v41, %v17345_v6  ;;  %v15344_v6 = vld [vmem:[%s16968_s30 + $0x72c] ss:$24 sps:$4 sm:$0xff]  }
 0x442   : > { %v2256_v47 = vpop.f32.mrf.mxu0  ;;  %v15386_v41 = vld [vmem:[%s16968_s30 + $0x854] ss:$24 sps:$4 sm:$0xff]  }
 0x443   : > { %v17470_v42 = vadd.f32 %v2256_v47, %v17348_v57  ;;  %v15342_v57 = vld [vmem:[%s16968_s30 + $0x728] ss:$24 sps:$4 sm:$0xff]  }
 0x444   : > { %v2258_v50 = vpop.f32.mrf.mxu0  ;;  %v15381_v47 = vld [vmem:[%s16968_s30 + $0x840] ss:$24 sps:$4 sm:$0xff]  }
 0x445   : > { %v15384_v50 = vld [vmem:[%s16968_s30 + $0x850] ss:$24 sps:$4 sm:$0xff]  }
 0x446   : > { %v2259_v43 = vpop.f32.mrf.mxu0 }
 0x447   : > { %v15389_v43 = vld [vmem:[%s16968_s30 + $0x814] ss:$24 sps:$4 sm:$0xff]  }
 0x474   : > { %v2360_v51 = vpop.f32.mrf.mxu0 }
 0x475   : > { %v2361_v44 = vadd.f32 %v17238_v36, %v2360_v51  ;;  %v15392_v51 = vld [vmem:[%s16968_s30 + $0x824] ss:$24 sps:$4 sm:$0xff]  }
 0x476   : > { %v2362_v45 = vpop.f32.mrf.mxu0 }
 0x477   : > { %v2366_v48 = vmax.f32 %v2361_v44, 0.0  ;;  %v15387_v44 = vld [vmem:[%s16968_s30 + $0x810] ss:$24 sps:$4 sm:$0xff]   ;;  %v15390_v45 = vld [vmem:[%s16968_s30 + $0x820] ss:$24 sps:$4 sm:$0xff]  }
 0x478   : > { %v2363_v49 = vpop.f32.mrf.mxu0 }
 0x479   : > { %v2367_v53 = vpack.c.bf16 %v2366_v48, %v2366_v48  ;;  %v15395_v48 = vld [vmem:[%s16968_s30 + $0x7e4] ss:$24 sps:$4 sm:$0xff]   ;;  %v15398_v49 = vld [vmem:[%s16968_s30 + $0x7f4] ss:$24 sps:$4 sm:$0xff]  }
 0x47a   : > { %v2364_v54 = vpop.f32.mrf.mxu0 }
 0x47b   : > { %2690 = vmatmul.mubr.bf16.vlgmr.msra.gmra.mxu1 %v2367_v53  ;;  %2772 = vmatmul.mubr.bf16.vlgmr.msra.gmra.mxu0 %v2367_v53  ;;  %v15404_v54 = vld [vmem:[%s16968_s30 + $0x7c4] ss:$24 sps:$4 sm:$0xff]  }
 0x47c   : > { %2699 = vmatpush1.bf16.msra.mxu1 %v15339_v52  ;;  %2730 = vmatprep.mubr.bf16.mxu1 %v16901_v0  ;;  %v15393_v52 = vld [vmem:[%s16968_s30 + $0x7e0] ss:$24 sps:$4 sm:$0xff]  }
 0x47d   : > { %2700 = vmatprep.subr.bf16.mxu1 %v15344_v6  ;;  %3167 = vmatprep.mubr.bf16.mxu0 %v16901_v0  ;;  %v15401_v6 = vld [vmem:[%s16968_s30 + $0x7b4] ss:$24 sps:$4 sm:$0xff]  }
 0x47e   : > { %3136 = vmatpush1.bf16.msra.mxu0 %v15363_v23 }
 0x47f   : > { %3137 = vmatprep.subr.bf16.mxu0 %v15371_v4 }
 0x480   : > { %2701 = vmatpush1.bf16.msra.mxu1 %v15342_v57  ;;  %v15399_v57 = vld [vmem:[%s16968_s30 + $0x7b0] ss:$24 sps:$4 sm:$0xff]  }
 0x481   : > { %2702 = vmatprep.subr.bf16.mxu1 %v15347_v55  ;;  %v15402_v55 = vld [vmem:[%s16968_s30 + $0x7c0] ss:$24 sps:$4 sm:$0xff]  }
 0x482   : > { %3138 = vmatpush1.bf16.msra.mxu0 %v15369_v7 }
 0x483   : > { %3139 = vmatprep.subr.bf16.mxu0 %v15377_v12 }
 0x484   : > { %2703 = vmatpush1.bf16.msra.mxu1 %v15345_v56  ;;  %v15407_v56 = vld [vmem:[%s16968_s30 + $0x784] ss:$24 sps:$4 sm:$0xff]  }
 0x485   : > { %2704 = vmatprep.subr.bf16.mxu1 %v15350_v26  ;;  %v15405_v26 = vld [vmem:[%s16968_s30 + $0x780] ss:$24 sps:$4 sm:$0xff]  }
 0x486   : > { %3140 = vmatpush1.bf16.msra.mxu0 %v15375_v37 }
 0x487   : > { %3141 = vmatprep.subr.bf16.mxu0 %v15383_v40  ;;  %v15417_v40 = vld [vmem:[%s16968_s30 + $0x878] ss:$24 sps:$4 sm:$0xff]  }
 0x488   : > { %2705 = vmatpush1.bf16.msra.mxu1 %v15348_v9  ;;  %v15410_v9 = vld [vmem:[%s16968_s30 + $0x794] ss:$24 sps:$4 sm:$0xff]  }
 0x489   : > { %2706 = vmatprep.subr.bf16.mxu1 %v15353_v58  ;;  %v15408_v58 = vld [vmem:[%s16968_s30 + $0x790] ss:$24 sps:$4 sm:$0xff]  }
 0x48a   : > { %3142 = vmatpush1.bf16.msra.mxu0 %v15381_v47  ;;  %v15420_v47 = vld [vmem:[%s16968_s30 + $0x848] ss:$24 sps:$4 sm:$0xff]  }
 0x48b   : > { %3143 = vmatprep.subr.bf16.mxu0 %v15389_v43  ;;  %v15423_v43 = vld [vmem:[%s16968_s30 + $0x818] ss:$24 sps:$4 sm:$0xff]  }
 0x48c   : > { %2707 = vmatpush1.bf16.msra.mxu1 %v15351_v30  ;;  %v15413_v30 = vld [vmem:[%s16968_s30 + $0x8dc] ss:$24 sps:$4 sm:$0xff]  }
 0x48d   : > { %2708 = vmatprep.subr.bf16.mxu1 %v15356_v59 }
 0x48e   : > { %3144 = vmatpush1.bf16.msra.mxu0 %v15387_v44  ;;  %v15426_v44 = vld [vmem:[%s16968_s30 + $0x7e8] ss:$24 sps:$4 sm:$0xff]  }
 0x48f   : > { %3145 = vmatprep.subr.bf16.mxu0 %v15395_v48  ;;  %v15429_v48 = vld [vmem:[%s16968_s30 + $0x7b8] ss:$24 sps:$4 sm:$0xff]  }
 0x490   : > { %2709 = vmatpush1.bf16.msra.mxu1 %v15354_v60 }
 0x491   : > { %2710 = vmatprep.subr.bf16.mxu1 %v15359_v17 }
 0x492   : > { %3146 = vmatpush1.bf16.msra.mxu0 %v15393_v52  ;;  %v13093_v52 = vld.sshfl [vmem:[%s16963_s27 + $0x18] sm:$0x33 pattern:$0x76325410] }
 0x493   : > { %3147 = vmatprep.subr.bf16.mxu0 %v15401_v6  ;;  %v3274_v6 = vcombine.high %v13093_v52, %v13093_v52 }
 0x494   : > { %2711 = vmatpush1.bf16.msra.mxu1 %v15357_v18 }
 0x495   : > { %2712 = vmatprep.subr.bf16.mxu1 %v15362_v19 }
 0x496   : > { %3148 = vmatpush1.bf16.msra.mxu0 %v15399_v57  ;;  %v15440_v57 = vld [vmem:[%s16968_s30 + $0xa64] ss:$24 sps:$4 sm:$0xff]  }
 0x497   : > { %3149 = vmatprep.subr.bf16.mxu0 %v15407_v56  ;;  %v15446_v56 = vld [vmem:[%s16968_s30 + $0xa34] ss:$24 sps:$4 sm:$0xff]  }
 0x498   : > { %2713 = vmatpush1.bf16.msra.mxu1 %v15360_v24 }
 0x499   : > { %2804 = vmatprep.subr.bf16.mxu1 %v16901_v0 }
 0x49a   : > { %3150 = vmatpush1.bf16.msra.mxu0 %v15405_v26  ;;  %v15441_v26 = vld [vmem:[%s16968_s30 + $0xa20] ss:$24 sps:$4 sm:$0xff]  }
 0x49b   : > { %2731 = vmatmul.mubr.bf16.vlgmr.msra.gmra.mxu1 %v2367_v53  ;;  %v15396_v53 = vld [vmem:[%s16968_s30 + $0x7f0] ss:$24 sps:$4 sm:$0xff]   ;;  %3176 = vmatprep.subr.bf16.mxu0 %v15413_v30  ;;  %v15452_v30 = vld [vmem:[%s16968_s30 + $0xa04] ss:$24 sps:$4 sm:$0xff]  }
 0x49c   : > { %2805 = vmatpush1.bf16.msra.mxu1 %v17261_v61  ;;  %12995 = vmatprep.mubr.msk.bf16.mxu1 %vm419_vm0, %v2800_v29 }
 0x49d   : > { %2806 = vmatprep.subr.bf16.mxu1 %v16901_v0 }
 0x4a0   : > { %2807 = vmatpush1.bf16.msra.mxu1 %v17267_v62 }
 0x4a1   : > { %2808 = vmatprep.subr.bf16.mxu1 %v16901_v0 }
 0x4a4   : > { %2809 = vmatpush1.bf16.msra.mxu1 %v17272_v63 }
 0x4a5   : > { %2810 = vmatprep.subr.bf16.mxu1 %v16901_v0 }
 0x4a8   : > { %2811 = vmatpush1.bf16.msra.mxu1 %v17277_v1 }
 0x4a9   : > { %2812 = vmatprep.subr.bf16.mxu1 %v16901_v0 }
 0x4ac   : > { %2813 = vmatpush1.bf16.msra.mxu1 %v17380_v27 }
 0x4ad   : > { %2814 = vmatprep.subr.bf16.mxu1 %v16901_v0 }
 0x4b0   : > { %2815 = vmatpush1.bf16.msra.mxu1 %v17385_v28 }
 0x4b1   : > { %2816 = vmatprep.subr.bf16.mxu1 %v16901_v0 }
 0x4b4   : > { %2817 = vmatpush1.bf16.msra.mxu1 %v17390_v31 }
 0x4b5   : > { %2818 = vmatprep.subr.bf16.mxu1 %v16901_v0 }
 0x4b8   : > { %2819 = vmatpush1.bf16.msra.mxu1 %v17395_v32 }
 0x4b9   : > { %2826 = vmatprep.subr.bf16.mxu1 %v16901_v0 }
 0x4bc   : > { %2827 = vmatpush2.bf16.msra.mxu1 %v16998_v16 }
 0x4bd   : > { %2828 = vmatprep.subr.bf16.mxu1 %v16901_v0 }
 0x4c0   : > { %2829 = vmatpush2.bf16.msra.mxu1 %v17402_v33 }
 0x4c1   : > { %2830 = vmatprep.subr.bf16.mxu1 %v16901_v0 }
 0x4c4   : > { %2831 = vmatpush2.bf16.msra.mxu1 %v17407_v34 }
 0x4c5   : > { %2832 = vmatprep.subr.bf16.mxu1 %v16901_v0 }
 0x4c8   : > { %2833 = vmatpush2.bf16.msra.mxu1 %v17412_v35 }
 0x4c9   : > { %2834 = vmatprep.subr.bf16.mxu1 %v16901_v0 }
 0x4cc   : > { %2835 = vmatpush2.bf16.msra.mxu1 %v17417_v38 }
 0x4cd   : > { %3217 = vmatprep.subr.bf16.mxu1 %v15368_v3 }
 0x4cf   : > { %2837 = vmatmul.mubr.bf16.vlgmr.msra.gmra.mxu1 %v2799_v22 }
 0x4d0   : > { %3249 = vmatprep.mubr.bf16.mxu1 %v16901_v0  ;;  %3218 = vmatpush1.bf16.msra.mxu1 %v15366_v25 }
 0x4d1   : > { %3219 = vmatprep.subr.bf16.mxu1 %v15374_v5 }
 0x4d4   : > { %3220 = vmatpush1.bf16.msra.mxu1 %v15372_v11 }
 0x4d5   : > { %3221 = vmatprep.subr.bf16.mxu1 %v15380_v15  ;;  %v15411_v15 = vld [vmem:[%s16968_s30 + $0x8d8] ss:$24 sps:$4 sm:$0xff]  }
 0x4d8   : > { %3222 = vmatpush1.bf16.msra.mxu1 %v15378_v39 }
 0x4d9   : > { %3223 = vmatprep.subr.bf16.mxu1 %v15386_v41  ;;  %v15422_v41 = vld [vmem:[%s16968_s30 + $0x84c] ss:$24 sps:$4 sm:$0xff]  }
 0x4dc   : > { %3224 = vmatpush1.bf16.msra.mxu1 %v15384_v50  ;;  %v15425_v50 = vld [vmem:[%s16968_s30 + $0x81c] ss:$24 sps:$4 sm:$0xff]  }
 0x4dd   : > { %3225 = vmatprep.subr.bf16.mxu1 %v15392_v51  ;;  %v15428_v51 = vld [vmem:[%s16968_s30 + $0x7ec] ss:$24 sps:$4 sm:$0xff]  }
 0x4e0   : > { %3226 = vmatpush1.bf16.msra.mxu1 %v15390_v45  ;;  %v15431_v45 = vld [vmem:[%s16968_s30 + $0x7bc] ss:$24 sps:$4 sm:$0xff]  }
 0x4e1   : > { %3227 = vmatprep.subr.bf16.mxu1 %v15398_v49  ;;  %v15434_v49 = vld [vmem:[%s16968_s30 + $0x78c] ss:$24 sps:$4 sm:$0xff]  }
 0x4e4   : > { %3228 = vmatpush1.bf16.msra.mxu1 %v15396_v53  ;;  %v15432_v53 = vld [vmem:[%s16968_s30 + $0x788] ss:$24 sps:$4 sm:$0xff]  }
 0x4e5   : > { %3229 = vmatprep.subr.bf16.mxu1 %v15404_v54  ;;  %v3278_v54 = vpack.c.bf16 %v3274_v6, %v3274_v6 }
 0x4e8   : > { %3230 = vmatpush1.bf16.msra.mxu1 %v15402_v55  ;;  %v15443_v55 = vld [vmem:[%s16968_s30 + $0xa24] ss:$24 sps:$4 sm:$0xff]  }
 0x4e9   : > { %3231 = vmatprep.subr.bf16.mxu1 %v15410_v9  ;;  %v15444_v9 = vld [vmem:[%s16968_s30 + $0xa30] ss:$24 sps:$4 sm:$0xff]  }
 0x4ec   : > { %3232 = vmatpush1.bf16.msra.mxu1 %v15408_v58  ;;  %v15449_v58 = vld [vmem:[%s16968_s30 + $0x9f4] ss:$24 sps:$4 sm:$0xff]  }
 0x53b   : > { %v2691_v59 = vpop.f32.mrf.mxu1  ;;  %v2773_v60 = vpop.f32.mrf.mxu0 }
 0x53c   : > { %v17553_v17 = vadd.f32 %v2691_v59, %v17455_v8  ;;  %v17556_v18 = vadd.f32 %v2773_v60, %v17458_v10  ;;  %v15447_v59 = vld [vmem:[%s16968_s30 + $0x9f0] ss:$24 sps:$4 sm:$0xff]   ;;  %v15450_v60 = vld [vmem:[%s16968_s30 + $0xa00] ss:$24 sps:$4 sm:$0xff]  }
 0x53d   : > { %v2693_v19 = vpop.f32.mrf.mxu1  ;;  %v2775_v20 = vpop.f32.mrf.mxu0 }
 0x53e   : > { %v17559_v24 = vadd.f32 %v2693_v19, %v17461_v13  ;;  %v17562_v21 = vadd.f32 %v2775_v20, %v17464_v14  ;;  %v15455_v19 = vld [vmem:[%s16968_s30 + $0x9c4] ss:$24 sps:$4 sm:$0xff]   ;;  %v15458_v20 = vld [vmem:[%s16968_s30 + $0x9d4] ss:$24 sps:$4 sm:$0xff]  }
 0x53f   : > { %v2695_v29 = vpop.f32.mrf.mxu1  ;;  %v2777_v22 = vpop.f32.mrf.mxu0 }
 0x540   : > { %v15453_v29 = vld [vmem:[%s16968_s30 + $0x9c0] ss:$24 sps:$4 sm:$0xff]   ;;  %v15456_v22 = vld [vmem:[%s16968_s30 + $0x9d0] ss:$24 sps:$4 sm:$0xff]  }
 0x541   : > { %v2696_v23 = vpop.f32.mrf.mxu1  ;;  %v2778_v2 = vpop.f32.mrf.mxu0 }
 0x542   : > { %v15461_v23 = vld [vmem:[%s16968_s30 + $0x994] ss:$24 sps:$4 sm:$0xff]   ;;  %v15464_v2 = vld [vmem:[%s16968_s30 + $0x9a4] ss:$24 sps:$4 sm:$0xff]  }
 0x55b   : > { %v2732_v25 = vpop.f32.mrf.mxu1 }
 0x55c   : > { %v17565_v8 = vadd.f32 %v2732_v25, %v17467_v46  ;;  %v15416_v46 = vld [vmem:[%s16968_s30 + $0x8ac] ss:$24 sps:$4 sm:$0xff]   ;;  %v15459_v25 = vld [vmem:[%s16968_s30 + $0x990] ss:$24 sps:$4 sm:$0xff]  }
 0x55d   : > { %v2734_v10 = vpop.f32.mrf.mxu1 }
 0x55e   : > { %v17568_v3 = vadd.f32 %v2734_v10, %v17470_v42  ;;  %v15414_v42 = vld [vmem:[%s16968_s30 + $0x8a8] ss:$24 sps:$4 sm:$0xff]  }
 0x55f   : > { %v2736_v13 = vpop.f32.mrf.mxu1  ;;  %v15462_v10 = vld [vmem:[%s16968_s30 + $0x9a0] ss:$24 sps:$4 sm:$0xff]  }
 0x560   : > { %v15467_v13 = vld [vmem:[%s16968_s30 + $0x964] ss:$24 sps:$4 sm:$0xff]  }
 0x561   : > { %v2737_v4 = vpop.f32.mrf.mxu1 }
 0x562   : > { %v15470_v4 = vld [vmem:[%s16968_s30 + $0x974] ss:$24 sps:$4 sm:$0xff]  }
 0x58f   : > { %v2838_v14 = vpop.f32.mrf.mxu1 }
 0x590   : > { %v2839_v5 = vadd.f32 %v17238_v36, %v2838_v14  ;;  %v15419_v36 = vld [vmem:[%s16968_s30 + $0x87c] ss:$24 sps:$4 sm:$0xff]   ;;  %v15465_v14 = vld [vmem:[%s16968_s30 + $0x960] ss:$24 sps:$4 sm:$0xff]  }
 0x591   : > { %v2840_v7 = vpop.f32.mrf.mxu1 }
 0x592   : > { %v2844_v11 = vmax.f32 %v2839_v5, 0.0  ;;  %v15468_v5 = vld [vmem:[%s16968_s30 + $0x970] ss:$24 sps:$4 sm:$0xff]   ;;  %v15473_v7 = vld [vmem:[%s16968_s30 + $0x934] ss:$24 sps:$4 sm:$0xff]  }
 0x593   : > { %v2841_v12 = vpop.f32.mrf.mxu1 }
 0x594   : > { %v2845_v37 = vpack.c.bf16 %v2844_v11, %v2844_v11  ;;  %v15476_v11 = vld [vmem:[%s16968_s30 + $0x944] ss:$24 sps:$4 sm:$0xff]   ;;  %v15471_v12 = vld [vmem:[%s16968_s30 + $0x930] ss:$24 sps:$4 sm:$0xff]  }
 0x595   : > { %v2842_v39 = vpop.f32.mrf.mxu1 }
 0x596   : > { %3168 = vmatmul.mubr.bf16.vlgmr.msra.gmra.mxu0 %v2845_v37  ;;  %3250 = vmatmul.mubr.bf16.vlgmr.msra.gmra.mxu1 %v2845_v37  ;;  %v15482_v39 = vld [vmem:[%s16968_s30 + $0x914] ss:$24 sps:$4 sm:$0xff]  }
 0x597   : > { %3177 = vmatpush1.bf16.msra.mxu0 %v15411_v15  ;;  %3208 = vmatprep.mubr.bf16.mxu0 %v16901_v0  ;;  %v15474_v15 = vld [vmem:[%s16968_s30 + $0x940] ss:$24 sps:$4 sm:$0xff]  }
 0x598   : > { %3178 = vmatprep.subr.bf16.mxu0 %v15416_v46  ;;  %3645 = vmatprep.mubr.bf16.mxu1 %v16901_v0  ;;  %v15477_v46 = vld [vmem:[%s16968_s30 + $0x900] ss:$24 sps:$4 sm:$0xff]  }
 0x59b   : > { %3179 = vmatpush1.bf16.msra.mxu0 %v15414_v42  ;;  %v15480_v42 = vld [vmem:[%s16968_s30 + $0x910] ss:$24 sps:$4 sm:$0xff]  }
 0x59c   : > { %3180 = vmatprep.subr.bf16.mxu0 %v15419_v36  ;;  %v15485_v36 = vld [vmem:[%s16968_s30 + $0xa5c] ss:$24 sps:$4 sm:$0xff]  }
 0x59f   : > { %3181 = vmatpush1.bf16.msra.mxu0 %v15417_v40 }
 0x5a0   : > { %3182 = vmatprep.subr.bf16.mxu0 %v15422_v41 }
 0x5a3   : > { %3183 = vmatpush1.bf16.msra.mxu0 %v15420_v47 }
 0x5a4   : > { %3184 = vmatprep.subr.bf16.mxu0 %v15425_v50 }
 0x5a7   : > { %3185 = vmatpush1.bf16.msra.mxu0 %v15423_v43 }
 0x5a8   : > { %3186 = vmatprep.subr.bf16.mxu0 %v15428_v51 }
 0x5ab   : > { %3187 = vmatpush1.bf16.msra.mxu0 %v15426_v44 }
 0x5ac   : > { %3188 = vmatprep.subr.bf16.mxu0 %v15431_v45 }
 0x5af   : > { %3189 = vmatpush1.bf16.msra.mxu0 %v15429_v48 }
 0x5b0   : > { %3190 = vmatprep.subr.bf16.mxu0 %v15434_v49 }
 0x5b3   : > { %3191 = vmatpush1.bf16.msra.mxu0 %v15432_v53 }
 0x5b4   : > { %3282 = vmatprep.subr.bf16.mxu0 %v16901_v0 }
 0x5b6   : > { %3209 = vmatmul.mubr.bf16.vlgmr.msra.gmra.mxu0 %v2845_v37  ;;  %v15479_v37 = vld [vmem:[%s16968_s30 + $0x904] ss:$24 sps:$4 sm:$0xff]  }
 0x5b7   : > { %3283 = vmatpush1.bf16.msra.mxu0 %v17261_v61  ;;  %13094 = vmatprep.mubr.msk.bf16.mxu0 %vm419_vm0, %v3278_v54  ;;  %v3277_v61 = vpack.c.bf16 %v13093_v52, %v13093_v52 }
 0x5b8   : > { %3284 = vmatprep.subr.bf16.mxu0 %v16901_v0 }
 0x5bb   : > { %3285 = vmatpush1.bf16.msra.mxu0 %v17267_v62  ;;  %v15435_v62 = vld [vmem:[%s16968_s30 + $0xa50] ss:$24 sps:$4 sm:$0xff]  }
 0x5bc   : > { %3286 = vmatprep.subr.bf16.mxu0 %v16901_v0 }
 0x5bf   : > { %3287 = vmatpush1.bf16.msra.mxu0 %v17272_v63  ;;  %v15437_v63 = vld [vmem:[%s16968_s30 + $0xa54] ss:$24 sps:$4 sm:$0xff]  }
 0x5c0   : > { %3288 = vmatprep.subr.bf16.mxu0 %v16901_v0  ;;  %3613 = vmatprep.subr.bf16.mxu1 %v15437_v63 }
 0x5c1   : > { %3614 = vmatpush1.bf16.msra.mxu1 %v15435_v62 }
 0x5c2   : > { %3615 = vmatprep.subr.bf16.mxu1 %v15443_v55 }
 0x5c3   : > { %3289 = vmatpush1.bf16.msra.mxu0 %v17277_v1  ;;  %v15438_v1 = vld [vmem:[%s16968_s30 + $0xa60] ss:$24 sps:$4 sm:$0xff]  }
 0x5c4   : > { %3290 = vmatprep.subr.bf16.mxu0 %v16901_v0 }
 0x5c5   : > { %3616 = vmatpush1.bf16.msra.mxu1 %v15441_v26  ;;  %v15488_v26 = vld [vmem:[%s16968_s30 + $0xa2c] ss:$24 sps:$4 sm:$0xff]  }
 0x5c6   : > { %3617 = vmatprep.subr.bf16.mxu1 %v15449_v58  ;;  %v15491_v58 = vld [vmem:[%s16968_s30 + $0x9fc] ss:$24 sps:$4 sm:$0xff]  }
 0x5c7   : > { %3291 = vmatpush1.bf16.msra.mxu0 %v17380_v27 }
 0x5c8   : > { %3292 = vmatprep.subr.bf16.mxu0 %v16901_v0 }
 0x5c9   : > { %3618 = vmatpush1.bf16.msra.mxu1 %v15447_v59  ;;  %v15494_v59 = vld [vmem:[%s16968_s30 + $0x9cc] ss:$24 sps:$4 sm:$0xff]  }
 0x5ca   : > { %3619 = vmatprep.subr.bf16.mxu1 %v15455_v19  ;;  %v15497_v19 = vld [vmem:[%s16968_s30 + $0x99c] ss:$24 sps:$4 sm:$0xff]  }
 0x5cb   : > { %3293 = vmatpush1.bf16.msra.mxu0 %v17385_v28 }
 0x5cc   : > { %3294 = vmatprep.subr.bf16.mxu0 %v16901_v0 }
 0x5cd   : > { %3620 = vmatpush1.bf16.msra.mxu1 %v15453_v29  ;;  %v15500_v29 = vld [vmem:[%s16968_s30 + $0x96c] ss:$24 sps:$4 sm:$0xff]  }
 0x5ce   : > { %3621 = vmatprep.subr.bf16.mxu1 %v15461_v23  ;;  %v15503_v23 = vld [vmem:[%s16968_s30 + $0x93c] ss:$24 sps:$4 sm:$0xff]  }
 0x5cf   : > { %3295 = vmatpush1.bf16.msra.mxu0 %v17390_v31 }
 0x5d0   : > { %3296 = vmatprep.subr.bf16.mxu0 %v16901_v0 }
 0x5d1   : > { %3622 = vmatpush1.bf16.msra.mxu1 %v15459_v25  ;;  %v15506_v25 = vld [vmem:[%s16968_s30 + $0x90c] ss:$24 sps:$4 sm:$0xff]  }
 0x5d2   : > { %3623 = vmatprep.subr.bf16.mxu1 %v15467_v13  ;;  %v15504_v13 = vld [vmem:[%s16968_s30 + $0x908] ss:$24 sps:$4 sm:$0xff]  }
 0x5d3   : > { %3297 = vmatpush1.bf16.msra.mxu0 %v17395_v32 }
 0x5d4   : > { %3304 = vmatprep.subr.bf16.mxu0 %v16901_v0 }
 0x5d5   : > { %3624 = vmatpush1.bf16.msra.mxu1 %v15465_v14 }
 0x5d6   : > { %3625 = vmatprep.subr.bf16.mxu1 %v15473_v7  ;;  %v17698_v7 = vld [vmem:[%s16949_s23 + $0x30] sm:$0xff]  }
 0x5d7   : > { %3305 = vmatpush2.bf16.msra.mxu0 %v16998_v16 }
 0x5d8   : > { %3306 = vmatprep.subr.bf16.mxu0 %v16901_v0 }
 0x5d9   : > { %3626 = vmatpush1.bf16.msra.mxu1 %v15471_v12  ;;  %v17708_v12 = vld [vmem:[%s16949_s23 + $0x20] sm:$0xff]  }
 0x5da   : > { %3627 = vmatprep.subr.bf16.mxu1 %v15479_v37  ;;  %v15521_v37 = vld [vmem:[%s16968_s30 + $0xb74] ss:$24 sps:$4 sm:$0xff]  }
 0x5db   : > { %3307 = vmatpush2.bf16.msra.mxu0 %v17402_v33 }
 0x5dc   : > { %3308 = vmatprep.subr.bf16.mxu0 %v16901_v0 }
 0x5dd   : > { %3628 = vmatpush1.bf16.msra.mxu1 %v15477_v46  ;;  %v15524_v46 = vld [vmem:[%s16968_s30 + $0xb84] ss:$24 sps:$4 sm:$0xff]  }
 0x5de   : > { %3654 = vmatprep.subr.bf16.mxu1 %v15485_v36  ;;  %v15527_v36 = vld [vmem:[%s16968_s30 + $0xb44] ss:$24 sps:$4 sm:$0xff]  }
 0x5df   : > { %3309 = vmatpush2.bf16.msra.mxu0 %v17407_v34 }
 0x5e0   : > { %3310 = vmatprep.subr.bf16.mxu0 %v16901_v0 }
 0x5e3   : > { %3311 = vmatpush2.bf16.msra.mxu0 %v17412_v35 }
 0x5e4   : > { %3312 = vmatprep.subr.bf16.mxu0 %v16901_v0 }
 0x5e7   : > { %3313 = vmatpush2.bf16.msra.mxu0 %v17417_v38 }
 0x5e8   : > { %3695 = vmatprep.subr.bf16.mxu0 %v15440_v57 }
 0x5ea   : > { %3315 = vmatmul.mubr.bf16.vlgmr.msra.gmra.mxu0 %v3277_v61 }
 0x5eb   : > { %3727 = vmatprep.mubr.bf16.mxu0 %v16901_v0  ;;  %3696 = vmatpush1.bf16.msra.mxu0 %v15438_v1 }
 0x5ec   : > { %3697 = vmatprep.subr.bf16.mxu0 %v15446_v56 }
 0x5ef   : > { %3698 = vmatpush1.bf16.msra.mxu0 %v15444_v9  ;;  %v15486_v9 = vld [vmem:[%s16968_s30 + $0xa28] ss:$24 sps:$4 sm:$0xff]  }
 0x5f0   : > { %3699 = vmatprep.subr.bf16.mxu0 %v15452_v30  ;;  %v15489_v30 = vld [vmem:[%s16968_s30 + $0x9f8] ss:$24 sps:$4 sm:$0xff]  }
 0x5f3   : > { %3700 = vmatpush1.bf16.msra.mxu0 %v15450_v60  ;;  %v15492_v60 = vld [vmem:[%s16968_s30 + $0x9c8] ss:$24 sps:$4 sm:$0xff]  }
 0x5f4   : > { %3701 = vmatprep.subr.bf16.mxu0 %v15458_v20  ;;  %v15495_v20 = vld [vmem:[%s16968_s30 + $0x998] ss:$24 sps:$4 sm:$0xff]  }
 0x5f7   : > { %3702 = vmatpush1.bf16.msra.mxu0 %v15456_v22  ;;  %v15498_v22 = vld [vmem:[%s16968_s30 + $0x968] ss:$24 sps:$4 sm:$0xff]  }
 0x5f8   : > { %3703 = vmatprep.subr.bf16.mxu0 %v15464_v2  ;;  %v15501_v2 = vld [vmem:[%s16968_s30 + $0x938] ss:$24 sps:$4 sm:$0xff]  }
 0x5fb   : > { %3704 = vmatpush1.bf16.msra.mxu0 %v15462_v10  ;;  %v13192_v10 = vld.sshfl [vmem:[%s16963_s27 + $0x1c] sm:$0x33 pattern:$0x76325410] }
 0x5fc   : > { %3705 = vmatprep.subr.bf16.mxu0 %v15470_v4  ;;  %v3752_v4 = vcombine.high %v13192_v10, %v13192_v10 }
 0x5fe   : > { %v3756_v14 = vpack.c.bf16 %v3752_v4, %v3752_v4 }
 0x5ff   : > { %3706 = vmatpush1.bf16.msra.mxu0 %v15468_v5  ;;  %v17692_v5 = vld [vmem:[%s16949_s23 + $0x38] sm:$0xff]  }
 0x600   : > { %3707 = vmatprep.subr.bf16.mxu0 %v15476_v11  ;;  %v17703_v11 = vld [vmem:[%s16949_s23 + $0x28] sm:$0xff]  }
 0x603   : > { %3708 = vmatpush1.bf16.msra.mxu0 %v15474_v15  ;;  %v15513_v15 = vld [vmem:[%s16968_s30 + $0xba0] ss:$24 sps:$4 sm:$0xff]  }
 0x604   : > { %3709 = vmatprep.subr.bf16.mxu0 %v15482_v39  ;;  %v15519_v39 = vld [vmem:[%s16968_s30 + $0xb70] ss:$24 sps:$4 sm:$0xff]  }
 0x607   : > { %3710 = vmatpush1.bf16.msra.mxu0 %v15480_v42  ;;  %v15522_v42 = vld [vmem:[%s16968_s30 + $0xb80] ss:$24 sps:$4 sm:$0xff]  }
 0x656   : > { %v3169_v40 = vpop.f32.mrf.mxu0  ;;  %v3251_v41 = vpop.f32.mrf.mxu1 }
 0x657   : > { %v17651_v47 = vadd.f32 %v3169_v40, %v17553_v17  ;;  %v17654_v50 = vadd.f32 %v3251_v41, %v17556_v18  ;;  %v15530_v40 = vld [vmem:[%s16968_s30 + $0xb54] ss:$24 sps:$4 sm:$0xff]   ;;  %v15525_v41 = vld [vmem:[%s16968_s30 + $0xb40] ss:$24 sps:$4 sm:$0xff]  }
 0x658   : > { %v3171_v43 = vpop.f32.mrf.mxu0  ;;  %v3253_v51 = vpop.f32.mrf.mxu1 }
 0x659   : > { %v17657_v44 = vadd.f32 %v3171_v43, %v17559_v24  ;;  %v17660_v45 = vadd.f32 %v3253_v51, %v17562_v21  ;;  %v17669_v21 = vld [vmem:[%s17059_s8] ss:$0 sm:$0xff]  ;;  %v15528_v43 = vld [vmem:[%s16968_s30 + $0xb50] ss:$24 sps:$4 sm:$0xff]   ;;  %v15533_v51 = vld [vmem:[%s16968_s30 + $0xb14] ss:$24 sps:$4 sm:$0xff]  }
 0x65a   : > { %v3173_v48 = vpop.f32.mrf.mxu0  ;;  %v3255_v49 = vpop.f32.mrf.mxu1 }
 0x65b   : > { %v15536_v48 = vld [vmem:[%s16968_s30 + $0xb24] ss:$24 sps:$4 sm:$0xff]   ;;  %v15531_v49 = vld [vmem:[%s16968_s30 + $0xb10] ss:$24 sps:$4 sm:$0xff]  }
 0x65c   : > { %v3174_v52 = vpop.f32.mrf.mxu0  ;;  %v3256_v53 = vpop.f32.mrf.mxu1 }
 0x65d   : > { %v15534_v52 = vld [vmem:[%s16968_s30 + $0xb20] ss:$24 sps:$4 sm:$0xff]   ;;  %v15539_v53 = vld [vmem:[%s16968_s30 + $0xae4] ss:$24 sps:$4 sm:$0xff]  }
 0x676   : > { %v3210_v17 = vpop.f32.mrf.mxu0 }
 0x677   : > { %v17663_v6 = vadd.f32 %v3210_v17, %v17565_v8  ;;  %v15483_v8 = vld [vmem:[%s16968_s30 + $0xa58] ss:$24 sps:$4 sm:$0xff]   ;;  %v15542_v17 = vld [vmem:[%s16968_s30 + $0xaf4] ss:$24 sps:$4 sm:$0xff]  }
 0x678   : > { %v3212_v18 = vpop.f32.mrf.mxu0 }
 0x679   : > { %v17666_v54 = vadd.f32 %v3212_v18, %v17568_v3  ;;  %v15537_v18 = vld [vmem:[%s16968_s30 + $0xae0] ss:$24 sps:$4 sm:$0xff]  }
 0x67a   : > { %v3214_v24 = vpop.f32.mrf.mxu0 }
 0x67b   : > { %v15540_v24 = vld [vmem:[%s16968_s30 + $0xaf0] ss:$24 sps:$4 sm:$0xff]  }
 0x67c   : > { %v3215_v61 = vpop.f32.mrf.mxu0 }
 0x67d   : > { %v15545_v61 = vld [vmem:[%s16968_s30 + $0xab4] ss:$24 sps:$4 sm:$0xff]  }
 0x6aa   : > { %v3316_v62 = vpop.f32.mrf.mxu0 }
 0x6ab   : > { %v3317_v63 = vadd.f32 %v17669_v21, %v3316_v62  ;;  %v15548_v62 = vld [vmem:[%s16968_s30 + $0xac4] ss:$24 sps:$4 sm:$0xff]  }
 0x6ac   : > { %v3318_v1 = vpop.f32.mrf.mxu0 }
 0x6ad   : > { %v3322_v57 = vmax.f32 %v3317_v63, 0.0  ;;  %v15543_v63 = vld [vmem:[%s16968_s30 + $0xab0] ss:$24 sps:$4 sm:$0xff]   ;;  %v15546_v1 = vld [vmem:[%s16968_s30 + $0xac0] ss:$24 sps:$4 sm:$0xff]  }
 0x6ae   : > { %v3319_v55 = vpop.f32.mrf.mxu0 }
 0x6af   : > { %v3323_v56 = vpack.c.bf16 %v3322_v57, %v3322_v57  ;;  %v15551_v57 = vld [vmem:[%s16968_s30 + $0xa84] ss:$24 sps:$4 sm:$0xff]   ;;  %v15549_v55 = vld [vmem:[%s16968_s30 + $0xa80] ss:$24 sps:$4 sm:$0xff]  }
 0x6b0   : > { %v3320_v3 = vpop.f32.mrf.mxu0 }
 0x6b1   : > { %3646 = vmatmul.mubr.bf16.vlgmr.msra.gmra.mxu1 %v3323_v56  ;;  %3728 = vmatmul.mubr.bf16.vlgmr.msra.gmra.mxu0 %v3323_v56 }
 0x6b2   : > { %3655 = vmatpush1.bf16.msra.mxu1 %v15483_v8  ;;  %3686 = vmatprep.mubr.bf16.mxu1 %v16901_v0  ;;  %v15554_v8 = vld [vmem:[%s16968_s30 + $0xa94] ss:$24 sps:$4 sm:$0xff]  }
 0x6b3   : > { %3656 = vmatprep.subr.bf16.mxu1 %v15488_v26  ;;  %4123 = vmatprep.mubr.bf16.mxu0 %v16901_v0  ;;  %v15557_v26 = vld [vmem:[%s16968_s30 + $0xbdc] ss:$24 sps:$4 sm:$0xff]  }
 0x6b6   : > { %3657 = vmatpush1.bf16.msra.mxu1 %v15486_v9 }
 0x6b7   : > { %3658 = vmatprep.subr.bf16.mxu1 %v15491_v58 }
 0x6ba   : > { %3659 = vmatpush1.bf16.msra.mxu1 %v15489_v30 }
 0x6bb   : > { %3660 = vmatprep.subr.bf16.mxu1 %v15494_v59 }
 0x6be   : > { %3661 = vmatpush1.bf16.msra.mxu1 %v15492_v60 }
 0x6bf   : > { %3662 = vmatprep.subr.bf16.mxu1 %v15497_v19 }
 0x6c2   : > { %3663 = vmatpush1.bf16.msra.mxu1 %v15495_v20 }
 0x6c3   : > { %3664 = vmatprep.subr.bf16.mxu1 %v15500_v29 }
 0x6c6   : > { %3665 = vmatpush1.bf16.msra.mxu1 %v15498_v22 }
 0x6c7   : > { %3666 = vmatprep.subr.bf16.mxu1 %v15503_v23 }
 0x6ca   : > { %3667 = vmatpush1.bf16.msra.mxu1 %v15501_v2 }
 0x6cb   : > { %3668 = vmatprep.subr.bf16.mxu1 %v15506_v25 }
 0x6ce   : > { %3669 = vmatpush1.bf16.msra.mxu1 %v15504_v13 }
 0x6cf   : > { %3760 = vmatprep.subr.bf16.mxu1 %v16901_v0 }
 0x6d1   : > { %3687 = vmatmul.mubr.bf16.vlgmr.msra.gmra.mxu1 %v3323_v56  ;;  %v15552_v56 = vld [vmem:[%s16968_s30 + $0xa90] ss:$24 sps:$4 sm:$0xff]  }
 0x6d2   : > { %3761 = vmatpush1.bf16.msra.mxu1 %v17692_v5  ;;  %13193 = vmatprep.mubr.msk.bf16.mxu1 %vm419_vm0, %v3756_v14 }
 0x6d3   : > { %3762 = vmatprep.subr.bf16.mxu1 %v16901_v0 }
 0x6d6   : > { %3763 = vmatpush1.bf16.msra.mxu1 %v17698_v7 }
 0x6d7   : > { %3764 = vmatprep.subr.bf16.mxu1 %v16901_v0 }
 0x6da   : > { %3765 = vmatpush1.bf16.msra.mxu1 %v17703_v11 }
 0x6db   : > { %3766 = vmatprep.subr.bf16.mxu1 %v16901_v0 }
 0x6de   : > { %3767 = vmatpush1.bf16.msra.mxu1 %v17708_v12 }
 0x6df   : > { %3768 = vmatprep.subr.bf16.mxu1 %v16901_v0 }
 0x6e2   : > { %3769 = vmatpush1.bf16.msra.mxu1 %v17380_v27  ;;  %v3755_v27 = vpack.c.bf16 %v13192_v10, %v13192_v10 }
 0x6e3   : > { %3770 = vmatprep.subr.bf16.mxu1 %v16901_v0 }
 0x6e6   : > { %3771 = vmatpush1.bf16.msra.mxu1 %v17385_v28  ;;  %v15507_v28 = vld [vmem:[%s16968_s30 + $0xbd0] ss:$24 sps:$4 sm:$0xff]  }
 0x6e7   : > { %3772 = vmatprep.subr.bf16.mxu1 %v16901_v0 }
 0x6ea   : > { %3773 = vmatpush1.bf16.msra.mxu1 %v17390_v31  ;;  %v15509_v31 = vld [vmem:[%s16968_s30 + $0xbd4] ss:$24 sps:$4 sm:$0xff]  }
 0x6eb   : > { %3774 = vmatprep.subr.bf16.mxu1 %v16901_v0  ;;  %4091 = vmatprep.subr.bf16.mxu0 %v15509_v31  ;;  %v15555_v31 = vld [vmem:[%s16968_s30 + $0xbd8] ss:$24 sps:$4 sm:$0xff]  }
 0x6ec   : > { %4092 = vmatpush1.bf16.msra.mxu0 %v15507_v28 }
 0x6ee   : > { %3775 = vmatpush1.bf16.msra.mxu1 %v17395_v32  ;;  %v15510_v32 = vld [vmem:[%s16968_s30 + $0xbe0] ss:$24 sps:$4 sm:$0xff]  }
 0x6ef   : > { %3782 = vmatprep.subr.bf16.mxu1 %v16901_v0 }
 0x6f2   : > { %3783 = vmatpush2.bf16.msra.mxu1 %v16998_v16 }
 0x6f3   : > { %3784 = vmatprep.subr.bf16.mxu1 %v16901_v0 }
 0x6f6   : > { %3785 = vmatpush2.bf16.msra.mxu1 %v17402_v33  ;;  %v15512_v33 = vld [vmem:[%s16968_s30 + $0xbe4] ss:$24 sps:$4 sm:$0xff]  }
 0x6f7   : > { %3786 = vmatprep.subr.bf16.mxu1 %v16901_v0 }
 0x6fa   : > { %3787 = vmatpush2.bf16.msra.mxu1 %v17407_v34  ;;  %v15515_v34 = vld [vmem:[%s16968_s30 + $0xba4] ss:$24 sps:$4 sm:$0xff]  }
 0x6fb   : > { %3788 = vmatprep.subr.bf16.mxu1 %v16901_v0  ;;  %4093 = vmatprep.subr.bf16.mxu0 %v15515_v34  ;;  %v15563_v34 = vld [vmem:[%s16968_s30 + $0xb7c] ss:$24 sps:$4 sm:$0xff]  }
 0x6fc   : > { %4094 = vmatpush1.bf16.msra.mxu0 %v15513_v15  ;;  %v15566_v15 = vld [vmem:[%s16968_s30 + $0xb4c] ss:$24 sps:$4 sm:$0xff]  }
 0x6fd   : > { %4095 = vmatprep.subr.bf16.mxu0 %v15521_v37  ;;  %v15569_v37 = vld [vmem:[%s16968_s30 + $0xb1c] ss:$24 sps:$4 sm:$0xff]  }
 0x6fe   : > { %3789 = vmatpush2.bf16.msra.mxu1 %v17412_v35  ;;  %v15518_v35 = vld [vmem:[%s16968_s30 + $0xbb4] ss:$24 sps:$4 sm:$0xff]  }
 0x6ff   : > { %3790 = vmatprep.subr.bf16.mxu1 %v16901_v0 }
 0x700   : > { %4096 = vmatpush1.bf16.msra.mxu0 %v15519_v39  ;;  %v15572_v39 = vld [vmem:[%s16968_s30 + $0xaec] ss:$24 sps:$4 sm:$0xff]  }
 0x701   : > { %4097 = vmatprep.subr.bf16.mxu0 %v15527_v36  ;;  %v15575_v36 = vld [vmem:[%s16968_s30 + $0xabc] ss:$24 sps:$4 sm:$0xff]  }
 0x702   : > { %3791 = vmatpush2.bf16.msra.mxu1 %v17417_v38  ;;  %v15516_v38 = vld [vmem:[%s16968_s30 + $0xbb0] ss:$24 sps:$4 sm:$0xff]  }
 0x703   : > { %4173 = vmatprep.subr.bf16.mxu1 %v15512_v33 }
 0x704   : > { %4098 = vmatpush1.bf16.msra.mxu0 %v15525_v41  ;;  %v15578_v41 = vld [vmem:[%s16968_s30 + $0xa8c] ss:$24 sps:$4 sm:$0xff]  }
 0x705   : > { %3793 = vmatmul.mubr.bf16.vlgmr.msra.gmra.mxu1 %v3755_v27  ;;  %4099 = vmatprep.subr.bf16.mxu0 %v15533_v51  ;;  %v15576_v51 = vld [vmem:[%s16968_s30 + $0xa88] ss:$24 sps:$4 sm:$0xff]  }
 0x706   : > { %4205 = vmatprep.mubr.bf16.mxu1 %v16901_v0  ;;  %4174 = vmatpush1.bf16.msra.mxu1 %v15510_v32 }
 0x707   : > { %4175 = vmatprep.subr.bf16.mxu1 %v15518_v35  ;;  %v15561_v35 = vld [vmem:[%s16968_s30 + $0xb78] ss:$24 sps:$4 sm:$0xff]  }
 0x708   : > { %4100 = vmatpush1.bf16.msra.mxu0 %v15531_v49 }
 0x709   : > { %4101 = vmatprep.subr.bf16.mxu0 %v15539_v53  ;;  %v17816_v53 = vld [vmem:[%s16949_s23 + $0x10] sm:$0xff]  }
 0x70a   : > { %4176 = vmatpush1.bf16.msra.mxu1 %v15516_v38  ;;  %v15564_v38 = vld [vmem:[%s16968_s30 + $0xb48] ss:$24 sps:$4 sm:$0xff]  }
 0x70b   : > { %4177 = vmatprep.subr.bf16.mxu1 %v15524_v46  ;;  %v15567_v46 = vld [vmem:[%s16968_s30 + $0xb18] ss:$24 sps:$4 sm:$0xff]  }
 0x70c   : > { %4102 = vmatpush1.bf16.msra.mxu0 %v15537_v18  ;;  %v17826_v18 = vld [vmem:[%s16949_s23] sm:$0xff]  }
 0x70d   : > { %4103 = vmatprep.subr.bf16.mxu0 %v15545_v61  ;;  %v17838_v61 = vld [vmem:[%s16949_s23 + $0x50] sm:$0xff]  }
 0x70e   : > { %4178 = vmatpush1.bf16.msra.mxu1 %v15522_v42  ;;  %v15570_v42 = vld [vmem:[%s16968_s30 + $0xae8] ss:$24 sps:$4 sm:$0xff]  }
 0x70f   : > { %4179 = vmatprep.subr.bf16.mxu1 %v15530_v40  ;;  %v15573_v40 = vld [vmem:[%s16968_s30 + $0xab8] ss:$24 sps:$4 sm:$0xff]  }
 0x710   : > { %4104 = vmatpush1.bf16.msra.mxu0 %v15543_v63 }
 0x711   : > { %4105 = vmatprep.subr.bf16.mxu0 %v15551_v57  ;;  %v15579_v57 = vld [vmem:[%s16968_s30 + $0xd50] ss:$24 sps:$4 sm:$0xff]  }
 0x712   : > { %4180 = vmatpush1.bf16.msra.mxu1 %v15528_v43  ;;  %v13291_v43 = vld.sshfl [vmem:[%s16963_s27 + $0x20] sm:$0x33 pattern:$0x76325410] }
 0x713   : > { %4181 = vmatprep.subr.bf16.mxu1 %v15536_v48  ;;  %v4230_v48 = vcombine.high %v13291_v43, %v13291_v43  ;;  %v4233_v63 = vpack.c.bf16 %v13291_v43, %v13291_v43 }
 0x714   : > { %4106 = vmatpush1.bf16.msra.mxu0 %v15549_v55  ;;  %v15581_v55 = vld [vmem:[%s16968_s30 + $0xd54] ss:$24 sps:$4 sm:$0xff]  }
 0x715   : > { %4132 = vmatprep.subr.bf16.mxu0 %v15557_v26  ;;  %v4234_v49 = vpack.c.bf16 %v4230_v48, %v4230_v48  ;;  %v15587_v26 = vld [vmem:[%s16968_s30 + $0xd24] ss:$24 sps:$4 sm:$0xff]  }
 0x716   : > { %4182 = vmatpush1.bf16.msra.mxu1 %v15534_v52  ;;  %v17811_v52 = vld [vmem:[%s16949_s23 + $0x18] sm:$0xff]  }
 0x717   : > { %4183 = vmatprep.subr.bf16.mxu1 %v15542_v17  ;;  %v17821_v17 = vld [vmem:[%s16949_s23 + $0x8] sm:$0xff]  }
 0x71a   : > { %4184 = vmatpush1.bf16.msra.mxu1 %v15540_v24  ;;  %v17833_v24 = vld [vmem:[%s16949_s23 + $0x58] sm:$0xff]  }
 0x71b   : > { %4185 = vmatprep.subr.bf16.mxu1 %v15548_v62  ;;  %v17843_v62 = vld [vmem:[%s16949_s23 + $0x48] sm:$0xff]  }
 0x71e   : > { %4186 = vmatpush1.bf16.msra.mxu1 %v15546_v1  ;;  %v17848_v1 = vld [vmem:[%s16949_s23 + $0x40] sm:$0xff]  }
 0x71f   : > { %4187 = vmatprep.subr.bf16.mxu1 %v15554_v8  ;;  %v15582_v8 = vld [vmem:[%s16968_s30 + $0xd60] ss:$24 sps:$4 sm:$0xff]  }
 0x722   : > { %4188 = vmatpush1.bf16.msra.mxu1 %v15552_v56  ;;  %v15584_v56 = vld [vmem:[%s16968_s30 + $0xd64] ss:$24 sps:$4 sm:$0xff]  }
 0x723   : > { %4569 = vmatprep.subr.bf16.mxu1 %v15581_v55 }
 0x771   : > { %v3647_v3 = vpop.f32.mrf.mxu1  ;;  %v3729_v9 = vpop.f32.mrf.mxu0 }
 0x772   : > { %v17764_v58 = vadd.f32 %v3647_v3, %v17651_v47  ;;  %v17767_v30 = vadd.f32 %v3729_v9, %v17654_v50  ;;  %v15590_v3 = vld [vmem:[%s16968_s30 + $0xd34] ss:$24 sps:$4 sm:$0xff]   ;;  %v15585_v9 = vld [vmem:[%s16968_s30 + $0xd20] ss:$24 sps:$4 sm:$0xff]  }
 0x773   : > { %v3649_v59 = vpop.f32.mrf.mxu1  ;;  %v3731_v60 = vpop.f32.mrf.mxu0 }
 0x774   : > { %v17770_v19 = vadd.f32 %v3649_v59, %v17657_v44  ;;  %v17773_v20 = vadd.f32 %v3731_v60, %v17660_v45  ;;  %v15588_v59 = vld [vmem:[%s16968_s30 + $0xd30] ss:$24 sps:$4 sm:$0xff]   ;;  %v15593_v60 = vld [vmem:[%s16968_s30 + $0xcf4] ss:$24 sps:$4 sm:$0xff]  }
 0x775   : > { %v3651_v29 = vpop.f32.mrf.mxu1  ;;  %v3733_v22 = vpop.f32.mrf.mxu0 }
 0x776   : > { %v15596_v29 = vld [vmem:[%s16968_s30 + $0xd04] ss:$24 sps:$4 sm:$0xff]   ;;  %v15591_v22 = vld [vmem:[%s16968_s30 + $0xcf0] ss:$24 sps:$4 sm:$0xff]  }
 0x777   : > { %v3652_v23 = vpop.f32.mrf.mxu1  ;;  %v3734_v2 = vpop.f32.mrf.mxu0 }
 0x778   : > { %v15594_v23 = vld [vmem:[%s16968_s30 + $0xd00] ss:$24 sps:$4 sm:$0xff]   ;;  %v15599_v2 = vld [vmem:[%s16968_s30 + $0xcc4] ss:$24 sps:$4 sm:$0xff]  }
 0x791   : > { %v3688_v25 = vpop.f32.mrf.mxu1 }
 0x792   : > { %v17776_v47 = vadd.f32 %v3688_v25, %v17663_v6  ;;  %v15560_v6 = vld [vmem:[%s16968_s30 + $0xbac] ss:$24 sps:$4 sm:$0xff]  }
 0x793   : > { %v3690_v50 = vpop.f32.mrf.mxu1  ;;  %v15602_v25 = vld [vmem:[%s16968_s30 + $0xcd4] ss:$24 sps:$4 sm:$0xff]  }
 0x794   : > { %v17779_v10 = vadd.f32 %v3690_v50, %v17666_v54  ;;  %v15558_v54 = vld [vmem:[%s16968_s30 + $0xba8] ss:$24 sps:$4 sm:$0xff]  }
 0x795   : > { %v3692_v44 = vpop.f32.mrf.mxu1  ;;  %v15597_v50 = vld [vmem:[%s16968_s30 + $0xcc0] ss:$24 sps:$4 sm:$0xff]  }
 0x796   : > { %v15600_v44 = vld [vmem:[%s16968_s30 + $0xcd0] ss:$24 sps:$4 sm:$0xff]  }
 0x797   : > { %v3693_v13 = vpop.f32.mrf.mxu1 }
 0x798   : > { %v15605_v13 = vld [vmem:[%s16968_s30 + $0xc94] ss:$24 sps:$4 sm:$0xff]  }
 0x7c5   : > { %v3794_v45 = vpop.f32.mrf.mxu1 }
 0x7c6   : > { %v3795_v4 = vadd.f32 %v17669_v21, %v3794_v45  ;;  %v15608_v45 = vld [vmem:[%s16968_s30 + $0xca4] ss:$24 sps:$4 sm:$0xff]  }
 0x7c7   : > { %v3796_v14 = vpop.f32.mrf.mxu1 }
 0x7c8   : > { %v3800_v27 = vmax.f32 %v3795_v4, 0.0  ;;  %v15603_v4 = vld [vmem:[%s16968_s30 + $0xc90] ss:$24 sps:$4 sm:$0xff]   ;;  %v15606_v14 = vld [vmem:[%s16968_s30 + $0xca0] ss:$24 sps:$4 sm:$0xff]  }
 0x7c9   : > { %v3797_v28 = vpop.f32.mrf.mxu1 }
 0x7ca   : > { %v3801_v32 = vpack.c.bf16 %v3800_v27, %v3800_v27  ;;  %v15611_v27 = vld [vmem:[%s16968_s30 + $0xc64] ss:$24 sps:$4 sm:$0xff]   ;;  %v15614_v28 = vld [vmem:[%s16968_s30 + $0xc74] ss:$24 sps:$4 sm:$0xff]  }
 0x7cb   : > { %v3798_v33 = vpop.f32.mrf.mxu1 }
 0x7cc   : > { %4124 = vmatmul.mubr.bf16.vlgmr.msra.gmra.mxu0 %v3801_v32  ;;  %4206 = vmatmul.mubr.bf16.vlgmr.msra.gmra.mxu1 %v3801_v32  ;;  %v15620_v33 = vld [vmem:[%s16968_s30 + $0xc44] ss:$24 sps:$4 sm:$0xff]  }
 0x7cd   : > { %4133 = vmatpush1.bf16.msra.mxu0 %v15555_v31  ;;  %4164 = vmatprep.mubr.bf16.mxu0 %v16901_v0  ;;  %v15609_v31 = vld [vmem:[%s16968_s30 + $0xc60] ss:$24 sps:$4 sm:$0xff]  }
 0x7ce   : > { %4134 = vmatprep.subr.bf16.mxu0 %v15560_v6  ;;  %4601 = vmatprep.mubr.bf16.mxu1 %v16901_v0  ;;  %v15617_v6 = vld [vmem:[%s16968_s30 + $0xc34] ss:$24 sps:$4 sm:$0xff]  }
 0x7cf   : > { %4570 = vmatpush1.bf16.msra.mxu1 %v15579_v57 }
 0x7d0   : > { %4571 = vmatprep.subr.bf16.mxu1 %v15587_v26 }
 0x7d1   : > { %4135 = vmatpush1.bf16.msra.mxu0 %v15558_v54  ;;  %v15615_v54 = vld [vmem:[%s16968_s30 + $0xc30] ss:$24 sps:$4 sm:$0xff]  }
 0x7d2   : > { %4136 = vmatprep.subr.bf16.mxu0 %v15563_v34  ;;  %v15618_v34 = vld [vmem:[%s16968_s30 + $0xc40] ss:$24 sps:$4 sm:$0xff]  }
 0x7d3   : > { %4572 = vmatpush1.bf16.msra.mxu1 %v15585_v9 }
 0x7d4   : > { %4573 = vmatprep.subr.bf16.mxu1 %v15593_v60 }
 0x7d5   : > { %4137 = vmatpush1.bf16.msra.mxu0 %v15561_v35  ;;  %v15623_v35 = vld [vmem:[%s16968_s30 + $0xc04] ss:$24 sps:$4 sm:$0xff]  }
 0x7d6   : > { %4138 = vmatprep.subr.bf16.mxu0 %v15566_v15  ;;  %v15621_v15 = vld [vmem:[%s16968_s30 + $0xc00] ss:$24 sps:$4 sm:$0xff]  }
 0x7d7   : > { %4574 = vmatpush1.bf16.msra.mxu1 %v15591_v22 }
 0x7d8   : > { %4575 = vmatprep.subr.bf16.mxu1 %v15599_v2  ;;  %v15635_v2 = vld [vmem:[%s16968_s30 + $0xcfc] ss:$24 sps:$4 sm:$0xff]  }
 0x7d9   : > { %4139 = vmatpush1.bf16.msra.mxu0 %v15564_v38  ;;  %v15626_v38 = vld [vmem:[%s16968_s30 + $0xc14] ss:$24 sps:$4 sm:$0xff]  }
 0x7da   : > { %4140 = vmatprep.subr.bf16.mxu0 %v15569_v37  ;;  %v15624_v37 = vld [vmem:[%s16968_s30 + $0xc10] ss:$24 sps:$4 sm:$0xff]  }
 0x7db   : > { %4576 = vmatpush1.bf16.msra.mxu1 %v15597_v50  ;;  %v15638_v50 = vld [vmem:[%s16968_s30 + $0xccc] ss:$24 sps:$4 sm:$0xff]  }
 0x7dc   : > { %4577 = vmatprep.subr.bf16.mxu1 %v15605_v13  ;;  %v15641_v13 = vld [vmem:[%s16968_s30 + $0xc9c] ss:$24 sps:$4 sm:$0xff]  }
 0x7dd   : > { %4141 = vmatpush1.bf16.msra.mxu0 %v15567_v46  ;;  %v15629_v46 = vld [vmem:[%s16968_s30 + $0xd5c] ss:$24 sps:$4 sm:$0xff]  }
 0x7de   : > { %4142 = vmatprep.subr.bf16.mxu0 %v15572_v39 }
 0x7df   : > { %4578 = vmatpush1.bf16.msra.mxu1 %v15603_v4  ;;  %v15644_v4 = vld [vmem:[%s16968_s30 + $0xc6c] ss:$24 sps:$4 sm:$0xff]  }
 0x7e0   : > { %4579 = vmatprep.subr.bf16.mxu1 %v15611_v27  ;;  %v15647_v27 = vld [vmem:[%s16968_s30 + $0xc3c] ss:$24 sps:$4 sm:$0xff]  }
 0x7e1   : > { %4143 = vmatpush1.bf16.msra.mxu0 %v15570_v42 }
 0x7e2   : > { %4144 = vmatprep.subr.bf16.mxu0 %v15575_v36 }
 0x7e3   : > { %4580 = vmatpush1.bf16.msra.mxu1 %v15609_v31  ;;  %v15650_v31 = vld [vmem:[%s16968_s30 + $0xc0c] ss:$24 sps:$4 sm:$0xff]  }
 0x7e4   : > { %4581 = vmatprep.subr.bf16.mxu1 %v15617_v6  ;;  %v15648_v6 = vld [vmem:[%s16968_s30 + $0xc08] ss:$24 sps:$4 sm:$0xff]  }
 0x7e5   : > { %4145 = vmatpush1.bf16.msra.mxu0 %v15573_v40 }
 0x7e6   : > { %4146 = vmatprep.subr.bf16.mxu0 %v15578_v41 }
 0x7e7   : > { %4582 = vmatpush1.bf16.msra.mxu1 %v15615_v54 }
 0x7e8   : > { %4583 = vmatprep.subr.bf16.mxu1 %v15623_v35  ;;  %v15651_v35 = vld [vmem:[%s16968_s30 + $0xed0] ss:$24 sps:$4 sm:$0xff]  }
 0x7e9   : > { %4147 = vmatpush1.bf16.msra.mxu0 %v15576_v51 }
 0x7ea   : > { %4238 = vmatprep.subr.bf16.mxu0 %v16901_v0 }
 0x7eb   : > { %4584 = vmatpush1.bf16.msra.mxu1 %v15621_v15  ;;  %v15653_v15 = vld [vmem:[%s16968_s30 + $0xed4] ss:$24 sps:$4 sm:$0xff]  }
 0x7ec   : > { %4165 = vmatmul.mubr.bf16.vlgmr.msra.gmra.mxu0 %v3801_v32  ;;  %v15612_v32 = vld [vmem:[%s16968_s30 + $0xc70] ss:$24 sps:$4 sm:$0xff]   ;;  %4610 = vmatprep.subr.bf16.mxu1 %v15629_v46  ;;  %v15659_v46 = vld [vmem:[%s16968_s30 + $0xea4] ss:$24 sps:$4 sm:$0xff]  }
 0x7ed   : > { %4239 = vmatpush1.bf16.msra.mxu0 %v17692_v5  ;;  %13292 = vmatprep.mubr.msk.bf16.mxu0 %vm419_vm0, %v4234_v49 }
 0x7ee   : > { %4240 = vmatprep.subr.bf16.mxu0 %v16901_v0 }
 0x7f1   : > { %4241 = vmatpush1.bf16.msra.mxu0 %v17698_v7 }
 0x7f2   : > { %4242 = vmatprep.subr.bf16.mxu0 %v16901_v0 }
 0x7f5   : > { %4243 = vmatpush1.bf16.msra.mxu0 %v17703_v11 }
 0x7f6   : > { %4244 = vmatprep.subr.bf16.mxu0 %v16901_v0 }
 0x7f9   : > { %4245 = vmatpush1.bf16.msra.mxu0 %v17708_v12 }
 0x7fa   : > { %4246 = vmatprep.subr.bf16.mxu0 %v16901_v0 }
 0x7fd   : > { %4247 = vmatpush1.bf16.msra.mxu0 %v17811_v52 }
 0x7fe   : > { %4248 = vmatprep.subr.bf16.mxu0 %v16901_v0 }
 0x801   : > { %4249 = vmatpush1.bf16.msra.mxu0 %v17816_v53 }
 0x802   : > { %4250 = vmatprep.subr.bf16.mxu0 %v16901_v0 }
 0x805   : > { %4251 = vmatpush1.bf16.msra.mxu0 %v17821_v17 }
 0x806   : > { %4252 = vmatprep.subr.bf16.mxu0 %v16901_v0 }
 0x809   : > { %4253 = vmatpush1.bf16.msra.mxu0 %v17826_v18 }
 0x80a   : > { %4260 = vmatprep.subr.bf16.mxu0 %v16901_v0 }
 0x80d   : > { %4261 = vmatpush2.bf16.msra.mxu0 %v16998_v16 }
 0x80e   : > { %4262 = vmatprep.subr.bf16.mxu0 %v16901_v0 }
 0x811   : > { %4263 = vmatpush2.bf16.msra.mxu0 %v17833_v24 }
 0x812   : > { %4264 = vmatprep.subr.bf16.mxu0 %v16901_v0 }
 0x815   : > { %4265 = vmatpush2.bf16.msra.mxu0 %v17838_v61 }
 0x816   : > { %4266 = vmatprep.subr.bf16.mxu0 %v16901_v0 }
 0x819   : > { %4267 = vmatpush2.bf16.msra.mxu0 %v17843_v62 }
 0x81a   : > { %4268 = vmatprep.subr.bf16.mxu0 %v16901_v0 }
 0x81d   : > { %4269 = vmatpush2.bf16.msra.mxu0 %v17848_v1 }
 0x81e   : > { %4651 = vmatprep.subr.bf16.mxu0 %v15584_v56 }
 0x820   : > { %4271 = vmatmul.mubr.bf16.vlgmr.msra.gmra.mxu0 %v4233_v63 }
 0x821   : > { %4683 = vmatprep.mubr.bf16.mxu0 %v16901_v0  ;;  %4652 = vmatpush1.bf16.msra.mxu0 %v15582_v8 }
 0x822   : > { %4653 = vmatprep.subr.bf16.mxu0 %v15590_v3 }
 0x825   : > { %4654 = vmatpush1.bf16.msra.mxu0 %v15588_v59 }
 0x826   : > { %4655 = vmatprep.subr.bf16.mxu0 %v15596_v29  ;;  %v15627_v29 = vld [vmem:[%s16968_s30 + $0xd58] ss:$24 sps:$4 sm:$0xff]  }
 0x829   : > { %4656 = vmatpush1.bf16.msra.mxu0 %v15594_v23 }
 0x82a   : > { %4657 = vmatprep.subr.bf16.mxu0 %v15602_v25  ;;  %v15633_v25 = vld [vmem:[%s16968_s30 + $0xcf8] ss:$24 sps:$4 sm:$0xff]  }
 0x82d   : > { %4658 = vmatpush1.bf16.msra.mxu0 %v15600_v44  ;;  %v15636_v44 = vld [vmem:[%s16968_s30 + $0xcc8] ss:$24 sps:$4 sm:$0xff]  }
 0x82e   : > { %4659 = vmatprep.subr.bf16.mxu0 %v15608_v45  ;;  %v15639_v45 = vld [vmem:[%s16968_s30 + $0xc98] ss:$24 sps:$4 sm:$0xff]  }
 0x831   : > { %4660 = vmatpush1.bf16.msra.mxu0 %v15606_v14  ;;  %v15642_v14 = vld [vmem:[%s16968_s30 + $0xc68] ss:$24 sps:$4 sm:$0xff]  }
 0x832   : > { %4661 = vmatprep.subr.bf16.mxu0 %v15614_v28  ;;  %v15645_v28 = vld [vmem:[%s16968_s30 + $0xc38] ss:$24 sps:$4 sm:$0xff]  }
 0x835   : > { %4662 = vmatpush1.bf16.msra.mxu0 %v15612_v32  ;;  %v13390_v32 = vld.sshfl [vmem:[%s16963_s27 + $0x24] sm:$0x33 pattern:$0x76325410] }
 0x836   : > { %4663 = vmatprep.subr.bf16.mxu0 %v15620_v33  ;;  %v4708_v33 = vcombine.high %v13390_v32, %v13390_v32 }
 0x838   : > { %v4712_v54 = vpack.c.bf16 %v4708_v33, %v4708_v33 }
 0x839   : > { %4664 = vmatpush1.bf16.msra.mxu0 %v15618_v34  ;;  %v4711_v34 = vpack.c.bf16 %v13390_v32, %v13390_v32 }
 0x83a   : > { %4665 = vmatprep.subr.bf16.mxu0 %v15626_v38  ;;  %v15654_v38 = vld [vmem:[%s16968_s30 + $0xee0] ss:$24 sps:$4 sm:$0xff]  }
 0x83d   : > { %4666 = vmatpush1.bf16.msra.mxu0 %v15624_v37  ;;  %v15656_v37 = vld [vmem:[%s16968_s30 + $0xee4] ss:$24 sps:$4 sm:$0xff]  }
 0x83e   : > { %5047 = vmatprep.subr.bf16.mxu0 %v15653_v15 }
 0x88c   : > { %v4125_v39 = vpop.f32.mrf.mxu0  ;;  %v4207_v42 = vpop.f32.mrf.mxu1 }
 0x88d   : > { %v17886_v36 = vadd.f32 %v4125_v39, %v17764_v58  ;;  %v17889_v40 = vadd.f32 %v4207_v42, %v17767_v30  ;;  %v15662_v39 = vld [vmem:[%s16968_s30 + $0xeb4] ss:$24 sps:$4 sm:$0xff]   ;;  %v15657_v42 = vld [vmem:[%s16968_s30 + $0xea0] ss:$24 sps:$4 sm:$0xff]  }
 0x88e   : > { %v4127_v41 = vpop.f32.mrf.mxu0  ;;  %v4209_v43 = vpop.f32.mrf.mxu1 }
 0x88f   : > { %v17892_v51 = vadd.f32 %v4127_v41, %v17770_v19  ;;  %v17895_v48 = vadd.f32 %v4209_v43, %v17773_v20  ;;  %v15660_v41 = vld [vmem:[%s16968_s30 + $0xeb0] ss:$24 sps:$4 sm:$0xff]   ;;  %v15665_v43 = vld [vmem:[%s16968_s30 + $0xe74] ss:$24 sps:$4 sm:$0xff]  }
 0x890   : > { %v4129_v49 = vpop.f32.mrf.mxu0  ;;  %v4211_v63 = vpop.f32.mrf.mxu1 }
 0x891   : > { %v15668_v49 = vld [vmem:[%s16968_s30 + $0xe84] ss:$24 sps:$4 sm:$0xff]   ;;  %v15663_v63 = vld [vmem:[%s16968_s30 + $0xe70] ss:$24 sps:$4 sm:$0xff]  }
 0x892   : > { %v4130_v57 = vpop.f32.mrf.mxu0  ;;  %v4212_v55 = vpop.f32.mrf.mxu1 }
 0x893   : > { %v15666_v57 = vld [vmem:[%s16968_s30 + $0xe80] ss:$24 sps:$4 sm:$0xff]   ;;  %v15671_v55 = vld [vmem:[%s16968_s30 + $0xe44] ss:$24 sps:$4 sm:$0xff]  }
 0x8ac   : > { %v4166_v8 = vpop.f32.mrf.mxu0 }
 0x8ad   : > { %v17898_v58 = vadd.f32 %v4166_v8, %v17776_v47  ;;  %v15632_v47 = vld [vmem:[%s16968_s30 + $0xd2c] ss:$24 sps:$4 sm:$0xff]  }
 0x8ae   : > { %v4168_v30 = vpop.f32.mrf.mxu0  ;;  %v15674_v8 = vld [vmem:[%s16968_s30 + $0xe54] ss:$24 sps:$4 sm:$0xff]  }
 0x8af   : > { %v17901_v56 = vadd.f32 %v4168_v30, %v17779_v10  ;;  %v15630_v10 = vld [vmem:[%s16968_s30 + $0xd28] ss:$24 sps:$4 sm:$0xff]  }
 0x8b0   : > { %v4170_v19 = vpop.f32.mrf.mxu0  ;;  %v15669_v30 = vld [vmem:[%s16968_s30 + $0xe40] ss:$24 sps:$4 sm:$0xff]  }
 0x8b1   : > { %v15672_v19 = vld [vmem:[%s16968_s30 + $0xe50] ss:$24 sps:$4 sm:$0xff]  }
 0x8b2   : > { %v4171_v26 = vpop.f32.mrf.mxu0 }
 0x8b3   : > { %v15677_v26 = vld [vmem:[%s16968_s30 + $0xe14] ss:$24 sps:$4 sm:$0xff]  }
 0x8e0   : > { %v4272_v20 = vpop.f32.mrf.mxu0 }
 0x8e1   : > { %v4273_v3 = vadd.f32 %v17669_v21, %v4272_v20  ;;  %v15680_v20 = vld [vmem:[%s16968_s30 + $0xe24] ss:$24 sps:$4 sm:$0xff]  }
 0x8e2   : > { %v4274_v9 = vpop.f32.mrf.mxu0 }
 0x8e3   : > { %v4278_v59 = vmax.f32 %v4273_v3, 0.0  ;;  %v15675_v3 = vld [vmem:[%s16968_s30 + $0xe10] ss:$24 sps:$4 sm:$0xff]   ;;  %v15678_v9 = vld [vmem:[%s16968_s30 + $0xe20] ss:$24 sps:$4 sm:$0xff]  }
 0x8e4   : > { %v4275_v60 = vpop.f32.mrf.mxu0 }
 0x8e5   : > { %v4279_v22 = vpack.c.bf16 %v4278_v59, %v4278_v59  ;;  %v15683_v59 = vld [vmem:[%s16968_s30 + $0xde4] ss:$24 sps:$4 sm:$0xff]   ;;  %v15686_v60 = vld [vmem:[%s16968_s30 + $0xdf4] ss:$24 sps:$4 sm:$0xff]  }
 0x8e6   : > { %v4276_v23 = vpop.f32.mrf.mxu0 }
 0x8e7   : > { %4602 = vmatmul.mubr.bf16.vlgmr.msra.gmra.mxu1 %v4279_v22  ;;  %4684 = vmatmul.mubr.bf16.vlgmr.msra.gmra.mxu0 %v4279_v22  ;;  %v15692_v23 = vld [vmem:[%s16968_s30 + $0xdc4] ss:$24 sps:$4 sm:$0xff]  }
 0x8e8   : > { %4611 = vmatpush1.bf16.msra.mxu1 %v15627_v29  ;;  %4642 = vmatprep.mubr.bf16.mxu1 %v16901_v0  ;;  %v15681_v29 = vld [vmem:[%s16968_s30 + $0xde0] ss:$24 sps:$4 sm:$0xff]  }
 0x8e9   : > { %4612 = vmatprep.subr.bf16.mxu1 %v15632_v47  ;;  %5079 = vmatprep.mubr.bf16.mxu0 %v16901_v0  ;;  %v15689_v47 = vld [vmem:[%s16968_s30 + $0xdb4] ss:$24 sps:$4 sm:$0xff]  }
 0x8ea   : > { %5048 = vmatpush1.bf16.msra.mxu0 %v15651_v35 }
 0x8eb   : > { %5049 = vmatprep.subr.bf16.mxu0 %v15659_v46 }
 0x8ec   : > { %4613 = vmatpush1.bf16.msra.mxu1 %v15630_v10  ;;  %v15687_v10 = vld [vmem:[%s16968_s30 + $0xdb0] ss:$24 sps:$4 sm:$0xff]  }
 0x8ed   : > { %4614 = vmatprep.subr.bf16.mxu1 %v15635_v2  ;;  %v15690_v2 = vld [vmem:[%s16968_s30 + $0xdc0] ss:$24 sps:$4 sm:$0xff]  }
 0x8ee   : > { %5050 = vmatpush1.bf16.msra.mxu0 %v15657_v42 }
 0x8ef   : > { %5051 = vmatprep.subr.bf16.mxu0 %v15665_v43 }
 0x8f0   : > { %4615 = vmatpush1.bf16.msra.mxu1 %v15633_v25  ;;  %v15695_v25 = vld [vmem:[%s16968_s30 + $0xd84] ss:$24 sps:$4 sm:$0xff]  }
 0x8f1   : > { %4616 = vmatprep.subr.bf16.mxu1 %v15638_v50  ;;  %v15693_v50 = vld [vmem:[%s16968_s30 + $0xd80] ss:$24 sps:$4 sm:$0xff]  }
 0x8f2   : > { %5052 = vmatpush1.bf16.msra.mxu0 %v15663_v63 }
 0x8f3   : > { %5053 = vmatprep.subr.bf16.mxu0 %v15671_v55  ;;  %v15705_v55 = vld [vmem:[%s16968_s30 + $0xe78] ss:$24 sps:$4 sm:$0xff]  }
 0x8f4   : > { %4617 = vmatpush1.bf16.msra.mxu1 %v15636_v44  ;;  %v15698_v44 = vld [vmem:[%s16968_s30 + $0xd94] ss:$24 sps:$4 sm:$0xff]  }
 0x8f5   : > { %4618 = vmatprep.subr.bf16.mxu1 %v15641_v13  ;;  %v15696_v13 = vld [vmem:[%s16968_s30 + $0xd90] ss:$24 sps:$4 sm:$0xff]  }
 0x8f6   : > { %5054 = vmatpush1.bf16.msra.mxu0 %v15669_v30  ;;  %v15708_v30 = vld [vmem:[%s16968_s30 + $0xe48] ss:$24 sps:$4 sm:$0xff]  }
 0x8f7   : > { %5055 = vmatprep.subr.bf16.mxu0 %v15677_v26  ;;  %v15711_v26 = vld [vmem:[%s16968_s30 + $0xe18] ss:$24 sps:$4 sm:$0xff]  }
 0x8f8   : > { %4619 = vmatpush1.bf16.msra.mxu1 %v15639_v45  ;;  %v15701_v45 = vld [vmem:[%s16968_s30 + $0xedc] ss:$24 sps:$4 sm:$0xff]  }
 0x8f9   : > { %4620 = vmatprep.subr.bf16.mxu1 %v15644_v4 }
 0x8fa   : > { %5056 = vmatpush1.bf16.msra.mxu0 %v15675_v3  ;;  %v15714_v3 = vld [vmem:[%s16968_s30 + $0xde8] ss:$24 sps:$4 sm:$0xff]  }
 0x8fb   : > { %5057 = vmatprep.subr.bf16.mxu0 %v15683_v59  ;;  %v15717_v59 = vld [vmem:[%s16968_s30 + $0xdb8] ss:$24 sps:$4 sm:$0xff]  }
 0x8fc   : > { %4621 = vmatpush1.bf16.msra.mxu1 %v15642_v14 }
 0x8fd   : > { %4622 = vmatprep.subr.bf16.mxu1 %v15647_v27 }
 0x8fe   : > { %5058 = vmatpush1.bf16.msra.mxu0 %v15681_v29  ;;  %v13489_v29 = vld.sshfl [vmem:[%s16963_s27 + $0x28] sm:$0x33 pattern:$0x76325410] }
 0x8ff   : > { %5059 = vmatprep.subr.bf16.mxu0 %v15689_v47  ;;  %v5186_v47 = vcombine.high %v13489_v29, %v13489_v29 }
 0x900   : > { %4623 = vmatpush1.bf16.msra.mxu1 %v15645_v28 }
 0x901   : > { %4624 = vmatprep.subr.bf16.mxu1 %v15650_v31 }
 0x902   : > { %5060 = vmatpush1.bf16.msra.mxu0 %v15687_v10  ;;  %v15728_v10 = vld [vmem:[%s16968_s30 + $0x1064] ss:$24 sps:$4 sm:$0xff]  }
 0x903   : > { %5061 = vmatprep.subr.bf16.mxu0 %v15695_v25  ;;  %v15734_v25 = vld [vmem:[%s16968_s30 + $0x1034] ss:$24 sps:$4 sm:$0xff]  }
 0x904   : > { %4625 = vmatpush1.bf16.msra.mxu1 %v15648_v6 }
 0x905   : > { %4716 = vmatprep.subr.bf16.mxu1 %v16901_v0 }
 0x906   : > { %5062 = vmatpush1.bf16.msra.mxu0 %v15693_v50  ;;  %v15729_v50 = vld [vmem:[%s16968_s30 + $0x1020] ss:$24 sps:$4 sm:$0xff]  }
 0x907   : > { %4643 = vmatmul.mubr.bf16.vlgmr.msra.gmra.mxu1 %v4279_v22  ;;  %v15684_v22 = vld [vmem:[%s16968_s30 + $0xdf0] ss:$24 sps:$4 sm:$0xff]   ;;  %5088 = vmatprep.subr.bf16.mxu0 %v15701_v45  ;;  %v15740_v45 = vld [vmem:[%s16968_s30 + $0x1004] ss:$24 sps:$4 sm:$0xff]  }
 0x908   : > { %4717 = vmatpush1.bf16.msra.mxu1 %v17692_v5  ;;  %13391 = vmatprep.mubr.msk.bf16.mxu1 %vm419_vm0, %v4712_v54 }
 0x909   : > { %4718 = vmatprep.subr.bf16.mxu1 %v16901_v0 }
 0x90c   : > { %4719 = vmatpush1.bf16.msra.mxu1 %v17698_v7 }
 0x90d   : > { %4720 = vmatprep.subr.bf16.mxu1 %v16901_v0 }
 0x910   : > { %4721 = vmatpush1.bf16.msra.mxu1 %v17703_v11 }
 0x911   : > { %4722 = vmatprep.subr.bf16.mxu1 %v16901_v0 }
 0x914   : > { %4723 = vmatpush1.bf16.msra.mxu1 %v17708_v12 }
 0x915   : > { %4724 = vmatprep.subr.bf16.mxu1 %v16901_v0 }
 0x918   : > { %4725 = vmatpush1.bf16.msra.mxu1 %v17811_v52 }
 0x919   : > { %4726 = vmatprep.subr.bf16.mxu1 %v16901_v0 }
 0x91c   : > { %4727 = vmatpush1.bf16.msra.mxu1 %v17816_v53 }
 0x91d   : > { %4728 = vmatprep.subr.bf16.mxu1 %v16901_v0 }
 0x920   : > { %4729 = vmatpush1.bf16.msra.mxu1 %v17821_v17 }
 0x921   : > { %4730 = vmatprep.subr.bf16.mxu1 %v16901_v0 }
 0x924   : > { %4731 = vmatpush1.bf16.msra.mxu1 %v17826_v18 }
 0x925   : > { %4738 = vmatprep.subr.bf16.mxu1 %v16901_v0 }
 0x928   : > { %4739 = vmatpush2.bf16.msra.mxu1 %v16998_v16 }
 0x929   : > { %4740 = vmatprep.subr.bf16.mxu1 %v16901_v0 }
 0x92c   : > { %4741 = vmatpush2.bf16.msra.mxu1 %v17833_v24 }
 0x92d   : > { %4742 = vmatprep.subr.bf16.mxu1 %v16901_v0 }
 0x930   : > { %4743 = vmatpush2.bf16.msra.mxu1 %v17838_v61 }
 0x931   : > { %4744 = vmatprep.subr.bf16.mxu1 %v16901_v0 }
 0x934   : > { %4745 = vmatpush2.bf16.msra.mxu1 %v17843_v62 }
 0x935   : > { %4746 = vmatprep.subr.bf16.mxu1 %v16901_v0 }
 0x938   : > { %4747 = vmatpush2.bf16.msra.mxu1 %v17848_v1 }
 0x939   : > { %5129 = vmatprep.subr.bf16.mxu1 %v15656_v37 }
 0x93b   : > { %4749 = vmatmul.mubr.bf16.vlgmr.msra.gmra.mxu1 %v4711_v34 }
 0x93c   : > { %5161 = vmatprep.mubr.bf16.mxu1 %v16901_v0  ;;  %5130 = vmatpush1.bf16.msra.mxu1 %v15654_v38 }
 0x93d   : > { %5131 = vmatprep.subr.bf16.mxu1 %v15662_v39 }
 0x940   : > { %5132 = vmatpush1.bf16.msra.mxu1 %v15660_v41 }
 0x941   : > { %5133 = vmatprep.subr.bf16.mxu1 %v15668_v49  ;;  %v15699_v49 = vld [vmem:[%s16968_s30 + $0xed8] ss:$24 sps:$4 sm:$0xff]  }
 0x944   : > { %5134 = vmatpush1.bf16.msra.mxu1 %v15666_v57 }
 0x945   : > { %5135 = vmatprep.subr.bf16.mxu1 %v15674_v8  ;;  %v15710_v8 = vld [vmem:[%s16968_s30 + $0xe4c] ss:$24 sps:$4 sm:$0xff]  }
 0x948   : > { %5136 = vmatpush1.bf16.msra.mxu1 %v15672_v19  ;;  %v15713_v19 = vld [vmem:[%s16968_s30 + $0xe1c] ss:$24 sps:$4 sm:$0xff]  }
 0x949   : > { %5137 = vmatprep.subr.bf16.mxu1 %v15680_v20  ;;  %v15716_v20 = vld [vmem:[%s16968_s30 + $0xdec] ss:$24 sps:$4 sm:$0xff]  }
 0x94c   : > { %5138 = vmatpush1.bf16.msra.mxu1 %v15678_v9  ;;  %v15719_v9 = vld [vmem:[%s16968_s30 + $0xdbc] ss:$24 sps:$4 sm:$0xff]  }
 0x94d   : > { %5139 = vmatprep.subr.bf16.mxu1 %v15686_v60  ;;  %v15722_v60 = vld [vmem:[%s16968_s30 + $0xd8c] ss:$24 sps:$4 sm:$0xff]  }
 0x950   : > { %5140 = vmatpush1.bf16.msra.mxu1 %v15684_v22  ;;  %v15720_v22 = vld [vmem:[%s16968_s30 + $0xd88] ss:$24 sps:$4 sm:$0xff]  }
 0x951   : > { %5141 = vmatprep.subr.bf16.mxu1 %v15692_v23  ;;  %v5190_v23 = vpack.c.bf16 %v5186_v47, %v5186_v47 }
 0x954   : > { %5142 = vmatpush1.bf16.msra.mxu1 %v15690_v2  ;;  %v15731_v2 = vld [vmem:[%s16968_s30 + $0x1024] ss:$24 sps:$4 sm:$0xff]  }
 0x955   : > { %5143 = vmatprep.subr.bf16.mxu1 %v15698_v44  ;;  %v15732_v44 = vld [vmem:[%s16968_s30 + $0x1030] ss:$24 sps:$4 sm:$0xff]  }
 0x958   : > { %5144 = vmatpush1.bf16.msra.mxu1 %v15696_v13  ;;  %v15737_v13 = vld [vmem:[%s16968_s30 + $0xff4] ss:$24 sps:$4 sm:$0xff]  }
 0x9a7   : > { %v4603_v4 = vpop.f32.mrf.mxu1  ;;  %v4685_v14 = vpop.f32.mrf.mxu0 }
 0x9a8   : > { %v17984_v27 = vadd.f32 %v4603_v4, %v17886_v36  ;;  %v17987_v28 = vadd.f32 %v4685_v14, %v17889_v40  ;;  %v15735_v4 = vld [vmem:[%s16968_s30 + $0xff0] ss:$24 sps:$4 sm:$0xff]   ;;  %v15738_v14 = vld [vmem:[%s16968_s30 + $0x1000] ss:$24 sps:$4 sm:$0xff]  }
 0x9a9   : > { %v4605_v31 = vpop.f32.mrf.mxu1  ;;  %v4687_v32 = vpop.f32.mrf.mxu0 }
 0x9aa   : > { %v17990_v6 = vadd.f32 %v4605_v31, %v17892_v51  ;;  %v17993_v33 = vadd.f32 %v4687_v32, %v17895_v48  ;;  %v15743_v31 = vld [vmem:[%s16968_s30 + $0xfc4] ss:$24 sps:$4 sm:$0xff]   ;;  %v15746_v32 = vld [vmem:[%s16968_s30 + $0xfd4] ss:$24 sps:$4 sm:$0xff]  }
 0x9ab   : > { %v4607_v54 = vpop.f32.mrf.mxu1  ;;  %v4689_v34 = vpop.f32.mrf.mxu0 }
 0x9ac   : > { %v15741_v54 = vld [vmem:[%s16968_s30 + $0xfc0] ss:$24 sps:$4 sm:$0xff]   ;;  %v15744_v34 = vld [vmem:[%s16968_s30 + $0xfd0] ss:$24 sps:$4 sm:$0xff]  }
 0x9ad   : > { %v4608_v35 = vpop.f32.mrf.mxu1  ;;  %v4690_v15 = vpop.f32.mrf.mxu0 }
 0x9ae   : > { %v15749_v35 = vld [vmem:[%s16968_s30 + $0xf94] ss:$24 sps:$4 sm:$0xff]   ;;  %v15752_v15 = vld [vmem:[%s16968_s30 + $0xfa4] ss:$24 sps:$4 sm:$0xff]  }
 0x9c7   : > { %v4644_v38 = vpop.f32.mrf.mxu1 }
 0x9c8   : > { %v17996_v36 = vadd.f32 %v4644_v38, %v17898_v58  ;;  %v15704_v58 = vld [vmem:[%s16968_s30 + $0xeac] ss:$24 sps:$4 sm:$0xff]   ;;  %v15747_v38 = vld [vmem:[%s16968_s30 + $0xf90] ss:$24 sps:$4 sm:$0xff]  }
 0x9c9   : > { %v4646_v40 = vpop.f32.mrf.mxu1 }
 0x9ca   : > { %v17999_v37 = vadd.f32 %v4646_v40, %v17901_v56  ;;  %v15702_v56 = vld [vmem:[%s16968_s30 + $0xea8] ss:$24 sps:$4 sm:$0xff]  }
 0x9cb   : > { %v4648_v51 = vpop.f32.mrf.mxu1  ;;  %v15750_v40 = vld [vmem:[%s16968_s30 + $0xfa0] ss:$24 sps:$4 sm:$0xff]  }
 0x9cc   : > { %v15755_v51 = vld [vmem:[%s16968_s30 + $0xf64] ss:$24 sps:$4 sm:$0xff]  }
 0x9cd   : > { %v4649_v46 = vpop.f32.mrf.mxu1 }
 0x9ce   : > { %v15758_v46 = vld [vmem:[%s16968_s30 + $0xf74] ss:$24 sps:$4 sm:$0xff]  }
 0x9fb   : > { %v4750_v48 = vpop.f32.mrf.mxu1 }
 0x9fc   : > { %v4751_v39 = vadd.f32 %v17669_v21, %v4750_v48  ;;  %v15707_v21 = vld [vmem:[%s16968_s30 + $0xe7c] ss:$24 sps:$4 sm:$0xff]   ;;  %v15753_v48 = vld [vmem:[%s16968_s30 + $0xf60] ss:$24 sps:$4 sm:$0xff]  }
 0x9fd   : > { %v4752_v42 = vpop.f32.mrf.mxu1 }
 0x9fe   : > { %v4756_v41 = vmax.f32 %v4751_v39, 0.0  ;;  %v15756_v39 = vld [vmem:[%s16968_s30 + $0xf70] ss:$24 sps:$4 sm:$0xff]   ;;  %v15761_v42 = vld [vmem:[%s16968_s30 + $0xf34] ss:$24 sps:$4 sm:$0xff]  }
 0x9ff   : > { %v4753_v43 = vpop.f32.mrf.mxu1 }
 0xa00   : > { %v4757_v63 = vpack.c.bf16 %v4756_v41, %v4756_v41  ;;  %v15764_v41 = vld [vmem:[%s16968_s30 + $0xf44] ss:$24 sps:$4 sm:$0xff]   ;;  %v15759_v43 = vld [vmem:[%s16968_s30 + $0xf30] ss:$24 sps:$4 sm:$0xff]  }
 0xa01   : > { %v4754_v57 = vpop.f32.mrf.mxu1 }
 0xa02   : > { %5080 = vmatmul.mubr.bf16.vlgmr.msra.gmra.mxu0 %v4757_v63  ;;  %5162 = vmatmul.mubr.bf16.vlgmr.msra.gmra.mxu1 %v4757_v63  ;;  %v15770_v57 = vld [vmem:[%s16968_s30 + $0xf14] ss:$24 sps:$4 sm:$0xff]  }
 0xa03   : > { %5089 = vmatpush1.bf16.msra.mxu0 %v15699_v49  ;;  %5120 = vmatprep.mubr.bf16.mxu0 %v16901_v0  ;;  %v15762_v49 = vld [vmem:[%s16968_s30 + $0xf40] ss:$24 sps:$4 sm:$0xff]  }
 0xa04   : > { %5090 = vmatprep.subr.bf16.mxu0 %v15704_v58  ;;  %5557 = vmatprep.mubr.bf16.mxu1 %v16901_v0  ;;  %v15765_v58 = vld [vmem:[%s16968_s30 + $0xf00] ss:$24 sps:$4 sm:$0xff]  }
 0xa07   : > { %5091 = vmatpush1.bf16.msra.mxu0 %v15702_v56  ;;  %v15768_v56 = vld [vmem:[%s16968_s30 + $0xf10] ss:$24 sps:$4 sm:$0xff]  }
 0xa08   : > { %5092 = vmatprep.subr.bf16.mxu0 %v15707_v21  ;;  %v15773_v21 = vld [vmem:[%s16968_s30 + $0x105c] ss:$24 sps:$4 sm:$0xff]  }
 0xa0b   : > { %5093 = vmatpush1.bf16.msra.mxu0 %v15705_v55 }
 0xa0c   : > { %5094 = vmatprep.subr.bf16.mxu0 %v15710_v8 }
 0xa0f   : > { %5095 = vmatpush1.bf16.msra.mxu0 %v15708_v30 }
 0xa10   : > { %5096 = vmatprep.subr.bf16.mxu0 %v15713_v19 }
 0xa13   : > { %5097 = vmatpush1.bf16.msra.mxu0 %v15711_v26 }
 0xa14   : > { %5098 = vmatprep.subr.bf16.mxu0 %v15716_v20 }
 0xa17   : > { %5099 = vmatpush1.bf16.msra.mxu0 %v15714_v3 }
 0xa18   : > { %5100 = vmatprep.subr.bf16.mxu0 %v15719_v9 }
 0xa1b   : > { %5101 = vmatpush1.bf16.msra.mxu0 %v15717_v59 }
 0xa1c   : > { %5102 = vmatprep.subr.bf16.mxu0 %v15722_v60 }
 0xa1f   : > { %5103 = vmatpush1.bf16.msra.mxu0 %v15720_v22 }
 0xa20   : > { %5194 = vmatprep.subr.bf16.mxu0 %v16901_v0 }
 0xa22   : > { %5121 = vmatmul.mubr.bf16.vlgmr.msra.gmra.mxu0 %v4757_v63  ;;  %v15767_v63 = vld [vmem:[%s16968_s30 + $0xf04] ss:$24 sps:$4 sm:$0xff]  }
 0xa23   : > { %5195 = vmatpush1.bf16.msra.mxu0 %v17692_v5  ;;  %13490 = vmatprep.mubr.msk.bf16.mxu0 %vm419_vm0, %v5190_v23  ;;  %v5189_v5 = vpack.c.bf16 %v13489_v29, %v13489_v29 }
 0xa24   : > { %5196 = vmatprep.subr.bf16.mxu0 %v16901_v0 }
 0xa27   : > { %5197 = vmatpush1.bf16.msra.mxu0 %v17698_v7  ;;  %v15723_v7 = vld [vmem:[%s16968_s30 + $0x1050] ss:$24 sps:$4 sm:$0xff]  }
 0xa28   : > { %5198 = vmatprep.subr.bf16.mxu0 %v16901_v0 }
 0xa2b   : > { %5199 = vmatpush1.bf16.msra.mxu0 %v17703_v11  ;;  %v15725_v11 = vld [vmem:[%s16968_s30 + $0x1054] ss:$24 sps:$4 sm:$0xff]  }
 0xa2c   : > { %5200 = vmatprep.subr.bf16.mxu0 %v16901_v0  ;;  %5525 = vmatprep.subr.bf16.mxu1 %v15725_v11 }
 0xa2d   : > { %5526 = vmatpush1.bf16.msra.mxu1 %v15723_v7 }
 0xa2e   : > { %5527 = vmatprep.subr.bf16.mxu1 %v15731_v2 }
 0xa2f   : > { %5201 = vmatpush1.bf16.msra.mxu0 %v17708_v12  ;;  %v15726_v12 = vld [vmem:[%s16968_s30 + $0x1060] ss:$24 sps:$4 sm:$0xff]  }
 0xa30   : > { %5202 = vmatprep.subr.bf16.mxu0 %v16901_v0 }
 0xa31   : > { %5528 = vmatpush1.bf16.msra.mxu1 %v15729_v50  ;;  %v15776_v50 = vld [vmem:[%s16968_s30 + $0x102c] ss:$24 sps:$4 sm:$0xff]  }
 0xa32   : > { %5529 = vmatprep.subr.bf16.mxu1 %v15737_v13  ;;  %v15779_v13 = vld [vmem:[%s16968_s30 + $0xffc] ss:$24 sps:$4 sm:$0xff]  }
 0xa33   : > { %5203 = vmatpush1.bf16.msra.mxu0 %v17811_v52 }
 0xa34   : > { %5204 = vmatprep.subr.bf16.mxu0 %v16901_v0 }
 0xa35   : > { %5530 = vmatpush1.bf16.msra.mxu1 %v15735_v4  ;;  %v15782_v4 = vld [vmem:[%s16968_s30 + $0xfcc] ss:$24 sps:$4 sm:$0xff]  }
 0xa36   : > { %5531 = vmatprep.subr.bf16.mxu1 %v15743_v31  ;;  %v15785_v31 = vld [vmem:[%s16968_s30 + $0xf9c] ss:$24 sps:$4 sm:$0xff]  }
 0xa37   : > { %5205 = vmatpush1.bf16.msra.mxu0 %v17816_v53 }
 0xa38   : > { %5206 = vmatprep.subr.bf16.mxu0 %v16901_v0 }
 0xa39   : > { %5532 = vmatpush1.bf16.msra.mxu1 %v15741_v54  ;;  %v15788_v54 = vld [vmem:[%s16968_s30 + $0xf6c] ss:$24 sps:$4 sm:$0xff]  }
 0xa3a   : > { %5533 = vmatprep.subr.bf16.mxu1 %v15749_v35  ;;  %v15791_v35 = vld [vmem:[%s16968_s30 + $0xf3c] ss:$24 sps:$4 sm:$0xff]  }
 0xa3b   : > { %5207 = vmatpush1.bf16.msra.mxu0 %v17821_v17 }
 0xa3c   : > { %5208 = vmatprep.subr.bf16.mxu0 %v16901_v0 }
 0xa3d   : > { %5534 = vmatpush1.bf16.msra.mxu1 %v15747_v38  ;;  %v15794_v38 = vld [vmem:[%s16968_s30 + $0xf0c] ss:$24 sps:$4 sm:$0xff]  }
 0xa3e   : > { %5535 = vmatprep.subr.bf16.mxu1 %v15755_v51  ;;  %v15792_v51 = vld [vmem:[%s16968_s30 + $0xf08] ss:$24 sps:$4 sm:$0xff]  }
 0xa3f   : > { %5209 = vmatpush1.bf16.msra.mxu0 %v17826_v18 }
 0xa40   : > { %5216 = vmatprep.subr.bf16.mxu0 %v16901_v0 }
 0xa41   : > { %5536 = vmatpush1.bf16.msra.mxu1 %v15753_v48 }
 0xa42   : > { %5537 = vmatprep.subr.bf16.mxu1 %v15761_v42  ;;  %v18129_v42 = vld [vmem:[%s16949_s23 + $0x30] sm:$0xff]  }
 0xa43   : > { %5217 = vmatpush2.bf16.msra.mxu0 %v16998_v16 }
 0xa44   : > { %5218 = vmatprep.subr.bf16.mxu0 %v16901_v0 }
 0xa45   : > { %5538 = vmatpush1.bf16.msra.mxu1 %v15759_v43  ;;  %v18139_v43 = vld [vmem:[%s16949_s23 + $0x20] sm:$0xff]  }
 0xa46   : > { %5539 = vmatprep.subr.bf16.mxu1 %v15767_v63  ;;  %v15809_v63 = vld [vmem:[%s16968_s30 + $0x1174] ss:$24 sps:$4 sm:$0xff]  }
 0xa47   : > { %5219 = vmatpush2.bf16.msra.mxu0 %v17833_v24 }
 0xa48   : > { %5220 = vmatprep.subr.bf16.mxu0 %v16901_v0 }
 0xa49   : > { %5540 = vmatpush1.bf16.msra.mxu1 %v15765_v58  ;;  %v15812_v58 = vld [vmem:[%s16968_s30 + $0x1184] ss:$24 sps:$4 sm:$0xff]  }
 0xa4a   : > { %5566 = vmatprep.subr.bf16.mxu1 %v15773_v21  ;;  %v15815_v21 = vld [vmem:[%s16968_s30 + $0x1144] ss:$24 sps:$4 sm:$0xff]  }
 0xa4b   : > { %5221 = vmatpush2.bf16.msra.mxu0 %v17838_v61 }
 0xa4c   : > { %5222 = vmatprep.subr.bf16.mxu0 %v16901_v0 }
 0xa4f   : > { %5223 = vmatpush2.bf16.msra.mxu0 %v17843_v62 }
 0xa50   : > { %5224 = vmatprep.subr.bf16.mxu0 %v16901_v0 }
 0xa53   : > { %5225 = vmatpush2.bf16.msra.mxu0 %v17848_v1 }
 0xa54   : > { %5607 = vmatprep.subr.bf16.mxu0 %v15728_v10 }
 0xa56   : > { %5227 = vmatmul.mubr.bf16.vlgmr.msra.gmra.mxu0 %v5189_v5 }
 0xa57   : > { %5639 = vmatprep.mubr.bf16.mxu0 %v16901_v0  ;;  %5608 = vmatpush1.bf16.msra.mxu0 %v15726_v12 }
 0xa58   : > { %5609 = vmatprep.subr.bf16.mxu0 %v15734_v25 }
 0xa5b   : > { %5610 = vmatpush1.bf16.msra.mxu0 %v15732_v44  ;;  %v15774_v44 = vld [vmem:[%s16968_s30 + $0x1028] ss:$24 sps:$4 sm:$0xff]  }
 0xa5c   : > { %5611 = vmatprep.subr.bf16.mxu0 %v15740_v45  ;;  %v15777_v45 = vld [vmem:[%s16968_s30 + $0xff8] ss:$24 sps:$4 sm:$0xff]  }
 0xa5f   : > { %5612 = vmatpush1.bf16.msra.mxu0 %v15738_v14  ;;  %v15780_v14 = vld [vmem:[%s16968_s30 + $0xfc8] ss:$24 sps:$4 sm:$0xff]  }
 0xa60   : > { %5613 = vmatprep.subr.bf16.mxu0 %v15746_v32  ;;  %v15783_v32 = vld [vmem:[%s16968_s30 + $0xf98] ss:$24 sps:$4 sm:$0xff]  }
 0xa63   : > { %5614 = vmatpush1.bf16.msra.mxu0 %v15744_v34  ;;  %v15786_v34 = vld [vmem:[%s16968_s30 + $0xf68] ss:$24 sps:$4 sm:$0xff]  }
 0xa64   : > { %5615 = vmatprep.subr.bf16.mxu0 %v15752_v15  ;;  %v15789_v15 = vld [vmem:[%s16968_s30 + $0xf38] ss:$24 sps:$4 sm:$0xff]  }
 0xa67   : > { %5616 = vmatpush1.bf16.msra.mxu0 %v15750_v40  ;;  %v13588_v40 = vld.sshfl [vmem:[%s16963_s27 + $0x2c] sm:$0x33 pattern:$0x76325410] }
 0xa68   : > { %5617 = vmatprep.subr.bf16.mxu0 %v15758_v46  ;;  %v5664_v46 = vcombine.high %v13588_v40, %v13588_v40 }
 0xa6a   : > { %v5668_v48 = vpack.c.bf16 %v5664_v46, %v5664_v46 }
 0xa6b   : > { %5618 = vmatpush1.bf16.msra.mxu0 %v15756_v39  ;;  %v18123_v39 = vld [vmem:[%s16949_s23 + $0x38] sm:$0xff]  }
 0xa6c   : > { %5619 = vmatprep.subr.bf16.mxu0 %v15764_v41  ;;  %v18134_v41 = vld [vmem:[%s16949_s23 + $0x28] sm:$0xff]  }
 0xa6f   : > { %5620 = vmatpush1.bf16.msra.mxu0 %v15762_v49  ;;  %v15801_v49 = vld [vmem:[%s16968_s30 + $0x11a0] ss:$24 sps:$4 sm:$0xff]  }
 0xa70   : > { %5621 = vmatprep.subr.bf16.mxu0 %v15770_v57  ;;  %v15807_v57 = vld [vmem:[%s16968_s30 + $0x1170] ss:$24 sps:$4 sm:$0xff]  }
 0xa73   : > { %5622 = vmatpush1.bf16.msra.mxu0 %v15768_v56  ;;  %v15810_v56 = vld [vmem:[%s16968_s30 + $0x1180] ss:$24 sps:$4 sm:$0xff]  }
 0xac2   : > { %v5081_v55 = vpop.f32.mrf.mxu0  ;;  %v5163_v8 = vpop.f32.mrf.mxu1 }
 0xac3   : > { %v18082_v30 = vadd.f32 %v5081_v55, %v17984_v27  ;;  %v18085_v19 = vadd.f32 %v5163_v8, %v17987_v28  ;;  %v15818_v55 = vld [vmem:[%s16968_s30 + $0x1154] ss:$24 sps:$4 sm:$0xff]   ;;  %v15813_v8 = vld [vmem:[%s16968_s30 + $0x1140] ss:$24 sps:$4 sm:$0xff]  }
 0xac4   : > { %v5083_v26 = vpop.f32.mrf.mxu0  ;;  %v5165_v20 = vpop.f32.mrf.mxu1 }
 0xac5   : > { %v18088_v3 = vadd.f32 %v5083_v26, %v17990_v6  ;;  %v18091_v9 = vadd.f32 %v5165_v20, %v17993_v33  ;;  %v18100_v33 = vld [vmem:[%s17059_s8] ss:$0 sm:$0xff]  ;;  %v15816_v26 = vld [vmem:[%s16968_s30 + $0x1150] ss:$24 sps:$4 sm:$0xff]   ;;  %v15821_v20 = vld [vmem:[%s16968_s30 + $0x1114] ss:$24 sps:$4 sm:$0xff]  }
 0xac6   : > { %v5085_v59 = vpop.f32.mrf.mxu0  ;;  %v5167_v60 = vpop.f32.mrf.mxu1 }
 0xac7   : > { %v15824_v59 = vld [vmem:[%s16968_s30 + $0x1124] ss:$24 sps:$4 sm:$0xff]   ;;  %v15819_v60 = vld [vmem:[%s16968_s30 + $0x1110] ss:$24 sps:$4 sm:$0xff]  }
 0xac8   : > { %v5086_v29 = vpop.f32.mrf.mxu0  ;;  %v5168_v22 = vpop.f32.mrf.mxu1 }
 0xac9   : > { %v15822_v29 = vld [vmem:[%s16968_s30 + $0x1120] ss:$24 sps:$4 sm:$0xff]   ;;  %v15827_v22 = vld [vmem:[%s16968_s30 + $0x10e4] ss:$24 sps:$4 sm:$0xff]  }
 0xae2   : > { %v5122_v27 = vpop.f32.mrf.mxu0 }
 0xae3   : > { %v18094_v47 = vadd.f32 %v5122_v27, %v17996_v36  ;;  %v15771_v36 = vld [vmem:[%s16968_s30 + $0x1058] ss:$24 sps:$4 sm:$0xff]   ;;  %v15830_v27 = vld [vmem:[%s16968_s30 + $0x10f4] ss:$24 sps:$4 sm:$0xff]  }
 0xae4   : > { %v5124_v28 = vpop.f32.mrf.mxu0 }
 0xae5   : > { %v18097_v23 = vadd.f32 %v5124_v28, %v17999_v37  ;;  %v15825_v28 = vld [vmem:[%s16968_s30 + $0x10e0] ss:$24 sps:$4 sm:$0xff]  }
 0xae6   : > { %v5126_v6 = vpop.f32.mrf.mxu0 }
 0xae7   : > { %v15828_v6 = vld [vmem:[%s16968_s30 + $0x10f0] ss:$24 sps:$4 sm:$0xff]  }
 0xae8   : > { %v5127_v5 = vpop.f32.mrf.mxu0 }
 0xae9   : > { %v15833_v5 = vld [vmem:[%s16968_s30 + $0x10b4] ss:$24 sps:$4 sm:$0xff]  }
 0xb16   : > { %v5228_v7 = vpop.f32.mrf.mxu0 }
 0xb17   : > { %v5229_v11 = vadd.f32 %v18100_v33, %v5228_v7  ;;  %v15836_v7 = vld [vmem:[%s16968_s30 + $0x10c4] ss:$24 sps:$4 sm:$0xff]  }
 0xb18   : > { %v5230_v12 = vpop.f32.mrf.mxu0 }
 0xb19   : > { %v5234_v10 = vmax.f32 %v5229_v11, 0.0  ;;  %v15831_v11 = vld [vmem:[%s16968_s30 + $0x10b0] ss:$24 sps:$4 sm:$0xff]   ;;  %v15834_v12 = vld [vmem:[%s16968_s30 + $0x10c0] ss:$24 sps:$4 sm:$0xff]  }
 0xb1a   : > { %v5231_v2 = vpop.f32.mrf.mxu0 }
 0xb1b   : > { %v5235_v25 = vpack.c.bf16 %v5234_v10, %v5234_v10  ;;  %v15839_v10 = vld [vmem:[%s16968_s30 + $0x1084] ss:$24 sps:$4 sm:$0xff]   ;;  %v15837_v2 = vld [vmem:[%s16968_s30 + $0x1080] ss:$24 sps:$4 sm:$0xff]  }
 0xb1c   : > { %v5232_v37 = vpop.f32.mrf.mxu0 }
 0xb1d   : > { %5558 = vmatmul.mubr.bf16.vlgmr.msra.gmra.mxu1 %v5235_v25  ;;  %5640 = vmatmul.mubr.bf16.vlgmr.msra.gmra.mxu0 %v5235_v25 }
 0xb1e   : > { %5567 = vmatpush1.bf16.msra.mxu1 %v15771_v36  ;;  %5598 = vmatprep.mubr.bf16.mxu1 %v16901_v0  ;;  %v15842_v36 = vld [vmem:[%s16968_s30 + $0x1094] ss:$24 sps:$4 sm:$0xff]  }
 0xb1f   : > { %5568 = vmatprep.subr.bf16.mxu1 %v15776_v50  ;;  %6035 = vmatprep.mubr.bf16.mxu0 %v16901_v0  ;;  %v15845_v50 = vld [vmem:[%s16968_s30 + $0x11dc] ss:$24 sps:$4 sm:$0xff]  }
 0xb22   : > { %5569 = vmatpush1.bf16.msra.mxu1 %v15774_v44 }
 0xb23   : > { %5570 = vmatprep.subr.bf16.mxu1 %v15779_v13 }
 0xb26   : > { %5571 = vmatpush1.bf16.msra.mxu1 %v15777_v45 }
 0xb27   : > { %5572 = vmatprep.subr.bf16.mxu1 %v15782_v4 }
 0xb2a   : > { %5573 = vmatpush1.bf16.msra.mxu1 %v15780_v14 }
 0xb2b   : > { %5574 = vmatprep.subr.bf16.mxu1 %v15785_v31 }
 0xb2e   : > { %5575 = vmatpush1.bf16.msra.mxu1 %v15783_v32 }
 0xb2f   : > { %5576 = vmatprep.subr.bf16.mxu1 %v15788_v54 }
 0xb32   : > { %5577 = vmatpush1.bf16.msra.mxu1 %v15786_v34 }
 0xb33   : > { %5578 = vmatprep.subr.bf16.mxu1 %v15791_v35 }
 0xb36   : > { %5579 = vmatpush1.bf16.msra.mxu1 %v15789_v15 }
 0xb37   : > { %5580 = vmatprep.subr.bf16.mxu1 %v15794_v38 }
 0xb3a   : > { %5581 = vmatpush1.bf16.msra.mxu1 %v15792_v51 }
 0xb3b   : > { %5672 = vmatprep.subr.bf16.mxu1 %v16901_v0 }
 0xb3d   : > { %5599 = vmatmul.mubr.bf16.vlgmr.msra.gmra.mxu1 %v5235_v25  ;;  %v15840_v25 = vld [vmem:[%s16968_s30 + $0x1090] ss:$24 sps:$4 sm:$0xff]  }
 0xb3e   : > { %5673 = vmatpush1.bf16.msra.mxu1 %v18123_v39  ;;  %13589 = vmatprep.mubr.msk.bf16.mxu1 %vm419_vm0, %v5668_v48 }
 0xb3f   : > { %5674 = vmatprep.subr.bf16.mxu1 %v16901_v0 }
 0xb42   : > { %5675 = vmatpush1.bf16.msra.mxu1 %v18129_v42 }
 0xb43   : > { %5676 = vmatprep.subr.bf16.mxu1 %v16901_v0 }
 0xb46   : > { %5677 = vmatpush1.bf16.msra.mxu1 %v18134_v41 }
 0xb47   : > { %5678 = vmatprep.subr.bf16.mxu1 %v16901_v0 }
 0xb4a   : > { %5679 = vmatpush1.bf16.msra.mxu1 %v18139_v43 }
 0xb4b   : > { %5680 = vmatprep.subr.bf16.mxu1 %v16901_v0 }
 0xb4e   : > { %5681 = vmatpush1.bf16.msra.mxu1 %v17811_v52  ;;  %v5667_v52 = vpack.c.bf16 %v13588_v40, %v13588_v40 }
 0xb4f   : > { %5682 = vmatprep.subr.bf16.mxu1 %v16901_v0 }
 0xb52   : > { %5683 = vmatpush1.bf16.msra.mxu1 %v17816_v53  ;;  %v15795_v53 = vld [vmem:[%s16968_s30 + $0x11d0] ss:$24 sps:$4 sm:$0xff]  }
 0xb53   : > { %5684 = vmatprep.subr.bf16.mxu1 %v16901_v0 }
 0xb56   : > { %5685 = vmatpush1.bf16.msra.mxu1 %v17821_v17  ;;  %v15797_v17 = vld [vmem:[%s16968_s30 + $0x11d4] ss:$24 sps:$4 sm:$0xff]  }
 0xb57   : > { %5686 = vmatprep.subr.bf16.mxu1 %v16901_v0  ;;  %6003 = vmatprep.subr.bf16.mxu0 %v15797_v17  ;;  %v15843_v17 = vld [vmem:[%s16968_s30 + $0x11d8] ss:$24 sps:$4 sm:$0xff]  }
 0xb58   : > { %6004 = vmatpush1.bf16.msra.mxu0 %v15795_v53 }
 0xb5a   : > { %5687 = vmatpush1.bf16.msra.mxu1 %v17826_v18  ;;  %v15798_v18 = vld [vmem:[%s16968_s30 + $0x11e0] ss:$24 sps:$4 sm:$0xff]  }
 0xb5b   : > { %5694 = vmatprep.subr.bf16.mxu1 %v16901_v0 }
 0xb5e   : > { %5695 = vmatpush2.bf16.msra.mxu1 %v16998_v16 }
 0xb5f   : > { %5696 = vmatprep.subr.bf16.mxu1 %v16901_v0 }
 0xb62   : > { %5697 = vmatpush2.bf16.msra.mxu1 %v17833_v24  ;;  %v15800_v24 = vld [vmem:[%s16968_s30 + $0x11e4] ss:$24 sps:$4 sm:$0xff]  }
 0xb63   : > { %5698 = vmatprep.subr.bf16.mxu1 %v16901_v0 }
 0xb66   : > { %5699 = vmatpush2.bf16.msra.mxu1 %v17838_v61  ;;  %v15803_v61 = vld [vmem:[%s16968_s30 + $0x11a4] ss:$24 sps:$4 sm:$0xff]  }
 0xb67   : > { %5700 = vmatprep.subr.bf16.mxu1 %v16901_v0  ;;  %6005 = vmatprep.subr.bf16.mxu0 %v15803_v61  ;;  %v15851_v61 = vld [vmem:[%s16968_s30 + $0x117c] ss:$24 sps:$4 sm:$0xff]  }
 0xb68   : > { %6006 = vmatpush1.bf16.msra.mxu0 %v15801_v49  ;;  %v15854_v49 = vld [vmem:[%s16968_s30 + $0x114c] ss:$24 sps:$4 sm:$0xff]  }
 0xb69   : > { %6007 = vmatprep.subr.bf16.mxu0 %v15809_v63  ;;  %v15857_v63 = vld [vmem:[%s16968_s30 + $0x111c] ss:$24 sps:$4 sm:$0xff]  }
 0xb6a   : > { %5701 = vmatpush2.bf16.msra.mxu1 %v17843_v62  ;;  %v15806_v62 = vld [vmem:[%s16968_s30 + $0x11b4] ss:$24 sps:$4 sm:$0xff]  }
 0xb6b   : > { %5702 = vmatprep.subr.bf16.mxu1 %v16901_v0 }
 0xb6c   : > { %6008 = vmatpush1.bf16.msra.mxu0 %v15807_v57  ;;  %v15860_v57 = vld [vmem:[%s16968_s30 + $0x10ec] ss:$24 sps:$4 sm:$0xff]  }
 0xb6d   : > { %6009 = vmatprep.subr.bf16.mxu0 %v15815_v21  ;;  %v15863_v21 = vld [vmem:[%s16968_s30 + $0x10bc] ss:$24 sps:$4 sm:$0xff]  }
 0xb6e   : > { %5703 = vmatpush2.bf16.msra.mxu1 %v17848_v1  ;;  %v15804_v1 = vld [vmem:[%s16968_s30 + $0x11b0] ss:$24 sps:$4 sm:$0xff]  }
 0xb6f   : > { %6085 = vmatprep.subr.bf16.mxu1 %v15800_v24 }
 0xb70   : > { %6010 = vmatpush1.bf16.msra.mxu0 %v15813_v8  ;;  %v15866_v8 = vld [vmem:[%s16968_s30 + $0x108c] ss:$24 sps:$4 sm:$0xff]  }
 0xb71   : > { %5705 = vmatmul.mubr.bf16.vlgmr.msra.gmra.mxu1 %v5667_v52  ;;  %6011 = vmatprep.subr.bf16.mxu0 %v15821_v20  ;;  %v15864_v20 = vld [vmem:[%s16968_s30 + $0x1088] ss:$24 sps:$4 sm:$0xff]  }
 0xb72   : > { %6117 = vmatprep.mubr.bf16.mxu1 %v16901_v0  ;;  %6086 = vmatpush1.bf16.msra.mxu1 %v15798_v18 }
 0xb73   : > { %6087 = vmatprep.subr.bf16.mxu1 %v15806_v62  ;;  %v15849_v62 = vld [vmem:[%s16968_s30 + $0x1178] ss:$24 sps:$4 sm:$0xff]  }
 0xb74   : > { %6012 = vmatpush1.bf16.msra.mxu0 %v15819_v60 }
 0xb75   : > { %6013 = vmatprep.subr.bf16.mxu0 %v15827_v22  ;;  %v18247_v22 = vld [vmem:[%s16949_s23 + $0x10] sm:$0xff]  }
 0xb76   : > { %6088 = vmatpush1.bf16.msra.mxu1 %v15804_v1  ;;  %v15852_v1 = vld [vmem:[%s16968_s30 + $0x1148] ss:$24 sps:$4 sm:$0xff]  }
 0xb77   : > { %6089 = vmatprep.subr.bf16.mxu1 %v15812_v58  ;;  %v15855_v58 = vld [vmem:[%s16968_s30 + $0x1118] ss:$24 sps:$4 sm:$0xff]  }
 0xb78   : > { %6014 = vmatpush1.bf16.msra.mxu0 %v15825_v28  ;;  %v18257_v28 = vld [vmem:[%s16949_s23] sm:$0xff]  }
 0xb79   : > { %6015 = vmatprep.subr.bf16.mxu0 %v15833_v5  ;;  %v18269_v5 = vld [vmem:[%s16949_s23 + $0x50] sm:$0xff]  }
 0xb7a   : > { %6090 = vmatpush1.bf16.msra.mxu1 %v15810_v56  ;;  %v15858_v56 = vld [vmem:[%s16968_s30 + $0x10e8] ss:$24 sps:$4 sm:$0xff]  }
 0xb7b   : > { %6091 = vmatprep.subr.bf16.mxu1 %v15818_v55  ;;  %v15861_v55 = vld [vmem:[%s16968_s30 + $0x10b8] ss:$24 sps:$4 sm:$0xff]  }
 0xb7c   : > { %6016 = vmatpush1.bf16.msra.mxu0 %v15831_v11 }
 0xb7d   : > { %6017 = vmatprep.subr.bf16.mxu0 %v15839_v10  ;;  %v15867_v10 = vld [vmem:[%s16968_s30 + $0x1350] ss:$24 sps:$4 sm:$0xff]  }
 0xb7e   : > { %6092 = vmatpush1.bf16.msra.mxu1 %v15816_v26  ;;  %v13687_v26 = vld.sshfl [vmem:[%s16963_s27 + $0x30] sm:$0x33 pattern:$0x76325410] }
 0xb7f   : > { %6093 = vmatprep.subr.bf16.mxu1 %v15824_v59  ;;  %v6142_v59 = vcombine.high %v13687_v26, %v13687_v26  ;;  %v6145_v11 = vpack.c.bf16 %v13687_v26, %v13687_v26 }
 0xb80   : > { %6018 = vmatpush1.bf16.msra.mxu0 %v15837_v2  ;;  %v15869_v2 = vld [vmem:[%s16968_s30 + $0x1354] ss:$24 sps:$4 sm:$0xff]  }
 0xb81   : > { %6044 = vmatprep.subr.bf16.mxu0 %v15845_v50  ;;  %v6146_v60 = vpack.c.bf16 %v6142_v59, %v6142_v59  ;;  %v15875_v50 = vld [vmem:[%s16968_s30 + $0x1324] ss:$24 sps:$4 sm:$0xff]  }
 0xb82   : > { %6094 = vmatpush1.bf16.msra.mxu1 %v15822_v29  ;;  %v18242_v29 = vld [vmem:[%s16949_s23 + $0x18] sm:$0xff]  }
 0xb83   : > { %6095 = vmatprep.subr.bf16.mxu1 %v15830_v27  ;;  %v18252_v27 = vld [vmem:[%s16949_s23 + $0x8] sm:$0xff]  }
 0xb86   : > { %6096 = vmatpush1.bf16.msra.mxu1 %v15828_v6  ;;  %v18264_v6 = vld [vmem:[%s16949_s23 + $0x58] sm:$0xff]  }
 0xb87   : > { %6097 = vmatprep.subr.bf16.mxu1 %v15836_v7  ;;  %v18274_v7 = vld [vmem:[%s16949_s23 + $0x48] sm:$0xff]  }
 0xb8a   : > { %6098 = vmatpush1.bf16.msra.mxu1 %v15834_v12  ;;  %v18279_v12 = vld [vmem:[%s16949_s23 + $0x40] sm:$0xff]  }
 0xb8b   : > { %6099 = vmatprep.subr.bf16.mxu1 %v15842_v36  ;;  %v15870_v36 = vld [vmem:[%s16968_s30 + $0x1360] ss:$24 sps:$4 sm:$0xff]  }
 0xb8e   : > { %6100 = vmatpush1.bf16.msra.mxu1 %v15840_v25  ;;  %v15872_v25 = vld [vmem:[%s16968_s30 + $0x1364] ss:$24 sps:$4 sm:$0xff]  }
 0xb8f   : > { %6481 = vmatprep.subr.bf16.mxu1 %v15869_v2 }
 0xbdd   : > { %v5559_v37 = vpop.f32.mrf.mxu1  ;;  %v5641_v44 = vpop.f32.mrf.mxu0 }
 0xbde   : > { %v18195_v13 = vadd.f32 %v5559_v37, %v18082_v30  ;;  %v18198_v45 = vadd.f32 %v5641_v44, %v18085_v19  ;;  %v15878_v37 = vld [vmem:[%s16968_s30 + $0x1334] ss:$24 sps:$4 sm:$0xff]   ;;  %v15873_v44 = vld [vmem:[%s16968_s30 + $0x1320] ss:$24 sps:$4 sm:$0xff]  }
 0xbdf   : > { %v5561_v4 = vpop.f32.mrf.mxu1  ;;  %v5643_v14 = vpop.f32.mrf.mxu0 }
 0xbe0   : > { %v18201_v31 = vadd.f32 %v5561_v4, %v18088_v3  ;;  %v18204_v32 = vadd.f32 %v5643_v14, %v18091_v9  ;;  %v15876_v4 = vld [vmem:[%s16968_s30 + $0x1330] ss:$24 sps:$4 sm:$0xff]   ;;  %v15881_v14 = vld [vmem:[%s16968_s30 + $0x12f4] ss:$24 sps:$4 sm:$0xff]  }
 0xbe1   : > { %v5563_v54 = vpop.f32.mrf.mxu1  ;;  %v5645_v34 = vpop.f32.mrf.mxu0 }
 0xbe2   : > { %v15884_v54 = vld [vmem:[%s16968_s30 + $0x1304] ss:$24 sps:$4 sm:$0xff]   ;;  %v15879_v34 = vld [vmem:[%s16968_s30 + $0x12f0] ss:$24 sps:$4 sm:$0xff]  }
 0xbe3   : > { %v5564_v35 = vpop.f32.mrf.mxu1  ;;  %v5646_v15 = vpop.f32.mrf.mxu0 }
 0xbe4   : > { %v15882_v35 = vld [vmem:[%s16968_s30 + $0x1300] ss:$24 sps:$4 sm:$0xff]   ;;  %v15887_v15 = vld [vmem:[%s16968_s30 + $0x12c4] ss:$24 sps:$4 sm:$0xff]  }
 0xbfd   : > { %v5600_v38 = vpop.f32.mrf.mxu1 }
 0xbfe   : > { %v18207_v30 = vadd.f32 %v5600_v38, %v18094_v47  ;;  %v15848_v47 = vld [vmem:[%s16968_s30 + $0x11ac] ss:$24 sps:$4 sm:$0xff]  }
 0xbff   : > { %v5602_v19 = vpop.f32.mrf.mxu1  ;;  %v15890_v38 = vld [vmem:[%s16968_s30 + $0x12d4] ss:$24 sps:$4 sm:$0xff]  }
 0xc00   : > { %v18210_v40 = vadd.f32 %v5602_v19, %v18097_v23  ;;  %v15846_v23 = vld [vmem:[%s16968_s30 + $0x11a8] ss:$24 sps:$4 sm:$0xff]  }
 0xc01   : > { %v5604_v3 = vpop.f32.mrf.mxu1  ;;  %v15885_v19 = vld [vmem:[%s16968_s30 + $0x12c0] ss:$24 sps:$4 sm:$0xff]  }
 0xc02   : > { %v15888_v3 = vld [vmem:[%s16968_s30 + $0x12d0] ss:$24 sps:$4 sm:$0xff]  }
 0xc03   : > { %v5605_v51 = vpop.f32.mrf.mxu1 }
 0xc04   : > { %v15893_v51 = vld [vmem:[%s16968_s30 + $0x1294] ss:$24 sps:$4 sm:$0xff]  }
 0xc31   : > { %v5706_v9 = vpop.f32.mrf.mxu1 }
 0xc32   : > { %v5707_v46 = vadd.f32 %v18100_v33, %v5706_v9  ;;  %v15896_v9 = vld [vmem:[%s16968_s30 + $0x12a4] ss:$24 sps:$4 sm:$0xff]  }
 0xc33   : > { %v5708_v48 = vpop.f32.mrf.mxu1 }
 0xc34   : > { %v5712_v52 = vmax.f32 %v5707_v46, 0.0  ;;  %v15891_v46 = vld [vmem:[%s16968_s30 + $0x1290] ss:$24 sps:$4 sm:$0xff]   ;;  %v15894_v48 = vld [vmem:[%s16968_s30 + $0x12a0] ss:$24 sps:$4 sm:$0xff]  }
 0xc35   : > { %v5709_v53 = vpop.f32.mrf.mxu1 }
 0xc36   : > { %v5713_v18 = vpack.c.bf16 %v5712_v52, %v5712_v52  ;;  %v15899_v52 = vld [vmem:[%s16968_s30 + $0x1264] ss:$24 sps:$4 sm:$0xff]   ;;  %v15902_v53 = vld [vmem:[%s16968_s30 + $0x1274] ss:$24 sps:$4 sm:$0xff]  }
 0xc37   : > { %v5710_v24 = vpop.f32.mrf.mxu1 }
 0xc38   : > { %6036 = vmatmul.mubr.bf16.vlgmr.msra.gmra.mxu0 %v5713_v18  ;;  %6118 = vmatmul.mubr.bf16.vlgmr.msra.gmra.mxu1 %v5713_v18  ;;  %v15908_v24 = vld [vmem:[%s16968_s30 + $0x1244] ss:$24 sps:$4 sm:$0xff]  }
 0xc39   : > { %6045 = vmatpush1.bf16.msra.mxu0 %v15843_v17  ;;  %6076 = vmatprep.mubr.bf16.mxu0 %v16901_v0  ;;  %v15897_v17 = vld [vmem:[%s16968_s30 + $0x1260] ss:$24 sps:$4 sm:$0xff]  }
 0xc3a   : > { %6046 = vmatprep.subr.bf16.mxu0 %v15848_v47  ;;  %6513 = vmatprep.mubr.bf16.mxu1 %v16901_v0  ;;  %v15905_v47 = vld [vmem:[%s16968_s30 + $0x1234] ss:$24 sps:$4 sm:$0xff]  }
 0xc3b   : > { %6482 = vmatpush1.bf16.msra.mxu1 %v15867_v10 }
 0xc3c   : > { %6483 = vmatprep.subr.bf16.mxu1 %v15875_v50 }
 0xc3d   : > { %6047 = vmatpush1.bf16.msra.mxu0 %v15846_v23  ;;  %v15903_v23 = vld [vmem:[%s16968_s30 + $0x1230] ss:$24 sps:$4 sm:$0xff]  }
 0xc3e   : > { %6048 = vmatprep.subr.bf16.mxu0 %v15851_v61  ;;  %v15906_v61 = vld [vmem:[%s16968_s30 + $0x1240] ss:$24 sps:$4 sm:$0xff]  }
 0xc3f   : > { %6484 = vmatpush1.bf16.msra.mxu1 %v15873_v44 }
 0xc40   : > { %6485 = vmatprep.subr.bf16.mxu1 %v15881_v14 }
 0xc41   : > { %6049 = vmatpush1.bf16.msra.mxu0 %v15849_v62  ;;  %v15911_v62 = vld [vmem:[%s16968_s30 + $0x1204] ss:$24 sps:$4 sm:$0xff]  }
 0xc42   : > { %6050 = vmatprep.subr.bf16.mxu0 %v15854_v49  ;;  %v15909_v49 = vld [vmem:[%s16968_s30 + $0x1200] ss:$24 sps:$4 sm:$0xff]  }
 0xc43   : > { %6486 = vmatpush1.bf16.msra.mxu1 %v15879_v34 }
 0xc44   : > { %6487 = vmatprep.subr.bf16.mxu1 %v15887_v15  ;;  %v15923_v15 = vld [vmem:[%s16968_s30 + $0x12fc] ss:$24 sps:$4 sm:$0xff]  }
 0xc45   : > { %6051 = vmatpush1.bf16.msra.mxu0 %v15852_v1  ;;  %v15914_v1 = vld [vmem:[%s16968_s30 + $0x1214] ss:$24 sps:$4 sm:$0xff]  }
 0xc46   : > { %6052 = vmatprep.subr.bf16.mxu0 %v15857_v63  ;;  %v15912_v63 = vld [vmem:[%s16968_s30 + $0x1210] ss:$24 sps:$4 sm:$0xff]  }
 0xc47   : > { %6488 = vmatpush1.bf16.msra.mxu1 %v15885_v19  ;;  %v15926_v19 = vld [vmem:[%s16968_s30 + $0x12cc] ss:$24 sps:$4 sm:$0xff]  }
 0xc48   : > { %6489 = vmatprep.subr.bf16.mxu1 %v15893_v51  ;;  %v15929_v51 = vld [vmem:[%s16968_s30 + $0x129c] ss:$24 sps:$4 sm:$0xff]  }
 0xc49   : > { %6053 = vmatpush1.bf16.msra.mxu0 %v15855_v58  ;;  %v15917_v58 = vld [vmem:[%s16968_s30 + $0x135c] ss:$24 sps:$4 sm:$0xff]  }
 0xc4a   : > { %6054 = vmatprep.subr.bf16.mxu0 %v15860_v57 }
 0xc4b   : > { %6490 = vmatpush1.bf16.msra.mxu1 %v15891_v46  ;;  %v15932_v46 = vld [vmem:[%s16968_s30 + $0x126c] ss:$24 sps:$4 sm:$0xff]  }
 0xc4c   : > { %6491 = vmatprep.subr.bf16.mxu1 %v15899_v52  ;;  %v15935_v52 = vld [vmem:[%s16968_s30 + $0x123c] ss:$24 sps:$4 sm:$0xff]  }
 0xc4d   : > { %6055 = vmatpush1.bf16.msra.mxu0 %v15858_v56 }
 0xc4e   : > { %6056 = vmatprep.subr.bf16.mxu0 %v15863_v21 }
 0xc4f   : > { %6492 = vmatpush1.bf16.msra.mxu1 %v15897_v17  ;;  %v15938_v17 = vld [vmem:[%s16968_s30 + $0x120c] ss:$24 sps:$4 sm:$0xff]  }
 0xc50   : > { %6493 = vmatprep.subr.bf16.mxu1 %v15905_v47  ;;  %v15936_v47 = vld [vmem:[%s16968_s30 + $0x1208] ss:$24 sps:$4 sm:$0xff]  }
 0xc51   : > { %6057 = vmatpush1.bf16.msra.mxu0 %v15861_v55 }
 0xc52   : > { %6058 = vmatprep.subr.bf16.mxu0 %v15866_v8 }
 0xc53   : > { %6494 = vmatpush1.bf16.msra.mxu1 %v15903_v23 }
 0xc54   : > { %6495 = vmatprep.subr.bf16.mxu1 %v15911_v62  ;;  %v15939_v62 = vld [vmem:[%s16968_s30 + $0x14d0] ss:$24 sps:$4 sm:$0xff]  }
 0xc55   : > { %6059 = vmatpush1.bf16.msra.mxu0 %v15864_v20 }
 0xc56   : > { %6150 = vmatprep.subr.bf16.mxu0 %v16901_v0 }
 0xc57   : > { %6496 = vmatpush1.bf16.msra.mxu1 %v15909_v49  ;;  %v15941_v49 = vld [vmem:[%s16968_s30 + $0x14d4] ss:$24 sps:$4 sm:$0xff]  }
 0xc58   : > { %6077 = vmatmul.mubr.bf16.vlgmr.msra.gmra.mxu0 %v5713_v18  ;;  %v15900_v18 = vld [vmem:[%s16968_s30 + $0x1270] ss:$24 sps:$4 sm:$0xff]   ;;  %6522 = vmatprep.subr.bf16.mxu1 %v15917_v58  ;;  %v15947_v58 = vld [vmem:[%s16968_s30 + $0x14a4] ss:$24 sps:$4 sm:$0xff]  }
 0xc59   : > { %6151 = vmatpush1.bf16.msra.mxu0 %v18123_v39  ;;  %13688 = vmatprep.mubr.msk.bf16.mxu0 %vm419_vm0, %v6146_v60 }
 0xc5a   : > { %6152 = vmatprep.subr.bf16.mxu0 %v16901_v0 }
 0xc5d   : > { %6153 = vmatpush1.bf16.msra.mxu0 %v18129_v42 }
 0xc5e   : > { %6154 = vmatprep.subr.bf16.mxu0 %v16901_v0 }
 0xc61   : > { %6155 = vmatpush1.bf16.msra.mxu0 %v18134_v41 }
 0xc62   : > { %6156 = vmatprep.subr.bf16.mxu0 %v16901_v0 }
 0xc65   : > { %6157 = vmatpush1.bf16.msra.mxu0 %v18139_v43 }
 0xc66   : > { %6158 = vmatprep.subr.bf16.mxu0 %v16901_v0 }
 0xc69   : > { %6159 = vmatpush1.bf16.msra.mxu0 %v18242_v29 }
 0xc6a   : > { %6160 = vmatprep.subr.bf16.mxu0 %v16901_v0 }
 0xc6d   : > { %6161 = vmatpush1.bf16.msra.mxu0 %v18247_v22 }
 0xc6e   : > { %6162 = vmatprep.subr.bf16.mxu0 %v16901_v0 }
 0xc71   : > { %6163 = vmatpush1.bf16.msra.mxu0 %v18252_v27 }
 0xc72   : > { %6164 = vmatprep.subr.bf16.mxu0 %v16901_v0 }
 0xc75   : > { %6165 = vmatpush1.bf16.msra.mxu0 %v18257_v28 }
 0xc76   : > { %6172 = vmatprep.subr.bf16.mxu0 %v16901_v0 }
 0xc79   : > { %6173 = vmatpush2.bf16.msra.mxu0 %v16998_v16 }
 0xc7a   : > { %6174 = vmatprep.subr.bf16.mxu0 %v16901_v0 }
 0xc7d   : > { %6175 = vmatpush2.bf16.msra.mxu0 %v18264_v6 }
 0xc7e   : > { %6176 = vmatprep.subr.bf16.mxu0 %v16901_v0 }
 0xc81   : > { %6177 = vmatpush2.bf16.msra.mxu0 %v18269_v5 }
 0xc82   : > { %6178 = vmatprep.subr.bf16.mxu0 %v16901_v0 }
 0xc85   : > { %6179 = vmatpush2.bf16.msra.mxu0 %v18274_v7 }
 0xc86   : > { %6180 = vmatprep.subr.bf16.mxu0 %v16901_v0 }
 0xc89   : > { %6181 = vmatpush2.bf16.msra.mxu0 %v18279_v12 }
 0xc8a   : > { %6563 = vmatprep.subr.bf16.mxu0 %v15872_v25 }
 0xc8c   : > { %6183 = vmatmul.mubr.bf16.vlgmr.msra.gmra.mxu0 %v6145_v11 }
 0xc8d   : > { %6595 = vmatprep.mubr.bf16.mxu0 %v16901_v0  ;;  %6564 = vmatpush1.bf16.msra.mxu0 %v15870_v36 }
 0xc8e   : > { %6565 = vmatprep.subr.bf16.mxu0 %v15878_v37 }
 0xc91   : > { %6566 = vmatpush1.bf16.msra.mxu0 %v15876_v4 }
 0xc92   : > { %6567 = vmatprep.subr.bf16.mxu0 %v15884_v54  ;;  %v15915_v54 = vld [vmem:[%s16968_s30 + $0x1358] ss:$24 sps:$4 sm:$0xff]  }
 0xc95   : > { %6568 = vmatpush1.bf16.msra.mxu0 %v15882_v35 }
 0xc96   : > { %6569 = vmatprep.subr.bf16.mxu0 %v15890_v38  ;;  %v15921_v38 = vld [vmem:[%s16968_s30 + $0x12f8] ss:$24 sps:$4 sm:$0xff]  }
 0xc99   : > { %6570 = vmatpush1.bf16.msra.mxu0 %v15888_v3  ;;  %v15924_v3 = vld [vmem:[%s16968_s30 + $0x12c8] ss:$24 sps:$4 sm:$0xff]  }
 0xc9a   : > { %6571 = vmatprep.subr.bf16.mxu0 %v15896_v9  ;;  %v15927_v9 = vld [vmem:[%s16968_s30 + $0x1298] ss:$24 sps:$4 sm:$0xff]  }
 0xc9d   : > { %6572 = vmatpush1.bf16.msra.mxu0 %v15894_v48  ;;  %v15930_v48 = vld [vmem:[%s16968_s30 + $0x1268] ss:$24 sps:$4 sm:$0xff]  }
 0xc9e   : > { %6573 = vmatprep.subr.bf16.mxu0 %v15902_v53  ;;  %v15933_v53 = vld [vmem:[%s16968_s30 + $0x1238] ss:$24 sps:$4 sm:$0xff]  }
 0xca1   : > { %6574 = vmatpush1.bf16.msra.mxu0 %v15900_v18  ;;  %v13786_v18 = vld.sshfl [vmem:[%s16963_s27 + $0x34] sm:$0x33 pattern:$0x76325410] }
 0xca2   : > { %6575 = vmatprep.subr.bf16.mxu0 %v15908_v24  ;;  %v6620_v24 = vcombine.high %v13786_v18, %v13786_v18 }
 0xca4   : > { %v6624_v23 = vpack.c.bf16 %v6620_v24, %v6620_v24 }
 0xca5   : > { %6576 = vmatpush1.bf16.msra.mxu0 %v15906_v61  ;;  %v6623_v61 = vpack.c.bf16 %v13786_v18, %v13786_v18 }
 0xca6   : > { %6577 = vmatprep.subr.bf16.mxu0 %v15914_v1  ;;  %v15942_v1 = vld [vmem:[%s16968_s30 + $0x14e0] ss:$24 sps:$4 sm:$0xff]  }
 0xca9   : > { %6578 = vmatpush1.bf16.msra.mxu0 %v15912_v63  ;;  %v15944_v63 = vld [vmem:[%s16968_s30 + $0x14e4] ss:$24 sps:$4 sm:$0xff]  }
 0xcaa   : > { %6959 = vmatprep.subr.bf16.mxu0 %v15941_v49 }
 0xcf8   : > { %v6037_v57 = vpop.f32.mrf.mxu0  ;;  %v6119_v56 = vpop.f32.mrf.mxu1 }
 0xcf9   : > { %v18317_v21 = vadd.f32 %v6037_v57, %v18195_v13  ;;  %v18320_v55 = vadd.f32 %v6119_v56, %v18198_v45  ;;  %v15950_v57 = vld [vmem:[%s16968_s30 + $0x14b4] ss:$24 sps:$4 sm:$0xff]   ;;  %v15945_v56 = vld [vmem:[%s16968_s30 + $0x14a0] ss:$24 sps:$4 sm:$0xff]  }
 0xcfa   : > { %v6039_v8 = vpop.f32.mrf.mxu0  ;;  %v6121_v26 = vpop.f32.mrf.mxu1 }
 0xcfb   : > { %v18323_v20 = vadd.f32 %v6039_v8, %v18201_v31  ;;  %v18326_v59 = vadd.f32 %v6121_v26, %v18204_v32  ;;  %v15948_v8 = vld [vmem:[%s16968_s30 + $0x14b0] ss:$24 sps:$4 sm:$0xff]   ;;  %v15953_v26 = vld [vmem:[%s16968_s30 + $0x1474] ss:$24 sps:$4 sm:$0xff]  }
 0xcfc   : > { %v6041_v60 = vpop.f32.mrf.mxu0  ;;  %v6123_v11 = vpop.f32.mrf.mxu1 }
 0xcfd   : > { %v15956_v60 = vld [vmem:[%s16968_s30 + $0x1484] ss:$24 sps:$4 sm:$0xff]   ;;  %v15951_v11 = vld [vmem:[%s16968_s30 + $0x1470] ss:$24 sps:$4 sm:$0xff]  }
 0xcfe   : > { %v6042_v10 = vpop.f32.mrf.mxu0  ;;  %v6124_v2 = vpop.f32.mrf.mxu1 }
 0xcff   : > { %v15954_v10 = vld [vmem:[%s16968_s30 + $0x1480] ss:$24 sps:$4 sm:$0xff]   ;;  %v15959_v2 = vld [vmem:[%s16968_s30 + $0x1444] ss:$24 sps:$4 sm:$0xff]  }
 0xd18   : > { %v6078_v36 = vpop.f32.mrf.mxu0 }
 0xd19   : > { %v18329_v13 = vadd.f32 %v6078_v36, %v18207_v30  ;;  %v15920_v30 = vld [vmem:[%s16968_s30 + $0x132c] ss:$24 sps:$4 sm:$0xff]  }
 0xd1a   : > { %v6080_v45 = vpop.f32.mrf.mxu0  ;;  %v15962_v36 = vld [vmem:[%s16968_s30 + $0x1454] ss:$24 sps:$4 sm:$0xff]  }
 0xd1b   : > { %v18332_v25 = vadd.f32 %v6080_v45, %v18210_v40  ;;  %v15918_v40 = vld [vmem:[%s16968_s30 + $0x1328] ss:$24 sps:$4 sm:$0xff]  }
 0xd1c   : > { %v6082_v31 = vpop.f32.mrf.mxu0  ;;  %v15957_v45 = vld [vmem:[%s16968_s30 + $0x1440] ss:$24 sps:$4 sm:$0xff]  }
 0xd1d   : > { %v15960_v31 = vld [vmem:[%s16968_s30 + $0x1450] ss:$24 sps:$4 sm:$0xff]  }
 0xd1e   : > { %v6083_v50 = vpop.f32.mrf.mxu0 }
 0xd1f   : > { %v15965_v50 = vld [vmem:[%s16968_s30 + $0x1414] ss:$24 sps:$4 sm:$0xff]  }
 0xd4c   : > { %v6184_v32 = vpop.f32.mrf.mxu0 }
 0xd4d   : > { %v6185_v37 = vadd.f32 %v18100_v33, %v6184_v32  ;;  %v15968_v32 = vld [vmem:[%s16968_s30 + $0x1424] ss:$24 sps:$4 sm:$0xff]  }
 0xd4e   : > { %v6186_v44 = vpop.f32.mrf.mxu0 }
 0xd4f   : > { %v6190_v4 = vmax.f32 %v6185_v37, 0.0  ;;  %v15963_v37 = vld [vmem:[%s16968_s30 + $0x1410] ss:$24 sps:$4 sm:$0xff]   ;;  %v15966_v44 = vld [vmem:[%s16968_s30 + $0x1420] ss:$24 sps:$4 sm:$0xff]  }
 0xd50   : > { %v6187_v14 = vpop.f32.mrf.mxu0 }
 0xd51   : > { %v6191_v34 = vpack.c.bf16 %v6190_v4, %v6190_v4  ;;  %v15971_v4 = vld [vmem:[%s16968_s30 + $0x13e4] ss:$24 sps:$4 sm:$0xff]   ;;  %v15974_v14 = vld [vmem:[%s16968_s30 + $0x13f4] ss:$24 sps:$4 sm:$0xff]  }
 0xd52   : > { %v6188_v35 = vpop.f32.mrf.mxu0 }
 0xd53   : > { %6514 = vmatmul.mubr.bf16.vlgmr.msra.gmra.mxu1 %v6191_v34  ;;  %6596 = vmatmul.mubr.bf16.vlgmr.msra.gmra.mxu0 %v6191_v34  ;;  %v15980_v35 = vld [vmem:[%s16968_s30 + $0x13c4] ss:$24 sps:$4 sm:$0xff]  }
 0xd54   : > { %6523 = vmatpush1.bf16.msra.mxu1 %v15915_v54  ;;  %6554 = vmatprep.mubr.bf16.mxu1 %v16901_v0  ;;  %v15969_v54 = vld [vmem:[%s16968_s30 + $0x13e0] ss:$24 sps:$4 sm:$0xff]  }
 0xd55   : > { %6524 = vmatprep.subr.bf16.mxu1 %v15920_v30  ;;  %6991 = vmatprep.mubr.bf16.mxu0 %v16901_v0  ;;  %v15977_v30 = vld [vmem:[%s16968_s30 + $0x13b4] ss:$24 sps:$4 sm:$0xff]  }
 0xd56   : > { %6960 = vmatpush1.bf16.msra.mxu0 %v15939_v62 }
 0xd57   : > { %6961 = vmatprep.subr.bf16.mxu0 %v15947_v58 }
 0xd58   : > { %6525 = vmatpush1.bf16.msra.mxu1 %v15918_v40  ;;  %v15975_v40 = vld [vmem:[%s16968_s30 + $0x13b0] ss:$24 sps:$4 sm:$0xff]  }
 0xd59   : > { %6526 = vmatprep.subr.bf16.mxu1 %v15923_v15  ;;  %v15978_v15 = vld [vmem:[%s16968_s30 + $0x13c0] ss:$24 sps:$4 sm:$0xff]  }
 0xd5a   : > { %6962 = vmatpush1.bf16.msra.mxu0 %v15945_v56 }
 0xd5b   : > { %6963 = vmatprep.subr.bf16.mxu0 %v15953_v26 }
 0xd5c   : > { %6527 = vmatpush1.bf16.msra.mxu1 %v15921_v38  ;;  %v15983_v38 = vld [vmem:[%s16968_s30 + $0x1384] ss:$24 sps:$4 sm:$0xff]  }
 0xd5d   : > { %6528 = vmatprep.subr.bf16.mxu1 %v15926_v19  ;;  %v15981_v19 = vld [vmem:[%s16968_s30 + $0x1380] ss:$24 sps:$4 sm:$0xff]  }
 0xd5e   : > { %6964 = vmatpush1.bf16.msra.mxu0 %v15951_v11 }
 0xd5f   : > { %6965 = vmatprep.subr.bf16.mxu0 %v15959_v2  ;;  %v15993_v2 = vld [vmem:[%s16968_s30 + $0x1478] ss:$24 sps:$4 sm:$0xff]  }
 0xd60   : > { %6529 = vmatpush1.bf16.msra.mxu1 %v15924_v3  ;;  %v15986_v3 = vld [vmem:[%s16968_s30 + $0x1394] ss:$24 sps:$4 sm:$0xff]  }
 0xd61   : > { %6530 = vmatprep.subr.bf16.mxu1 %v15929_v51  ;;  %v15984_v51 = vld [vmem:[%s16968_s30 + $0x1390] ss:$24 sps:$4 sm:$0xff]  }
 0xd62   : > { %6966 = vmatpush1.bf16.msra.mxu0 %v15957_v45  ;;  %v15996_v45 = vld [vmem:[%s16968_s30 + $0x1448] ss:$24 sps:$4 sm:$0xff]  }
 0xd63   : > { %6967 = vmatprep.subr.bf16.mxu0 %v15965_v50  ;;  %v15999_v50 = vld [vmem:[%s16968_s30 + $0x1418] ss:$24 sps:$4 sm:$0xff]  }
 0xd64   : > { %6531 = vmatpush1.bf16.msra.mxu1 %v15927_v9  ;;  %v15989_v9 = vld [vmem:[%s16968_s30 + $0x14dc] ss:$24 sps:$4 sm:$0xff]  }
 0xd65   : > { %6532 = vmatprep.subr.bf16.mxu1 %v15932_v46 }
 0xd66   : > { %6968 = vmatpush1.bf16.msra.mxu0 %v15963_v37  ;;  %v16002_v37 = vld [vmem:[%s16968_s30 + $0x13e8] ss:$24 sps:$4 sm:$0xff]  }
 0xd67   : > { %6969 = vmatprep.subr.bf16.mxu0 %v15971_v4  ;;  %v16005_v4 = vld [vmem:[%s16968_s30 + $0x13b8] ss:$24 sps:$4 sm:$0xff]  }
 0xd68   : > { %6533 = vmatpush1.bf16.msra.mxu1 %v15930_v48 }
 0xd69   : > { %6534 = vmatprep.subr.bf16.mxu1 %v15935_v52 }
 0xd6a   : > { %6970 = vmatpush1.bf16.msra.mxu0 %v15969_v54  ;;  %v13885_v54 = vld.sshfl [vmem:[%s16963_s27 + $0x38] sm:$0x33 pattern:$0x76325410] }
 0xd6b   : > { %6971 = vmatprep.subr.bf16.mxu0 %v15977_v30  ;;  %v7098_v30 = vcombine.high %v13885_v54, %v13885_v54 }
 0xd6c   : > { %6535 = vmatpush1.bf16.msra.mxu1 %v15933_v53 }
 0xd6d   : > { %6536 = vmatprep.subr.bf16.mxu1 %v15938_v17 }
 0xd6e   : > { %6972 = vmatpush1.bf16.msra.mxu0 %v15975_v40  ;;  %v16016_v40 = vld [vmem:[%s16968_s30 + $0x1664] ss:$24 sps:$4 sm:$0xff]  }
 0xd6f   : > { %6973 = vmatprep.subr.bf16.mxu0 %v15983_v38  ;;  %v16022_v38 = vld [vmem:[%s16968_s30 + $0x1634] ss:$24 sps:$4 sm:$0xff]  }
 0xd70   : > { %6537 = vmatpush1.bf16.msra.mxu1 %v15936_v47 }
 0xd71   : > { %6628 = vmatprep.subr.bf16.mxu1 %v16901_v0 }
 0xd72   : > { %6974 = vmatpush1.bf16.msra.mxu0 %v15981_v19  ;;  %v16017_v19 = vld [vmem:[%s16968_s30 + $0x1620] ss:$24 sps:$4 sm:$0xff]  }
 0xd73   : > { %6555 = vmatmul.mubr.bf16.vlgmr.msra.gmra.mxu1 %v6191_v34  ;;  %v15972_v34 = vld [vmem:[%s16968_s30 + $0x13f0] ss:$24 sps:$4 sm:$0xff]   ;;  %7000 = vmatprep.subr.bf16.mxu0 %v15989_v9  ;;  %v16028_v9 = vld [vmem:[%s16968_s30 + $0x1604] ss:$24 sps:$4 sm:$0xff]  }
 0xd74   : > { %6629 = vmatpush1.bf16.msra.mxu1 %v18123_v39  ;;  %13787 = vmatprep.mubr.msk.bf16.mxu1 %vm419_vm0, %v6624_v23 }
 0xd75   : > { %6630 = vmatprep.subr.bf16.mxu1 %v16901_v0 }
 0xd78   : > { %6631 = vmatpush1.bf16.msra.mxu1 %v18129_v42 }
 0xd79   : > { %6632 = vmatprep.subr.bf16.mxu1 %v16901_v0 }
 0xd7c   : > { %6633 = vmatpush1.bf16.msra.mxu1 %v18134_v41 }
 0xd7d   : > { %6634 = vmatprep.subr.bf16.mxu1 %v16901_v0 }
 0xd80   : > { %6635 = vmatpush1.bf16.msra.mxu1 %v18139_v43 }
 0xd81   : > { %6636 = vmatprep.subr.bf16.mxu1 %v16901_v0 }
 0xd84   : > { %6637 = vmatpush1.bf16.msra.mxu1 %v18242_v29 }
 0xd85   : > { %6638 = vmatprep.subr.bf16.mxu1 %v16901_v0 }
 0xd88   : > { %6639 = vmatpush1.bf16.msra.mxu1 %v18247_v22 }
 0xd89   : > { %6640 = vmatprep.subr.bf16.mxu1 %v16901_v0 }
 0xd8c   : > { %6641 = vmatpush1.bf16.msra.mxu1 %v18252_v27 }
 0xd8d   : > { %6642 = vmatprep.subr.bf16.mxu1 %v16901_v0 }
 0xd90   : > { %6643 = vmatpush1.bf16.msra.mxu1 %v18257_v28 }
 0xd91   : > { %6650 = vmatprep.subr.bf16.mxu1 %v16901_v0 }
 0xd94   : > { %6651 = vmatpush2.bf16.msra.mxu1 %v16998_v16 }
 0xd95   : > { %6652 = vmatprep.subr.bf16.mxu1 %v16901_v0 }
 0xd98   : > { %6653 = vmatpush2.bf16.msra.mxu1 %v18264_v6 }
 0xd99   : > { %6654 = vmatprep.subr.bf16.mxu1 %v16901_v0 }
 0xd9c   : > { %6655 = vmatpush2.bf16.msra.mxu1 %v18269_v5 }
 0xd9d   : > { %6656 = vmatprep.subr.bf16.mxu1 %v16901_v0 }
 0xda0   : > { %6657 = vmatpush2.bf16.msra.mxu1 %v18274_v7 }
 0xda1   : > { %6658 = vmatprep.subr.bf16.mxu1 %v16901_v0 }
 0xda4   : > { %6659 = vmatpush2.bf16.msra.mxu1 %v18279_v12 }
 0xda5   : > { %7041 = vmatprep.subr.bf16.mxu1 %v15944_v63 }
 0xda7   : > { %6661 = vmatmul.mubr.bf16.vlgmr.msra.gmra.mxu1 %v6623_v61 }
 0xda8   : > { %7073 = vmatprep.mubr.bf16.mxu1 %v16901_v0  ;;  %7042 = vmatpush1.bf16.msra.mxu1 %v15942_v1 }
 0xda9   : > { %7043 = vmatprep.subr.bf16.mxu1 %v15950_v57 }
 0xdac   : > { %7044 = vmatpush1.bf16.msra.mxu1 %v15948_v8 }
 0xdad   : > { %7045 = vmatprep.subr.bf16.mxu1 %v15956_v60  ;;  %v15987_v60 = vld [vmem:[%s16968_s30 + $0x14d8] ss:$24 sps:$4 sm:$0xff]  }
 0xdb0   : > { %7046 = vmatpush1.bf16.msra.mxu1 %v15954_v10 }
 0xdb1   : > { %7047 = vmatprep.subr.bf16.mxu1 %v15962_v36  ;;  %v15998_v36 = vld [vmem:[%s16968_s30 + $0x144c] ss:$24 sps:$4 sm:$0xff]  }
 0xdb4   : > { %7048 = vmatpush1.bf16.msra.mxu1 %v15960_v31  ;;  %v16001_v31 = vld [vmem:[%s16968_s30 + $0x141c] ss:$24 sps:$4 sm:$0xff]  }
 0xdb5   : > { %7049 = vmatprep.subr.bf16.mxu1 %v15968_v32  ;;  %v16004_v32 = vld [vmem:[%s16968_s30 + $0x13ec] ss:$24 sps:$4 sm:$0xff]  }
 0xdb8   : > { %7050 = vmatpush1.bf16.msra.mxu1 %v15966_v44  ;;  %v16007_v44 = vld [vmem:[%s16968_s30 + $0x13bc] ss:$24 sps:$4 sm:$0xff]  }
 0xdb9   : > { %7051 = vmatprep.subr.bf16.mxu1 %v15974_v14  ;;  %v16010_v14 = vld [vmem:[%s16968_s30 + $0x138c] ss:$24 sps:$4 sm:$0xff]  }
 0xdbc   : > { %7052 = vmatpush1.bf16.msra.mxu1 %v15972_v34  ;;  %v16008_v34 = vld [vmem:[%s16968_s30 + $0x1388] ss:$24 sps:$4 sm:$0xff]  }
 0xdbd   : > { %7053 = vmatprep.subr.bf16.mxu1 %v15980_v35  ;;  %v7102_v35 = vpack.c.bf16 %v7098_v30, %v7098_v30 }
 0xdc0   : > { %7054 = vmatpush1.bf16.msra.mxu1 %v15978_v15  ;;  %v16019_v15 = vld [vmem:[%s16968_s30 + $0x1624] ss:$24 sps:$4 sm:$0xff]  }
 0xdc1   : > { %7055 = vmatprep.subr.bf16.mxu1 %v15986_v3  ;;  %v16020_v3 = vld [vmem:[%s16968_s30 + $0x1630] ss:$24 sps:$4 sm:$0xff]  }
 0xdc4   : > { %7056 = vmatpush1.bf16.msra.mxu1 %v15984_v51  ;;  %v16025_v51 = vld [vmem:[%s16968_s30 + $0x15f4] ss:$24 sps:$4 sm:$0xff]  }
 0xe13   : > { %v6515_v46 = vpop.f32.mrf.mxu1  ;;  %v6597_v48 = vpop.f32.mrf.mxu0 }
 0xe14   : > { %v18415_v52 = vadd.f32 %v6515_v46, %v18317_v21  ;;  %v18418_v53 = vadd.f32 %v6597_v48, %v18320_v55  ;;  %v16023_v46 = vld [vmem:[%s16968_s30 + $0x15f0] ss:$24 sps:$4 sm:$0xff]   ;;  %v16026_v48 = vld [vmem:[%s16968_s30 + $0x1600] ss:$24 sps:$4 sm:$0xff]  }
 0xe15   : > { %v6517_v17 = vpop.f32.mrf.mxu1  ;;  %v6599_v18 = vpop.f32.mrf.mxu0 }
 0xe16   : > { %v18421_v47 = vadd.f32 %v6517_v17, %v18323_v20  ;;  %v18424_v24 = vadd.f32 %v6599_v18, %v18326_v59  ;;  %v16031_v17 = vld [vmem:[%s16968_s30 + $0x15c4] ss:$24 sps:$4 sm:$0xff]   ;;  %v16034_v18 = vld [vmem:[%s16968_s30 + $0x15d4] ss:$24 sps:$4 sm:$0xff]  }
 0xe17   : > { %v6519_v23 = vpop.f32.mrf.mxu1  ;;  %v6601_v61 = vpop.f32.mrf.mxu0 }
 0xe18   : > { %v16029_v23 = vld [vmem:[%s16968_s30 + $0x15c0] ss:$24 sps:$4 sm:$0xff]   ;;  %v16032_v61 = vld [vmem:[%s16968_s30 + $0x15d0] ss:$24 sps:$4 sm:$0xff]  }
 0xe19   : > { %v6520_v62 = vpop.f32.mrf.mxu1  ;;  %v6602_v49 = vpop.f32.mrf.mxu0 }
 0xe1a   : > { %v16037_v62 = vld [vmem:[%s16968_s30 + $0x1594] ss:$24 sps:$4 sm:$0xff]   ;;  %v16040_v49 = vld [vmem:[%s16968_s30 + $0x15a4] ss:$24 sps:$4 sm:$0xff]  }
 0xe33   : > { %v6556_v1 = vpop.f32.mrf.mxu1 }
 0xe34   : > { %v18427_v21 = vadd.f32 %v6556_v1, %v18329_v13  ;;  %v15992_v13 = vld [vmem:[%s16968_s30 + $0x14ac] ss:$24 sps:$4 sm:$0xff]   ;;  %v16035_v1 = vld [vmem:[%s16968_s30 + $0x1590] ss:$24 sps:$4 sm:$0xff]  }
 0xe35   : > { %v6558_v55 = vpop.f32.mrf.mxu1 }
 0xe36   : > { %v18430_v63 = vadd.f32 %v6558_v55, %v18332_v25  ;;  %v15990_v25 = vld [vmem:[%s16968_s30 + $0x14a8] ss:$24 sps:$4 sm:$0xff]  }
 0xe37   : > { %v6560_v20 = vpop.f32.mrf.mxu1  ;;  %v16038_v55 = vld [vmem:[%s16968_s30 + $0x15a0] ss:$24 sps:$4 sm:$0xff]  }
 0xe38   : > { %v16043_v20 = vld [vmem:[%s16968_s30 + $0x1564] ss:$24 sps:$4 sm:$0xff]  }
 0xe39   : > { %v6561_v58 = vpop.f32.mrf.mxu1 }
 0xe3a   : > { %v16046_v58 = vld [vmem:[%s16968_s30 + $0x1574] ss:$24 sps:$4 sm:$0xff]  }
 0xe67   : > { %v6662_v59 = vpop.f32.mrf.mxu1 }
 0xe68   : > { %v6663_v57 = vadd.f32 %v18100_v33, %v6662_v59  ;;  %v15995_v33 = vld [vmem:[%s16968_s30 + $0x147c] ss:$24 sps:$4 sm:$0xff]   ;;  %v16041_v59 = vld [vmem:[%s16968_s30 + $0x1560] ss:$24 sps:$4 sm:$0xff]  }
 0xe69   : > { %v6664_v56 = vpop.f32.mrf.mxu1 }
 0xe6a   : > { %v6668_v8 = vmax.f32 %v6663_v57, 0.0  ;;  %v16044_v57 = vld [vmem:[%s16968_s30 + $0x1570] ss:$24 sps:$4 sm:$0xff]   ;;  %v16049_v56 = vld [vmem:[%s16968_s30 + $0x1534] ss:$24 sps:$4 sm:$0xff]  }
 0xe6b   : > { %v6665_v26 = vpop.f32.mrf.mxu1 }
 0xe6c   : > { %v6669_v11 = vpack.c.bf16 %v6668_v8, %v6668_v8  ;;  %v16052_v8 = vld [vmem:[%s16968_s30 + $0x1544] ss:$24 sps:$4 sm:$0xff]   ;;  %v16047_v26 = vld [vmem:[%s16968_s30 + $0x1530] ss:$24 sps:$4 sm:$0xff]  }
 0xe6d   : > { %v6666_v10 = vpop.f32.mrf.mxu1 }
 0xe6e   : > { %6992 = vmatmul.mubr.bf16.vlgmr.msra.gmra.mxu0 %v6669_v11  ;;  %7074 = vmatmul.mubr.bf16.vlgmr.msra.gmra.mxu1 %v6669_v11  ;;  %v16058_v10 = vld [vmem:[%s16968_s30 + $0x1514] ss:$24 sps:$4 sm:$0xff]  }
 0xe6f   : > { %7001 = vmatpush1.bf16.msra.mxu0 %v15987_v60  ;;  %7032 = vmatprep.mubr.bf16.mxu0 %v16901_v0  ;;  %v16050_v60 = vld [vmem:[%s16968_s30 + $0x1540] ss:$24 sps:$4 sm:$0xff]  }
 0xe70   : > { %7002 = vmatprep.subr.bf16.mxu0 %v15992_v13  ;;  %7469 = vmatprep.mubr.bf16.mxu1 %v16901_v0  ;;  %v16053_v13 = vld [vmem:[%s16968_s30 + $0x1500] ss:$24 sps:$4 sm:$0xff]  }
 0xe73   : > { %7003 = vmatpush1.bf16.msra.mxu0 %v15990_v25  ;;  %v16056_v25 = vld [vmem:[%s16968_s30 + $0x1510] ss:$24 sps:$4 sm:$0xff]  }
 0xe74   : > { %7004 = vmatprep.subr.bf16.mxu0 %v15995_v33  ;;  %v16061_v33 = vld [vmem:[%s16968_s30 + $0x165c] ss:$24 sps:$4 sm:$0xff]  }
 0xe77   : > { %7005 = vmatpush1.bf16.msra.mxu0 %v15993_v2 }
 0xe78   : > { %7006 = vmatprep.subr.bf16.mxu0 %v15998_v36 }
 0xe7b   : > { %7007 = vmatpush1.bf16.msra.mxu0 %v15996_v45 }
 0xe7c   : > { %7008 = vmatprep.subr.bf16.mxu0 %v16001_v31 }
 0xe7f   : > { %7009 = vmatpush1.bf16.msra.mxu0 %v15999_v50 }
 0xe80   : > { %7010 = vmatprep.subr.bf16.mxu0 %v16004_v32 }
 0xe83   : > { %7011 = vmatpush1.bf16.msra.mxu0 %v16002_v37 }
 0xe84   : > { %7012 = vmatprep.subr.bf16.mxu0 %v16007_v44 }
 0xe87   : > { %7013 = vmatpush1.bf16.msra.mxu0 %v16005_v4 }
 0xe88   : > { %7014 = vmatprep.subr.bf16.mxu0 %v16010_v14 }
 0xe8b   : > { %7015 = vmatpush1.bf16.msra.mxu0 %v16008_v34 }
 0xe8c   : > { %7106 = vmatprep.subr.bf16.mxu0 %v16901_v0 }
 0xe8e   : > { %7033 = vmatmul.mubr.bf16.vlgmr.msra.gmra.mxu0 %v6669_v11  ;;  %v16055_v11 = vld [vmem:[%s16968_s30 + $0x1504] ss:$24 sps:$4 sm:$0xff]  }
 0xe8f   : > { %7107 = vmatpush1.bf16.msra.mxu0 %v18123_v39  ;;  %13886 = vmatprep.mubr.msk.bf16.mxu0 %vm419_vm0, %v7102_v35  ;;  %v7101_v39 = vpack.c.bf16 %v13885_v54, %v13885_v54 }
 0xe90   : > { %7108 = vmatprep.subr.bf16.mxu0 %v16901_v0 }
 0xe93   : > { %7109 = vmatpush1.bf16.msra.mxu0 %v18129_v42  ;;  %v16011_v42 = vld [vmem:[%s16968_s30 + $0x1650] ss:$24 sps:$4 sm:$0xff]  }
 0xe94   : > { %7110 = vmatprep.subr.bf16.mxu0 %v16901_v0 }
 0xe97   : > { %7111 = vmatpush1.bf16.msra.mxu0 %v18134_v41  ;;  %v16013_v41 = vld [vmem:[%s16968_s30 + $0x1654] ss:$24 sps:$4 sm:$0xff]  }
 0xe98   : > { %7112 = vmatprep.subr.bf16.mxu0 %v16901_v0  ;;  %7437 = vmatprep.subr.bf16.mxu1 %v16013_v41 }
 0xe99   : > { %7438 = vmatpush1.bf16.msra.mxu1 %v16011_v42 }
 0xe9a   : > { %7439 = vmatprep.subr.bf16.mxu1 %v16019_v15 }
 0xe9b   : > { %7113 = vmatpush1.bf16.msra.mxu0 %v18139_v43  ;;  %v16014_v43 = vld [vmem:[%s16968_s30 + $0x1660] ss:$24 sps:$4 sm:$0xff]  }
 0xe9c   : > { %7114 = vmatprep.subr.bf16.mxu0 %v16901_v0 }
 0xe9d   : > { %7440 = vmatpush1.bf16.msra.mxu1 %v16017_v19  ;;  %v16064_v19 = vld [vmem:[%s16968_s30 + $0x162c] ss:$24 sps:$4 sm:$0xff]  }
 0xe9e   : > { %7441 = vmatprep.subr.bf16.mxu1 %v16025_v51  ;;  %v16067_v51 = vld [vmem:[%s16968_s30 + $0x15fc] ss:$24 sps:$4 sm:$0xff]  }
 0xe9f   : > { %7115 = vmatpush1.bf16.msra.mxu0 %v18242_v29 }
 0xea0   : > { %7116 = vmatprep.subr.bf16.mxu0 %v16901_v0 }
 0xea1   : > { %7442 = vmatpush1.bf16.msra.mxu1 %v16023_v46  ;;  %v16070_v46 = vld [vmem:[%s16968_s30 + $0x15cc] ss:$24 sps:$4 sm:$0xff]  }
 0xea2   : > { %7443 = vmatprep.subr.bf16.mxu1 %v16031_v17  ;;  %v16073_v17 = vld [vmem:[%s16968_s30 + $0x159c] ss:$24 sps:$4 sm:$0xff]  }
 0xea3   : > { %7117 = vmatpush1.bf16.msra.mxu0 %v18247_v22 }
 0xea4   : > { %7118 = vmatprep.subr.bf16.mxu0 %v16901_v0 }
 0xea5   : > { %7444 = vmatpush1.bf16.msra.mxu1 %v16029_v23  ;;  %v16076_v23 = vld [vmem:[%s16968_s30 + $0x156c] ss:$24 sps:$4 sm:$0xff]  }
 0xea6   : > { %7445 = vmatprep.subr.bf16.mxu1 %v16037_v62  ;;  %v16079_v62 = vld [vmem:[%s16968_s30 + $0x153c] ss:$24 sps:$4 sm:$0xff]  }
 0xea7   : > { %7119 = vmatpush1.bf16.msra.mxu0 %v18252_v27 }
 0xea8   : > { %7120 = vmatprep.subr.bf16.mxu0 %v16901_v0 }
 0xea9   : > { %7446 = vmatpush1.bf16.msra.mxu1 %v16035_v1  ;;  %v16082_v1 = vld [vmem:[%s16968_s30 + $0x150c] ss:$24 sps:$4 sm:$0xff]  }
 0xeaa   : > { %7447 = vmatprep.subr.bf16.mxu1 %v16043_v20  ;;  %v16080_v20 = vld [vmem:[%s16968_s30 + $0x1508] ss:$24 sps:$4 sm:$0xff]  }
 0xeab   : > { %7121 = vmatpush1.bf16.msra.mxu0 %v18257_v28 }
 0xeac   : > { %7128 = vmatprep.subr.bf16.mxu0 %v16901_v0 }
 0xead   : > { %7448 = vmatpush1.bf16.msra.mxu1 %v16041_v59 }
 0xeae   : > { %7449 = vmatprep.subr.bf16.mxu1 %v16049_v56  ;;  %v18560_v56 = vld [vmem:[%s16949_s23 + $0x30] sm:$0xff]  }
 0xeaf   : > { %7129 = vmatpush2.bf16.msra.mxu0 %v16998_v16 }
 0xeb0   : > { %7130 = vmatprep.subr.bf16.mxu0 %v16901_v0 }
 0xeb1   : > { %7450 = vmatpush1.bf16.msra.mxu1 %v16047_v26  ;;  %v18570_v26 = vld [vmem:[%s16949_s23 + $0x20] sm:$0xff]  }
 0xeb2   : > { %7451 = vmatprep.subr.bf16.mxu1 %v16055_v11  ;;  %v16097_v11 = vld [vmem:[%s16968_s30 + $0x1774] ss:$24 sps:$4 sm:$0xff]  }
 0xeb3   : > { %7131 = vmatpush2.bf16.msra.mxu0 %v18264_v6 }
 0xeb4   : > { %7132 = vmatprep.subr.bf16.mxu0 %v16901_v0 }
 0xeb5   : > { %7452 = vmatpush1.bf16.msra.mxu1 %v16053_v13  ;;  %v16100_v13 = vld [vmem:[%s16968_s30 + $0x1784] ss:$24 sps:$4 sm:$0xff]  }
 0xeb6   : > { %7478 = vmatprep.subr.bf16.mxu1 %v16061_v33  ;;  %v16103_v33 = vld [vmem:[%s16968_s30 + $0x1744] ss:$24 sps:$4 sm:$0xff]  }
 0xeb7   : > { %7133 = vmatpush2.bf16.msra.mxu0 %v18269_v5 }
 0xeb8   : > { %7134 = vmatprep.subr.bf16.mxu0 %v16901_v0 }
 0xebb   : > { %7135 = vmatpush2.bf16.msra.mxu0 %v18274_v7 }
 0xebc   : > { %7136 = vmatprep.subr.bf16.mxu0 %v16901_v0 }
 0xebf   : > { %7137 = vmatpush2.bf16.msra.mxu0 %v18279_v12 }
 0xec0   : > { %7519 = vmatprep.subr.bf16.mxu0 %v16016_v40 }
 0xec2   : > { %7139 = vmatmul.mubr.bf16.vlgmr.msra.gmra.mxu0 %v7101_v39 }
 0xec3   : > { %7551 = vmatprep.mubr.bf16.mxu0 %v16901_v0  ;;  %7520 = vmatpush1.bf16.msra.mxu0 %v16014_v43 }
 0xec4   : > { %7521 = vmatprep.subr.bf16.mxu0 %v16022_v38 }
 0xec7   : > { %7522 = vmatpush1.bf16.msra.mxu0 %v16020_v3  ;;  %v16062_v3 = vld [vmem:[%s16968_s30 + $0x1628] ss:$24 sps:$4 sm:$0xff]  }
 0xec8   : > { %7523 = vmatprep.subr.bf16.mxu0 %v16028_v9  ;;  %v16065_v9 = vld [vmem:[%s16968_s30 + $0x15f8] ss:$24 sps:$4 sm:$0xff]  }
 0xecb   : > { %7524 = vmatpush1.bf16.msra.mxu0 %v16026_v48  ;;  %v16068_v48 = vld [vmem:[%s16968_s30 + $0x15c8] ss:$24 sps:$4 sm:$0xff]  }
 0xecc   : > { %7525 = vmatprep.subr.bf16.mxu0 %v16034_v18  ;;  %v16071_v18 = vld [vmem:[%s16968_s30 + $0x1598] ss:$24 sps:$4 sm:$0xff]  }
 0xecf   : > { %7526 = vmatpush1.bf16.msra.mxu0 %v16032_v61  ;;  %v16074_v61 = vld [vmem:[%s16968_s30 + $0x1568] ss:$24 sps:$4 sm:$0xff]  }
 0xed0   : > { %7527 = vmatprep.subr.bf16.mxu0 %v16040_v49  ;;  %v16077_v49 = vld [vmem:[%s16968_s30 + $0x1538] ss:$24 sps:$4 sm:$0xff]  }
 0xed3   : > { %7528 = vmatpush1.bf16.msra.mxu0 %v16038_v55  ;;  %v13984_v55 = vld.sshfl [vmem:[%s16963_s27 + $0x3c] sm:$0x33 pattern:$0x76325410] }
 0xed4   : > { %7529 = vmatprep.subr.bf16.mxu0 %v16046_v58  ;;  %v7576_v58 = vcombine.high %v13984_v55, %v13984_v55 }
 0xed6   : > { %v7580_v59 = vpack.c.bf16 %v7576_v58, %v7576_v58 }
 0xed7   : > { %7530 = vmatpush1.bf16.msra.mxu0 %v16044_v57  ;;  %v18554_v57 = vld [vmem:[%s16949_s23 + $0x38] sm:$0xff]  }
 0xed8   : > { %7531 = vmatprep.subr.bf16.mxu0 %v16052_v8  ;;  %v18565_v8 = vld [vmem:[%s16949_s23 + $0x28] sm:$0xff]  }
 0xedb   : > { %7532 = vmatpush1.bf16.msra.mxu0 %v16050_v60  ;;  %v16089_v60 = vld [vmem:[%s16968_s30 + $0x17a0] ss:$24 sps:$4 sm:$0xff]  }
 0xedc   : > { %7533 = vmatprep.subr.bf16.mxu0 %v16058_v10  ;;  %v16095_v10 = vld [vmem:[%s16968_s30 + $0x1770] ss:$24 sps:$4 sm:$0xff]  }
 0xedf   : > { %7534 = vmatpush1.bf16.msra.mxu0 %v16056_v25  ;;  %v16098_v25 = vld [vmem:[%s16968_s30 + $0x1780] ss:$24 sps:$4 sm:$0xff]  }
 0xf2e   : > { %v6993_v2 = vpop.f32.mrf.mxu0  ;;  %v7075_v36 = vpop.f32.mrf.mxu1 }
 0xf2f   : > { %v18513_v45 = vadd.f32 %v6993_v2, %v18415_v52  ;;  %v18516_v31 = vadd.f32 %v7075_v36, %v18418_v53  ;;  %v16106_v2 = vld [vmem:[%s16968_s30 + $0x1754] ss:$24 sps:$4 sm:$0xff]   ;;  %v16101_v36 = vld [vmem:[%s16968_s30 + $0x1740] ss:$24 sps:$4 sm:$0xff]  }
 0xf30   : > { %v6995_v50 = vpop.f32.mrf.mxu0  ;;  %v7077_v32 = vpop.f32.mrf.mxu1 }
 0xf31   : > { %v18519_v37 = vadd.f32 %v6995_v50, %v18421_v47  ;;  %v18522_v44 = vadd.f32 %v7077_v32, %v18424_v24  ;;  %v18531_v24 = vld [vmem:[%s17059_s8] ss:$0 sm:$0xff]  ;;  %v16104_v50 = vld [vmem:[%s16968_s30 + $0x1750] ss:$24 sps:$4 sm:$0xff]   ;;  %v16109_v32 = vld [vmem:[%s16968_s30 + $0x1714] ss:$24 sps:$4 sm:$0xff]  }
 0xf32   : > { %v6997_v4 = vpop.f32.mrf.mxu0  ;;  %v7079_v14 = vpop.f32.mrf.mxu1 }
 0xf33   : > { %v16112_v4 = vld [vmem:[%s16968_s30 + $0x1724] ss:$24 sps:$4 sm:$0xff]   ;;  %v16107_v14 = vld [vmem:[%s16968_s30 + $0x1710] ss:$24 sps:$4 sm:$0xff]  }
 0xf34   : > { %v6998_v54 = vpop.f32.mrf.mxu0  ;;  %v7080_v34 = vpop.f32.mrf.mxu1 }
 0xf35   : > { %v16110_v54 = vld [vmem:[%s16968_s30 + $0x1720] ss:$24 sps:$4 sm:$0xff]   ;;  %v16115_v34 = vld [vmem:[%s16968_s30 + $0x16e4] ss:$24 sps:$4 sm:$0xff]  }
 0xf4e   : > { %v7034_v52 = vpop.f32.mrf.mxu0 }
 0xf4f   : > { %v18525_v30 = vadd.f32 %v7034_v52, %v18427_v21  ;;  %v16059_v21 = vld [vmem:[%s16968_s30 + $0x1658] ss:$24 sps:$4 sm:$0xff]   ;;  %v16118_v52 = vld [vmem:[%s16968_s30 + $0x16f4] ss:$24 sps:$4 sm:$0xff]  }
 0xf50   : > { %v7036_v53 = vpop.f32.mrf.mxu0 }
 0xf51   : > { %v18528_v35 = vadd.f32 %v7036_v53, %v18430_v63  ;;  %v16113_v53 = vld [vmem:[%s16968_s30 + $0x16e0] ss:$24 sps:$4 sm:$0xff]  }
 0xf52   : > { %v7038_v47 = vpop.f32.mrf.mxu0 }
 0xf53   : > { %v16116_v47 = vld [vmem:[%s16968_s30 + $0x16f0] ss:$24 sps:$4 sm:$0xff]  }
 0xf54   : > { %v7039_v39 = vpop.f32.mrf.mxu0 }
 0xf55   : > { %v16121_v39 = vld [vmem:[%s16968_s30 + $0x16b4] ss:$24 sps:$4 sm:$0xff]  }
 0xf82   : > { %v7140_v42 = vpop.f32.mrf.mxu0 }
 0xf83   : > { %v7141_v41 = vadd.f32 %v18531_v24, %v7140_v42  ;;  %v16124_v42 = vld [vmem:[%s16968_s30 + $0x16c4] ss:$24 sps:$4 sm:$0xff]  }
 0xf84   : > { %v7142_v43 = vpop.f32.mrf.mxu0 }
 0xf85   : > { %v7146_v40 = vmax.f32 %v7141_v41, 0.0  ;;  %v16119_v41 = vld [vmem:[%s16968_s30 + $0x16b0] ss:$24 sps:$4 sm:$0xff]   ;;  %v16122_v43 = vld [vmem:[%s16968_s30 + $0x16c0] ss:$24 sps:$4 sm:$0xff]  }
 0xf86   : > { %v7143_v15 = vpop.f32.mrf.mxu0 }
 0xf87   : > { %v7147_v38 = vpack.c.bf16 %v7146_v40, %v7146_v40  ;;  %v16127_v40 = vld [vmem:[%s16968_s30 + $0x1684] ss:$24 sps:$4 sm:$0xff]   ;;  %v16125_v15 = vld [vmem:[%s16968_s30 + $0x1680] ss:$24 sps:$4 sm:$0xff]  }
 0xf88   : > { %v7144_v63 = vpop.f32.mrf.mxu0 }
 0xf89   : > { %7470 = vmatmul.mubr.bf16.vlgmr.msra.gmra.mxu1 %v7147_v38  ;;  %7552 = vmatmul.mubr.bf16.vlgmr.msra.gmra.mxu0 %v7147_v38 }
 0xf8a   : > { %7479 = vmatpush1.bf16.msra.mxu1 %v16059_v21  ;;  %7510 = vmatprep.mubr.bf16.mxu1 %v16901_v0  ;;  %v16130_v21 = vld [vmem:[%s16968_s30 + $0x1694] ss:$24 sps:$4 sm:$0xff]  }
 0xf8b   : > { %7480 = vmatprep.subr.bf16.mxu1 %v16064_v19  ;;  %7947 = vmatprep.mubr.bf16.mxu0 %v16901_v0  ;;  %v16133_v19 = vld [vmem:[%s16968_s30 + $0x17dc] ss:$24 sps:$4 sm:$0xff]  }
 0xf8e   : > { %7481 = vmatpush1.bf16.msra.mxu1 %v16062_v3 }
 0xf8f   : > { %7482 = vmatprep.subr.bf16.mxu1 %v16067_v51 }
 0xf92   : > { %7483 = vmatpush1.bf16.msra.mxu1 %v16065_v9 }
 0xf93   : > { %7484 = vmatprep.subr.bf16.mxu1 %v16070_v46 }
 0xf96   : > { %7485 = vmatpush1.bf16.msra.mxu1 %v16068_v48 }
 0xf97   : > { %7486 = vmatprep.subr.bf16.mxu1 %v16073_v17 }
 0xf9a   : > { %7487 = vmatpush1.bf16.msra.mxu1 %v16071_v18 }
 0xf9b   : > { %7488 = vmatprep.subr.bf16.mxu1 %v16076_v23 }
 0xf9e   : > { %7489 = vmatpush1.bf16.msra.mxu1 %v16074_v61 }
 0xf9f   : > { %7490 = vmatprep.subr.bf16.mxu1 %v16079_v62 }
 0xfa2   : > { %7491 = vmatpush1.bf16.msra.mxu1 %v16077_v49 }
 0xfa3   : > { %7492 = vmatprep.subr.bf16.mxu1 %v16082_v1 }
 0xfa6   : > { %7493 = vmatpush1.bf16.msra.mxu1 %v16080_v20 }
 0xfa7   : > { %7584 = vmatprep.subr.bf16.mxu1 %v16901_v0 }
 0xfa9   : > { %7511 = vmatmul.mubr.bf16.vlgmr.msra.gmra.mxu1 %v7147_v38  ;;  %v16128_v38 = vld [vmem:[%s16968_s30 + $0x1690] ss:$24 sps:$4 sm:$0xff]  }
 0xfaa   : > { %7585 = vmatpush1.bf16.msra.mxu1 %v18554_v57  ;;  %13985 = vmatprep.mubr.msk.bf16.mxu1 %vm419_vm0, %v7580_v59 }
 0xfab   : > { %7586 = vmatprep.subr.bf16.mxu1 %v16901_v0 }
 0xfae   : > { %7587 = vmatpush1.bf16.msra.mxu1 %v18560_v56 }
 0xfaf   : > { %7588 = vmatprep.subr.bf16.mxu1 %v16901_v0 }
 0xfb2   : > { %7589 = vmatpush1.bf16.msra.mxu1 %v18565_v8 }
 0xfb3   : > { %7590 = vmatprep.subr.bf16.mxu1 %v16901_v0 }
 0xfb6   : > { %7591 = vmatpush1.bf16.msra.mxu1 %v18570_v26 }
 0xfb7   : > { %7592 = vmatprep.subr.bf16.mxu1 %v16901_v0 }
 0xfba   : > { %7593 = vmatpush1.bf16.msra.mxu1 %v18242_v29  ;;  %v7579_v29 = vpack.c.bf16 %v13984_v55, %v13984_v55 }
 0xfbb   : > { %7594 = vmatprep.subr.bf16.mxu1 %v16901_v0 }
 0xfbe   : > { %7595 = vmatpush1.bf16.msra.mxu1 %v18247_v22  ;;  %v16083_v22 = vld [vmem:[%s16968_s30 + $0x17d0] ss:$24 sps:$4 sm:$0xff]  }
 0xfbf   : > { %7596 = vmatprep.subr.bf16.mxu1 %v16901_v0 }
 0xfc2   : > { %7597 = vmatpush1.bf16.msra.mxu1 %v18252_v27  ;;  %v16085_v27 = vld [vmem:[%s16968_s30 + $0x17d4] ss:$24 sps:$4 sm:$0xff]  }
 0xfc3   : > { %7598 = vmatprep.subr.bf16.mxu1 %v16901_v0  ;;  %7915 = vmatprep.subr.bf16.mxu0 %v16085_v27  ;;  %v16131_v27 = vld [vmem:[%s16968_s30 + $0x17d8] ss:$24 sps:$4 sm:$0xff]  }
 0xfc4   : > { %7916 = vmatpush1.bf16.msra.mxu0 %v16083_v22 }
 0xfc6   : > { %7599 = vmatpush1.bf16.msra.mxu1 %v18257_v28  ;;  %v16086_v28 = vld [vmem:[%s16968_s30 + $0x17e0] ss:$24 sps:$4 sm:$0xff]  }
 0xfc7   : > { %7606 = vmatprep.subr.bf16.mxu1 %v16901_v0 }
 0xfca   : > { %7607 = vmatpush2.bf16.msra.mxu1 %v16998_v16 }
 0xfcb   : > { %7608 = vmatprep.subr.bf16.mxu1 %v16901_v0 }
 0xfce   : > { %7609 = vmatpush2.bf16.msra.mxu1 %v18264_v6  ;;  %v16088_v6 = vld [vmem:[%s16968_s30 + $0x17e4] ss:$24 sps:$4 sm:$0xff]  }
 0xfcf   : > { %7610 = vmatprep.subr.bf16.mxu1 %v16901_v0 }
 0xfd2   : > { %7611 = vmatpush2.bf16.msra.mxu1 %v18269_v5  ;;  %v16091_v5 = vld [vmem:[%s16968_s30 + $0x17a4] ss:$24 sps:$4 sm:$0xff]  }
 0xfd3   : > { %7612 = vmatprep.subr.bf16.mxu1 %v16901_v0  ;;  %7917 = vmatprep.subr.bf16.mxu0 %v16091_v5  ;;  %v16139_v5 = vld [vmem:[%s16968_s30 + $0x177c] ss:$24 sps:$4 sm:$0xff]  }
 0xfd4   : > { %7918 = vmatpush1.bf16.msra.mxu0 %v16089_v60  ;;  %v16142_v60 = vld [vmem:[%s16968_s30 + $0x174c] ss:$24 sps:$4 sm:$0xff]  }
 0xfd5   : > { %7919 = vmatprep.subr.bf16.mxu0 %v16097_v11  ;;  %v16145_v11 = vld [vmem:[%s16968_s30 + $0x171c] ss:$24 sps:$4 sm:$0xff]  }
 0xfd6   : > { %7613 = vmatpush2.bf16.msra.mxu1 %v18274_v7  ;;  %v16094_v7 = vld [vmem:[%s16968_s30 + $0x17b4] ss:$24 sps:$4 sm:$0xff]  }
 0xfd7   : > { %7614 = vmatprep.subr.bf16.mxu1 %v16901_v0 }
 0xfd8   : > { %7920 = vmatpush1.bf16.msra.mxu0 %v16095_v10  ;;  %v16148_v10 = vld [vmem:[%s16968_s30 + $0x16ec] ss:$24 sps:$4 sm:$0xff]  }
 0xfd9   : > { %7921 = vmatprep.subr.bf16.mxu0 %v16103_v33  ;;  %v16151_v33 = vld [vmem:[%s16968_s30 + $0x16bc] ss:$24 sps:$4 sm:$0xff]  }
 0xfda   : > { %7615 = vmatpush2.bf16.msra.mxu1 %v18279_v12  ;;  %v16092_v12 = vld [vmem:[%s16968_s30 + $0x17b0] ss:$24 sps:$4 sm:$0xff]  }
 0xfdb   : > { %7997 = vmatprep.subr.bf16.mxu1 %v16088_v6 }
 0xfdc   : > { %7922 = vmatpush1.bf16.msra.mxu0 %v16101_v36  ;;  %v16154_v36 = vld [vmem:[%s16968_s30 + $0x168c] ss:$24 sps:$4 sm:$0xff]  }
 0xfdd   : > { %7617 = vmatmul.mubr.bf16.vlgmr.msra.gmra.mxu1 %v7579_v29  ;;  %7923 = vmatprep.subr.bf16.mxu0 %v16109_v32  ;;  %v16152_v32 = vld [vmem:[%s16968_s30 + $0x1688] ss:$24 sps:$4 sm:$0xff]  }
 0xfde   : > { %8029 = vmatprep.mubr.bf16.mxu1 %v16901_v0  ;;  %7998 = vmatpush1.bf16.msra.mxu1 %v16086_v28 }
 0xfdf   : > { %7999 = vmatprep.subr.bf16.mxu1 %v16094_v7  ;;  %v16137_v7 = vld [vmem:[%s16968_s30 + $0x1778] ss:$24 sps:$4 sm:$0xff]  }
 0xfe0   : > { %7924 = vmatpush1.bf16.msra.mxu0 %v16107_v14 }
 0xfe1   : > { %7925 = vmatprep.subr.bf16.mxu0 %v16115_v34  ;;  %v18678_v34 = vld [vmem:[%s16949_s23 + $0x10] sm:$0xff]  }
 0xfe2   : > { %8000 = vmatpush1.bf16.msra.mxu1 %v16092_v12  ;;  %v16140_v12 = vld [vmem:[%s16968_s30 + $0x1748] ss:$24 sps:$4 sm:$0xff]  }
 0xfe3   : > { %8001 = vmatprep.subr.bf16.mxu1 %v16100_v13  ;;  %v16143_v13 = vld [vmem:[%s16968_s30 + $0x1718] ss:$24 sps:$4 sm:$0xff]  }
 0xfe4   : > { %7926 = vmatpush1.bf16.msra.mxu0 %v16113_v53  ;;  %v18688_v53 = vld [vmem:[%s16949_s23] sm:$0xff]  }
 0xfe5   : > { %7927 = vmatprep.subr.bf16.mxu0 %v16121_v39  ;;  %v18700_v39 = vld [vmem:[%s16949_s23 + $0x50] sm:$0xff]  }
 0xfe6   : > { %8002 = vmatpush1.bf16.msra.mxu1 %v16098_v25  ;;  %v16146_v25 = vld [vmem:[%s16968_s30 + $0x16e8] ss:$24 sps:$4 sm:$0xff]  }
 0xfe7   : > { %8003 = vmatprep.subr.bf16.mxu1 %v16106_v2  ;;  %v16149_v2 = vld [vmem:[%s16968_s30 + $0x16b8] ss:$24 sps:$4 sm:$0xff]  }
 0xfe8   : > { %7928 = vmatpush1.bf16.msra.mxu0 %v16119_v41 }
 0xfe9   : > { %7929 = vmatprep.subr.bf16.mxu0 %v16127_v40  ;;  %v16155_v40 = vld [vmem:[%s16968_s30 + $0x1950] ss:$24 sps:$4 sm:$0xff]  }
 0xfea   : > { %8004 = vmatpush1.bf16.msra.mxu1 %v16104_v50  ;;  %v14083_v50 = vld.sshfl [vmem:[%s16963_s27 + $0x40] sm:$0x33 pattern:$0x76325410] }
 0xfeb   : > { %8005 = vmatprep.subr.bf16.mxu1 %v16112_v4  ;;  %v8054_v4 = vcombine.high %v14083_v50, %v14083_v50  ;;  %v8057_v41 = vpack.c.bf16 %v14083_v50, %v14083_v50 }
 0xfec   : > { %7930 = vmatpush1.bf16.msra.mxu0 %v16125_v15  ;;  %v16157_v15 = vld [vmem:[%s16968_s30 + $0x1954] ss:$24 sps:$4 sm:$0xff]  }
 0xfed   : > { %7956 = vmatprep.subr.bf16.mxu0 %v16133_v19  ;;  %v8058_v14 = vpack.c.bf16 %v8054_v4, %v8054_v4  ;;  %v16163_v19 = vld [vmem:[%s16968_s30 + $0x1924] ss:$24 sps:$4 sm:$0xff]  }
 0xfee   : > { %8006 = vmatpush1.bf16.msra.mxu1 %v16110_v54  ;;  %v18673_v54 = vld [vmem:[%s16949_s23 + $0x18] sm:$0xff]  }
 0xfef   : > { %8007 = vmatprep.subr.bf16.mxu1 %v16118_v52  ;;  %v18683_v52 = vld [vmem:[%s16949_s23 + $0x8] sm:$0xff]  }
 0xff2   : > { %8008 = vmatpush1.bf16.msra.mxu1 %v16116_v47  ;;  %v18695_v47 = vld [vmem:[%s16949_s23 + $0x58] sm:$0xff]  }
 0xff3   : > { %8009 = vmatprep.subr.bf16.mxu1 %v16124_v42  ;;  %v18705_v42 = vld [vmem:[%s16949_s23 + $0x48] sm:$0xff]  }
 0xff6   : > { %8010 = vmatpush1.bf16.msra.mxu1 %v16122_v43  ;;  %v18710_v43 = vld [vmem:[%s16949_s23 + $0x40] sm:$0xff]  }
 0xff7   : > { %8011 = vmatprep.subr.bf16.mxu1 %v16130_v21  ;;  %v16158_v21 = vld [vmem:[%s16968_s30 + $0x1960] ss:$24 sps:$4 sm:$0xff]  }
 0xffa   : > { %8012 = vmatpush1.bf16.msra.mxu1 %v16128_v38  ;;  %v16160_v38 = vld [vmem:[%s16968_s30 + $0x1964] ss:$24 sps:$4 sm:$0xff]  }
 0xffb   : > { %8393 = vmatprep.subr.bf16.mxu1 %v16157_v15 }
0x1049   : > { %v7471_v63 = vpop.f32.mrf.mxu1  ;;  %v7553_v3 = vpop.f32.mrf.mxu0 }
0x104a   : > { %v18626_v51 = vadd.f32 %v7471_v63, %v18513_v45  ;;  %v18629_v9 = vadd.f32 %v7553_v3, %v18516_v31  ;;  %v16166_v63 = vld [vmem:[%s16968_s30 + $0x1934] ss:$24 sps:$4 sm:$0xff]   ;;  %v16161_v3 = vld [vmem:[%s16968_s30 + $0x1920] ss:$24 sps:$4 sm:$0xff]  }
0x104b   : > { %v7473_v46 = vpop.f32.mrf.mxu1  ;;  %v7555_v48 = vpop.f32.mrf.mxu0 }
0x104c   : > { %v18632_v17 = vadd.f32 %v7473_v46, %v18519_v37  ;;  %v18635_v18 = vadd.f32 %v7555_v48, %v18522_v44  ;;  %v16164_v46 = vld [vmem:[%s16968_s30 + $0x1930] ss:$24 sps:$4 sm:$0xff]   ;;  %v16169_v48 = vld [vmem:[%s16968_s30 + $0x18f4] ss:$24 sps:$4 sm:$0xff]  }
0x104d   : > { %v7475_v23 = vpop.f32.mrf.mxu1  ;;  %v7557_v61 = vpop.f32.mrf.mxu0 }
0x104e   : > { %v16172_v23 = vld [vmem:[%s16968_s30 + $0x1904] ss:$24 sps:$4 sm:$0xff]   ;;  %v16167_v61 = vld [vmem:[%s16968_s30 + $0x18f0] ss:$24 sps:$4 sm:$0xff]  }
0x104f   : > { %v7476_v62 = vpop.f32.mrf.mxu1  ;;  %v7558_v49 = vpop.f32.mrf.mxu0 }
0x1050   : > { %v16170_v62 = vld [vmem:[%s16968_s30 + $0x1900] ss:$24 sps:$4 sm:$0xff]   ;;  %v16175_v49 = vld [vmem:[%s16968_s30 + $0x18c4] ss:$24 sps:$4 sm:$0xff]  }
0x1069   : > { %v7512_v1 = vpop.f32.mrf.mxu1 }
0x106a   : > { %v18638_v45 = vadd.f32 %v7512_v1, %v18525_v30  ;;  %v16136_v30 = vld [vmem:[%s16968_s30 + $0x17ac] ss:$24 sps:$4 sm:$0xff]  }
0x106b   : > { %v7514_v31 = vpop.f32.mrf.mxu1  ;;  %v16178_v1 = vld [vmem:[%s16968_s30 + $0x18d4] ss:$24 sps:$4 sm:$0xff]  }
0x106c   : > { %v18641_v55 = vadd.f32 %v7514_v31, %v18528_v35  ;;  %v16134_v35 = vld [vmem:[%s16968_s30 + $0x17a8] ss:$24 sps:$4 sm:$0xff]  }
0x106d   : > { %v7516_v37 = vpop.f32.mrf.mxu1  ;;  %v16173_v31 = vld [vmem:[%s16968_s30 + $0x18c0] ss:$24 sps:$4 sm:$0xff]  }
0x106e   : > { %v16176_v37 = vld [vmem:[%s16968_s30 + $0x18d0] ss:$24 sps:$4 sm:$0xff]  }
0x106f   : > { %v7517_v20 = vpop.f32.mrf.mxu1 }
0x1070   : > { %v16181_v20 = vld [vmem:[%s16968_s30 + $0x1894] ss:$24 sps:$4 sm:$0xff]  }
0x109d   : > { %v7618_v44 = vpop.f32.mrf.mxu1 }
0x109e   : > { %v7619_v58 = vadd.f32 %v18531_v24, %v7618_v44  ;;  %v16184_v44 = vld [vmem:[%s16968_s30 + $0x18a4] ss:$24 sps:$4 sm:$0xff]  }
0x109f   : > { %v7620_v59 = vpop.f32.mrf.mxu1 }
0x10a0   : > { %v7624_v29 = vmax.f32 %v7619_v58, 0.0  ;;  %v16179_v58 = vld [vmem:[%s16968_s30 + $0x1890] ss:$24 sps:$4 sm:$0xff]   ;;  %v16182_v59 = vld [vmem:[%s16968_s30 + $0x18a0] ss:$24 sps:$4 sm:$0xff]  }
0x10a1   : > { %v7621_v22 = vpop.f32.mrf.mxu1 }
0x10a2   : > { %v7625_v28 = vpack.c.bf16 %v7624_v29, %v7624_v29  ;;  %v16187_v29 = vld [vmem:[%s16968_s30 + $0x1864] ss:$24 sps:$4 sm:$0xff]   ;;  %v16190_v22 = vld [vmem:[%s16968_s30 + $0x1874] ss:$24 sps:$4 sm:$0xff]  }
0x10a3   : > { %v7622_v6 = vpop.f32.mrf.mxu1 }
0x10a4   : > { %7948 = vmatmul.mubr.bf16.vlgmr.msra.gmra.mxu0 %v7625_v28  ;;  %8030 = vmatmul.mubr.bf16.vlgmr.msra.gmra.mxu1 %v7625_v28  ;;  %v16196_v6 = vld [vmem:[%s16968_s30 + $0x1844] ss:$24 sps:$4 sm:$0xff]  }
0x10a5   : > { %7957 = vmatpush1.bf16.msra.mxu0 %v16131_v27  ;;  %7988 = vmatprep.mubr.bf16.mxu0 %v16901_v0  ;;  %v16185_v27 = vld [vmem:[%s16968_s30 + $0x1860] ss:$24 sps:$4 sm:$0xff]  }
0x10a6   : > { %7958 = vmatprep.subr.bf16.mxu0 %v16136_v30  ;;  %8425 = vmatprep.mubr.bf16.mxu1 %v16901_v0  ;;  %v16193_v30 = vld [vmem:[%s16968_s30 + $0x1834] ss:$24 sps:$4 sm:$0xff]  }
0x10a7   : > { %8394 = vmatpush1.bf16.msra.mxu1 %v16155_v40 }
0x10a8   : > { %8395 = vmatprep.subr.bf16.mxu1 %v16163_v19 }
0x10a9   : > { %7959 = vmatpush1.bf16.msra.mxu0 %v16134_v35  ;;  %v16191_v35 = vld [vmem:[%s16968_s30 + $0x1830] ss:$24 sps:$4 sm:$0xff]  }
0x10aa   : > { %7960 = vmatprep.subr.bf16.mxu0 %v16139_v5  ;;  %v16194_v5 = vld [vmem:[%s16968_s30 + $0x1840] ss:$24 sps:$4 sm:$0xff]  }
0x10ab   : > { %8396 = vmatpush1.bf16.msra.mxu1 %v16161_v3 }
0x10ac   : > { %8397 = vmatprep.subr.bf16.mxu1 %v16169_v48 }
0x10ad   : > { %7961 = vmatpush1.bf16.msra.mxu0 %v16137_v7  ;;  %v16199_v7 = vld [vmem:[%s16968_s30 + $0x1804] ss:$24 sps:$4 sm:$0xff]  }
0x10ae   : > { %7962 = vmatprep.subr.bf16.mxu0 %v16142_v60  ;;  %v16197_v60 = vld [vmem:[%s16968_s30 + $0x1800] ss:$24 sps:$4 sm:$0xff]  }
0x10af   : > { %8398 = vmatpush1.bf16.msra.mxu1 %v16167_v61 }
0x10b0   : > { %8399 = vmatprep.subr.bf16.mxu1 %v16175_v49  ;;  %v16211_v49 = vld [vmem:[%s16968_s30 + $0x18fc] ss:$24 sps:$4 sm:$0xff]  }
0x10b1   : > { %7963 = vmatpush1.bf16.msra.mxu0 %v16140_v12  ;;  %v16202_v12 = vld [vmem:[%s16968_s30 + $0x1814] ss:$24 sps:$4 sm:$0xff]  }
0x10b2   : > { %7964 = vmatprep.subr.bf16.mxu0 %v16145_v11  ;;  %v16200_v11 = vld [vmem:[%s16968_s30 + $0x1810] ss:$24 sps:$4 sm:$0xff]  }
0x10b3   : > { %8400 = vmatpush1.bf16.msra.mxu1 %v16173_v31  ;;  %v16214_v31 = vld [vmem:[%s16968_s30 + $0x18cc] ss:$24 sps:$4 sm:$0xff]  }
0x10b4   : > { %8401 = vmatprep.subr.bf16.mxu1 %v16181_v20  ;;  %v16217_v20 = vld [vmem:[%s16968_s30 + $0x189c] ss:$24 sps:$4 sm:$0xff]  }
0x10b5   : > { %7965 = vmatpush1.bf16.msra.mxu0 %v16143_v13  ;;  %v16205_v13 = vld [vmem:[%s16968_s30 + $0x195c] ss:$24 sps:$4 sm:$0xff]  }
0x10b6   : > { %7966 = vmatprep.subr.bf16.mxu0 %v16148_v10 }
0x10b7   : > { %8402 = vmatpush1.bf16.msra.mxu1 %v16179_v58  ;;  %v16220_v58 = vld [vmem:[%s16968_s30 + $0x186c] ss:$24 sps:$4 sm:$0xff]  }
0x10b8   : > { %8403 = vmatprep.subr.bf16.mxu1 %v16187_v29  ;;  %v16223_v29 = vld [vmem:[%s16968_s30 + $0x183c] ss:$24 sps:$4 sm:$0xff]  }
0x10b9   : > { %7967 = vmatpush1.bf16.msra.mxu0 %v16146_v25 }
0x10ba   : > { %7968 = vmatprep.subr.bf16.mxu0 %v16151_v33 }
0x10bb   : > { %8404 = vmatpush1.bf16.msra.mxu1 %v16185_v27  ;;  %v16226_v27 = vld [vmem:[%s16968_s30 + $0x180c] ss:$24 sps:$4 sm:$0xff]  }
0x10bc   : > { %8405 = vmatprep.subr.bf16.mxu1 %v16193_v30  ;;  %v16224_v30 = vld [vmem:[%s16968_s30 + $0x1808] ss:$24 sps:$4 sm:$0xff]  }
0x10bd   : > { %7969 = vmatpush1.bf16.msra.mxu0 %v16149_v2 }
0x10be   : > { %7970 = vmatprep.subr.bf16.mxu0 %v16154_v36 }
0x10bf   : > { %8406 = vmatpush1.bf16.msra.mxu1 %v16191_v35 }
0x10c0   : > { %8407 = vmatprep.subr.bf16.mxu1 %v16199_v7  ;;  %v16227_v7 = vld [vmem:[%s16968_s30 + $0x1ad0] ss:$24 sps:$4 sm:$0xff]  }
0x10c1   : > { %7971 = vmatpush1.bf16.msra.mxu0 %v16152_v32 }
0x10c2   : > { %8062 = vmatprep.subr.bf16.mxu0 %v16901_v0 }
0x10c3   : > { %8408 = vmatpush1.bf16.msra.mxu1 %v16197_v60  ;;  %v16229_v60 = vld [vmem:[%s16968_s30 + $0x1ad4] ss:$24 sps:$4 sm:$0xff]  }
0x10c4   : > { %7989 = vmatmul.mubr.bf16.vlgmr.msra.gmra.mxu0 %v7625_v28  ;;  %v16188_v28 = vld [vmem:[%s16968_s30 + $0x1870] ss:$24 sps:$4 sm:$0xff]   ;;  %8434 = vmatprep.subr.bf16.mxu1 %v16205_v13  ;;  %v16235_v13 = vld [vmem:[%s16968_s30 + $0x1aa4] ss:$24 sps:$4 sm:$0xff]  }
0x10c5   : > { %8063 = vmatpush1.bf16.msra.mxu0 %v18554_v57  ;;  %14084 = vmatprep.mubr.msk.bf16.mxu0 %vm419_vm0, %v8058_v14 }
0x10c6   : > { %8064 = vmatprep.subr.bf16.mxu0 %v16901_v0 }
0x10c9   : > { %8065 = vmatpush1.bf16.msra.mxu0 %v18560_v56 }
0x10ca   : > { %8066 = vmatprep.subr.bf16.mxu0 %v16901_v0 }
0x10cd   : > { %8067 = vmatpush1.bf16.msra.mxu0 %v18565_v8 }
0x10ce   : > { %8068 = vmatprep.subr.bf16.mxu0 %v16901_v0 }
0x10d1   : > { %8069 = vmatpush1.bf16.msra.mxu0 %v18570_v26 }
0x10d2   : > { %8070 = vmatprep.subr.bf16.mxu0 %v16901_v0 }
0x10d5   : > { %8071 = vmatpush1.bf16.msra.mxu0 %v18673_v54 }
0x10d6   : > { %8072 = vmatprep.subr.bf16.mxu0 %v16901_v0 }
0x10d9   : > { %8073 = vmatpush1.bf16.msra.mxu0 %v18678_v34 }
0x10da   : > { %8074 = vmatprep.subr.bf16.mxu0 %v16901_v0 }
0x10dd   : > { %8075 = vmatpush1.bf16.msra.mxu0 %v18683_v52 }
0x10de   : > { %8076 = vmatprep.subr.bf16.mxu0 %v16901_v0 }
0x10e1   : > { %8077 = vmatpush1.bf16.msra.mxu0 %v18688_v53 }
0x10e2   : > { %8084 = vmatprep.subr.bf16.mxu0 %v16901_v0 }
0x10e5   : > { %8085 = vmatpush2.bf16.msra.mxu0 %v16998_v16 }
0x10e6   : > { %8086 = vmatprep.subr.bf16.mxu0 %v16901_v0 }
0x10e9   : > { %8087 = vmatpush2.bf16.msra.mxu0 %v18695_v47 }
0x10ea   : > { %8088 = vmatprep.subr.bf16.mxu0 %v16901_v0 }
0x10ed   : > { %8089 = vmatpush2.bf16.msra.mxu0 %v18700_v39 }
0x10ee   : > { %8090 = vmatprep.subr.bf16.mxu0 %v16901_v0 }
0x10f1   : > { %8091 = vmatpush2.bf16.msra.mxu0 %v18705_v42 }
0x10f2   : > { %8092 = vmatprep.subr.bf16.mxu0 %v16901_v0 }
0x10f5   : > { %8093 = vmatpush2.bf16.msra.mxu0 %v18710_v43 }
0x10f6   : > { %8475 = vmatprep.subr.bf16.mxu0 %v16160_v38 }
0x10f8   : > { %8095 = vmatmul.mubr.bf16.vlgmr.msra.gmra.mxu0 %v8057_v41 }
0x10f9   : > { %8507 = vmatprep.mubr.bf16.mxu0 %v16901_v0  ;;  %8476 = vmatpush1.bf16.msra.mxu0 %v16158_v21 }
0x10fa   : > { %8477 = vmatprep.subr.bf16.mxu0 %v16166_v63 }
0x10fd   : > { %8478 = vmatpush1.bf16.msra.mxu0 %v16164_v46 }
0x10fe   : > { %8479 = vmatprep.subr.bf16.mxu0 %v16172_v23  ;;  %v16203_v23 = vld [vmem:[%s16968_s30 + $0x1958] ss:$24 sps:$4 sm:$0xff]  }
0x1101   : > { %8480 = vmatpush1.bf16.msra.mxu0 %v16170_v62 }
0x1102   : > { %8481 = vmatprep.subr.bf16.mxu0 %v16178_v1  ;;  %v16209_v1 = vld [vmem:[%s16968_s30 + $0x18f8] ss:$24 sps:$4 sm:$0xff]  }
0x1105   : > { %8482 = vmatpush1.bf16.msra.mxu0 %v16176_v37  ;;  %v16212_v37 = vld [vmem:[%s16968_s30 + $0x18c8] ss:$24 sps:$4 sm:$0xff]  }
0x1106   : > { %8483 = vmatprep.subr.bf16.mxu0 %v16184_v44  ;;  %v16215_v44 = vld [vmem:[%s16968_s30 + $0x1898] ss:$24 sps:$4 sm:$0xff]  }
0x1109   : > { %8484 = vmatpush1.bf16.msra.mxu0 %v16182_v59  ;;  %v16218_v59 = vld [vmem:[%s16968_s30 + $0x1868] ss:$24 sps:$4 sm:$0xff]  }
0x110a   : > { %8485 = vmatprep.subr.bf16.mxu0 %v16190_v22  ;;  %v16221_v22 = vld [vmem:[%s16968_s30 + $0x1838] ss:$24 sps:$4 sm:$0xff]  }
0x110d   : > { %8486 = vmatpush1.bf16.msra.mxu0 %v16188_v28  ;;  %v14182_v28 = vld.sshfl [vmem:[%s16963_s27 + $0x44] sm:$0x33 pattern:$0x76325410] }
0x110e   : > { %8487 = vmatprep.subr.bf16.mxu0 %v16196_v6  ;;  %v8532_v6 = vcombine.high %v14182_v28, %v14182_v28 }
0x1110   : > { %v8536_v35 = vpack.c.bf16 %v8532_v6, %v8532_v6 }
0x1111   : > { %8488 = vmatpush1.bf16.msra.mxu0 %v16194_v5  ;;  %v8535_v5 = vpack.c.bf16 %v14182_v28, %v14182_v28 }
0x1112   : > { %8489 = vmatprep.subr.bf16.mxu0 %v16202_v12  ;;  %v16230_v12 = vld [vmem:[%s16968_s30 + $0x1ae0] ss:$24 sps:$4 sm:$0xff]  }
0x1115   : > { %8490 = vmatpush1.bf16.msra.mxu0 %v16200_v11  ;;  %v16232_v11 = vld [vmem:[%s16968_s30 + $0x1ae4] ss:$24 sps:$4 sm:$0xff]  }
0x1116   : > { %8871 = vmatprep.subr.bf16.mxu0 %v16229_v60 }
0x1164   : > { %v7949_v10 = vpop.f32.mrf.mxu0  ;;  %v8031_v25 = vpop.f32.mrf.mxu1 }
0x1165   : > { %v18748_v33 = vadd.f32 %v7949_v10, %v18626_v51  ;;  %v18751_v2 = vadd.f32 %v8031_v25, %v18629_v9  ;;  %v16238_v10 = vld [vmem:[%s16968_s30 + $0x1ab4] ss:$24 sps:$4 sm:$0xff]   ;;  %v16233_v25 = vld [vmem:[%s16968_s30 + $0x1aa0] ss:$24 sps:$4 sm:$0xff]  }
0x1166   : > { %v7951_v36 = vpop.f32.mrf.mxu0  ;;  %v8033_v50 = vpop.f32.mrf.mxu1 }
0x1167   : > { %v18754_v32 = vadd.f32 %v7951_v36, %v18632_v17  ;;  %v18757_v4 = vadd.f32 %v8033_v50, %v18635_v18  ;;  %v16236_v36 = vld [vmem:[%s16968_s30 + $0x1ab0] ss:$24 sps:$4 sm:$0xff]   ;;  %v16241_v50 = vld [vmem:[%s16968_s30 + $0x1a74] ss:$24 sps:$4 sm:$0xff]  }
0x1168   : > { %v7953_v14 = vpop.f32.mrf.mxu0  ;;  %v8035_v41 = vpop.f32.mrf.mxu1 }
0x1169   : > { %v16244_v14 = vld [vmem:[%s16968_s30 + $0x1a84] ss:$24 sps:$4 sm:$0xff]   ;;  %v16239_v41 = vld [vmem:[%s16968_s30 + $0x1a70] ss:$24 sps:$4 sm:$0xff]  }
0x116a   : > { %v7954_v40 = vpop.f32.mrf.mxu0  ;;  %v8036_v15 = vpop.f32.mrf.mxu1 }
0x116b   : > { %v16242_v40 = vld [vmem:[%s16968_s30 + $0x1a80] ss:$24 sps:$4 sm:$0xff]   ;;  %v16247_v15 = vld [vmem:[%s16968_s30 + $0x1a44] ss:$24 sps:$4 sm:$0xff]  }
0x1184   : > { %v7990_v21 = vpop.f32.mrf.mxu0 }
0x1185   : > { %v18760_v51 = vadd.f32 %v7990_v21, %v18638_v45  ;;  %v16208_v45 = vld [vmem:[%s16968_s30 + $0x192c] ss:$24 sps:$4 sm:$0xff]  }
0x1186   : > { %v7992_v9 = vpop.f32.mrf.mxu0  ;;  %v16250_v21 = vld [vmem:[%s16968_s30 + $0x1a54] ss:$24 sps:$4 sm:$0xff]  }
0x1187   : > { %v18763_v38 = vadd.f32 %v7992_v9, %v18641_v55  ;;  %v16206_v55 = vld [vmem:[%s16968_s30 + $0x1928] ss:$24 sps:$4 sm:$0xff]  }
0x1188   : > { %v7994_v17 = vpop.f32.mrf.mxu0  ;;  %v16245_v9 = vld [vmem:[%s16968_s30 + $0x1a40] ss:$24 sps:$4 sm:$0xff]  }
0x1189   : > { %v16248_v17 = vld [vmem:[%s16968_s30 + $0x1a50] ss:$24 sps:$4 sm:$0xff]  }
0x118a   : > { %v7995_v19 = vpop.f32.mrf.mxu0 }
0x118b   : > { %v16253_v19 = vld [vmem:[%s16968_s30 + $0x1a14] ss:$24 sps:$4 sm:$0xff]  }
0x11b8   : > { %v8096_v18 = vpop.f32.mrf.mxu0 }
0x11b9   : > { %v8097_v63 = vadd.f32 %v18531_v24, %v8096_v18  ;;  %v16256_v18 = vld [vmem:[%s16968_s30 + $0x1a24] ss:$24 sps:$4 sm:$0xff]  }
0x11ba   : > { %v8098_v3 = vpop.f32.mrf.mxu0 }
0x11bb   : > { %v8102_v46 = vmax.f32 %v8097_v63, 0.0  ;;  %v16251_v63 = vld [vmem:[%s16968_s30 + $0x1a10] ss:$24 sps:$4 sm:$0xff]   ;;  %v16254_v3 = vld [vmem:[%s16968_s30 + $0x1a20] ss:$24 sps:$4 sm:$0xff]  }
0x11bc   : > { %v8099_v48 = vpop.f32.mrf.mxu0 }
0x11bd   : > { %v8103_v61 = vpack.c.bf16 %v8102_v46, %v8102_v46  ;;  %v16259_v46 = vld [vmem:[%s16968_s30 + $0x19e4] ss:$24 sps:$4 sm:$0xff]   ;;  %v16262_v48 = vld [vmem:[%s16968_s30 + $0x19f4] ss:$24 sps:$4 sm:$0xff]  }
0x11be   : > { %v8100_v62 = vpop.f32.mrf.mxu0 }
0x11bf   : > { %8426 = vmatmul.mubr.bf16.vlgmr.msra.gmra.mxu1 %v8103_v61  ;;  %8508 = vmatmul.mubr.bf16.vlgmr.msra.gmra.mxu0 %v8103_v61  ;;  %v16268_v62 = vld [vmem:[%s16968_s30 + $0x19c4] ss:$24 sps:$4 sm:$0xff]  }
0x11c0   : > { %8435 = vmatpush1.bf16.msra.mxu1 %v16203_v23  ;;  %8466 = vmatprep.mubr.bf16.mxu1 %v16901_v0  ;;  %v16257_v23 = vld [vmem:[%s16968_s30 + $0x19e0] ss:$24 sps:$4 sm:$0xff]  }
0x11c1   : > { %8436 = vmatprep.subr.bf16.mxu1 %v16208_v45  ;;  %8903 = vmatprep.mubr.bf16.mxu0 %v16901_v0  ;;  %v16265_v45 = vld [vmem:[%s16968_s30 + $0x19b4] ss:$24 sps:$4 sm:$0xff]  }
0x11c2   : > { %8872 = vmatpush1.bf16.msra.mxu0 %v16227_v7 }
0x11c3   : > { %8873 = vmatprep.subr.bf16.mxu0 %v16235_v13 }
0x11c4   : > { %8437 = vmatpush1.bf16.msra.mxu1 %v16206_v55  ;;  %v16263_v55 = vld [vmem:[%s16968_s30 + $0x19b0] ss:$24 sps:$4 sm:$0xff]  }
0x11c5   : > { %8438 = vmatprep.subr.bf16.mxu1 %v16211_v49  ;;  %v16266_v49 = vld [vmem:[%s16968_s30 + $0x19c0] ss:$24 sps:$4 sm:$0xff]  }
0x11c6   : > { %8874 = vmatpush1.bf16.msra.mxu0 %v16233_v25 }
0x11c7   : > { %8875 = vmatprep.subr.bf16.mxu0 %v16241_v50 }
0x11c8   : > { %8439 = vmatpush1.bf16.msra.mxu1 %v16209_v1  ;;  %v16271_v1 = vld [vmem:[%s16968_s30 + $0x1984] ss:$24 sps:$4 sm:$0xff]  }
0x11c9   : > { %8440 = vmatprep.subr.bf16.mxu1 %v16214_v31  ;;  %v16269_v31 = vld [vmem:[%s16968_s30 + $0x1980] ss:$24 sps:$4 sm:$0xff]  }
0x11ca   : > { %8876 = vmatpush1.bf16.msra.mxu0 %v16239_v41 }
0x11cb   : > { %8877 = vmatprep.subr.bf16.mxu0 %v16247_v15  ;;  %v16281_v15 = vld [vmem:[%s16968_s30 + $0x1a78] ss:$24 sps:$4 sm:$0xff]  }
0x11cc   : > { %8441 = vmatpush1.bf16.msra.mxu1 %v16212_v37  ;;  %v16274_v37 = vld [vmem:[%s16968_s30 + $0x1994] ss:$24 sps:$4 sm:$0xff]  }
0x11cd   : > { %8442 = vmatprep.subr.bf16.mxu1 %v16217_v20  ;;  %v16272_v20 = vld [vmem:[%s16968_s30 + $0x1990] ss:$24 sps:$4 sm:$0xff]  }
0x11ce   : > { %8878 = vmatpush1.bf16.msra.mxu0 %v16245_v9  ;;  %v16284_v9 = vld [vmem:[%s16968_s30 + $0x1a48] ss:$24 sps:$4 sm:$0xff]  }
0x11cf   : > { %8879 = vmatprep.subr.bf16.mxu0 %v16253_v19  ;;  %v16287_v19 = vld [vmem:[%s16968_s30 + $0x1a18] ss:$24 sps:$4 sm:$0xff]  }
0x11d0   : > { %8443 = vmatpush1.bf16.msra.mxu1 %v16215_v44  ;;  %v16277_v44 = vld [vmem:[%s16968_s30 + $0x1adc] ss:$24 sps:$4 sm:$0xff]  }
0x11d1   : > { %8444 = vmatprep.subr.bf16.mxu1 %v16220_v58 }
0x11d2   : > { %8880 = vmatpush1.bf16.msra.mxu0 %v16251_v63  ;;  %v16290_v63 = vld [vmem:[%s16968_s30 + $0x19e8] ss:$24 sps:$4 sm:$0xff]  }
0x11d3   : > { %8881 = vmatprep.subr.bf16.mxu0 %v16259_v46  ;;  %v16293_v46 = vld [vmem:[%s16968_s30 + $0x19b8] ss:$24 sps:$4 sm:$0xff]  }
0x11d4   : > { %8445 = vmatpush1.bf16.msra.mxu1 %v16218_v59 }
0x11d5   : > { %8446 = vmatprep.subr.bf16.mxu1 %v16223_v29 }
0x11d6   : > { %8882 = vmatpush1.bf16.msra.mxu0 %v16257_v23  ;;  %v14281_v23 = vld.sshfl [vmem:[%s16963_s27 + $0x48] sm:$0x33 pattern:$0x76325410] }
0x11d7   : > { %8883 = vmatprep.subr.bf16.mxu0 %v16265_v45  ;;  %v9010_v45 = vcombine.high %v14281_v23, %v14281_v23 }
0x11d8   : > { %8447 = vmatpush1.bf16.msra.mxu1 %v16221_v22 }
0x11d9   : > { %8448 = vmatprep.subr.bf16.mxu1 %v16226_v27 }
0x11da   : > { %8884 = vmatpush1.bf16.msra.mxu0 %v16263_v55  ;;  %v16304_v55 = vld [vmem:[%s16968_s30 + $0x1c64] ss:$24 sps:$4 sm:$0xff]  }
0x11db   : > { %8885 = vmatprep.subr.bf16.mxu0 %v16271_v1  ;;  %v16310_v1 = vld [vmem:[%s16968_s30 + $0x1c34] ss:$24 sps:$4 sm:$0xff]  }
0x11dc   : > { %8449 = vmatpush1.bf16.msra.mxu1 %v16224_v30 }
0x11dd   : > { %8540 = vmatprep.subr.bf16.mxu1 %v16901_v0 }
0x11de   : > { %8886 = vmatpush1.bf16.msra.mxu0 %v16269_v31  ;;  %v16305_v31 = vld [vmem:[%s16968_s30 + $0x1c20] ss:$24 sps:$4 sm:$0xff]  }
0x11df   : > { %8467 = vmatmul.mubr.bf16.vlgmr.msra.gmra.mxu1 %v8103_v61  ;;  %v16260_v61 = vld [vmem:[%s16968_s30 + $0x19f0] ss:$24 sps:$4 sm:$0xff]   ;;  %8912 = vmatprep.subr.bf16.mxu0 %v16277_v44  ;;  %v16316_v44 = vld [vmem:[%s16968_s30 + $0x1c04] ss:$24 sps:$4 sm:$0xff]  }
0x11e0   : > { %8541 = vmatpush1.bf16.msra.mxu1 %v18554_v57  ;;  %14183 = vmatprep.mubr.msk.bf16.mxu1 %vm419_vm0, %v8536_v35 }
0x11e1   : > { %8542 = vmatprep.subr.bf16.mxu1 %v16901_v0 }
0x11e4   : > { %8543 = vmatpush1.bf16.msra.mxu1 %v18560_v56 }
0x11e5   : > { %8544 = vmatprep.subr.bf16.mxu1 %v16901_v0 }
0x11e8   : > { %8545 = vmatpush1.bf16.msra.mxu1 %v18565_v8 }
0x11e9   : > { %8546 = vmatprep.subr.bf16.mxu1 %v16901_v0 }
0x11ec   : > { %8547 = vmatpush1.bf16.msra.mxu1 %v18570_v26 }
0x11ed   : > { %8548 = vmatprep.subr.bf16.mxu1 %v16901_v0 }
0x11f0   : > { %8549 = vmatpush1.bf16.msra.mxu1 %v18673_v54 }
0x11f1   : > { %8550 = vmatprep.subr.bf16.mxu1 %v16901_v0 }
0x11f4   : > { %8551 = vmatpush1.bf16.msra.mxu1 %v18678_v34 }
0x11f5   : > { %8552 = vmatprep.subr.bf16.mxu1 %v16901_v0 }
0x11f8   : > { %8553 = vmatpush1.bf16.msra.mxu1 %v18683_v52 }
0x11f9   : > { %8554 = vmatprep.subr.bf16.mxu1 %v16901_v0 }
0x11fc   : > { %8555 = vmatpush1.bf16.msra.mxu1 %v18688_v53 }
0x11fd   : > { %8562 = vmatprep.subr.bf16.mxu1 %v16901_v0 }
0x1200   : > { %8563 = vmatpush2.bf16.msra.mxu1 %v16998_v16 }
0x1201   : > { %8564 = vmatprep.subr.bf16.mxu1 %v16901_v0 }
0x1204   : > { %8565 = vmatpush2.bf16.msra.mxu1 %v18695_v47 }
0x1205   : > { %8566 = vmatprep.subr.bf16.mxu1 %v16901_v0 }
0x1208   : > { %8567 = vmatpush2.bf16.msra.mxu1 %v18700_v39 }
0x1209   : > { %8568 = vmatprep.subr.bf16.mxu1 %v16901_v0 }
0x120c   : > { %8569 = vmatpush2.bf16.msra.mxu1 %v18705_v42 }
0x120d   : > { %8570 = vmatprep.subr.bf16.mxu1 %v16901_v0 }
0x1210   : > { %8571 = vmatpush2.bf16.msra.mxu1 %v18710_v43 }
0x1211   : > { %8953 = vmatprep.subr.bf16.mxu1 %v16232_v11 }
0x1213   : > { %8573 = vmatmul.mubr.bf16.vlgmr.msra.gmra.mxu1 %v8535_v5 }
0x1214   : > { %8985 = vmatprep.mubr.bf16.mxu1 %v16901_v0  ;;  %8954 = vmatpush1.bf16.msra.mxu1 %v16230_v12 }
0x1215   : > { %8955 = vmatprep.subr.bf16.mxu1 %v16238_v10 }
0x1218   : > { %8956 = vmatpush1.bf16.msra.mxu1 %v16236_v36 }
0x1219   : > { %8957 = vmatprep.subr.bf16.mxu1 %v16244_v14  ;;  %v16275_v14 = vld [vmem:[%s16968_s30 + $0x1ad8] ss:$24 sps:$4 sm:$0xff]  }
0x121c   : > { %8958 = vmatpush1.bf16.msra.mxu1 %v16242_v40 }
0x121d   : > { %8959 = vmatprep.subr.bf16.mxu1 %v16250_v21  ;;  %v16286_v21 = vld [vmem:[%s16968_s30 + $0x1a4c] ss:$24 sps:$4 sm:$0xff]  }
0x1220   : > { %8960 = vmatpush1.bf16.msra.mxu1 %v16248_v17  ;;  %v16289_v17 = vld [vmem:[%s16968_s30 + $0x1a1c] ss:$24 sps:$4 sm:$0xff]  }
0x1221   : > { %8961 = vmatprep.subr.bf16.mxu1 %v16256_v18  ;;  %v16292_v18 = vld [vmem:[%s16968_s30 + $0x19ec] ss:$24 sps:$4 sm:$0xff]  }
0x1224   : > { %8962 = vmatpush1.bf16.msra.mxu1 %v16254_v3  ;;  %v16295_v3 = vld [vmem:[%s16968_s30 + $0x19bc] ss:$24 sps:$4 sm:$0xff]  }
0x1225   : > { %8963 = vmatprep.subr.bf16.mxu1 %v16262_v48  ;;  %v16298_v48 = vld [vmem:[%s16968_s30 + $0x198c] ss:$24 sps:$4 sm:$0xff]  }
0x1228   : > { %8964 = vmatpush1.bf16.msra.mxu1 %v16260_v61  ;;  %v16296_v61 = vld [vmem:[%s16968_s30 + $0x1988] ss:$24 sps:$4 sm:$0xff]  }
0x1229   : > { %8965 = vmatprep.subr.bf16.mxu1 %v16268_v62  ;;  %v9014_v62 = vpack.c.bf16 %v9010_v45, %v9010_v45 }
0x122c   : > { %8966 = vmatpush1.bf16.msra.mxu1 %v16266_v49  ;;  %v16307_v49 = vld [vmem:[%s16968_s30 + $0x1c24] ss:$24 sps:$4 sm:$0xff]  }
0x122d   : > { %8967 = vmatprep.subr.bf16.mxu1 %v16274_v37  ;;  %v16308_v37 = vld [vmem:[%s16968_s30 + $0x1c30] ss:$24 sps:$4 sm:$0xff]  }
0x1230   : > { %8968 = vmatpush1.bf16.msra.mxu1 %v16272_v20  ;;  %v16313_v20 = vld [vmem:[%s16968_s30 + $0x1bf4] ss:$24 sps:$4 sm:$0xff]  }
0x127f   : > { %v8427_v58 = vpop.f32.mrf.mxu1  ;;  %v8509_v59 = vpop.f32.mrf.mxu0 }
0x1280   : > { %v18846_v29 = vadd.f32 %v8427_v58, %v18748_v33  ;;  %v18849_v22 = vadd.f32 %v8509_v59, %v18751_v2  ;;  %v16311_v58 = vld [vmem:[%s16968_s30 + $0x1bf0] ss:$24 sps:$4 sm:$0xff]   ;;  %v16314_v59 = vld [vmem:[%s16968_s30 + $0x1c00] ss:$24 sps:$4 sm:$0xff]  }
0x1281   : > { %v8429_v27 = vpop.f32.mrf.mxu1  ;;  %v8511_v28 = vpop.f32.mrf.mxu0 }
0x1282   : > { %v18852_v30 = vadd.f32 %v8429_v27, %v18754_v32  ;;  %v18855_v6 = vadd.f32 %v8511_v28, %v18757_v4  ;;  %v16319_v27 = vld [vmem:[%s16968_s30 + $0x1bc4] ss:$24 sps:$4 sm:$0xff]   ;;  %v16322_v28 = vld [vmem:[%s16968_s30 + $0x1bd4] ss:$24 sps:$4 sm:$0xff]  }
0x1283   : > { %v8431_v35 = vpop.f32.mrf.mxu1  ;;  %v8513_v5 = vpop.f32.mrf.mxu0 }
0x1284   : > { %v16317_v35 = vld [vmem:[%s16968_s30 + $0x1bc0] ss:$24 sps:$4 sm:$0xff]   ;;  %v16320_v5 = vld [vmem:[%s16968_s30 + $0x1bd0] ss:$24 sps:$4 sm:$0xff]  }
0x1285   : > { %v8432_v7 = vpop.f32.mrf.mxu1  ;;  %v8514_v60 = vpop.f32.mrf.mxu0 }
0x1286   : > { %v16325_v7 = vld [vmem:[%s16968_s30 + $0x1b94] ss:$24 sps:$4 sm:$0xff]   ;;  %v16328_v60 = vld [vmem:[%s16968_s30 + $0x1ba4] ss:$24 sps:$4 sm:$0xff]  }
0x129f   : > { %v8468_v12 = vpop.f32.mrf.mxu1 }
0x12a0   : > { %v18858_v33 = vadd.f32 %v8468_v12, %v18760_v51  ;;  %v16280_v51 = vld [vmem:[%s16968_s30 + $0x1aac] ss:$24 sps:$4 sm:$0xff]   ;;  %v16323_v12 = vld [vmem:[%s16968_s30 + $0x1b90] ss:$24 sps:$4 sm:$0xff]  }
0x12a1   : > { %v8470_v2 = vpop.f32.mrf.mxu1 }
0x12a2   : > { %v18861_v11 = vadd.f32 %v8470_v2, %v18763_v38  ;;  %v16278_v38 = vld [vmem:[%s16968_s30 + $0x1aa8] ss:$24 sps:$4 sm:$0xff]  }
0x12a3   : > { %v8472_v32 = vpop.f32.mrf.mxu1  ;;  %v16326_v2 = vld [vmem:[%s16968_s30 + $0x1ba0] ss:$24 sps:$4 sm:$0xff]  }
0x12a4   : > { %v16331_v32 = vld [vmem:[%s16968_s30 + $0x1b64] ss:$24 sps:$4 sm:$0xff]  }
0x12a5   : > { %v8473_v13 = vpop.f32.mrf.mxu1 }
0x12a6   : > { %v16334_v13 = vld [vmem:[%s16968_s30 + $0x1b74] ss:$24 sps:$4 sm:$0xff]  }
0x12d3   : > { %v8574_v4 = vpop.f32.mrf.mxu1 }
0x12d4   : > { %v8575_v10 = vadd.f32 %v18531_v24, %v8574_v4  ;;  %v16283_v24 = vld [vmem:[%s16968_s30 + $0x1a7c] ss:$24 sps:$4 sm:$0xff]   ;;  %v16329_v4 = vld [vmem:[%s16968_s30 + $0x1b60] ss:$24 sps:$4 sm:$0xff]  }
0x12d5   : > { %v8576_v25 = vpop.f32.mrf.mxu1 }
0x12d6   : > { %v8580_v36 = vmax.f32 %v8575_v10, 0.0  ;;  %v16332_v10 = vld [vmem:[%s16968_s30 + $0x1b70] ss:$24 sps:$4 sm:$0xff]   ;;  %v16337_v25 = vld [vmem:[%s16968_s30 + $0x1b34] ss:$24 sps:$4 sm:$0xff]  }
0x12d7   : > { %v8577_v50 = vpop.f32.mrf.mxu1 }
0x12d8   : > { %v8581_v41 = vpack.c.bf16 %v8580_v36, %v8580_v36  ;;  %v16340_v36 = vld [vmem:[%s16968_s30 + $0x1b44] ss:$24 sps:$4 sm:$0xff]   ;;  %v16335_v50 = vld [vmem:[%s16968_s30 + $0x1b30] ss:$24 sps:$4 sm:$0xff]  }
0x12d9   : > { %v8578_v40 = vpop.f32.mrf.mxu1 }
0x12da   : > { %8904 = vmatmul.mubr.bf16.vlgmr.msra.gmra.mxu0 %v8581_v41  ;;  %8986 = vmatmul.mubr.bf16.vlgmr.msra.gmra.mxu1 %v8581_v41  ;;  %v16346_v40 = vld [vmem:[%s16968_s30 + $0x1b14] ss:$24 sps:$4 sm:$0xff]  }
0x12db   : > { %8913 = vmatpush1.bf16.msra.mxu0 %v16275_v14  ;;  %8944 = vmatprep.mubr.bf16.mxu0 %v16901_v0  ;;  %v16338_v14 = vld [vmem:[%s16968_s30 + $0x1b40] ss:$24 sps:$4 sm:$0xff]  }
0x12dc   : > { %8914 = vmatprep.subr.bf16.mxu0 %v16280_v51  ;;  %9381 = vmatprep.mubr.bf16.mxu1 %v16901_v0  ;;  %v16341_v51 = vld [vmem:[%s16968_s30 + $0x1b00] ss:$24 sps:$4 sm:$0xff]  }
0x12df   : > { %8915 = vmatpush1.bf16.msra.mxu0 %v16278_v38  ;;  %v16344_v38 = vld [vmem:[%s16968_s30 + $0x1b10] ss:$24 sps:$4 sm:$0xff]  }
0x12e0   : > { %8916 = vmatprep.subr.bf16.mxu0 %v16283_v24  ;;  %v16349_v24 = vld [vmem:[%s16968_s30 + $0x1c5c] ss:$24 sps:$4 sm:$0xff]  }
0x12e3   : > { %8917 = vmatpush1.bf16.msra.mxu0 %v16281_v15 }
0x12e4   : > { %8918 = vmatprep.subr.bf16.mxu0 %v16286_v21 }
0x12e7   : > { %8919 = vmatpush1.bf16.msra.mxu0 %v16284_v9 }
0x12e8   : > { %8920 = vmatprep.subr.bf16.mxu0 %v16289_v17 }
0x12eb   : > { %8921 = vmatpush1.bf16.msra.mxu0 %v16287_v19 }
0x12ec   : > { %8922 = vmatprep.subr.bf16.mxu0 %v16292_v18 }
0x12ef   : > { %8923 = vmatpush1.bf16.msra.mxu0 %v16290_v63 }
0x12f0   : > { %8924 = vmatprep.subr.bf16.mxu0 %v16295_v3 }
0x12f3   : > { %8925 = vmatpush1.bf16.msra.mxu0 %v16293_v46 }
0x12f4   : > { %8926 = vmatprep.subr.bf16.mxu0 %v16298_v48 }
0x12f7   : > { %8927 = vmatpush1.bf16.msra.mxu0 %v16296_v61 }
0x12f8   : > { %9018 = vmatprep.subr.bf16.mxu0 %v16901_v0 }
0x12fa   : > { %8945 = vmatmul.mubr.bf16.vlgmr.msra.gmra.mxu0 %v8581_v41  ;;  %v16343_v41 = vld [vmem:[%s16968_s30 + $0x1b04] ss:$24 sps:$4 sm:$0xff]  }
0x12fb   : > { %9019 = vmatpush1.bf16.msra.mxu0 %v18554_v57  ;;  %14282 = vmatprep.mubr.msk.bf16.mxu0 %vm419_vm0, %v9014_v62  ;;  %v9013_v57 = vpack.c.bf16 %v14281_v23, %v14281_v23 }
0x12fc   : > { %9020 = vmatprep.subr.bf16.mxu0 %v16901_v0 }
0x12ff   : > { %9021 = vmatpush1.bf16.msra.mxu0 %v18560_v56  ;;  %v16299_v56 = vld [vmem:[%s16968_s30 + $0x1c50] ss:$24 sps:$4 sm:$0xff]  }
0x1300   : > { %9022 = vmatprep.subr.bf16.mxu0 %v16901_v0 }
0x1303   : > { %9023 = vmatpush1.bf16.msra.mxu0 %v18565_v8  ;;  %v16301_v8 = vld [vmem:[%s16968_s30 + $0x1c54] ss:$24 sps:$4 sm:$0xff]  }
0x1304   : > { %9024 = vmatprep.subr.bf16.mxu0 %v16901_v0  ;;  %9349 = vmatprep.subr.bf16.mxu1 %v16301_v8 }
0x1305   : > { %9350 = vmatpush1.bf16.msra.mxu1 %v16299_v56 }
0x1306   : > { %9351 = vmatprep.subr.bf16.mxu1 %v16307_v49 }
0x1307   : > { %9025 = vmatpush1.bf16.msra.mxu0 %v18570_v26  ;;  %v16302_v26 = vld [vmem:[%s16968_s30 + $0x1c60] ss:$24 sps:$4 sm:$0xff]  }
0x1308   : > { %9026 = vmatprep.subr.bf16.mxu0 %v16901_v0 }
0x1309   : > { %9352 = vmatpush1.bf16.msra.mxu1 %v16305_v31  ;;  %v16352_v31 = vld [vmem:[%s16968_s30 + $0x1c2c] ss:$24 sps:$4 sm:$0xff]  }
0x130a   : > { %9353 = vmatprep.subr.bf16.mxu1 %v16313_v20  ;;  %v16355_v20 = vld [vmem:[%s16968_s30 + $0x1bfc] ss:$24 sps:$4 sm:$0xff]  }
0x130b   : > { %9027 = vmatpush1.bf16.msra.mxu0 %v18673_v54 }
0x130c   : > { %9028 = vmatprep.subr.bf16.mxu0 %v16901_v0 }
0x130d   : > { %9354 = vmatpush1.bf16.msra.mxu1 %v16311_v58  ;;  %v16358_v58 = vld [vmem:[%s16968_s30 + $0x1bcc] ss:$24 sps:$4 sm:$0xff]  }
0x130e   : > { %9355 = vmatprep.subr.bf16.mxu1 %v16319_v27  ;;  %v16361_v27 = vld [vmem:[%s16968_s30 + $0x1b9c] ss:$24 sps:$4 sm:$0xff]  }
0x130f   : > { %9029 = vmatpush1.bf16.msra.mxu0 %v18678_v34 }
0x1310   : > { %9030 = vmatprep.subr.bf16.mxu0 %v16901_v0 }
0x1311   : > { %9356 = vmatpush1.bf16.msra.mxu1 %v16317_v35  ;;  %v16364_v35 = vld [vmem:[%s16968_s30 + $0x1b6c] ss:$24 sps:$4 sm:$0xff]  }
0x1312   : > { %9357 = vmatprep.subr.bf16.mxu1 %v16325_v7  ;;  %v16367_v7 = vld [vmem:[%s16968_s30 + $0x1b3c] ss:$24 sps:$4 sm:$0xff]  }
0x1313   : > { %9031 = vmatpush1.bf16.msra.mxu0 %v18683_v52 }
0x1314   : > { %9032 = vmatprep.subr.bf16.mxu0 %v16901_v0 }
0x1315   : > { %9358 = vmatpush1.bf16.msra.mxu1 %v16323_v12  ;;  %v16370_v12 = vld [vmem:[%s16968_s30 + $0x1b0c] ss:$24 sps:$4 sm:$0xff]  }
0x1316   : > { %9359 = vmatprep.subr.bf16.mxu1 %v16331_v32  ;;  %v16368_v32 = vld [vmem:[%s16968_s30 + $0x1b08] ss:$24 sps:$4 sm:$0xff]  }
0x1317   : > { %9033 = vmatpush1.bf16.msra.mxu0 %v18688_v53 }
0x1318   : > { %9040 = vmatprep.subr.bf16.mxu0 %v16901_v0 }
0x1319   : > { %9360 = vmatpush1.bf16.msra.mxu1 %v16329_v4 }
0x131a   : > { %9361 = vmatprep.subr.bf16.mxu1 %v16337_v25  ;;  %v18991_v25 = vld [vmem:[%s16949_s23 + $0x30] sm:$0xff]  }
0x131b   : > { %9041 = vmatpush2.bf16.msra.mxu0 %v16998_v16 }
0x131c   : > { %9042 = vmatprep.subr.bf16.mxu0 %v16901_v0 }
0x131d   : > { %9362 = vmatpush1.bf16.msra.mxu1 %v16335_v50  ;;  %v19001_v50 = vld [vmem:[%s16949_s23 + $0x20] sm:$0xff]  }
0x131e   : > { %9363 = vmatprep.subr.bf16.mxu1 %v16343_v41  ;;  %v16385_v41 = vld [vmem:[%s16968_s30 + $0x1d74] ss:$24 sps:$4 sm:$0xff]  }
0x131f   : > { %9043 = vmatpush2.bf16.msra.mxu0 %v18695_v47 }
0x1320   : > { %9044 = vmatprep.subr.bf16.mxu0 %v16901_v0 }
0x1321   : > { %9364 = vmatpush1.bf16.msra.mxu1 %v16341_v51  ;;  %v16388_v51 = vld [vmem:[%s16968_s30 + $0x1d84] ss:$24 sps:$4 sm:$0xff]  }
0x1322   : > { %9390 = vmatprep.subr.bf16.mxu1 %v16349_v24  ;;  %v16391_v24 = vld [vmem:[%s16968_s30 + $0x1d44] ss:$24 sps:$4 sm:$0xff]  }
0x1323   : > { %9045 = vmatpush2.bf16.msra.mxu0 %v18700_v39 }
0x1324   : > { %9046 = vmatprep.subr.bf16.mxu0 %v16901_v0 }
0x1327   : > { %9047 = vmatpush2.bf16.msra.mxu0 %v18705_v42 }
0x1328   : > { %9048 = vmatprep.subr.bf16.mxu0 %v16901_v0 }
0x132b   : > { %9049 = vmatpush2.bf16.msra.mxu0 %v18710_v43 }
0x132c   : > { %9431 = vmatprep.subr.bf16.mxu0 %v16304_v55 }
0x132e   : > { %9051 = vmatmul.mubr.bf16.vlgmr.msra.gmra.mxu0 %v9013_v57 }
0x132f   : > { %9463 = vmatprep.mubr.bf16.mxu0 %v16901_v0  ;;  %9432 = vmatpush1.bf16.msra.mxu0 %v16302_v26 }
0x1330   : > { %9433 = vmatprep.subr.bf16.mxu0 %v16310_v1 }
0x1333   : > { %9434 = vmatpush1.bf16.msra.mxu0 %v16308_v37  ;;  %v16350_v37 = vld [vmem:[%s16968_s30 + $0x1c28] ss:$24 sps:$4 sm:$0xff]  }
0x1334   : > { %9435 = vmatprep.subr.bf16.mxu0 %v16316_v44  ;;  %v16353_v44 = vld [vmem:[%s16968_s30 + $0x1bf8] ss:$24 sps:$4 sm:$0xff]  }
0x1337   : > { %9436 = vmatpush1.bf16.msra.mxu0 %v16314_v59  ;;  %v16356_v59 = vld [vmem:[%s16968_s30 + $0x1bc8] ss:$24 sps:$4 sm:$0xff]  }
0x1338   : > { %9437 = vmatprep.subr.bf16.mxu0 %v16322_v28  ;;  %v16359_v28 = vld [vmem:[%s16968_s30 + $0x1b98] ss:$24 sps:$4 sm:$0xff]  }
0x133b   : > { %9438 = vmatpush1.bf16.msra.mxu0 %v16320_v5  ;;  %v16362_v5 = vld [vmem:[%s16968_s30 + $0x1b68] ss:$24 sps:$4 sm:$0xff]  }
0x133c   : > { %9439 = vmatprep.subr.bf16.mxu0 %v16328_v60  ;;  %v16365_v60 = vld [vmem:[%s16968_s30 + $0x1b38] ss:$24 sps:$4 sm:$0xff]  }
0x133f   : > { %9440 = vmatpush1.bf16.msra.mxu0 %v16326_v2  ;;  %v14380_v2 = vld.sshfl [vmem:[%s16963_s27 + $0x4c] sm:$0x33 pattern:$0x76325410] }
0x1340   : > { %9441 = vmatprep.subr.bf16.mxu0 %v16334_v13  ;;  %v9488_v13 = vcombine.high %v14380_v2, %v14380_v2 }
0x1342   : > { %v9492_v4 = vpack.c.bf16 %v9488_v13, %v9488_v13 }
0x1343   : > { %9442 = vmatpush1.bf16.msra.mxu0 %v16332_v10  ;;  %v18985_v10 = vld [vmem:[%s16949_s23 + $0x38] sm:$0xff]  }
0x1344   : > { %9443 = vmatprep.subr.bf16.mxu0 %v16340_v36  ;;  %v18996_v36 = vld [vmem:[%s16949_s23 + $0x28] sm:$0xff]  }
0x1347   : > { %9444 = vmatpush1.bf16.msra.mxu0 %v16338_v14  ;;  %v16377_v14 = vld [vmem:[%s16968_s30 + $0x1da0] ss:$24 sps:$4 sm:$0xff]  }
0x1348   : > { %9445 = vmatprep.subr.bf16.mxu0 %v16346_v40  ;;  %v16383_v40 = vld [vmem:[%s16968_s30 + $0x1d70] ss:$24 sps:$4 sm:$0xff]  }
0x134b   : > { %9446 = vmatpush1.bf16.msra.mxu0 %v16344_v38  ;;  %v16386_v38 = vld [vmem:[%s16968_s30 + $0x1d80] ss:$24 sps:$4 sm:$0xff]  }
0x139a   : > { %v8905_v15 = vpop.f32.mrf.mxu0  ;;  %v8987_v21 = vpop.f32.mrf.mxu1 }
0x139b   : > { %v18944_v9 = vadd.f32 %v8905_v15, %v18846_v29  ;;  %v18947_v17 = vadd.f32 %v8987_v21, %v18849_v22  ;;  %v16394_v15 = vld [vmem:[%s16968_s30 + $0x1d54] ss:$24 sps:$4 sm:$0xff]   ;;  %v16389_v21 = vld [vmem:[%s16968_s30 + $0x1d40] ss:$24 sps:$4 sm:$0xff]  }
0x139c   : > { %v8907_v19 = vpop.f32.mrf.mxu0  ;;  %v8989_v18 = vpop.f32.mrf.mxu1 }
0x139d   : > { %v18950_v63 = vadd.f32 %v8907_v19, %v18852_v30  ;;  %v18953_v3 = vadd.f32 %v8989_v18, %v18855_v6  ;;  %v18962_v6 = vld [vmem:[%s17059_s8] ss:$0 sm:$0xff]  ;;  %v16392_v19 = vld [vmem:[%s16968_s30 + $0x1d50] ss:$24 sps:$4 sm:$0xff]   ;;  %v16397_v18 = vld [vmem:[%s16968_s30 + $0x1d14] ss:$24 sps:$4 sm:$0xff]  }
0x139e   : > { %v8909_v46 = vpop.f32.mrf.mxu0  ;;  %v8991_v48 = vpop.f32.mrf.mxu1 }
0x139f   : > { %v16400_v46 = vld [vmem:[%s16968_s30 + $0x1d24] ss:$24 sps:$4 sm:$0xff]   ;;  %v16395_v48 = vld [vmem:[%s16968_s30 + $0x1d10] ss:$24 sps:$4 sm:$0xff]  }
0x13a0   : > { %v8910_v23 = vpop.f32.mrf.mxu0  ;;  %v8992_v61 = vpop.f32.mrf.mxu1 }
0x13a1   : > { %v16398_v23 = vld [vmem:[%s16968_s30 + $0x1d20] ss:$24 sps:$4 sm:$0xff]   ;;  %v16403_v61 = vld [vmem:[%s16968_s30 + $0x1ce4] ss:$24 sps:$4 sm:$0xff]  }
0x13ba   : > { %v8946_v29 = vpop.f32.mrf.mxu0 }
0x13bb   : > { %v18956_v45 = vadd.f32 %v8946_v29, %v18858_v33  ;;  %v16347_v33 = vld [vmem:[%s16968_s30 + $0x1c58] ss:$24 sps:$4 sm:$0xff]   ;;  %v16406_v29 = vld [vmem:[%s16968_s30 + $0x1cf4] ss:$24 sps:$4 sm:$0xff]  }
0x13bc   : > { %v8948_v22 = vpop.f32.mrf.mxu0 }
0x13bd   : > { %v18959_v62 = vadd.f32 %v8948_v22, %v18861_v11  ;;  %v16401_v22 = vld [vmem:[%s16968_s30 + $0x1ce0] ss:$24 sps:$4 sm:$0xff]  }
0x13be   : > { %v8950_v30 = vpop.f32.mrf.mxu0 }
0x13bf   : > { %v16404_v30 = vld [vmem:[%s16968_s30 + $0x1cf0] ss:$24 sps:$4 sm:$0xff]  }
0x13c0   : > { %v8951_v57 = vpop.f32.mrf.mxu0 }
0x13c1   : > { %v16409_v57 = vld [vmem:[%s16968_s30 + $0x1cb4] ss:$24 sps:$4 sm:$0xff]  }
0x13ee   : > { %v9052_v56 = vpop.f32.mrf.mxu0 }
0x13ef   : > { %v9053_v8 = vadd.f32 %v18962_v6, %v9052_v56  ;;  %v16412_v56 = vld [vmem:[%s16968_s30 + $0x1cc4] ss:$24 sps:$4 sm:$0xff]  }
0x13f0   : > { %v9054_v26 = vpop.f32.mrf.mxu0 }
0x13f1   : > { %v9058_v55 = vmax.f32 %v9053_v8, 0.0  ;;  %v16407_v8 = vld [vmem:[%s16968_s30 + $0x1cb0] ss:$24 sps:$4 sm:$0xff]   ;;  %v16410_v26 = vld [vmem:[%s16968_s30 + $0x1cc0] ss:$24 sps:$4 sm:$0xff]  }
0x13f2   : > { %v9055_v49 = vpop.f32.mrf.mxu0 }
0x13f3   : > { %v9059_v1 = vpack.c.bf16 %v9058_v55, %v9058_v55  ;;  %v16415_v55 = vld [vmem:[%s16968_s30 + $0x1c84] ss:$24 sps:$4 sm:$0xff]   ;;  %v16413_v49 = vld [vmem:[%s16968_s30 + $0x1c80] ss:$24 sps:$4 sm:$0xff]  }
0x13f4   : > { %v9056_v11 = vpop.f32.mrf.mxu0 }
0x13f5   : > { %9382 = vmatmul.mubr.bf16.vlgmr.msra.gmra.mxu1 %v9059_v1  ;;  %9464 = vmatmul.mubr.bf16.vlgmr.msra.gmra.mxu0 %v9059_v1 }
0x13f6   : > { %9391 = vmatpush1.bf16.msra.mxu1 %v16347_v33  ;;  %9422 = vmatprep.mubr.bf16.mxu1 %v16901_v0  ;;  %v16418_v33 = vld [vmem:[%s16968_s30 + $0x1c94] ss:$24 sps:$4 sm:$0xff]  }
0x13f7   : > { %9392 = vmatprep.subr.bf16.mxu1 %v16352_v31  ;;  %9859 = vmatprep.mubr.bf16.mxu0 %v16901_v0  ;;  %v16421_v31 = vld [vmem:[%s16968_s30 + $0x1ddc] ss:$24 sps:$4 sm:$0xff]  }
0x13fa   : > { %9393 = vmatpush1.bf16.msra.mxu1 %v16350_v37 }
0x13fb   : > { %9394 = vmatprep.subr.bf16.mxu1 %v16355_v20 }
0x13fe   : > { %9395 = vmatpush1.bf16.msra.mxu1 %v16353_v44 }
0x13ff   : > { %9396 = vmatprep.subr.bf16.mxu1 %v16358_v58 }
0x1402   : > { %9397 = vmatpush1.bf16.msra.mxu1 %v16356_v59 }
0x1403   : > { %9398 = vmatprep.subr.bf16.mxu1 %v16361_v27 }
0x1406   : > { %9399 = vmatpush1.bf16.msra.mxu1 %v16359_v28 }
0x1407   : > { %9400 = vmatprep.subr.bf16.mxu1 %v16364_v35 }
0x140a   : > { %9401 = vmatpush1.bf16.msra.mxu1 %v16362_v5 }
0x140b   : > { %9402 = vmatprep.subr.bf16.mxu1 %v16367_v7 }
0x140e   : > { %9403 = vmatpush1.bf16.msra.mxu1 %v16365_v60 }
0x140f   : > { %9404 = vmatprep.subr.bf16.mxu1 %v16370_v12 }
0x1412   : > { %9405 = vmatpush1.bf16.msra.mxu1 %v16368_v32 }
0x1413   : > { %9496 = vmatprep.subr.bf16.mxu1 %v16901_v0 }
0x1415   : > { %9423 = vmatmul.mubr.bf16.vlgmr.msra.gmra.mxu1 %v9059_v1  ;;  %v16416_v1 = vld [vmem:[%s16968_s30 + $0x1c90] ss:$24 sps:$4 sm:$0xff]  }
0x1416   : > { %9497 = vmatpush1.bf16.msra.mxu1 %v18985_v10  ;;  %14381 = vmatprep.mubr.msk.bf16.mxu1 %vm419_vm0, %v9492_v4 }
0x1417   : > { %9498 = vmatprep.subr.bf16.mxu1 %v16901_v0 }
0x141a   : > { %9499 = vmatpush1.bf16.msra.mxu1 %v18991_v25 }
0x141b   : > { %9500 = vmatprep.subr.bf16.mxu1 %v16901_v0 }
0x141e   : > { %9501 = vmatpush1.bf16.msra.mxu1 %v18996_v36 }
0x141f   : > { %9502 = vmatprep.subr.bf16.mxu1 %v16901_v0 }
0x1422   : > { %9503 = vmatpush1.bf16.msra.mxu1 %v19001_v50 }
0x1423   : > { %9504 = vmatprep.subr.bf16.mxu1 %v16901_v0 }
0x1426   : > { %9505 = vmatpush1.bf16.msra.mxu1 %v18673_v54  ;;  %v9491_v54 = vpack.c.bf16 %v14380_v2, %v14380_v2 }
0x1427   : > { %9506 = vmatprep.subr.bf16.mxu1 %v16901_v0 }
0x142a   : > { %9507 = vmatpush1.bf16.msra.mxu1 %v18678_v34  ;;  %v16371_v34 = vld [vmem:[%s16968_s30 + $0x1dd0] ss:$24 sps:$4 sm:$0xff]  }
0x142b   : > { %9508 = vmatprep.subr.bf16.mxu1 %v16901_v0 }
0x142e   : > { %9509 = vmatpush1.bf16.msra.mxu1 %v18683_v52  ;;  %v16373_v52 = vld [vmem:[%s16968_s30 + $0x1dd4] ss:$24 sps:$4 sm:$0xff]  }
0x142f   : > { %9510 = vmatprep.subr.bf16.mxu1 %v16901_v0  ;;  %9827 = vmatprep.subr.bf16.mxu0 %v16373_v52  ;;  %v16419_v52 = vld [vmem:[%s16968_s30 + $0x1dd8] ss:$24 sps:$4 sm:$0xff]  }
0x1430   : > { %9828 = vmatpush1.bf16.msra.mxu0 %v16371_v34 }
0x1432   : > { %9511 = vmatpush1.bf16.msra.mxu1 %v18688_v53  ;;  %v16374_v53 = vld [vmem:[%s16968_s30 + $0x1de0] ss:$24 sps:$4 sm:$0xff]  }
0x1433   : > { %9518 = vmatprep.subr.bf16.mxu1 %v16901_v0 }
0x1436   : > { %9519 = vmatpush2.bf16.msra.mxu1 %v16998_v16 }
0x1437   : > { %9520 = vmatprep.subr.bf16.mxu1 %v16901_v0 }
0x143a   : > { %9521 = vmatpush2.bf16.msra.mxu1 %v18695_v47  ;;  %v16376_v47 = vld [vmem:[%s16968_s30 + $0x1de4] ss:$24 sps:$4 sm:$0xff]  }
0x143b   : > { %9522 = vmatprep.subr.bf16.mxu1 %v16901_v0 }
0x143e   : > { %9523 = vmatpush2.bf16.msra.mxu1 %v18700_v39  ;;  %v16379_v39 = vld [vmem:[%s16968_s30 + $0x1da4] ss:$24 sps:$4 sm:$0xff]  }
0x143f   : > { %9524 = vmatprep.subr.bf16.mxu1 %v16901_v0  ;;  %9829 = vmatprep.subr.bf16.mxu0 %v16379_v39  ;;  %v16427_v39 = vld [vmem:[%s16968_s30 + $0x1d7c] ss:$24 sps:$4 sm:$0xff]  }
0x1440   : > { %9830 = vmatpush1.bf16.msra.mxu0 %v16377_v14  ;;  %v16430_v14 = vld [vmem:[%s16968_s30 + $0x1d4c] ss:$24 sps:$4 sm:$0xff]  }
0x1441   : > { %9831 = vmatprep.subr.bf16.mxu0 %v16385_v41  ;;  %v16433_v41 = vld [vmem:[%s16968_s30 + $0x1d1c] ss:$24 sps:$4 sm:$0xff]  }
0x1442   : > { %9525 = vmatpush2.bf16.msra.mxu1 %v18705_v42  ;;  %v16382_v42 = vld [vmem:[%s16968_s30 + $0x1db4] ss:$24 sps:$4 sm:$0xff]  }
0x1443   : > { %9526 = vmatprep.subr.bf16.mxu1 %v16901_v0 }
0x1444   : > { %9832 = vmatpush1.bf16.msra.mxu0 %v16383_v40  ;;  %v16436_v40 = vld [vmem:[%s16968_s30 + $0x1cec] ss:$24 sps:$4 sm:$0xff]  }
0x1445   : > { %9833 = vmatprep.subr.bf16.mxu0 %v16391_v24  ;;  %v16439_v24 = vld [vmem:[%s16968_s30 + $0x1cbc] ss:$24 sps:$4 sm:$0xff]  }
0x1446   : > { %9527 = vmatpush2.bf16.msra.mxu1 %v18710_v43  ;;  %v16380_v43 = vld [vmem:[%s16968_s30 + $0x1db0] ss:$24 sps:$4 sm:$0xff]  }
0x1447   : > { %9909 = vmatprep.subr.bf16.mxu1 %v16376_v47 }
0x1448   : > { %9834 = vmatpush1.bf16.msra.mxu0 %v16389_v21  ;;  %v16442_v21 = vld [vmem:[%s16968_s30 + $0x1c8c] ss:$24 sps:$4 sm:$0xff]  }
0x1449   : > { %9529 = vmatmul.mubr.bf16.vlgmr.msra.gmra.mxu1 %v9491_v54  ;;  %9835 = vmatprep.subr.bf16.mxu0 %v16397_v18  ;;  %v16440_v18 = vld [vmem:[%s16968_s30 + $0x1c88] ss:$24 sps:$4 sm:$0xff]  }
0x144a   : > { %9941 = vmatprep.mubr.bf16.mxu1 %v16901_v0  ;;  %9910 = vmatpush1.bf16.msra.mxu1 %v16374_v53 }
0x144b   : > { %9911 = vmatprep.subr.bf16.mxu1 %v16382_v42  ;;  %v16425_v42 = vld [vmem:[%s16968_s30 + $0x1d78] ss:$24 sps:$4 sm:$0xff]  }
0x144c   : > { %9836 = vmatpush1.bf16.msra.mxu0 %v16395_v48 }
0x144d   : > { %9837 = vmatprep.subr.bf16.mxu0 %v16403_v61  ;;  %v19109_v61 = vld [vmem:[%s16949_s23 + $0x10] sm:$0xff]  }
0x144e   : > { %9912 = vmatpush1.bf16.msra.mxu1 %v16380_v43  ;;  %v16428_v43 = vld [vmem:[%s16968_s30 + $0x1d48] ss:$24 sps:$4 sm:$0xff]  }
0x144f   : > { %9913 = vmatprep.subr.bf16.mxu1 %v16388_v51  ;;  %v16431_v51 = vld [vmem:[%s16968_s30 + $0x1d18] ss:$24 sps:$4 sm:$0xff]  }
0x1450   : > { %9838 = vmatpush1.bf16.msra.mxu0 %v16401_v22  ;;  %v19119_v22 = vld [vmem:[%s16949_s23] sm:$0xff]  }
0x1451   : > { %9839 = vmatprep.subr.bf16.mxu0 %v16409_v57  ;;  %v19131_v57 = vld [vmem:[%s16949_s23 + $0x50] sm:$0xff]  }
0x1452   : > { %9914 = vmatpush1.bf16.msra.mxu1 %v16386_v38  ;;  %v16434_v38 = vld [vmem:[%s16968_s30 + $0x1ce8] ss:$24 sps:$4 sm:$0xff]  }
0x1453   : > { %9915 = vmatprep.subr.bf16.mxu1 %v16394_v15  ;;  %v16437_v15 = vld [vmem:[%s16968_s30 + $0x1cb8] ss:$24 sps:$4 sm:$0xff]  }
0x1454   : > { %9840 = vmatpush1.bf16.msra.mxu0 %v16407_v8 }
0x1455   : > { %9841 = vmatprep.subr.bf16.mxu0 %v16415_v55  ;;  %v16443_v55 = vld [vmem:[%s16968_s30 + $0x1f50] ss:$24 sps:$4 sm:$0xff]  }
0x1456   : > { %9916 = vmatpush1.bf16.msra.mxu1 %v16392_v19  ;;  %v14479_v19 = vld.sshfl [vmem:[%s16963_s27 + $0x50] sm:$0x33 pattern:$0x76325410] }
0x1457   : > { %9917 = vmatprep.subr.bf16.mxu1 %v16400_v46  ;;  %v9966_v46 = vcombine.high %v14479_v19, %v14479_v19  ;;  %v9969_v8 = vpack.c.bf16 %v14479_v19, %v14479_v19 }
0x1458   : > { %9842 = vmatpush1.bf16.msra.mxu0 %v16413_v49  ;;  %v16445_v49 = vld [vmem:[%s16968_s30 + $0x1f54] ss:$24 sps:$4 sm:$0xff]  }
0x1459   : > { %9868 = vmatprep.subr.bf16.mxu0 %v16421_v31  ;;  %v9970_v48 = vpack.c.bf16 %v9966_v46, %v9966_v46  ;;  %v16451_v31 = vld [vmem:[%s16968_s30 + $0x1f24] ss:$24 sps:$4 sm:$0xff]  }
0x145a   : > { %9918 = vmatpush1.bf16.msra.mxu1 %v16398_v23  ;;  %v19104_v23 = vld [vmem:[%s16949_s23 + $0x18] sm:$0xff]  }
0x145b   : > { %9919 = vmatprep.subr.bf16.mxu1 %v16406_v29  ;;  %v19114_v29 = vld [vmem:[%s16949_s23 + $0x8] sm:$0xff]  }
0x145e   : > { %9920 = vmatpush1.bf16.msra.mxu1 %v16404_v30  ;;  %v19126_v30 = vld [vmem:[%s16949_s23 + $0x58] sm:$0xff]  }
0x145f   : > { %9921 = vmatprep.subr.bf16.mxu1 %v16412_v56  ;;  %v19136_v56 = vld [vmem:[%s16949_s23 + $0x48] sm:$0xff]  }
0x1462   : > { %9922 = vmatpush1.bf16.msra.mxu1 %v16410_v26  ;;  %v19141_v26 = vld [vmem:[%s16949_s23 + $0x40] sm:$0xff]  }
0x1463   : > { %9923 = vmatprep.subr.bf16.mxu1 %v16418_v33  ;;  %v16446_v33 = vld [vmem:[%s16968_s30 + $0x1f60] ss:$24 sps:$4 sm:$0xff]  }
0x1466   : > { %9924 = vmatpush1.bf16.msra.mxu1 %v16416_v1  ;;  %v16448_v1 = vld [vmem:[%s16968_s30 + $0x1f64] ss:$24 sps:$4 sm:$0xff]  }
0x1467   : > { %10305 = vmatprep.subr.bf16.mxu1 %v16445_v49 }
0x14b5   : > { %v9383_v11 = vpop.f32.mrf.mxu1  ;;  %v9465_v37 = vpop.f32.mrf.mxu0 }
0x14b6   : > { %v19057_v20 = vadd.f32 %v9383_v11, %v18944_v9  ;;  %v19060_v44 = vadd.f32 %v9465_v37, %v18947_v17  ;;  %v16454_v11 = vld [vmem:[%s16968_s30 + $0x1f34] ss:$24 sps:$4 sm:$0xff]   ;;  %v16449_v37 = vld [vmem:[%s16968_s30 + $0x1f20] ss:$24 sps:$4 sm:$0xff]  }
0x14b7   : > { %v9385_v58 = vpop.f32.mrf.mxu1  ;;  %v9467_v59 = vpop.f32.mrf.mxu0 }
0x14b8   : > { %v19063_v27 = vadd.f32 %v9385_v58, %v18950_v63  ;;  %v19066_v28 = vadd.f32 %v9467_v59, %v18953_v3  ;;  %v16452_v58 = vld [vmem:[%s16968_s30 + $0x1f30] ss:$24 sps:$4 sm:$0xff]   ;;  %v16457_v59 = vld [vmem:[%s16968_s30 + $0x1ef4] ss:$24 sps:$4 sm:$0xff]  }
0x14b9   : > { %v9387_v35 = vpop.f32.mrf.mxu1  ;;  %v9469_v5 = vpop.f32.mrf.mxu0 }
0x14ba   : > { %v16460_v35 = vld [vmem:[%s16968_s30 + $0x1f04] ss:$24 sps:$4 sm:$0xff]   ;;  %v16455_v5 = vld [vmem:[%s16968_s30 + $0x1ef0] ss:$24 sps:$4 sm:$0xff]  }
0x14bb   : > { %v9388_v7 = vpop.f32.mrf.mxu1  ;;  %v9470_v60 = vpop.f32.mrf.mxu0 }
0x14bc   : > { %v16458_v7 = vld [vmem:[%s16968_s30 + $0x1f00] ss:$24 sps:$4 sm:$0xff]   ;;  %v16463_v60 = vld [vmem:[%s16968_s30 + $0x1ec4] ss:$24 sps:$4 sm:$0xff]  }
0x14d5   : > { %v9424_v12 = vpop.f32.mrf.mxu1 }
0x14d6   : > { %v19069_v9 = vadd.f32 %v9424_v12, %v18956_v45  ;;  %v16424_v45 = vld [vmem:[%s16968_s30 + $0x1dac] ss:$24 sps:$4 sm:$0xff]  }
0x14d7   : > { %v9426_v17 = vpop.f32.mrf.mxu1  ;;  %v16466_v12 = vld [vmem:[%s16968_s30 + $0x1ed4] ss:$24 sps:$4 sm:$0xff]  }
0x14d8   : > { %v19072_v2 = vadd.f32 %v9426_v17, %v18959_v62  ;;  %v16422_v62 = vld [vmem:[%s16968_s30 + $0x1da8] ss:$24 sps:$4 sm:$0xff]  }
0x14d9   : > { %v9428_v63 = vpop.f32.mrf.mxu1  ;;  %v16461_v17 = vld [vmem:[%s16968_s30 + $0x1ec0] ss:$24 sps:$4 sm:$0xff]  }
0x14da   : > { %v16464_v63 = vld [vmem:[%s16968_s30 + $0x1ed0] ss:$24 sps:$4 sm:$0xff]  }
0x14db   : > { %v9429_v32 = vpop.f32.mrf.mxu1 }
0x14dc   : > { %v16469_v32 = vld [vmem:[%s16968_s30 + $0x1e94] ss:$24 sps:$4 sm:$0xff]  }
0x1509   : > { %v9530_v3 = vpop.f32.mrf.mxu1 }
0x150a   : > { %v9531_v13 = vadd.f32 %v18962_v6, %v9530_v3  ;;  %v16472_v3 = vld [vmem:[%s16968_s30 + $0x1ea4] ss:$24 sps:$4 sm:$0xff]  }
0x150b   : > { %v9532_v4 = vpop.f32.mrf.mxu1 }
0x150c   : > { %v9536_v54 = vmax.f32 %v9531_v13, 0.0  ;;  %v16467_v13 = vld [vmem:[%s16968_s30 + $0x1e90] ss:$24 sps:$4 sm:$0xff]   ;;  %v16470_v4 = vld [vmem:[%s16968_s30 + $0x1ea0] ss:$24 sps:$4 sm:$0xff]  }
0x150d   : > { %v9533_v34 = vpop.f32.mrf.mxu1 }
0x150e   : > { %v9537_v53 = vpack.c.bf16 %v9536_v54, %v9536_v54  ;;  %v16475_v54 = vld [vmem:[%s16968_s30 + $0x1e64] ss:$24 sps:$4 sm:$0xff]   ;;  %v16478_v34 = vld [vmem:[%s16968_s30 + $0x1e74] ss:$24 sps:$4 sm:$0xff]  }
0x150f   : > { %v9534_v47 = vpop.f32.mrf.mxu1 }
0x1510   : > { %9860 = vmatmul.mubr.bf16.vlgmr.msra.gmra.mxu0 %v9537_v53  ;;  %9942 = vmatmul.mubr.bf16.vlgmr.msra.gmra.mxu1 %v9537_v53  ;;  %v16484_v47 = vld [vmem:[%s16968_s30 + $0x1e44] ss:$24 sps:$4 sm:$0xff]  }
0x1511   : > { %9869 = vmatpush1.bf16.msra.mxu0 %v16419_v52  ;;  %9900 = vmatprep.mubr.bf16.mxu0 %v16901_v0  ;;  %v16473_v52 = vld [vmem:[%s16968_s30 + $0x1e60] ss:$24 sps:$4 sm:$0xff]  }
0x1512   : > { %9870 = vmatprep.subr.bf16.mxu0 %v16424_v45  ;;  %10337 = vmatprep.mubr.bf16.mxu1 %v16901_v0  ;;  %v16481_v45 = vld [vmem:[%s16968_s30 + $0x1e34] ss:$24 sps:$4 sm:$0xff]  }
0x1513   : > { %10306 = vmatpush1.bf16.msra.mxu1 %v16443_v55 }
0x1514   : > { %10307 = vmatprep.subr.bf16.mxu1 %v16451_v31 }
0x1515   : > { %9871 = vmatpush1.bf16.msra.mxu0 %v16422_v62  ;;  %v16479_v62 = vld [vmem:[%s16968_s30 + $0x1e30] ss:$24 sps:$4 sm:$0xff]  }
0x1516   : > { %9872 = vmatprep.subr.bf16.mxu0 %v16427_v39  ;;  %v16482_v39 = vld [vmem:[%s16968_s30 + $0x1e40] ss:$24 sps:$4 sm:$0xff]  }
0x1517   : > { %10308 = vmatpush1.bf16.msra.mxu1 %v16449_v37 }
0x1518   : > { %10309 = vmatprep.subr.bf16.mxu1 %v16457_v59 }
0x1519   : > { %9873 = vmatpush1.bf16.msra.mxu0 %v16425_v42  ;;  %v16487_v42 = vld [vmem:[%s16968_s30 + $0x1e04] ss:$24 sps:$4 sm:$0xff]  }
0x151a   : > { %9874 = vmatprep.subr.bf16.mxu0 %v16430_v14  ;;  %v16485_v14 = vld [vmem:[%s16968_s30 + $0x1e00] ss:$24 sps:$4 sm:$0xff]  }
0x151b   : > { %10310 = vmatpush1.bf16.msra.mxu1 %v16455_v5 }
0x151c   : > { %10311 = vmatprep.subr.bf16.mxu1 %v16463_v60  ;;  %v16499_v60 = vld [vmem:[%s16968_s30 + $0x1efc] ss:$24 sps:$4 sm:$0xff]  }
0x151d   : > { %9875 = vmatpush1.bf16.msra.mxu0 %v16428_v43  ;;  %v16490_v43 = vld [vmem:[%s16968_s30 + $0x1e14] ss:$24 sps:$4 sm:$0xff]  }
0x151e   : > { %9876 = vmatprep.subr.bf16.mxu0 %v16433_v41  ;;  %v16488_v41 = vld [vmem:[%s16968_s30 + $0x1e10] ss:$24 sps:$4 sm:$0xff]  }
0x151f   : > { %10312 = vmatpush1.bf16.msra.mxu1 %v16461_v17  ;;  %v16502_v17 = vld [vmem:[%s16968_s30 + $0x1ecc] ss:$24 sps:$4 sm:$0xff]  }
0x1520   : > { %10313 = vmatprep.subr.bf16.mxu1 %v16469_v32  ;;  %v16505_v32 = vld [vmem:[%s16968_s30 + $0x1e9c] ss:$24 sps:$4 sm:$0xff]  }
0x1521   : > { %9877 = vmatpush1.bf16.msra.mxu0 %v16431_v51  ;;  %v16493_v51 = vld [vmem:[%s16968_s30 + $0x1f5c] ss:$24 sps:$4 sm:$0xff]  }
0x1522   : > { %9878 = vmatprep.subr.bf16.mxu0 %v16436_v40 }
0x1523   : > { %10314 = vmatpush1.bf16.msra.mxu1 %v16467_v13  ;;  %v16508_v13 = vld [vmem:[%s16968_s30 + $0x1e6c] ss:$24 sps:$4 sm:$0xff]  }
0x1524   : > { %10315 = vmatprep.subr.bf16.mxu1 %v16475_v54  ;;  %v16511_v54 = vld [vmem:[%s16968_s30 + $0x1e3c] ss:$24 sps:$4 sm:$0xff]  }
0x1525   : > { %9879 = vmatpush1.bf16.msra.mxu0 %v16434_v38 }
0x1526   : > { %9880 = vmatprep.subr.bf16.mxu0 %v16439_v24 }
0x1527   : > { %10316 = vmatpush1.bf16.msra.mxu1 %v16473_v52  ;;  %v16514_v52 = vld [vmem:[%s16968_s30 + $0x1e0c] ss:$24 sps:$4 sm:$0xff]  }
0x1528   : > { %10317 = vmatprep.subr.bf16.mxu1 %v16481_v45  ;;  %v16512_v45 = vld [vmem:[%s16968_s30 + $0x1e08] ss:$24 sps:$4 sm:$0xff]  }
0x1529   : > { %9881 = vmatpush1.bf16.msra.mxu0 %v16437_v15 }
0x152a   : > { %9882 = vmatprep.subr.bf16.mxu0 %v16442_v21 }
0x152b   : > { %10318 = vmatpush1.bf16.msra.mxu1 %v16479_v62 }
0x152c   : > { %10319 = vmatprep.subr.bf16.mxu1 %v16487_v42  ;;  %v16515_v42 = vld [vmem:[%s16968_s30 + $0x20d0] ss:$24 sps:$4 sm:$0xff]  }
0x152d   : > { %9883 = vmatpush1.bf16.msra.mxu0 %v16440_v18 }
0x152e   : > { %9974 = vmatprep.subr.bf16.mxu0 %v16901_v0 }
0x152f   : > { %10320 = vmatpush1.bf16.msra.mxu1 %v16485_v14  ;;  %v16517_v14 = vld [vmem:[%s16968_s30 + $0x20d4] ss:$24 sps:$4 sm:$0xff]  }
0x1530   : > { %9901 = vmatmul.mubr.bf16.vlgmr.msra.gmra.mxu0 %v9537_v53  ;;  %v16476_v53 = vld [vmem:[%s16968_s30 + $0x1e70] ss:$24 sps:$4 sm:$0xff]   ;;  %10346 = vmatprep.subr.bf16.mxu1 %v16493_v51  ;;  %v16523_v51 = vld [vmem:[%s16968_s30 + $0x20a4] ss:$24 sps:$4 sm:$0xff]  }
0x1531   : > { %9975 = vmatpush1.bf16.msra.mxu0 %v18985_v10  ;;  %14480 = vmatprep.mubr.msk.bf16.mxu0 %vm419_vm0, %v9970_v48 }
0x1532   : > { %9976 = vmatprep.subr.bf16.mxu0 %v16901_v0 }
0x1535   : > { %9977 = vmatpush1.bf16.msra.mxu0 %v18991_v25 }
0x1536   : > { %9978 = vmatprep.subr.bf16.mxu0 %v16901_v0 }
0x1539   : > { %9979 = vmatpush1.bf16.msra.mxu0 %v18996_v36 }
0x153a   : > { %9980 = vmatprep.subr.bf16.mxu0 %v16901_v0 }
0x153d   : > { %9981 = vmatpush1.bf16.msra.mxu0 %v19001_v50 }
0x153e   : > { %9982 = vmatprep.subr.bf16.mxu0 %v16901_v0 }
0x1541   : > { %9983 = vmatpush1.bf16.msra.mxu0 %v19104_v23 }
0x1542   : > { %9984 = vmatprep.subr.bf16.mxu0 %v16901_v0 }
0x1545   : > { %9985 = vmatpush1.bf16.msra.mxu0 %v19109_v61 }
0x1546   : > { %9986 = vmatprep.subr.bf16.mxu0 %v16901_v0 }
0x1549   : > { %9987 = vmatpush1.bf16.msra.mxu0 %v19114_v29 }
0x154a   : > { %9988 = vmatprep.subr.bf16.mxu0 %v16901_v0 }
0x154d   : > { %9989 = vmatpush1.bf16.msra.mxu0 %v19119_v22 }
0x154e   : > { %9996 = vmatprep.subr.bf16.mxu0 %v16901_v0 }
0x1551   : > { %9997 = vmatpush2.bf16.msra.mxu0 %v16998_v16 }
0x1552   : > { %9998 = vmatprep.subr.bf16.mxu0 %v16901_v0 }
0x1555   : > { %9999 = vmatpush2.bf16.msra.mxu0 %v19126_v30 }
0x1556   : > { %10000 = vmatprep.subr.bf16.mxu0 %v16901_v0 }
0x1559   : > { %10001 = vmatpush2.bf16.msra.mxu0 %v19131_v57 }
0x155a   : > { %10002 = vmatprep.subr.bf16.mxu0 %v16901_v0 }
0x155d   : > { %10003 = vmatpush2.bf16.msra.mxu0 %v19136_v56 }
0x155e   : > { %10004 = vmatprep.subr.bf16.mxu0 %v16901_v0 }
0x1561   : > { %10005 = vmatpush2.bf16.msra.mxu0 %v19141_v26 }
0x1562   : > { %10387 = vmatprep.subr.bf16.mxu0 %v16448_v1 }
0x1564   : > { %10007 = vmatmul.mubr.bf16.vlgmr.msra.gmra.mxu0 %v9969_v8 }
0x1565   : > { %10419 = vmatprep.mubr.bf16.mxu0 %v16901_v0  ;;  %10388 = vmatpush1.bf16.msra.mxu0 %v16446_v33 }
0x1566   : > { %10389 = vmatprep.subr.bf16.mxu0 %v16454_v11 }
0x1569   : > { %10390 = vmatpush1.bf16.msra.mxu0 %v16452_v58 }
0x156a   : > { %10391 = vmatprep.subr.bf16.mxu0 %v16460_v35  ;;  %v16491_v35 = vld [vmem:[%s16968_s30 + $0x1f58] ss:$24 sps:$4 sm:$0xff]  }
0x156d   : > { %10392 = vmatpush1.bf16.msra.mxu0 %v16458_v7 }
0x156e   : > { %10393 = vmatprep.subr.bf16.mxu0 %v16466_v12  ;;  %v16497_v12 = vld [vmem:[%s16968_s30 + $0x1ef8] ss:$24 sps:$4 sm:$0xff]  }
0x1571   : > { %10394 = vmatpush1.bf16.msra.mxu0 %v16464_v63  ;;  %v16500_v63 = vld [vmem:[%s16968_s30 + $0x1ec8] ss:$24 sps:$4 sm:$0xff]  }
0x1572   : > { %10395 = vmatprep.subr.bf16.mxu0 %v16472_v3  ;;  %v16503_v3 = vld [vmem:[%s16968_s30 + $0x1e98] ss:$24 sps:$4 sm:$0xff]  }
0x1575   : > { %10396 = vmatpush1.bf16.msra.mxu0 %v16470_v4  ;;  %v16506_v4 = vld [vmem:[%s16968_s30 + $0x1e68] ss:$24 sps:$4 sm:$0xff]  }
0x1576   : > { %10397 = vmatprep.subr.bf16.mxu0 %v16478_v34  ;;  %v16509_v34 = vld [vmem:[%s16968_s30 + $0x1e38] ss:$24 sps:$4 sm:$0xff]  }
0x1579   : > { %10398 = vmatpush1.bf16.msra.mxu0 %v16476_v53  ;;  %v14578_v53 = vld.sshfl [vmem:[%s16963_s27 + $0x54] sm:$0x33 pattern:$0x76325410] }
0x157a   : > { %10399 = vmatprep.subr.bf16.mxu0 %v16484_v47  ;;  %v10444_v47 = vcombine.high %v14578_v53, %v14578_v53 }
0x157c   : > { %v10448_v62 = vpack.c.bf16 %v10444_v47, %v10444_v47 }
0x157d   : > { %10400 = vmatpush1.bf16.msra.mxu0 %v16482_v39  ;;  %v10447_v39 = vpack.c.bf16 %v14578_v53, %v14578_v53 }
0x157e   : > { %10401 = vmatprep.subr.bf16.mxu0 %v16490_v43  ;;  %v16518_v43 = vld [vmem:[%s16968_s30 + $0x20e0] ss:$24 sps:$4 sm:$0xff]  }
0x1581   : > { %10402 = vmatpush1.bf16.msra.mxu0 %v16488_v41  ;;  %v16520_v41 = vld [vmem:[%s16968_s30 + $0x20e4] ss:$24 sps:$4 sm:$0xff]  }
0x1582   : > { %10783 = vmatprep.subr.bf16.mxu0 %v16517_v14 }
0x15d0   : > { %v9861_v40 = vpop.f32.mrf.mxu0  ;;  %v9943_v38 = vpop.f32.mrf.mxu1 }
0x15d1   : > { %v19179_v24 = vadd.f32 %v9861_v40, %v19057_v20  ;;  %v19182_v15 = vadd.f32 %v9943_v38, %v19060_v44  ;;  %v16526_v40 = vld [vmem:[%s16968_s30 + $0x20b4] ss:$24 sps:$4 sm:$0xff]   ;;  %v16521_v38 = vld [vmem:[%s16968_s30 + $0x20a0] ss:$24 sps:$4 sm:$0xff]  }
0x15d2   : > { %v9863_v21 = vpop.f32.mrf.mxu0  ;;  %v9945_v19 = vpop.f32.mrf.mxu1 }
0x15d3   : > { %v19185_v18 = vadd.f32 %v9863_v21, %v19063_v27  ;;  %v19188_v46 = vadd.f32 %v9945_v19, %v19066_v28  ;;  %v16524_v21 = vld [vmem:[%s16968_s30 + $0x20b0] ss:$24 sps:$4 sm:$0xff]   ;;  %v16529_v19 = vld [vmem:[%s16968_s30 + $0x2074] ss:$24 sps:$4 sm:$0xff]  }
0x15d4   : > { %v9865_v48 = vpop.f32.mrf.mxu0  ;;  %v9947_v8 = vpop.f32.mrf.mxu1 }
0x15d5   : > { %v16532_v48 = vld [vmem:[%s16968_s30 + $0x2084] ss:$24 sps:$4 sm:$0xff]   ;;  %v16527_v8 = vld [vmem:[%s16968_s30 + $0x2070] ss:$24 sps:$4 sm:$0xff]  }
0x15d6   : > { %v9866_v55 = vpop.f32.mrf.mxu0  ;;  %v9948_v49 = vpop.f32.mrf.mxu1 }
0x15d7   : > { %v16530_v55 = vld [vmem:[%s16968_s30 + $0x2080] ss:$24 sps:$4 sm:$0xff]   ;;  %v16535_v49 = vld [vmem:[%s16968_s30 + $0x2044] ss:$24 sps:$4 sm:$0xff]  }
0x15f0   : > { %v9902_v33 = vpop.f32.mrf.mxu0 }
0x15f1   : > { %v19191_v20 = vadd.f32 %v9902_v33, %v19069_v9  ;;  %v16496_v9 = vld [vmem:[%s16968_s30 + $0x1f2c] ss:$24 sps:$4 sm:$0xff]  }
0x15f2   : > { %v9904_v44 = vpop.f32.mrf.mxu0  ;;  %v16538_v33 = vld [vmem:[%s16968_s30 + $0x2054] ss:$24 sps:$4 sm:$0xff]  }
0x15f3   : > { %v19194_v1 = vadd.f32 %v9904_v44, %v19072_v2  ;;  %v16494_v2 = vld [vmem:[%s16968_s30 + $0x1f28] ss:$24 sps:$4 sm:$0xff]  }
0x15f4   : > { %v9906_v27 = vpop.f32.mrf.mxu0  ;;  %v16533_v44 = vld [vmem:[%s16968_s30 + $0x2040] ss:$24 sps:$4 sm:$0xff]  }
0x15f5   : > { %v16536_v27 = vld [vmem:[%s16968_s30 + $0x2050] ss:$24 sps:$4 sm:$0xff]  }
0x15f6   : > { %v9907_v31 = vpop.f32.mrf.mxu0 }
0x15f7   : > { %v16541_v31 = vld [vmem:[%s16968_s30 + $0x2014] ss:$24 sps:$4 sm:$0xff]  }
0x1624   : > { %v10008_v28 = vpop.f32.mrf.mxu0 }
0x1625   : > { %v10009_v11 = vadd.f32 %v18962_v6, %v10008_v28  ;;  %v16544_v28 = vld [vmem:[%s16968_s30 + $0x2024] ss:$24 sps:$4 sm:$0xff]  }
0x1626   : > { %v10010_v37 = vpop.f32.mrf.mxu0 }
0x1627   : > { %v10014_v58 = vmax.f32 %v10009_v11, 0.0  ;;  %v16539_v11 = vld [vmem:[%s16968_s30 + $0x2010] ss:$24 sps:$4 sm:$0xff]   ;;  %v16542_v37 = vld [vmem:[%s16968_s30 + $0x2020] ss:$24 sps:$4 sm:$0xff]  }
0x1628   : > { %v10011_v59 = vpop.f32.mrf.mxu0 }
0x1629   : > { %v10015_v5 = vpack.c.bf16 %v10014_v58, %v10014_v58  ;;  %v16547_v58 = vld [vmem:[%s16968_s30 + $0x1fe4] ss:$24 sps:$4 sm:$0xff]   ;;  %v16550_v59 = vld [vmem:[%s16968_s30 + $0x1ff4] ss:$24 sps:$4 sm:$0xff]  }
0x162a   : > { %v10012_v7 = vpop.f32.mrf.mxu0 }
0x162b   : > { %10338 = vmatmul.mubr.bf16.vlgmr.msra.gmra.mxu1 %v10015_v5  ;;  %10420 = vmatmul.mubr.bf16.vlgmr.msra.gmra.mxu0 %v10015_v5  ;;  %v16556_v7 = vld [vmem:[%s16968_s30 + $0x1fc4] ss:$24 sps:$4 sm:$0xff]  }
0x162c   : > { %10347 = vmatpush1.bf16.msra.mxu1 %v16491_v35  ;;  %10378 = vmatprep.mubr.bf16.mxu1 %v16901_v0  ;;  %v16545_v35 = vld [vmem:[%s16968_s30 + $0x1fe0] ss:$24 sps:$4 sm:$0xff]  }
0x162d   : > { %10348 = vmatprep.subr.bf16.mxu1 %v16496_v9  ;;  %10815 = vmatprep.mubr.bf16.mxu0 %v16901_v0  ;;  %v16553_v9 = vld [vmem:[%s16968_s30 + $0x1fb4] ss:$24 sps:$4 sm:$0xff]  }
0x162e   : > { %10784 = vmatpush1.bf16.msra.mxu0 %v16515_v42 }
0x162f   : > { %10785 = vmatprep.subr.bf16.mxu0 %v16523_v51 }
0x1630   : > { %10349 = vmatpush1.bf16.msra.mxu1 %v16494_v2  ;;  %v16551_v2 = vld [vmem:[%s16968_s30 + $0x1fb0] ss:$24 sps:$4 sm:$0xff]  }
0x1631   : > { %10350 = vmatprep.subr.bf16.mxu1 %v16499_v60  ;;  %v16554_v60 = vld [vmem:[%s16968_s30 + $0x1fc0] ss:$24 sps:$4 sm:$0xff]  }
0x1632   : > { %10786 = vmatpush1.bf16.msra.mxu0 %v16521_v38 }
0x1633   : > { %10787 = vmatprep.subr.bf16.mxu0 %v16529_v19 }
0x1634   : > { %10351 = vmatpush1.bf16.msra.mxu1 %v16497_v12  ;;  %v16559_v12 = vld [vmem:[%s16968_s30 + $0x1f84] ss:$24 sps:$4 sm:$0xff]  }
0x1635   : > { %10352 = vmatprep.subr.bf16.mxu1 %v16502_v17  ;;  %v16557_v17 = vld [vmem:[%s16968_s30 + $0x1f80] ss:$24 sps:$4 sm:$0xff]  }
0x1636   : > { %10788 = vmatpush1.bf16.msra.mxu0 %v16527_v8 }
0x1637   : > { %10789 = vmatprep.subr.bf16.mxu0 %v16535_v49  ;;  %v16569_v49 = vld [vmem:[%s16968_s30 + $0x2078] ss:$24 sps:$4 sm:$0xff]  }
0x1638   : > { %10353 = vmatpush1.bf16.msra.mxu1 %v16500_v63  ;;  %v16562_v63 = vld [vmem:[%s16968_s30 + $0x1f94] ss:$24 sps:$4 sm:$0xff]  }
0x1639   : > { %10354 = vmatprep.subr.bf16.mxu1 %v16505_v32  ;;  %v16560_v32 = vld [vmem:[%s16968_s30 + $0x1f90] ss:$24 sps:$4 sm:$0xff]  }
0x163a   : > { %10790 = vmatpush1.bf16.msra.mxu0 %v16533_v44  ;;  %v16572_v44 = vld [vmem:[%s16968_s30 + $0x2048] ss:$24 sps:$4 sm:$0xff]  }
0x163b   : > { %10791 = vmatprep.subr.bf16.mxu0 %v16541_v31  ;;  %v16575_v31 = vld [vmem:[%s16968_s30 + $0x2018] ss:$24 sps:$4 sm:$0xff]  }
0x163c   : > { %10355 = vmatpush1.bf16.msra.mxu1 %v16503_v3  ;;  %v16565_v3 = vld [vmem:[%s16968_s30 + $0x20dc] ss:$24 sps:$4 sm:$0xff]  }
0x163d   : > { %10356 = vmatprep.subr.bf16.mxu1 %v16508_v13 }
0x163e   : > { %10792 = vmatpush1.bf16.msra.mxu0 %v16539_v11  ;;  %v16578_v11 = vld [vmem:[%s16968_s30 + $0x1fe8] ss:$24 sps:$4 sm:$0xff]  }
0x163f   : > { %10793 = vmatprep.subr.bf16.mxu0 %v16547_v58  ;;  %v16581_v58 = vld [vmem:[%s16968_s30 + $0x1fb8] ss:$24 sps:$4 sm:$0xff]  }
0x1640   : > { %10357 = vmatpush1.bf16.msra.mxu1 %v16506_v4 }
0x1641   : > { %10358 = vmatprep.subr.bf16.mxu1 %v16511_v54 }
0x1642   : > { %10794 = vmatpush1.bf16.msra.mxu0 %v16545_v35  ;;  %v14677_v35 = vld.sshfl [vmem:[%s16963_s27 + $0x58] sm:$0x33 pattern:$0x76325410] }
0x1643   : > { %10795 = vmatprep.subr.bf16.mxu0 %v16553_v9  ;;  %v10922_v9 = vcombine.high %v14677_v35, %v14677_v35 }
0x1644   : > { %10359 = vmatpush1.bf16.msra.mxu1 %v16509_v34 }
0x1645   : > { %10360 = vmatprep.subr.bf16.mxu1 %v16514_v52 }
0x1646   : > { %10796 = vmatpush1.bf16.msra.mxu0 %v16551_v2  ;;  %v16592_v2 = vld [vmem:[%s16968_s30 + $0x2264] ss:$24 sps:$4 sm:$0xff]  }
0x1647   : > { %10797 = vmatprep.subr.bf16.mxu0 %v16559_v12  ;;  %v16598_v12 = vld [vmem:[%s16968_s30 + $0x2234] ss:$24 sps:$4 sm:$0xff]  }
0x1648   : > { %10361 = vmatpush1.bf16.msra.mxu1 %v16512_v45 }
0x1649   : > { %10452 = vmatprep.subr.bf16.mxu1 %v16901_v0 }
0x164a   : > { %10798 = vmatpush1.bf16.msra.mxu0 %v16557_v17  ;;  %v16593_v17 = vld [vmem:[%s16968_s30 + $0x2220] ss:$24 sps:$4 sm:$0xff]  }
0x164b   : > { %10379 = vmatmul.mubr.bf16.vlgmr.msra.gmra.mxu1 %v10015_v5  ;;  %v16548_v5 = vld [vmem:[%s16968_s30 + $0x1ff0] ss:$24 sps:$4 sm:$0xff]   ;;  %10824 = vmatprep.subr.bf16.mxu0 %v16565_v3  ;;  %v16604_v3 = vld [vmem:[%s16968_s30 + $0x2204] ss:$24 sps:$4 sm:$0xff]  }
0x164c   : > { %10453 = vmatpush1.bf16.msra.mxu1 %v18985_v10  ;;  %14579 = vmatprep.mubr.msk.bf16.mxu1 %vm419_vm0, %v10448_v62 }
0x164d   : > { %10454 = vmatprep.subr.bf16.mxu1 %v16901_v0 }
0x1650   : > { %10455 = vmatpush1.bf16.msra.mxu1 %v18991_v25 }
0x1651   : > { %10456 = vmatprep.subr.bf16.mxu1 %v16901_v0 }
0x1654   : > { %10457 = vmatpush1.bf16.msra.mxu1 %v18996_v36 }
0x1655   : > { %10458 = vmatprep.subr.bf16.mxu1 %v16901_v0 }
0x1658   : > { %10459 = vmatpush1.bf16.msra.mxu1 %v19001_v50 }
0x1659   : > { %10460 = vmatprep.subr.bf16.mxu1 %v16901_v0 }
0x165c   : > { %10461 = vmatpush1.bf16.msra.mxu1 %v19104_v23 }
0x165d   : > { %10462 = vmatprep.subr.bf16.mxu1 %v16901_v0 }
0x1660   : > { %10463 = vmatpush1.bf16.msra.mxu1 %v19109_v61 }
0x1661   : > { %10464 = vmatprep.subr.bf16.mxu1 %v16901_v0 }
0x1664   : > { %10465 = vmatpush1.bf16.msra.mxu1 %v19114_v29 }
0x1665   : > { %10466 = vmatprep.subr.bf16.mxu1 %v16901_v0 }
0x1668   : > { %10467 = vmatpush1.bf16.msra.mxu1 %v19119_v22 }
0x1669   : > { %10474 = vmatprep.subr.bf16.mxu1 %v16901_v0 }
0x166c   : > { %10475 = vmatpush2.bf16.msra.mxu1 %v16998_v16 }
0x166d   : > { %10476 = vmatprep.subr.bf16.mxu1 %v16901_v0 }
0x1670   : > { %10477 = vmatpush2.bf16.msra.mxu1 %v19126_v30 }
0x1671   : > { %10478 = vmatprep.subr.bf16.mxu1 %v16901_v0 }
0x1674   : > { %10479 = vmatpush2.bf16.msra.mxu1 %v19131_v57 }
0x1675   : > { %10480 = vmatprep.subr.bf16.mxu1 %v16901_v0 }
0x1678   : > { %10481 = vmatpush2.bf16.msra.mxu1 %v19136_v56 }
0x1679   : > { %10482 = vmatprep.subr.bf16.mxu1 %v16901_v0 }
0x167c   : > { %10483 = vmatpush2.bf16.msra.mxu1 %v19141_v26 }
0x167d   : > { %10865 = vmatprep.subr.bf16.mxu1 %v16520_v41 }
0x167f   : > { %10485 = vmatmul.mubr.bf16.vlgmr.msra.gmra.mxu1 %v10447_v39 }
0x1680   : > { %10897 = vmatprep.mubr.bf16.mxu1 %v16901_v0  ;;  %10866 = vmatpush1.bf16.msra.mxu1 %v16518_v43 }
0x1681   : > { %10867 = vmatprep.subr.bf16.mxu1 %v16526_v40 }
0x1684   : > { %10868 = vmatpush1.bf16.msra.mxu1 %v16524_v21 }
0x1685   : > { %10869 = vmatprep.subr.bf16.mxu1 %v16532_v48  ;;  %v16563_v48 = vld [vmem:[%s16968_s30 + $0x20d8] ss:$24 sps:$4 sm:$0xff]  }
0x1688   : > { %10870 = vmatpush1.bf16.msra.mxu1 %v16530_v55 }
0x1689   : > { %10871 = vmatprep.subr.bf16.mxu1 %v16538_v33  ;;  %v16574_v33 = vld [vmem:[%s16968_s30 + $0x204c] ss:$24 sps:$4 sm:$0xff]  }
0x168c   : > { %10872 = vmatpush1.bf16.msra.mxu1 %v16536_v27  ;;  %v16577_v27 = vld [vmem:[%s16968_s30 + $0x201c] ss:$24 sps:$4 sm:$0xff]  }
0x168d   : > { %10873 = vmatprep.subr.bf16.mxu1 %v16544_v28  ;;  %v16580_v28 = vld [vmem:[%s16968_s30 + $0x1fec] ss:$24 sps:$4 sm:$0xff]  }
0x1690   : > { %10874 = vmatpush1.bf16.msra.mxu1 %v16542_v37  ;;  %v16583_v37 = vld [vmem:[%s16968_s30 + $0x1fbc] ss:$24 sps:$4 sm:$0xff]  }
0x1691   : > { %10875 = vmatprep.subr.bf16.mxu1 %v16550_v59  ;;  %v16586_v59 = vld [vmem:[%s16968_s30 + $0x1f8c] ss:$24 sps:$4 sm:$0xff]  }
0x1694   : > { %10876 = vmatpush1.bf16.msra.mxu1 %v16548_v5  ;;  %v16584_v5 = vld [vmem:[%s16968_s30 + $0x1f88] ss:$24 sps:$4 sm:$0xff]  }
0x1695   : > { %10877 = vmatprep.subr.bf16.mxu1 %v16556_v7  ;;  %v10926_v7 = vpack.c.bf16 %v10922_v9, %v10922_v9 }
0x1698   : > { %10878 = vmatpush1.bf16.msra.mxu1 %v16554_v60  ;;  %v16595_v60 = vld [vmem:[%s16968_s30 + $0x2224] ss:$24 sps:$4 sm:$0xff]  }
0x1699   : > { %10879 = vmatprep.subr.bf16.mxu1 %v16562_v63  ;;  %v16596_v63 = vld [vmem:[%s16968_s30 + $0x2230] ss:$24 sps:$4 sm:$0xff]  }
0x169c   : > { %10880 = vmatpush1.bf16.msra.mxu1 %v16560_v32  ;;  %v16601_v32 = vld [vmem:[%s16968_s30 + $0x21f4] ss:$24 sps:$4 sm:$0xff]  }
0x16eb   : > { %v10339_v13 = vpop.f32.mrf.mxu1  ;;  %v10421_v4 = vpop.f32.mrf.mxu0 }
0x16ec   : > { %v19277_v54 = vadd.f32 %v10339_v13, %v19179_v24  ;;  %v19280_v34 = vadd.f32 %v10421_v4, %v19182_v15  ;;  %v16599_v13 = vld [vmem:[%s16968_s30 + $0x21f0] ss:$24 sps:$4 sm:$0xff]   ;;  %v16602_v4 = vld [vmem:[%s16968_s30 + $0x2200] ss:$24 sps:$4 sm:$0xff]  }
0x16ed   : > { %v10341_v52 = vpop.f32.mrf.mxu1  ;;  %v10423_v53 = vpop.f32.mrf.mxu0 }
0x16ee   : > { %v19283_v45 = vadd.f32 %v10341_v52, %v19185_v18  ;;  %v19286_v47 = vadd.f32 %v10423_v53, %v19188_v46  ;;  %v16607_v52 = vld [vmem:[%s16968_s30 + $0x21c4] ss:$24 sps:$4 sm:$0xff]   ;;  %v16610_v53 = vld [vmem:[%s16968_s30 + $0x21d4] ss:$24 sps:$4 sm:$0xff]  }
0x16ef   : > { %v10343_v62 = vpop.f32.mrf.mxu1  ;;  %v10425_v39 = vpop.f32.mrf.mxu0 }
0x16f0   : > { %v16605_v62 = vld [vmem:[%s16968_s30 + $0x21c0] ss:$24 sps:$4 sm:$0xff]   ;;  %v16608_v39 = vld [vmem:[%s16968_s30 + $0x21d0] ss:$24 sps:$4 sm:$0xff]  }
0x16f1   : > { %v10344_v42 = vpop.f32.mrf.mxu1  ;;  %v10426_v14 = vpop.f32.mrf.mxu0 }
0x16f2   : > { %v16613_v42 = vld [vmem:[%s16968_s30 + $0x2194] ss:$24 sps:$4 sm:$0xff]   ;;  %v16616_v14 = vld [vmem:[%s16968_s30 + $0x21a4] ss:$24 sps:$4 sm:$0xff]  }
0x170b   : > { %v10380_v43 = vpop.f32.mrf.mxu1 }
0x170c   : > { %v19289_v24 = vadd.f32 %v10380_v43, %v19191_v20  ;;  %v16568_v20 = vld [vmem:[%s16968_s30 + $0x20ac] ss:$24 sps:$4 sm:$0xff]   ;;  %v16611_v43 = vld [vmem:[%s16968_s30 + $0x2190] ss:$24 sps:$4 sm:$0xff]  }
0x170d   : > { %v10382_v15 = vpop.f32.mrf.mxu1 }
0x170e   : > { %v19292_v41 = vadd.f32 %v10382_v15, %v19194_v1  ;;  %v16566_v1 = vld [vmem:[%s16968_s30 + $0x20a8] ss:$24 sps:$4 sm:$0xff]  }
0x170f   : > { %v10384_v18 = vpop.f32.mrf.mxu1  ;;  %v16614_v15 = vld [vmem:[%s16968_s30 + $0x21a0] ss:$24 sps:$4 sm:$0xff]  }
0x1710   : > { %v16619_v18 = vld [vmem:[%s16968_s30 + $0x2164] ss:$24 sps:$4 sm:$0xff]  }
0x1711   : > { %v10385_v51 = vpop.f32.mrf.mxu1 }
0x1712   : > { %v16622_v51 = vld [vmem:[%s16968_s30 + $0x2174] ss:$24 sps:$4 sm:$0xff]  }
0x173f   : > { %v10486_v46 = vpop.f32.mrf.mxu1 }
0x1740   : > { %v10487_v40 = vadd.f32 %v18962_v6, %v10486_v46  ;;  %v16571_v6 = vld [vmem:[%s16968_s30 + $0x207c] ss:$24 sps:$4 sm:$0xff]   ;;  %v16617_v46 = vld [vmem:[%s16968_s30 + $0x2160] ss:$24 sps:$4 sm:$0xff]  }
0x1741   : > { %v10488_v38 = vpop.f32.mrf.mxu1 }
0x1742   : > { %v10492_v21 = vmax.f32 %v10487_v40, 0.0  ;;  %v16620_v40 = vld [vmem:[%s16968_s30 + $0x2170] ss:$24 sps:$4 sm:$0xff]   ;;  %v16625_v38 = vld [vmem:[%s16968_s30 + $0x2134] ss:$24 sps:$4 sm:$0xff]  }
0x1743   : > { %v10489_v19 = vpop.f32.mrf.mxu1 }
0x1744   : > { %v10493_v8 = vpack.c.bf16 %v10492_v21, %v10492_v21  ;;  %v16628_v21 = vld [vmem:[%s16968_s30 + $0x2144] ss:$24 sps:$4 sm:$0xff]   ;;  %v16623_v19 = vld [vmem:[%s16968_s30 + $0x2130] ss:$24 sps:$4 sm:$0xff]  }
0x1745   : > { %v10490_v55 = vpop.f32.mrf.mxu1 }
0x1746   : > { %10816 = vmatmul.mubr.bf16.vlgmr.msra.gmra.mxu0 %v10493_v8  ;;  %10898 = vmatmul.mubr.bf16.vlgmr.msra.gmra.mxu1 %v10493_v8  ;;  %v16634_v55 = vld [vmem:[%s16968_s30 + $0x2114] ss:$24 sps:$4 sm:$0xff]  }
0x1747   : > { %10825 = vmatpush1.bf16.msra.mxu0 %v16563_v48  ;;  %10856 = vmatprep.mubr.bf16.mxu0 %v16901_v0  ;;  %v16626_v48 = vld [vmem:[%s16968_s30 + $0x2140] ss:$24 sps:$4 sm:$0xff]  }
0x1748   : > { %10826 = vmatprep.subr.bf16.mxu0 %v16568_v20  ;;  %11293 = vmatprep.mubr.bf16.mxu1 %v16901_v0  ;;  %v16629_v20 = vld [vmem:[%s16968_s30 + $0x2100] ss:$24 sps:$4 sm:$0xff]  }
0x174b   : > { %10827 = vmatpush1.bf16.msra.mxu0 %v16566_v1  ;;  %v16632_v1 = vld [vmem:[%s16968_s30 + $0x2110] ss:$24 sps:$4 sm:$0xff]  }
0x174c   : > { %10828 = vmatprep.subr.bf16.mxu0 %v16571_v6  ;;  %v16637_v6 = vld [vmem:[%s16968_s30 + $0x225c] ss:$24 sps:$4 sm:$0xff]  }
0x174f   : > { %10829 = vmatpush1.bf16.msra.mxu0 %v16569_v49 }
0x1750   : > { %10830 = vmatprep.subr.bf16.mxu0 %v16574_v33 }
0x1753   : > { %10831 = vmatpush1.bf16.msra.mxu0 %v16572_v44 }
0x1754   : > { %10832 = vmatprep.subr.bf16.mxu0 %v16577_v27 }
0x1757   : > { %10833 = vmatpush1.bf16.msra.mxu0 %v16575_v31 }
0x1758   : > { %10834 = vmatprep.subr.bf16.mxu0 %v16580_v28 }
0x175b   : > { %10835 = vmatpush1.bf16.msra.mxu0 %v16578_v11 }
0x175c   : > { %10836 = vmatprep.subr.bf16.mxu0 %v16583_v37 }
0x175f   : > { %10837 = vmatpush1.bf16.msra.mxu0 %v16581_v58 }
0x1760   : > { %10838 = vmatprep.subr.bf16.mxu0 %v16586_v59 }
0x1763   : > { %10839 = vmatpush1.bf16.msra.mxu0 %v16584_v5 }
0x1764   : > { %10930 = vmatprep.subr.bf16.mxu0 %v16901_v0 }
0x1766   : > { %10857 = vmatmul.mubr.bf16.vlgmr.msra.gmra.mxu0 %v10493_v8  ;;  %v16631_v8 = vld [vmem:[%s16968_s30 + $0x2104] ss:$24 sps:$4 sm:$0xff]  }
0x1767   : > { %10931 = vmatpush1.bf16.msra.mxu0 %v18985_v10  ;;  %14678 = vmatprep.mubr.msk.bf16.mxu0 %vm419_vm0, %v10926_v7  ;;  %v10925_v10 = vpack.c.bf16 %v14677_v35, %v14677_v35 }
0x1768   : > { %10932 = vmatprep.subr.bf16.mxu0 %v16901_v0 }
0x176b   : > { %10933 = vmatpush1.bf16.msra.mxu0 %v18991_v25  ;;  %v16587_v25 = vld [vmem:[%s16968_s30 + $0x2250] ss:$24 sps:$4 sm:$0xff]  }
0x176c   : > { %10934 = vmatprep.subr.bf16.mxu0 %v16901_v0 }
0x176f   : > { %10935 = vmatpush1.bf16.msra.mxu0 %v18996_v36  ;;  %v16589_v36 = vld [vmem:[%s16968_s30 + $0x2254] ss:$24 sps:$4 sm:$0xff]  }
0x1770   : > { %10936 = vmatprep.subr.bf16.mxu0 %v16901_v0  ;;  %11261 = vmatprep.subr.bf16.mxu1 %v16589_v36 }
0x1771   : > { %11262 = vmatpush1.bf16.msra.mxu1 %v16587_v25 }
0x1772   : > { %11263 = vmatprep.subr.bf16.mxu1 %v16595_v60 }
0x1773   : > { %10937 = vmatpush1.bf16.msra.mxu0 %v19001_v50  ;;  %v16590_v50 = vld [vmem:[%s16968_s30 + $0x2260] ss:$24 sps:$4 sm:$0xff]  }
0x1774   : > { %10938 = vmatprep.subr.bf16.mxu0 %v16901_v0 }
0x1775   : > { %11264 = vmatpush1.bf16.msra.mxu1 %v16593_v17  ;;  %v16640_v17 = vld [vmem:[%s16968_s30 + $0x222c] ss:$24 sps:$4 sm:$0xff]  }
0x1776   : > { %11265 = vmatprep.subr.bf16.mxu1 %v16601_v32  ;;  %v16643_v32 = vld [vmem:[%s16968_s30 + $0x21fc] ss:$24 sps:$4 sm:$0xff]  }
0x1777   : > { %10939 = vmatpush1.bf16.msra.mxu0 %v19104_v23 }
0x1778   : > { %10940 = vmatprep.subr.bf16.mxu0 %v16901_v0 }
0x1779   : > { %11266 = vmatpush1.bf16.msra.mxu1 %v16599_v13  ;;  %v16646_v13 = vld [vmem:[%s16968_s30 + $0x21cc] ss:$24 sps:$4 sm:$0xff]  }
0x177a   : > { %11267 = vmatprep.subr.bf16.mxu1 %v16607_v52  ;;  %v16649_v52 = vld [vmem:[%s16968_s30 + $0x219c] ss:$24 sps:$4 sm:$0xff]  }
0x177b   : > { %10941 = vmatpush1.bf16.msra.mxu0 %v19109_v61 }
0x177c   : > { %10942 = vmatprep.subr.bf16.mxu0 %v16901_v0 }
0x177d   : > { %11268 = vmatpush1.bf16.msra.mxu1 %v16605_v62  ;;  %v16652_v62 = vld [vmem:[%s16968_s30 + $0x216c] ss:$24 sps:$4 sm:$0xff]  }
0x177e   : > { %11269 = vmatprep.subr.bf16.mxu1 %v16613_v42  ;;  %v16655_v42 = vld [vmem:[%s16968_s30 + $0x213c] ss:$24 sps:$4 sm:$0xff]  }
0x177f   : > { %10943 = vmatpush1.bf16.msra.mxu0 %v19114_v29 }
0x1780   : > { %10944 = vmatprep.subr.bf16.mxu0 %v16901_v0 }
0x1781   : > { %11270 = vmatpush1.bf16.msra.mxu1 %v16611_v43  ;;  %v16658_v43 = vld [vmem:[%s16968_s30 + $0x210c] ss:$24 sps:$4 sm:$0xff]  }
0x1782   : > { %11271 = vmatprep.subr.bf16.mxu1 %v16619_v18  ;;  %v16656_v18 = vld [vmem:[%s16968_s30 + $0x2108] ss:$24 sps:$4 sm:$0xff]  }
0x1783   : > { %10945 = vmatpush1.bf16.msra.mxu0 %v19119_v22 }
0x1784   : > { %10952 = vmatprep.subr.bf16.mxu0 %v16901_v0 }
0x1785   : > { %11272 = vmatpush1.bf16.msra.mxu1 %v16617_v46 }
0x1786   : > { %11273 = vmatprep.subr.bf16.mxu1 %v16625_v38  ;;  %v19422_v38 = vld [vmem:[%s16949_s23 + $0x30] sm:$0xff]  }
0x1787   : > { %10953 = vmatpush2.bf16.msra.mxu0 %v16998_v16 }
0x1788   : > { %10954 = vmatprep.subr.bf16.mxu0 %v16901_v0 }
0x1789   : > { %11274 = vmatpush1.bf16.msra.mxu1 %v16623_v19  ;;  %v19432_v19 = vld [vmem:[%s16949_s23 + $0x20] sm:$0xff]  }
0x178a   : > { %11275 = vmatprep.subr.bf16.mxu1 %v16631_v8  ;;  %v16673_v8 = vld [vmem:[%s16968_s30 + $0x2374] ss:$24 sps:$4 sm:$0xff]  }
0x178b   : > { %10955 = vmatpush2.bf16.msra.mxu0 %v19126_v30 }
0x178c   : > { %10956 = vmatprep.subr.bf16.mxu0 %v16901_v0 }
0x178d   : > { %11276 = vmatpush1.bf16.msra.mxu1 %v16629_v20  ;;  %v16676_v20 = vld [vmem:[%s16968_s30 + $0x2384] ss:$24 sps:$4 sm:$0xff]  }
0x178e   : > { %11302 = vmatprep.subr.bf16.mxu1 %v16637_v6  ;;  %v16679_v6 = vld [vmem:[%s16968_s30 + $0x2344] ss:$24 sps:$4 sm:$0xff]  }
0x178f   : > { %10957 = vmatpush2.bf16.msra.mxu0 %v19131_v57 }
0x1790   : > { %10958 = vmatprep.subr.bf16.mxu0 %v16901_v0 }
0x1793   : > { %10959 = vmatpush2.bf16.msra.mxu0 %v19136_v56 }
0x1794   : > { %10960 = vmatprep.subr.bf16.mxu0 %v16901_v0 }
0x1797   : > { %10961 = vmatpush2.bf16.msra.mxu0 %v19141_v26 }
0x1798   : > { %11343 = vmatprep.subr.bf16.mxu0 %v16592_v2 }
0x179a   : > { %10963 = vmatmul.mubr.bf16.vlgmr.msra.gmra.mxu0 %v10925_v10 }
0x179b   : > { %11375 = vmatprep.mubr.bf16.mxu0 %v16901_v0  ;;  %11344 = vmatpush1.bf16.msra.mxu0 %v16590_v50 }
0x179c   : > { %11345 = vmatprep.subr.bf16.mxu0 %v16598_v12 }
0x179f   : > { %11346 = vmatpush1.bf16.msra.mxu0 %v16596_v63  ;;  %v16638_v63 = vld [vmem:[%s16968_s30 + $0x2228] ss:$24 sps:$4 sm:$0xff]  }
0x17a0   : > { %11347 = vmatprep.subr.bf16.mxu0 %v16604_v3  ;;  %v16641_v3 = vld [vmem:[%s16968_s30 + $0x21f8] ss:$24 sps:$4 sm:$0xff]  }
0x17a3   : > { %11348 = vmatpush1.bf16.msra.mxu0 %v16602_v4  ;;  %v16644_v4 = vld [vmem:[%s16968_s30 + $0x21c8] ss:$24 sps:$4 sm:$0xff]  }
0x17a4   : > { %11349 = vmatprep.subr.bf16.mxu0 %v16610_v53  ;;  %v16647_v53 = vld [vmem:[%s16968_s30 + $0x2198] ss:$24 sps:$4 sm:$0xff]  }
0x17a7   : > { %11350 = vmatpush1.bf16.msra.mxu0 %v16608_v39  ;;  %v16650_v39 = vld [vmem:[%s16968_s30 + $0x2168] ss:$24 sps:$4 sm:$0xff]  }
0x17a8   : > { %11351 = vmatprep.subr.bf16.mxu0 %v16616_v14  ;;  %v16653_v14 = vld [vmem:[%s16968_s30 + $0x2138] ss:$24 sps:$4 sm:$0xff]  }
0x17ab   : > { %11352 = vmatpush1.bf16.msra.mxu0 %v16614_v15  ;;  %v14776_v15 = vld.sshfl [vmem:[%s16963_s27 + $0x5c] sm:$0x33 pattern:$0x76325410] }
0x17ac   : > { %11353 = vmatprep.subr.bf16.mxu0 %v16622_v51  ;;  %v11400_v51 = vcombine.high %v14776_v15, %v14776_v15 }
0x17ae   : > { %v11404_v46 = vpack.c.bf16 %v11400_v51, %v11400_v51 }
0x17af   : > { %11354 = vmatpush1.bf16.msra.mxu0 %v16620_v40  ;;  %v19416_v40 = vld [vmem:[%s16949_s23 + $0x38] sm:$0xff]  }
0x17b0   : > { %11355 = vmatprep.subr.bf16.mxu0 %v16628_v21  ;;  %v19427_v21 = vld [vmem:[%s16949_s23 + $0x28] sm:$0xff]  }
0x17b3   : > { %11356 = vmatpush1.bf16.msra.mxu0 %v16626_v48  ;;  %v16665_v48 = vld [vmem:[%s16968_s30 + $0x23a0] ss:$24 sps:$4 sm:$0xff]  }
0x17b4   : > { %11357 = vmatprep.subr.bf16.mxu0 %v16634_v55  ;;  %v16671_v55 = vld [vmem:[%s16968_s30 + $0x2370] ss:$24 sps:$4 sm:$0xff]  }
0x17b7   : > { %11358 = vmatpush1.bf16.msra.mxu0 %v16632_v1  ;;  %v16674_v1 = vld [vmem:[%s16968_s30 + $0x2380] ss:$24 sps:$4 sm:$0xff]  }
0x1806   : > { %v10817_v49 = vpop.f32.mrf.mxu0  ;;  %v10899_v33 = vpop.f32.mrf.mxu1 }
0x1807   : > { %v19375_v44 = vadd.f32 %v10817_v49, %v19277_v54  ;;  %v19378_v27 = vadd.f32 %v10899_v33, %v19280_v34  ;;  %v16682_v49 = vld [vmem:[%s16968_s30 + $0x2354] ss:$24 sps:$4 sm:$0xff]   ;;  %v16677_v33 = vld [vmem:[%s16968_s30 + $0x2340] ss:$24 sps:$4 sm:$0xff]  }
0x1808   : > { %v10819_v31 = vpop.f32.mrf.mxu0  ;;  %v10901_v28 = vpop.f32.mrf.mxu1 }
0x1809   : > { %v19381_v11 = vadd.f32 %v10819_v31, %v19283_v45  ;;  %v19384_v37 = vadd.f32 %v10901_v28, %v19286_v47  ;;  %v19393_v47 = vld [vmem:[%s17059_s8] ss:$0 sm:$0xff]  ;;  %v16680_v31 = vld [vmem:[%s16968_s30 + $0x2350] ss:$24 sps:$4 sm:$0xff]   ;;  %v16685_v28 = vld [vmem:[%s16968_s30 + $0x2314] ss:$24 sps:$4 sm:$0xff]  }
0x180a   : > { %v10821_v58 = vpop.f32.mrf.mxu0  ;;  %v10903_v59 = vpop.f32.mrf.mxu1 }
0x180b   : > { %v16688_v58 = vld [vmem:[%s16968_s30 + $0x2324] ss:$24 sps:$4 sm:$0xff]   ;;  %v16683_v59 = vld [vmem:[%s16968_s30 + $0x2310] ss:$24 sps:$4 sm:$0xff]  }
0x180c   : > { %v10822_v35 = vpop.f32.mrf.mxu0  ;;  %v10904_v5 = vpop.f32.mrf.mxu1 }
0x180d   : > { %v16686_v35 = vld [vmem:[%s16968_s30 + $0x2320] ss:$24 sps:$4 sm:$0xff]   ;;  %v16691_v5 = vld [vmem:[%s16968_s30 + $0x22e4] ss:$24 sps:$4 sm:$0xff]  }
0x1826   : > { %v10858_v54 = vpop.f32.mrf.mxu0 }
0x1827   : > { %v19387_v9 = vadd.f32 %v10858_v54, %v19289_v24  ;;  %v16635_v24 = vld [vmem:[%s16968_s30 + $0x2258] ss:$24 sps:$4 sm:$0xff]   ;;  %v16694_v54 = vld [vmem:[%s16968_s30 + $0x22f4] ss:$24 sps:$4 sm:$0xff]  }
0x1828   : > { %v10860_v34 = vpop.f32.mrf.mxu0 }
0x1829   : > { %v19390_v7 = vadd.f32 %v10860_v34, %v19292_v41  ;;  %v16689_v34 = vld [vmem:[%s16968_s30 + $0x22e0] ss:$24 sps:$4 sm:$0xff]  }
0x182a   : > { %v10862_v45 = vpop.f32.mrf.mxu0 }
0x182b   : > { %v16692_v45 = vld [vmem:[%s16968_s30 + $0x22f0] ss:$24 sps:$4 sm:$0xff]  }
0x182c   : > { %v10863_v10 = vpop.f32.mrf.mxu0 }
0x182d   : > { %v16697_v10 = vld [vmem:[%s16968_s30 + $0x22b4] ss:$24 sps:$4 sm:$0xff]  }
0x185a   : > { %v10964_v25 = vpop.f32.mrf.mxu0 }
0x185b   : > { %v10965_v36 = vadd.f32 %v19393_v47, %v10964_v25  ;;  %v16700_v25 = vld [vmem:[%s16968_s30 + $0x22c4] ss:$24 sps:$4 sm:$0xff]  }
0x185c   : > { %v10966_v50 = vpop.f32.mrf.mxu0 }
0x185d   : > { %v10970_v2 = vmax.f32 %v10965_v36, 0.0  ;;  %v16695_v36 = vld [vmem:[%s16968_s30 + $0x22b0] ss:$24 sps:$4 sm:$0xff]   ;;  %v16698_v50 = vld [vmem:[%s16968_s30 + $0x22c0] ss:$24 sps:$4 sm:$0xff]  }
0x185e   : > { %v10967_v60 = vpop.f32.mrf.mxu0 }
0x185f   : > { %v10971_v12 = vpack.c.bf16 %v10970_v2, %v10970_v2  ;;  %v16703_v2 = vld [vmem:[%s16968_s30 + $0x2284] ss:$24 sps:$4 sm:$0xff]   ;;  %v16701_v60 = vld [vmem:[%s16968_s30 + $0x2280] ss:$24 sps:$4 sm:$0xff]  }
0x1860   : > { %v10968_v41 = vpop.f32.mrf.mxu0 }
0x1861   : > { %11294 = vmatmul.mubr.bf16.vlgmr.msra.gmra.mxu1 %v10971_v12  ;;  %11376 = vmatmul.mubr.bf16.vlgmr.msra.gmra.mxu0 %v10971_v12 }
0x1862   : > { %11303 = vmatpush1.bf16.msra.mxu1 %v16635_v24  ;;  %11334 = vmatprep.mubr.bf16.mxu1 %v16901_v0  ;;  %v16706_v24 = vld [vmem:[%s16968_s30 + $0x2294] ss:$24 sps:$4 sm:$0xff]  }
0x1863   : > { %11304 = vmatprep.subr.bf16.mxu1 %v16640_v17  ;;  %11771 = vmatprep.mubr.bf16.mxu0 %v16901_v0  ;;  %v16709_v17 = vld [vmem:[%s16968_s30 + $0x23dc] ss:$24 sps:$4 sm:$0xff]  }
0x1866   : > { %11305 = vmatpush1.bf16.msra.mxu1 %v16638_v63 }
0x1867   : > { %11306 = vmatprep.subr.bf16.mxu1 %v16643_v32 }
0x186a   : > { %11307 = vmatpush1.bf16.msra.mxu1 %v16641_v3 }
0x186b   : > { %11308 = vmatprep.subr.bf16.mxu1 %v16646_v13 }
0x186e   : > { %11309 = vmatpush1.bf16.msra.mxu1 %v16644_v4 }
0x186f   : > { %11310 = vmatprep.subr.bf16.mxu1 %v16649_v52 }
0x1872   : > { %11311 = vmatpush1.bf16.msra.mxu1 %v16647_v53 }
0x1873   : > { %11312 = vmatprep.subr.bf16.mxu1 %v16652_v62 }
0x1876   : > { %11313 = vmatpush1.bf16.msra.mxu1 %v16650_v39 }
0x1877   : > { %11314 = vmatprep.subr.bf16.mxu1 %v16655_v42 }
0x187a   : > { %11315 = vmatpush1.bf16.msra.mxu1 %v16653_v14 }
0x187b   : > { %11316 = vmatprep.subr.bf16.mxu1 %v16658_v43 }
0x187e   : > { %11317 = vmatpush1.bf16.msra.mxu1 %v16656_v18 }
0x187f   : > { %11408 = vmatprep.subr.bf16.mxu1 %v16901_v0 }
0x1881   : > { %11335 = vmatmul.mubr.bf16.vlgmr.msra.gmra.mxu1 %v10971_v12  ;;  %v16704_v12 = vld [vmem:[%s16968_s30 + $0x2290] ss:$24 sps:$4 sm:$0xff]  }
0x1882   : > { %11409 = vmatpush1.bf16.msra.mxu1 %v19416_v40  ;;  %14777 = vmatprep.mubr.msk.bf16.mxu1 %vm419_vm0, %v11404_v46 }
0x1883   : > { %11410 = vmatprep.subr.bf16.mxu1 %v16901_v0 }
0x1886   : > { %11411 = vmatpush1.bf16.msra.mxu1 %v19422_v38 }
0x1887   : > { %11412 = vmatprep.subr.bf16.mxu1 %v16901_v0 }
0x188a   : > { %11413 = vmatpush1.bf16.msra.mxu1 %v19427_v21 }
0x188b   : > { %11414 = vmatprep.subr.bf16.mxu1 %v16901_v0 }
0x188e   : > { %11415 = vmatpush1.bf16.msra.mxu1 %v19432_v19 }
0x188f   : > { %11416 = vmatprep.subr.bf16.mxu1 %v16901_v0 }
0x1892   : > { %11417 = vmatpush1.bf16.msra.mxu1 %v19104_v23  ;;  %v11403_v23 = vpack.c.bf16 %v14776_v15, %v14776_v15 }
0x1893   : > { %11418 = vmatprep.subr.bf16.mxu1 %v16901_v0 }
0x1896   : > { %11419 = vmatpush1.bf16.msra.mxu1 %v19109_v61  ;;  %v16659_v61 = vld [vmem:[%s16968_s30 + $0x23d0] ss:$24 sps:$4 sm:$0xff]  }
0x1897   : > { %11420 = vmatprep.subr.bf16.mxu1 %v16901_v0 }
0x189a   : > { %11421 = vmatpush1.bf16.msra.mxu1 %v19114_v29  ;;  %v16661_v29 = vld [vmem:[%s16968_s30 + $0x23d4] ss:$24 sps:$4 sm:$0xff]  }
0x189b   : > { %11422 = vmatprep.subr.bf16.mxu1 %v16901_v0  ;;  %11739 = vmatprep.subr.bf16.mxu0 %v16661_v29  ;;  %v16707_v29 = vld [vmem:[%s16968_s30 + $0x23d8] ss:$24 sps:$4 sm:$0xff]  }
0x189c   : > { %11740 = vmatpush1.bf16.msra.mxu0 %v16659_v61 }
0x189e   : > { %11423 = vmatpush1.bf16.msra.mxu1 %v19119_v22  ;;  %v16662_v22 = vld [vmem:[%s16968_s30 + $0x23e0] ss:$24 sps:$4 sm:$0xff]  }
0x189f   : > { %11430 = vmatprep.subr.bf16.mxu1 %v16901_v0 }
0x18a2   : > { %11431 = vmatpush2.bf16.msra.mxu1 %v16998_v16 }
0x18a3   : > { %11432 = vmatprep.subr.bf16.mxu1 %v16901_v0 }
0x18a6   : > { %11433 = vmatpush2.bf16.msra.mxu1 %v19126_v30  ;;  %v16664_v30 = vld [vmem:[%s16968_s30 + $0x23e4] ss:$24 sps:$4 sm:$0xff]  }
0x18a7   : > { %11434 = vmatprep.subr.bf16.mxu1 %v16901_v0 }
0x18aa   : > { %11435 = vmatpush2.bf16.msra.mxu1 %v19131_v57  ;;  %v16667_v57 = vld [vmem:[%s16968_s30 + $0x23a4] ss:$24 sps:$4 sm:$0xff]  }
0x18ab   : > { %11436 = vmatprep.subr.bf16.mxu1 %v16901_v0  ;;  %11741 = vmatprep.subr.bf16.mxu0 %v16667_v57  ;;  %v16715_v57 = vld [vmem:[%s16968_s30 + $0x237c] ss:$24 sps:$4 sm:$0xff]  }
0x18ac   : > { %11742 = vmatpush1.bf16.msra.mxu0 %v16665_v48  ;;  %v16718_v48 = vld [vmem:[%s16968_s30 + $0x234c] ss:$24 sps:$4 sm:$0xff]  }
0x18ad   : > { %11743 = vmatprep.subr.bf16.mxu0 %v16673_v8  ;;  %v16721_v8 = vld [vmem:[%s16968_s30 + $0x231c] ss:$24 sps:$4 sm:$0xff]  }
0x18ae   : > { %11437 = vmatpush2.bf16.msra.mxu1 %v19136_v56  ;;  %v16670_v56 = vld [vmem:[%s16968_s30 + $0x23b4] ss:$24 sps:$4 sm:$0xff]  }
0x18af   : > { %11438 = vmatprep.subr.bf16.mxu1 %v16901_v0 }
0x18b0   : > { %11744 = vmatpush1.bf16.msra.mxu0 %v16671_v55  ;;  %v16724_v55 = vld [vmem:[%s16968_s30 + $0x22ec] ss:$24 sps:$4 sm:$0xff]  }
0x18b1   : > { %11745 = vmatprep.subr.bf16.mxu0 %v16679_v6  ;;  %v16727_v6 = vld [vmem:[%s16968_s30 + $0x22bc] ss:$24 sps:$4 sm:$0xff]  }
0x18b2   : > { %11439 = vmatpush2.bf16.msra.mxu1 %v19141_v26  ;;  %v16668_v26 = vld [vmem:[%s16968_s30 + $0x23b0] ss:$24 sps:$4 sm:$0xff]  }
0x18b3   : > { %11821 = vmatprep.subr.bf16.mxu1 %v16664_v30 }
0x18b4   : > { %11746 = vmatpush1.bf16.msra.mxu0 %v16677_v33  ;;  %v16730_v33 = vld [vmem:[%s16968_s30 + $0x228c] ss:$24 sps:$4 sm:$0xff]  }
0x18b5   : > { %11441 = vmatmul.mubr.bf16.vlgmr.msra.gmra.mxu1 %v11403_v23  ;;  %11747 = vmatprep.subr.bf16.mxu0 %v16685_v28  ;;  %v16728_v28 = vld [vmem:[%s16968_s30 + $0x2288] ss:$24 sps:$4 sm:$0xff]  }
0x18b6   : > { %11853 = vmatprep.mubr.bf16.mxu1 %v16901_v0  ;;  %11822 = vmatpush1.bf16.msra.mxu1 %v16662_v22 }
0x18b7   : > { %11823 = vmatprep.subr.bf16.mxu1 %v16670_v56  ;;  %v16713_v56 = vld [vmem:[%s16968_s30 + $0x2378] ss:$24 sps:$4 sm:$0xff]  }
0x18b8   : > { %11748 = vmatpush1.bf16.msra.mxu0 %v16683_v59 }
0x18b9   : > { %11749 = vmatprep.subr.bf16.mxu0 %v16691_v5  ;;  %v16890_v5 = vld [vmem:[%s16949_s23 + $0x50] sm:$0xff]  }
0x18ba   : > { %11824 = vmatpush1.bf16.msra.mxu1 %v16668_v26  ;;  %v16716_v26 = vld [vmem:[%s16968_s30 + $0x2348] ss:$24 sps:$4 sm:$0xff]  }
0x18bb   : > { %11825 = vmatprep.subr.bf16.mxu1 %v16676_v20  ;;  %v16719_v20 = vld [vmem:[%s16968_s30 + $0x2318] ss:$24 sps:$4 sm:$0xff]  }
0x18bc   : > { %11750 = vmatpush1.bf16.msra.mxu0 %v16689_v34  ;;  %v16892_v34 = vld [vmem:[%s16949_s23 + $0x40] sm:$0xff]  }
0x18bd   : > { %11751 = vmatprep.subr.bf16.mxu0 %v16697_v10  ;;  %v16733_v10 = vld [vmem:[%s16968_s30 + $0x2554] ss:$24 sps:$4 sm:$0xff]  }
0x18be   : > { %11826 = vmatpush1.bf16.msra.mxu1 %v16674_v1  ;;  %v16722_v1 = vld [vmem:[%s16968_s30 + $0x22e8] ss:$24 sps:$4 sm:$0xff]  }
0x18bf   : > { %11827 = vmatprep.subr.bf16.mxu1 %v16682_v49  ;;  %v16725_v49 = vld [vmem:[%s16968_s30 + $0x22b8] ss:$24 sps:$4 sm:$0xff]  }
0x18c0   : > { %11752 = vmatpush1.bf16.msra.mxu0 %v16695_v36  ;;  %v16736_v36 = vld [vmem:[%s16968_s30 + $0x2564] ss:$24 sps:$4 sm:$0xff]  }
0x18c1   : > { %11753 = vmatprep.subr.bf16.mxu0 %v16703_v2  ;;  %v16742_v2 = vld [vmem:[%s16968_s30 + $0x2534] ss:$24 sps:$4 sm:$0xff]  }
0x18c2   : > { %11828 = vmatpush1.bf16.msra.mxu1 %v16680_v31  ;;  %v14875_v31 = vld.sshfl [vmem:[%s16963_s27 + $0x60] sm:$0x33 pattern:$0x76325410] }
0x18c3   : > { %11829 = vmatprep.subr.bf16.mxu1 %v16688_v58  ;;  %v11878_v58 = vcombine.high %v14875_v31, %v14875_v31 }
0x18c4   : > { %11754 = vmatpush1.bf16.msra.mxu0 %v16701_v60  ;;  %v16737_v60 = vld [vmem:[%s16968_s30 + $0x2520] ss:$24 sps:$4 sm:$0xff]  }
0x18c5   : > { %11780 = vmatprep.subr.bf16.mxu0 %v16709_v17  ;;  %v11882_v59 = vpack.c.bf16 %v11878_v58, %v11878_v58  ;;  %v16748_v17 = vld [vmem:[%s16968_s30 + $0x2504] ss:$24 sps:$4 sm:$0xff]  }
0x18c6   : > { %11830 = vmatpush1.bf16.msra.mxu1 %v16686_v35  ;;  %v16885_v35 = vld [vmem:[%s16949_s23 + $0x18] sm:$0xff]  }
0x18c7   : > { %11831 = vmatprep.subr.bf16.mxu1 %v16694_v54  ;;  %v16891_v54 = vld [vmem:[%s16949_s23 + $0x48] sm:$0xff]  }
0x18ca   : > { %11832 = vmatpush1.bf16.msra.mxu1 %v16692_v45  ;;  %v16731_v45 = vld [vmem:[%s16968_s30 + $0x2550] ss:$24 sps:$4 sm:$0xff]  }
0x18cb   : > { %11833 = vmatprep.subr.bf16.mxu1 %v16700_v25  ;;  %v16734_v25 = vld [vmem:[%s16968_s30 + $0x2560] ss:$24 sps:$4 sm:$0xff]  }
0x18ce   : > { %11834 = vmatpush1.bf16.msra.mxu1 %v16698_v50  ;;  %v16739_v50 = vld [vmem:[%s16968_s30 + $0x2524] ss:$24 sps:$4 sm:$0xff]  }
0x18cf   : > { %11835 = vmatprep.subr.bf16.mxu1 %v16706_v24  ;;  %v16740_v24 = vld [vmem:[%s16968_s30 + $0x2530] ss:$24 sps:$4 sm:$0xff]  }
0x18d2   : > { %11836 = vmatpush1.bf16.msra.mxu1 %v16704_v12  ;;  %v16745_v12 = vld [vmem:[%s16968_s30 + $0x24f4] ss:$24 sps:$4 sm:$0xff]  }
0x18d3   : > { %12217 = vmatprep.subr.bf16.mxu1 %v16733_v10  ;;  %v16788_v10 = vld [vmem:[%s16968_s30 + $0x24c8] ss:$24 sps:$4 sm:$0xff]  }
0x1921   : > { %v11295_v41 = vpop.f32.mrf.mxu1  ;;  %v11377_v63 = vpop.f32.mrf.mxu0 }
0x1922   : > { %v19488_v32 = vadd.f32 %v11295_v41, %v19375_v44  ;;  %v19491_v3 = vadd.f32 %v11377_v63, %v19378_v27  ;;  %v16743_v41 = vld [vmem:[%s16968_s30 + $0x24f0] ss:$24 sps:$4 sm:$0xff]   ;;  %v16746_v63 = vld [vmem:[%s16968_s30 + $0x2500] ss:$24 sps:$4 sm:$0xff]  }
0x1923   : > { %v11297_v13 = vpop.f32.mrf.mxu1  ;;  %v11379_v4 = vpop.f32.mrf.mxu0 }
0x1924   : > { %v19494_v52 = vadd.f32 %v11297_v13, %v19381_v11  ;;  %v19497_v53 = vadd.f32 %v11379_v4, %v19384_v37  ;;  %v16751_v13 = vld [vmem:[%s16968_s30 + $0x24c4] ss:$24 sps:$4 sm:$0xff]   ;;  %v16754_v4 = vld [vmem:[%s16968_s30 + $0x24d4] ss:$24 sps:$4 sm:$0xff]  }
0x1925   : > { %v11299_v62 = vpop.f32.mrf.mxu1  ;;  %v11381_v39 = vpop.f32.mrf.mxu0 }
0x1926   : > { %v16749_v62 = vld [vmem:[%s16968_s30 + $0x24c0] ss:$24 sps:$4 sm:$0xff]   ;;  %v16752_v39 = vld [vmem:[%s16968_s30 + $0x24d0] ss:$24 sps:$4 sm:$0xff]  }
0x1927   : > { %v11300_v42 = vpop.f32.mrf.mxu1  ;;  %v11382_v14 = vpop.f32.mrf.mxu0 }
0x1928   : > { %v16757_v42 = vld [vmem:[%s16968_s30 + $0x2494] ss:$24 sps:$4 sm:$0xff]   ;;  %v16760_v14 = vld [vmem:[%s16968_s30 + $0x24a4] ss:$24 sps:$4 sm:$0xff]  }
0x1941   : > { %v11336_v43 = vpop.f32.mrf.mxu1 }
0x1942   : > { %v19500_v44 = vadd.f32 %v11336_v43, %v19387_v9  ;;  %v16712_v9 = vld [vmem:[%s16968_s30 + $0x23ac] ss:$24 sps:$4 sm:$0xff]   ;;  %v16755_v43 = vld [vmem:[%s16968_s30 + $0x2490] ss:$24 sps:$4 sm:$0xff]  }
0x1943   : > { %v11338_v27 = vpop.f32.mrf.mxu1 }
0x1944   : > { %v19503_v15 = vadd.f32 %v11338_v27, %v19390_v7  ;;  %v16710_v7 = vld [vmem:[%s16968_s30 + $0x23a8] ss:$24 sps:$4 sm:$0xff]  }
0x1945   : > { %v11340_v11 = vpop.f32.mrf.mxu1  ;;  %v16758_v27 = vld [vmem:[%s16968_s30 + $0x24a0] ss:$24 sps:$4 sm:$0xff]  }
0x1946   : > { %v16763_v11 = vld [vmem:[%s16968_s30 + $0x2464] ss:$24 sps:$4 sm:$0xff]  }
0x1947   : > { %v11341_v18 = vpop.f32.mrf.mxu1 }
0x1948   : > { %v16766_v18 = vld [vmem:[%s16968_s30 + $0x2474] ss:$24 sps:$4 sm:$0xff]  }
0x1975   : > { %v11442_v37 = vpop.f32.mrf.mxu1 }
0x1976   : > { %v11443_v51 = vadd.f32 %v19393_v47, %v11442_v37  ;;  %v16761_v37 = vld [vmem:[%s16968_s30 + $0x2460] ss:$24 sps:$4 sm:$0xff]  }
0x1977   : > { %v11444_v46 = vpop.f32.mrf.mxu1 }
0x1978   : > { %v11448_v23 = vmax.f32 %v11443_v51, 0.0  ;;  %v16764_v51 = vld [vmem:[%s16968_s30 + $0x2470] ss:$24 sps:$4 sm:$0xff]   ;;  %v16769_v46 = vld [vmem:[%s16968_s30 + $0x2434] ss:$24 sps:$4 sm:$0xff]  }
0x1979   : > { %v11445_v61 = vpop.f32.mrf.mxu1 }
0x197a   : > { %v11449_v22 = vpack.c.bf16 %v11448_v23, %v11448_v23  ;;  %v16772_v23 = vld [vmem:[%s16968_s30 + $0x2444] ss:$24 sps:$4 sm:$0xff]   ;;  %v16767_v61 = vld [vmem:[%s16968_s30 + $0x2430] ss:$24 sps:$4 sm:$0xff]  }
0x197b   : > { %v11446_v30 = vpop.f32.mrf.mxu1 }
0x197c   : > { %11772 = vmatmul.mubr.bf16.vlgmr.msra.gmra.mxu0 %v11449_v22  ;;  %11854 = vmatmul.mubr.bf16.vlgmr.msra.gmra.mxu1 %v11449_v22  ;;  %v16778_v30 = vld [vmem:[%s16968_s30 + $0x2414] ss:$24 sps:$4 sm:$0xff]  }
0x197d   : > { %11781 = vmatpush1.bf16.msra.mxu0 %v16707_v29  ;;  %11812 = vmatprep.mubr.bf16.mxu0 %v16901_v0  ;;  %v16770_v29 = vld [vmem:[%s16968_s30 + $0x2440] ss:$24 sps:$4 sm:$0xff]  }
0x197e   : > { %11782 = vmatprep.subr.bf16.mxu0 %v16712_v9  ;;  %12249 = vmatprep.mubr.bf16.mxu1 %v16901_v0  ;;  %v16773_v9 = vld [vmem:[%s16968_s30 + $0x2400] ss:$24 sps:$4 sm:$0xff]  }
0x197f   : > { %12218 = vmatpush1.bf16.msra.mxu1 %v16731_v45  ;;  %v16790_v45 = vld [vmem:[%s16968_s30 + $0x24cc] ss:$24 sps:$4 sm:$0xff]  }
0x1980   : > { %12219 = vmatprep.subr.bf16.mxu1 %v16739_v50  ;;  %v16794_v50 = vld [vmem:[%s16968_s30 + $0x2468] ss:$24 sps:$4 sm:$0xff]  }
0x1981   : > { %11783 = vmatpush1.bf16.msra.mxu0 %v16710_v7  ;;  %v16776_v7 = vld [vmem:[%s16968_s30 + $0x2410] ss:$24 sps:$4 sm:$0xff]  }
0x1982   : > { %11784 = vmatprep.subr.bf16.mxu0 %v16715_v57  ;;  %v16781_v57 = vld [vmem:[%s16968_s30 + $0x255c] ss:$24 sps:$4 sm:$0xff]  }
0x1983   : > { %12220 = vmatpush1.bf16.msra.mxu1 %v16737_v60  ;;  %v16797_v60 = vld [vmem:[%s16968_s30 + $0x2438] ss:$24 sps:$4 sm:$0xff]  }
0x1984   : > { %12221 = vmatprep.subr.bf16.mxu1 %v16745_v12  ;;  %v16800_v12 = vld [vmem:[%s16968_s30 + $0x2408] ss:$24 sps:$4 sm:$0xff]  }
0x1985   : > { %11785 = vmatpush1.bf16.msra.mxu0 %v16713_v56 }
0x1986   : > { %11786 = vmatprep.subr.bf16.mxu0 %v16718_v48 }
0x1987   : > { %12222 = vmatpush1.bf16.msra.mxu1 %v16743_v41 }
0x1988   : > { %12223 = vmatprep.subr.bf16.mxu1 %v16751_v13 }
0x1989   : > { %11787 = vmatpush1.bf16.msra.mxu0 %v16716_v26 }
0x198a   : > { %11788 = vmatprep.subr.bf16.mxu0 %v16721_v8 }
0x198b   : > { %12224 = vmatpush1.bf16.msra.mxu1 %v16749_v62 }
0x198c   : > { %12225 = vmatprep.subr.bf16.mxu1 %v16757_v42 }
0x198d   : > { %11789 = vmatpush1.bf16.msra.mxu0 %v16719_v20 }
0x198e   : > { %11790 = vmatprep.subr.bf16.mxu0 %v16724_v55 }
0x198f   : > { %12226 = vmatpush1.bf16.msra.mxu1 %v16755_v43 }
0x1990   : > { %12227 = vmatprep.subr.bf16.mxu1 %v16763_v11 }
0x1991   : > { %11791 = vmatpush1.bf16.msra.mxu0 %v16722_v1 }
0x1992   : > { %11792 = vmatprep.subr.bf16.mxu0 %v16727_v6 }
0x1993   : > { %12228 = vmatpush1.bf16.msra.mxu1 %v16761_v37 }
0x1994   : > { %12229 = vmatprep.subr.bf16.mxu1 %v16769_v46 }
0x1995   : > { %11793 = vmatpush1.bf16.msra.mxu0 %v16725_v49 }
0x1996   : > { %11794 = vmatprep.subr.bf16.mxu0 %v16730_v33 }
0x1997   : > { %12230 = vmatpush1.bf16.msra.mxu1 %v16767_v61 }
0x1999   : > { %11795 = vmatpush1.bf16.msra.mxu0 %v16728_v28 }
0x199a   : > { %11886 = vmatprep.subr.bf16.mxu0 %v16901_v0 }
0x199c   : > { %11813 = vmatmul.mubr.bf16.vlgmr.msra.gmra.mxu0 %v11449_v22  ;;  %v16775_v22 = vld [vmem:[%s16968_s30 + $0x2404] ss:$24 sps:$4 sm:$0xff]  }
0x199d   : > { %11887 = vmatpush1.bf16.msra.mxu0 %v19416_v40  ;;  %14876 = vmatprep.mubr.msk.bf16.mxu0 %vm419_vm0, %v11882_v59  ;;  %v16886_v40 = vld [vmem:[%s16949_s23 + $0x10] sm:$0xff]  }
0x199e   : > { %11888 = vmatprep.subr.bf16.mxu0 %v16901_v0  ;;  %12231 = vmatprep.subr.bf16.mxu1 %v16775_v22 }
0x199f   : > { %12232 = vmatpush1.bf16.msra.mxu1 %v16773_v9 }
0x19a0   : > { %12258 = vmatprep.subr.bf16.mxu1 %v16781_v57 }
0x19a1   : > { %11889 = vmatpush1.bf16.msra.mxu0 %v19422_v38  ;;  %v16887_v38 = vld [vmem:[%s16949_s23 + $0x8] sm:$0xff]  }
0x19a2   : > { %11890 = vmatprep.subr.bf16.mxu0 %v16901_v0 }
0x19a5   : > { %11891 = vmatpush1.bf16.msra.mxu0 %v19427_v21  ;;  %v16888_v21 = vld [vmem:[%s16949_s23] sm:$0xff]  }
0x19a6   : > { %11892 = vmatprep.subr.bf16.mxu0 %v16901_v0 }
0x19a9   : > { %11893 = vmatpush1.bf16.msra.mxu0 %v19432_v19  ;;  %v16889_v19 = vld [vmem:[%s16949_s23 + $0x58] sm:$0xff]  }
0x19aa   : > { %11894 = vmatprep.subr.bf16.mxu0 %v16901_v0 }
0x19ad   : > { %11895 = vmatpush1.bf16.msra.mxu0 %v16885_v35 }
0x19ae   : > { %11896 = vmatprep.subr.bf16.mxu0 %v16901_v0 }
0x19b1   : > { %11897 = vmatpush1.bf16.msra.mxu0 %v16886_v40 }
0x19b2   : > { %11898 = vmatprep.subr.bf16.mxu0 %v16901_v0 }
0x19b5   : > { %11899 = vmatpush1.bf16.msra.mxu0 %v16887_v38 }
0x19b6   : > { %11900 = vmatprep.subr.bf16.mxu0 %v16901_v0 }
0x19b9   : > { %11901 = vmatpush1.bf16.msra.mxu0 %v16888_v21 }
0x19ba   : > { %11908 = vmatprep.subr.bf16.mxu0 %v16901_v0 }
0x19bd   : > { %11909 = vmatpush2.bf16.msra.mxu0 %v16998_v16  ;;  %v11881_v16 = vpack.c.bf16 %v14875_v31, %v14875_v31 }
0x19be   : > { %11910 = vmatprep.subr.bf16.mxu0 %v16901_v0 }
0x19c1   : > { %11911 = vmatpush2.bf16.msra.mxu0 %v16889_v19 }
0x19c2   : > { %11912 = vmatprep.subr.bf16.mxu0 %v16901_v0 }
0x19c5   : > { %11913 = vmatpush2.bf16.msra.mxu0 %v16890_v5  ;;  %v16779_v5 = vld [vmem:[%s16968_s30 + $0x2558] ss:$24 sps:$4 sm:$0xff]  }
0x19c6   : > { %11914 = vmatprep.subr.bf16.mxu0 %v16901_v0 }
0x19c9   : > { %11915 = vmatpush2.bf16.msra.mxu0 %v16891_v54  ;;  %v16784_v54 = vld [vmem:[%s16968_s30 + $0x252c] ss:$24 sps:$4 sm:$0xff]  }
0x19ca   : > { %11916 = vmatprep.subr.bf16.mxu0 %v16901_v0 }
0x19cd   : > { %11917 = vmatpush2.bf16.msra.mxu0 %v16892_v34  ;;  %v16785_v34 = vld [vmem:[%s16968_s30 + $0x24f8] ss:$24 sps:$4 sm:$0xff]  }
0x19ce   : > { %12299 = vmatprep.subr.bf16.mxu0 %v16736_v36  ;;  %v16791_v36 = vld [vmem:[%s16968_s30 + $0x2498] ss:$24 sps:$4 sm:$0xff]  }
0x19d0   : > { %11919 = vmatmul.mubr.bf16.vlgmr.msra.gmra.mxu0 %v11881_v16 }
0x19d1   : > { %12331 = vmatprep.mubr.bf16.mxu0 %v16901_v0  ;;  %12300 = vmatpush1.bf16.msra.mxu0 %v16734_v25  ;;  %v16793_v25 = vld [vmem:[%s16968_s30 + $0x249c] ss:$24 sps:$4 sm:$0xff]  }
0x19d2   : > { %12301 = vmatprep.subr.bf16.mxu0 %v16742_v2  ;;  %v16799_v2 = vld [vmem:[%s16968_s30 + $0x243c] ss:$24 sps:$4 sm:$0xff]  }
0x19d5   : > { %12302 = vmatpush1.bf16.msra.mxu0 %v16740_v24  ;;  %v16802_v24 = vld [vmem:[%s16968_s30 + $0x240c] ss:$24 sps:$4 sm:$0xff]  }
0x19d6   : > { %12303 = vmatprep.subr.bf16.mxu0 %v16748_v17  ;;  %v12347_v17 = vlaneseq }
0x19d8   : > { %v12348_v41 = vshrl.u32 %v12347_v17, 7 }
0x19d9   : > { %12304 = vmatpush1.bf16.msra.mxu0 %v16746_v63 }
0x19da   : > { %12305 = vmatprep.subr.bf16.mxu0 %v16754_v4  ;;  %v12349_v63 = vsub.s32 0, %v12348_v41  ;;  %v12365_v13 = vsub.s32 4, %v12348_v41  ;;  %v323_v4 = vld [vmem:[%s290_s12] sm:$0x3f]  ;;  %v12353_v62 = vsub.s32 1, %v12348_v41 }
0x19dc   : > { %v12350_v42 = vrot.slane %v323_v4, %v12349_v63  ;;  %v12354_v37 = vrot.slane %v323_v4, %v12353_v62 }
0x19dd   : > { %12306 = vmatpush1.bf16.msra.mxu0 %v16752_v39  ;;  %v12369_v39 = vsub.s32 5, %v12348_v41 }
0x19de   : > { %12307 = vmatprep.subr.bf16.mxu0 %v16760_v14  ;;  %v12366_v14 = vrot.slane %v323_v4, %v12365_v13 }
0x19e1   : > { %12308 = vmatpush1.bf16.msra.mxu0 %v16758_v27 }
0x19e2   : > { %12309 = vmatprep.subr.bf16.mxu0 %v16766_v18 }
0x19e5   : > { %12310 = vmatpush1.bf16.msra.mxu0 %v16764_v51  ;;  %v12370_v51 = vrot.slane %v323_v4, %v12369_v39 }
0x19e6   : > { %12311 = vmatprep.subr.bf16.mxu0 %v16772_v23 }
0x19e9   : > { %12312 = vmatpush1.bf16.msra.mxu0 %v16770_v29 }
0x19ea   : > { %12313 = vmatprep.subr.bf16.mxu0 %v16778_v30 }
0x19ed   : > { %12314 = vmatpush1.bf16.msra.mxu0 %v16776_v7 }
0x1a3c   : > { %v11773_v56 = vpop.f32.mrf.mxu0  ;;  %v11855_v48 = vpop.f32.mrf.mxu1 }
0x1a3d   : > { %v19586_v26 = vadd.f32 %v11773_v56, %v19488_v32  ;;  %v19589_v8 = vadd.f32 %v11855_v48, %v19491_v3 }
0x1a3e   : > { %v11775_v20 = vpop.f32.mrf.mxu0  ;;  %v11857_v55 = vpop.f32.mrf.mxu1 }
0x1a3f   : > { %v19592_v1 = vadd.f32 %v11775_v20, %v19494_v52  ;;  %v19595_v6 = vadd.f32 %v11857_v55, %v19497_v53 }
0x1a40   : > { %v11777_v49 = vpop.f32.mrf.mxu0  ;;  %v11859_v33 = vpop.f32.mrf.mxu1 }
0x1a42   : > { %v11778_v31 = vpop.f32.mrf.mxu0  ;;  %v11860_v28 = vpop.f32.mrf.mxu1 }
0x1a43   : > { %v16902_v28 = vmov 1983009808  }
0x1a5c   : > { %v11814_v58 = vpop.f32.mrf.mxu0 }
0x1a5d   : > { %v19598_v32 = vadd.f32 %v11814_v58, %v19500_v44  ;;  %v12398_v58 = vunpack.c.l.s4 %v16902_v28 }
0x1a5e   : > { %v11816_v3 = vpop.f32.mrf.mxu0 }
0x1a5f   : > { %v19601_v59 = vadd.f32 %v11816_v3, %v19503_v15  ;;  %v16782_v15 = vld [vmem:[%s16968_s30 + $0x2528] ss:$24 sps:$4 sm:$0xff]  }
0x1a60   : > { %v11818_v52 = vpop.f32.mrf.mxu0 }
0x1a62   : > { %v11819_v35 = vpop.f32.mrf.mxu0 }
0x1a90   : > { %v11920_v53 = vpop.f32.mrf.mxu0 }
0x1a91   : > { %v11921_v40 = vadd.f32 %v19393_v47, %v11920_v53  ;;  %v16787_v47 = vld [vmem:[%s16968_s30 + $0x24fc] ss:$24 sps:$4 sm:$0xff]  }
0x1a92   : > { %v11922_v38 = vpop.f32.mrf.mxu0 }
0x1a93   : > { %v11926_v21 = vmax.f32 %v11921_v40, 0.0  ;;  %v12399_v38 = vunpack.c.0.s8 %v12398_v58 }
0x1a94   : > { %v11923_v19 = vpop.f32.mrf.mxu0 }
0x1a95   : > { %v11927_v44 = vpack.c.bf16 %v11926_v21, %v11926_v21 }
0x1a96   : > { %v11924_v16 = vpop.f32.mrf.mxu0 }
0x1a97   : > { %12250 = vmatmul.mubr.bf16.vlgmr.msra.gmra.mxu1 %v11927_v44  ;;  %12332 = vmatmul.mubr.bf16.vlgmr.msra.gmra.mxu0 %v11927_v44  ;;  %v12402_v16 = vsub.s32 %v12399_v38, %v12348_v41 }
0x1a98   : > { %12259 = vmatpush1.bf16.msra.mxu1 %v16779_v5  ;;  %12290 = vmatprep.mubr.bf16.mxu1 %v16901_v0  ;;  %v16796_v0 = vld [vmem:[%s16968_s30 + $0x246c] ss:$24 sps:$4 sm:$0xff]  }
0x1a99   : > { %12260 = vmatprep.subr.bf16.mxu1 %v16784_v54 }
0x1a9c   : > { %12261 = vmatpush1.bf16.msra.mxu1 %v16782_v15 }
0x1a9d   : > { %12262 = vmatprep.subr.bf16.mxu1 %v16787_v47 }
0x1aa0   : > { %12263 = vmatpush1.bf16.msra.mxu1 %v16785_v34 }
0x1aa1   : > { %12264 = vmatprep.subr.bf16.mxu1 %v16790_v45 }
0x1aa4   : > { %12265 = vmatpush1.bf16.msra.mxu1 %v16788_v10 }
0x1aa5   : > { %12266 = vmatprep.subr.bf16.mxu1 %v16793_v25 }
0x1aa8   : > { %12267 = vmatpush1.bf16.msra.mxu1 %v16791_v36 }
0x1aa9   : > { %12268 = vmatprep.subr.bf16.mxu1 %v16796_v0 }
0x1aac   : > { %12269 = vmatpush1.bf16.msra.mxu1 %v16794_v50 }
0x1aad   : > { %12270 = vmatprep.subr.bf16.mxu1 %v16799_v2 }
0x1ab0   : > { %12271 = vmatpush1.bf16.msra.mxu1 %v16797_v60 }
0x1ab1   : > { %12272 = vmatprep.subr.bf16.mxu1 %v16802_v24 }
0x1ab4   : > { %12273 = vmatpush1.bf16.msra.mxu1 %v16800_v12 }
0x1ab7   : > { %12291 = vmatmul.mubr.bf16.vlgmr.msra.gmra.mxu1 %v11927_v44 }
0x1b57   : > { %v12251_v43 = vpop.f32.mrf.mxu1  ;;  %v12333_v27 = vpop.f32.mrf.mxu0 }
0x1b58   : > { %v12340_v11 = vadd.f32 %v12251_v43, %v19586_v26  ;;  %v12344_v18 = vadd.f32 %v12333_v27, %v19589_v8 }
0x1b59   : > { %v12253_v46 = vpop.f32.mrf.mxu1  ;;  %v12335_v23 = vpop.f32.mrf.mxu0 }
0x1b5a   : > { %v12377_v61 = vadd.f32 %v12350_v42, %v12340_v11  ;;  %v12381_v29 = vadd.f32 %v12366_v14, %v12344_v18  ;;  %v12341_v22 = vadd.f32 %v12253_v46, %v19592_v1  ;;  %v12345_v9 = vadd.f32 %v12335_v23, %v19595_v6 }
0x1b5b   : > { %v12255_v30 = vpop.f32.mrf.mxu1  ;;  %v12337_v7 = vpop.f32.mrf.mxu0  ;;  %v12357_v1 = vsub.s32 2, %v12348_v41  ;;  %v12361_v6 = vsub.s32 3, %v12348_v41 }
0x1b5c   : > { %v12378_v57 = vadd.f32 %v12354_v37, %v12341_v22  ;;  %v12382_v56 = vadd.f32 %v12370_v51, %v12345_v9  ;;  %v12383_v26 = vmax.f32 %v12377_v61, 0.0  ;;  %v12387_v55 = vmax.f32 %v12381_v29, 0.0 }
0x1b5d   : > { %v12256_v48 = vpop.f32.mrf.mxu1  ;;  %v12338_v20 = vpop.f32.mrf.mxu0  ;;  %v12358_v3 = vrot.slane %v323_v4, %v12357_v1  ;;  %v12362_v53 = vrot.slane %v323_v4, %v12361_v6 }
0x1b5e   : > { %v12384_v8 = vmax.f32 %v12378_v57, 0.0  ;;  %v12388_v49 = vmax.f32 %v12382_v56, 0.0 }
0x1b60   : > { %v12395_v33 = vcombine.low %v12383_v26, %v12384_v8  ;;  %v12412_v31 = vcombine.low %v12387_v55, %v12388_v49 }
0x1b62   : > { %14973 = vst.sshfl [vmem:[%s295_s16 + $0x8] sm:$0x33 pattern:$0x76325410] %v12412_v31  ;;  %v12403_v45 = vrot.slane %v12395_v33, %v12402_v16 }
0x1b77   : > { %v12292_v52 = vpop.f32.mrf.mxu1 }
0x1b78   : > { %v12342_v35 = vadd.f32 %v12292_v52, %v19598_v32 }
0x1b79   : > { %v12294_v40 = vpop.f32.mrf.mxu1 }
0x1b7a   : > { %v12379_v21 = vadd.f32 %v12358_v3, %v12342_v35  ;;  %v12343_v19 = vadd.f32 %v12294_v40, %v19601_v59 }
0x1b7b   : > { %v12296_v5 = vpop.f32.mrf.mxu1 }
0x1b7c   : > { %v12380_v44 = vadd.f32 %v12362_v53, %v12343_v19  ;;  %v12385_v15 = vmax.f32 %v12379_v21, 0.0 }
0x1b7d   : > { %v12297_v54 = vpop.f32.mrf.mxu1 }
0x1b7e   : > { %v12386_v47 = vmax.f32 %v12380_v44, 0.0 }
0x1b80   : > { %v12396_v34 = vcombine.low %v12385_v15, %v12386_v47 }
0x1b82   : > { %v12410_v10 = vrot.slane %v12396_v34, %v12402_v16 }
0x1b84   : > { %v12411_v25 = vcombine.low %v12403_v45, %v12410_v10 }
0x1b86   : > { %12422 = vst [vmem:[%s295_s16] sm:$0xff] %v12411_v25 }
0x1b87 PF: > { %s15_s18 = sadd.s32 1, %s16899_s18  }
0x1b88   : > { %p12_p4 = scmp.ge.s32.totalorder %s15_s18, 4  }
0x1b8a   :  { %14 = sbr.rel (!%p12_p4) target bundleno = 1 (0x1), region = 130 }

</bundles_post_ra>
